<compile_context>
chip_gen: v6e
topology: v6e:2x2x1
jax: 0.10.0
libtpu: 0.0.40
codegen_flags: <defaults>
</compile_context>

<pallas_src>
import functools
import math

import jax
import jax.numpy as jnp
from jax import lax
from jax.experimental import pallas as pl
from jax.experimental.pallas import tpu as pltpu


# ------------------------------- kernel -------------------------------------

def _bev_head_kernel(x_ref, m1_ref, w1_ref, b1_ref, w2_ref, b2_ref,
                     w3_ref, b3_ref, out_ref, *, WP, TH, M1, M2, SXT):
    """One (batch, row-tile) per grid step.

    x_ref  : (1, SH, CP)      bf16 flat padded input slab (rows = h*WP + w),
                              whole image; resident across the row-tile axis.
    m1_ref : (1, M1, 1)       f32 border mask for this tile's y1 slab.
    w1_ref : (9, CP, C1P)     bf16 conv1 taps (BN1 scale folded).
    b1_ref : (1, C1P)         f32 BN1 shift.
    w2_ref : (9, C1P, C2P)    bf16 conv2 taps (BN2 scale folded).
    b2_ref : (1, C2P)         f32 BN2 shift.
    w3_ref : (C2P, NCP)       bf16 1x1 conv.
    b3_ref : (1, NCP)         f32 bias.
    out_ref: (1, 1, M2, NCP)  bf16 flattened logits slab (rows = h*WP + w).
    """
    t = pl.program_id(1)
    # Row window of this tile inside the resident slab (sublane aligned: WP%16==0).
    row0 = pl.multiple_of(t * (TH * WP), 16)
    slab = x_ref[0, pl.ds(row0, SXT), :]                  # (SXT, CP) bf16

    offs = [dy * WP + dx for dy in range(3) for dx in range(3)]

    # conv1 (3x3, BN scale folded): unrolled 9-tap accumulation, no im2col copy.
    y1 = jnp.dot(slab[offs[0]:offs[0] + M1], w1_ref[0],
                 preferred_element_type=jnp.float32)
    for k in range(1, 9):
        o = offs[k]
        y1 = y1 + jnp.dot(slab[o:o + M1], w1_ref[k],
                          preferred_element_type=jnp.float32)
    y1 = jnp.maximum(y1 + b1_ref[...], 0.0) * m1_ref[0]   # BN shift + ReLU + mask
    y1 = y1.astype(jnp.bfloat16)                          # (M1, C1P)

    # conv2 (3x3, BN scale folded): same unrolled 9-tap accumulation.
    y2 = jnp.dot(y1[offs[0]:offs[0] + M2], w2_ref[0],
                 preferred_element_type=jnp.float32)
    for k in range(1, 9):
        o = offs[k]
        y2 = y2 + jnp.dot(y1[o:o + M2], w2_ref[k],
                          preferred_element_type=jnp.float32)
    y2 = jnp.maximum(y2 + b2_ref[...], 0.0).astype(jnp.bfloat16)   # (M2, C2P)

    # conv3 (1x1 + bias); lane-dense bf16 store.
    y3 = jnp.dot(y2, w3_ref[...], preferred_element_type=jnp.float32) + b3_ref[...]
    out_ref[0, 0] = y3.astype(jnp.bfloat16)


# ------------------------------- wrapper -------------------------------------

def _round_up(x, m):
    return ((x + m - 1) // m) * m


def _pick_row_tile(h, cap=32):
    """Row-tile height. Prefers an exact divisor of h in [cap/2, cap]; otherwise
    uses `cap` and the wrapper pads H (masked) instead of degrading to TH=1."""
    if h <= cap:
        return h
    for th in range(cap, max(cap // 2, 1) - 1, -1):
        if h % th == 0:
            return th
    return cap


def _build_mask1(H, W, TH, WP, M1, n_tiles):
    """Border mask for the conv1 output slab of each row tile (f32, {0,1})."""
    i = jnp.arange(TH + 2)
    j = jnp.arange(WP)
    col_ok = (j >= 1) & (j <= W)            # y1 slab col j maps to image col j-1
    rows = []
    for t in range(n_tiles):
        g = t * TH + i - 1                  # global image row of y1 slab row i
        row_ok = (g >= 0) & (g < H)
        m = (row_ok[:, None] & col_ok[None, :]).astype(jnp.float32).reshape(-1)
        m = jnp.concatenate(
            [m, jnp.zeros((M1 - (TH + 2) * WP,), jnp.float32)])
        rows.append(m)
    return jnp.stack(rows, axis=0)[:, :, None]            # (n_tiles, M1, 1)


@functools.partial(jax.jit, static_argnums=(2,))
def bev_seg_head_forward(point_feats, params, num_classes):
    """point_feats: NCHW array (or list/tuple thereof, like the torch module)."""
    if isinstance(point_feats, (list, tuple)):
        point_feats = point_feats[0]
    x_nchw = point_feats
    B, C, H, W = x_nchw.shape

    w1m, b1p, w2m, b2p, w3m, b3p = params
    CP = w1m.shape[1]            # padded input channels
    NCP = w3m.shape[1]           # padded num_classes (multiple of 128)

    TH = _pick_row_tile(H)
    n_tiles = -(-H // TH)
    H_eff = n_tiles * TH                     # padded H (extra rows masked+cropped)
    WP = _round_up(W + 4, 16)                # sublane-aligned padded width
    TX = TH + 5                              # tile window rows (halo + slice slack)
    Hpad = H_eff + 5                         # 2 top pad + H_eff + >=3 bottom pad
    SH = Hpad * WP                           # flat slab rows (whole image)
    SXT = TX * WP                            # flat slab rows per tile window
    M1 = (TH + 2) * WP + 8                   # conv1 output slab rows (+8 slack)
    M2 = TH * WP                             # conv2/conv3 output slab rows

    # Slab-geometry asserts (per review).
    assert WP % 16 == 0
    assert M1 >= (TH + 2) * WP + 2, "conv2 reads past y1 slab"
    assert SXT >= M1 + 2 * WP + 2, "conv1 reads past input window"
    assert (n_tiles - 1) * TH + TX <= Hpad, "tile window past padded input"

    # NCHW -> NHWC fused with bf16 cast; zero-pad halo + channel pad in HBM,
    # then flatten (Hpad, WP) into one slab row axis.  Single fused XLA pass.
    # TODO(synk): accept NHWC directly from the producing network to drop this.
    x = jnp.transpose(x_nchw, (0, 2, 3, 1)).astype(jnp.bfloat16)
    x = jnp.pad(x, ((0, 0), (2, Hpad - H - 2), (2, WP - W - 2), (0, CP - C)))
    x = x.reshape(B, SH, CP)

    mask1 = _build_mask1(H, W, TH, WP, M1, n_tiles)

    out = pl.pallas_call(
        functools.partial(_bev_head_kernel, WP=WP, TH=TH, M1=M1, M2=M2, SXT=SXT),
        out_shape=jax.ShapeDtypeStruct((B, n_tiles, M2, NCP), jnp.bfloat16),
        grid=(B, n_tiles),
        in_specs=[
            # Whole-image slab: block index ignores t, so it is DMA'd once per
            # batch element and stays resident across all row tiles.
            pl.BlockSpec((1, SH, CP), lambda b, t: (b, 0, 0)),
            pl.BlockSpec((1, M1, 1), lambda b, t: (t, 0, 0)),
            pl.BlockSpec(w1m.shape, lambda b, t: (0, 0, 0)),
            pl.BlockSpec(b1p.shape, lambda b, t: (0, 0)),
            pl.BlockSpec(w2m.shape, lambda b, t: (0, 0, 0)),
            pl.BlockSpec(b2p.shape, lambda b, t: (0, 0)),
            pl.BlockSpec(w3m.shape, lambda b, t: (0, 0)),
            pl.BlockSpec(b3p.shape, lambda b, t: (0, 0)),
        ],
        out_specs=pl.BlockSpec((1, 1, M2, NCP), lambda b, t: (b, t, 0, 0)),
        compiler_params=pltpu.CompilerParams(
            dimension_semantics=("parallel", "parallel"),
            vmem_limit_bytes=32 * 1024 * 1024),
    )(x, mask1, w1m, b1p, w2m, b2p, w3m, b3p)

    # (B, n_tiles, TH*WP, NCP) -> (B, H_eff, WP, NCP) -> crop -> NCHW f32.
    out = out.reshape(B, H_eff, WP, NCP)[:, :H, :W, :num_classes]
    return jnp.transpose(out, (0, 3, 1, 2)).astype(jnp.float32)


# ------------------------- parameter construction ---------------------------

def _xavier_uniform_conv(key, cout, cin, kh, kw):
    fan_in = cin * kh * kw
    fan_out = cout * kh * kw
    bound = math.sqrt(6.0 / (fan_in + fan_out))
    return jax.random.uniform(key, (cout, cin, kh, kw), jnp.float32,
                              minval=-bound, maxval=bound)


def _bn_params(key, c, eps=1e-5):
    k1, k2, k3, k4 = jax.random.split(key, 4)
    gamma = jax.random.uniform(k1, (c,), jnp.float32, 0.5, 1.5)
    beta = jax.random.uniform(k2, (c,), jnp.float32, -0.1, 0.1)
    mean = jax.random.uniform(k3, (c,), jnp.float32, -0.1, 0.1)
    var = jax.random.uniform(k4, (c,), jnp.float32, 0.5, 1.5)
    scale = gamma / jnp.sqrt(var + eps)
    shift = beta - mean * scale
    return scale, shift


def make_params(key, in_channels, num_classes):
    C = in_channels
    C1, C2 = C // 2, C // 4
    CP = _round_up(C, 128)
    C1P = _round_up(C1, 128)
    C2P = _round_up(C2, 128)
    NCP = _round_up(num_classes, 128)

    k = jax.random.split(key, 5)
    w1 = _xavier_uniform_conv(k[0], C1, C, 3, 3)
    w2 = _xavier_uniform_conv(k[1], C2, C1, 3, 3)
    w3 = _xavier_uniform_conv(k[2], num_classes, C2, 1, 1)
    s1, t1 = _bn_params(k[3], C1)
    s2, t2 = _bn_params(k[4], C2)
    b3 = jnp.zeros((num_classes,), jnp.float32)   # xavier_init zeroes conv bias

    def pack3x3(w_oihw, scale, cin_pad, cout_pad):
        cout, cin = w_oihw.shape[0], w_oihw.shape[1]
        wf = w_oihw * scale[:, None, None, None]          # fold BN scale
        wm = jnp.transpose(wf, (2, 3, 1, 0))              # (3, 3, cin, cout)
        wm = jnp.pad(wm, ((0, 0), (0, 0),
                          (0, cin_pad - cin), (0, cout_pad - cout)))
        # 9 separate (cin_pad, cout_pad) tap matrices, dy-major / dx-minor.
        return wm.reshape(9, cin_pad, cout_pad).astype(jnp.bfloat16)

    w1m = pack3x3(w1, s1, CP, C1P)
    w2m = pack3x3(w2, s2, C1P, C2P)
    w3m = jnp.pad(w3[:, :, 0, 0].T,
                  ((0, C2P - C2), (0, NCP - num_classes))).astype(jnp.bfloat16)

    def padv(v, n):
        return jnp.pad(v, (0, n - v.shape[0]))[None, :].astype(jnp.float32)

    kernel_params = (w1m, padv(t1, C1P), w2m, padv(t2, C2P), w3m, padv(b3, NCP))

    # Reference params: same folded + bf16-quantized weights, spatial layout.
    def q(w):
        return w.astype(jnp.bfloat16).astype(jnp.float32)

    ref_params = (q(w1 * s1[:, None, None, None]), t1,
                  q(w2 * s2[:, None, None, None]), t2,
                  q(w3), b3)
    return kernel_params, ref_params


# ------------------------------ reference ------------------------------------

def reference_forward(x_nchw, ref_params):
    """Eval-mode module forward (XLA convs), mirroring the kernel's bf16 casts."""
    w1f, t1, w2f, t2, w3f, b3 = ref_params
    x = jnp.transpose(x_nchw, (0, 2, 3, 1))
    x = x.astype(jnp.bfloat16).astype(jnp.float32)

    def conv(inp, w_oihw, pad):
        w_hwio = jnp.transpose(w_oihw, (2, 3, 1, 0))
        return lax.conv_general_dilated(
            inp, w_hwio, window_strides=(1, 1),
            padding=[(pad, pad), (pad, pad)],
            dimension_numbers=("NHWC", "HWIO", "NHWC"))

    a1 = jnp.maximum(conv(x, w1f, 1) + t1, 0.0)
    a1 = a1.astype(jnp.bfloat16).astype(jnp.float32)
    a2 = jnp.maximum(conv(a1, w2f, 1) + t2, 0.0)
    a2 = a2.astype(jnp.bfloat16).astype(jnp.float32)
    y = conv(a2, w3f, 0) + b3
    return jnp.transpose(y, (0, 3, 1, 2))  # NCHW


# --------------------------------- main --------------------------------------

if __name__ == "__main__":
    B, C, H, W = 2, 16, 16, 16
    num_classes = 4

    key = jax.random.PRNGKey(0)
    kx, kp = jax.random.split(key)
    x = jax.random.normal(kx, (B, C, H, W), jnp.float32)  # NCHW, like PyTorch

    kernel_params, ref_params = make_params(kp, C, num_classes)

    out = bev_seg_head_forward(x, kernel_params, num_classes)
    out = jax.block_until_ready(out)

    ref = jax.block_until_ready(reference_forward(x, ref_params))

    assert out.shape == (B, num_classes, H, W), out.shape
    max_err = float(jnp.max(jnp.abs(out - ref)))
    assert jnp.allclose(out, ref, atol=2e-2, rtol=2e-2), max_err

    print("KERNEL_OK")
</pallas_src>

<mosaic_0001>
module attributes {stable_mosaic.version = 11 : i64} {
  func.func @_bev_head_kernel(%arg0: i32, %arg1: i32, %arg2: memref<1x672x128xbf16, #tpu.memory_space<vmem>>, %arg3: memref<1x584x1xf32, #tpu.memory_space<vmem>>, %arg4: memref<9x128x128xbf16, #tpu.memory_space<vmem>>, %arg5: memref<1x128xf32, #tpu.memory_space<vmem>>, %arg6: memref<9x128x128xbf16, #tpu.memory_space<vmem>>, %arg7: memref<1x128xf32, #tpu.memory_space<vmem>>, %arg8: memref<128x128xbf16, #tpu.memory_space<vmem>>, %arg9: memref<1x128xf32, #tpu.memory_space<vmem>>, %arg10: memref<1x1x512x128xbf16, #tpu.memory_space<vmem>>) attributes {dimension_semantics = [#tpu.dimension_semantics<parallel>, #tpu.dimension_semantics<parallel>], iteration_bounds = array<i64: 2, 1>, scalar_prefetch = 0 : i64, scratch_operands = 0 : i64, tpu.core_type = #tpu.core_type<tc>, window_params = [{transform_indices = @transform_0, window_bounds = array<i64: 1, 672, 128>}, {transform_indices = @transform_1, window_bounds = array<i64: 1, 584, 1>}, {pipeline_mode = #tpu.pipeline_mode<synchronous>, transform_indices = @transform_2, window_bounds = array<i64: 9, 128, 128>}, {pipeline_mode = #tpu.pipeline_mode<synchronous>, transform_indices = @transform_3, window_bounds = array<i64: 1, 128>}, {pipeline_mode = #tpu.pipeline_mode<synchronous>, transform_indices = @transform_4, window_bounds = array<i64: 9, 128, 128>}, {pipeline_mode = #tpu.pipeline_mode<synchronous>, transform_indices = @transform_5, window_bounds = array<i64: 1, 128>}, {pipeline_mode = #tpu.pipeline_mode<synchronous>, transform_indices = @transform_6, window_bounds = array<i64: 128, 128>}, {pipeline_mode = #tpu.pipeline_mode<synchronous>, transform_indices = @transform_7, window_bounds = array<i64: 1, 128>}, {transform_indices = @transform_8, window_bounds = array<i64: 1, 1, 512, 128>}]} {
    %c512_i32 = arith.constant 512 : i32
    %0 = arith.muli %arg1, %c512_i32 : i32
    %1 = tpu.assume_multiple %0, 16 : i32
    %c0 = arith.constant 0 : index
    %2 = arith.index_cast %1 : i32 to index
    %c0_0 = arith.constant 0 : index
    %3 = vector.load %arg2[%c0, %2, %c0_0] : memref<1x672x128xbf16, #tpu.memory_space<vmem>>, vector<1x672x128xbf16>
    %4 = vector.shape_cast %3 : vector<1x672x128xbf16> to vector<672x128xbf16>
    %5 = vector.extract_strided_slice %4 {offsets = [0, 0], sizes = [584, 128], strides = [1, 1]} : vector<672x128xbf16> to vector<584x128xbf16>
    %c0_1 = arith.constant 0 : index
    %c0_2 = arith.constant 0 : index
    %c0_3 = arith.constant 0 : index
    %6 = vector.load %arg4[%c0_1, %c0_2, %c0_3] : memref<9x128x128xbf16, #tpu.memory_space<vmem>>, vector<1x128x128xbf16>
    %7 = vector.shape_cast %6 : vector<1x128x128xbf16> to vector<128x128xbf16>
    %cst = arith.constant dense<0.000000e+00> : vector<584x128xf32>
    %8 = tpu.matmul %5, %7, %cst {dimension_numbers = #tpu.dot_dimension_numbers<[1], [0], [0], [1], [0, 0, 1, 1], [], []>} : vector<584x128xbf16>, vector<128x128xbf16>, vector<584x128xf32> -> vector<584x128xf32>
    %9 = vector.extract_strided_slice %4 {offsets = [1, 0], sizes = [584, 128], strides = [1, 1]} : vector<672x128xbf16> to vector<584x128xbf16>
    %c1 = arith.constant 1 : index
    %c0_4 = arith.constant 0 : index
    %c0_5 = arith.constant 0 : index
    %10 = vector.load %arg4[%c1, %c0_4, %c0_5] : memref<9x128x128xbf16, #tpu.memory_space<vmem>>, vector<1x128x128xbf16>
    %11 = vector.shape_cast %10 : vector<1x128x128xbf16> to vector<128x128xbf16>
    %cst_6 = arith.constant dense<0.000000e+00> : vector<584x128xf32>
    %12 = tpu.matmul %9, %11, %cst_6 {dimension_numbers = #tpu.dot_dimension_numbers<[1], [0], [0], [1], [0, 0, 1, 1], [], []>} : vector<584x128xbf16>, vector<128x128xbf16>, vector<584x128xf32> -> vector<584x128xf32>
    %13 = arith.addf %8, %12 : vector<584x128xf32>
    %14 = vector.extract_strided_slice %4 {offsets = [2, 0], sizes = [584, 128], strides = [1, 1]} : vector<672x128xbf16> to vector<584x128xbf16>
    %c2 = arith.constant 2 : index
    %c0_7 = arith.constant 0 : index
    %c0_8 = arith.constant 0 : index
    %15 = vector.load %arg4[%c2, %c0_7, %c0_8] : memref<9x128x128xbf16, #tpu.memory_space<vmem>>, vector<1x128x128xbf16>
    %16 = vector.shape_cast %15 : vector<1x128x128xbf16> to vector<128x128xbf16>
    %cst_9 = arith.constant dense<0.000000e+00> : vector<584x128xf32>
    %17 = tpu.matmul %14, %16, %cst_9 {dimension_numbers = #tpu.dot_dimension_numbers<[1], [0], [0], [1], [0, 0, 1, 1], [], []>} : vector<584x128xbf16>, vector<128x128xbf16>, vector<584x128xf32> -> vector<584x128xf32>
    %18 = arith.addf %13, %17 : vector<584x128xf32>
    %19 = vector.extract_strided_slice %4 {offsets = [32, 0], sizes = [584, 128], strides = [1, 1]} : vector<672x128xbf16> to vector<584x128xbf16>
    %c3 = arith.constant 3 : index
    %c0_10 = arith.constant 0 : index
    %c0_11 = arith.constant 0 : index
    %20 = vector.load %arg4[%c3, %c0_10, %c0_11] : memref<9x128x128xbf16, #tpu.memory_space<vmem>>, vector<1x128x128xbf16>
    %21 = vector.shape_cast %20 : vector<1x128x128xbf16> to vector<128x128xbf16>
    %cst_12 = arith.constant dense<0.000000e+00> : vector<584x128xf32>
    %22 = tpu.matmul %19, %21, %cst_12 {dimension_numbers = #tpu.dot_dimension_numbers<[1], [0], [0], [1], [0, 0, 1, 1], [], []>} : vector<584x128xbf16>, vector<128x128xbf16>, vector<584x128xf32> -> vector<584x128xf32>
    %23 = arith.addf %18, %22 : vector<584x128xf32>
    %24 = vector.extract_strided_slice %4 {offsets = [33, 0], sizes = [584, 128], strides = [1, 1]} : vector<672x128xbf16> to vector<584x128xbf16>
    %c4 = arith.constant 4 : index
    %c0_13 = arith.constant 0 : index
    %c0_14 = arith.constant 0 : index
    %25 = vector.load %arg4[%c4, %c0_13, %c0_14] : memref<9x128x128xbf16, #tpu.memory_space<vmem>>, vector<1x128x128xbf16>
    %26 = vector.shape_cast %25 : vector<1x128x128xbf16> to vector<128x128xbf16>
    %cst_15 = arith.constant dense<0.000000e+00> : vector<584x128xf32>
    %27 = tpu.matmul %24, %26, %cst_15 {dimension_numbers = #tpu.dot_dimension_numbers<[1], [0], [0], [1], [0, 0, 1, 1], [], []>} : vector<584x128xbf16>, vector<128x128xbf16>, vector<584x128xf32> -> vector<584x128xf32>
    %28 = arith.addf %23, %27 : vector<584x128xf32>
    %29 = vector.extract_strided_slice %4 {offsets = [34, 0], sizes = [584, 128], strides = [1, 1]} : vector<672x128xbf16> to vector<584x128xbf16>
    %c5 = arith.constant 5 : index
    %c0_16 = arith.constant 0 : index
    %c0_17 = arith.constant 0 : index
    %30 = vector.load %arg4[%c5, %c0_16, %c0_17] : memref<9x128x128xbf16, #tpu.memory_space<vmem>>, vector<1x128x128xbf16>
    %31 = vector.shape_cast %30 : vector<1x128x128xbf16> to vector<128x128xbf16>
    %cst_18 = arith.constant dense<0.000000e+00> : vector<584x128xf32>
    %32 = tpu.matmul %29, %31, %cst_18 {dimension_numbers = #tpu.dot_dimension_numbers<[1], [0], [0], [1], [0, 0, 1, 1], [], []>} : vector<584x128xbf16>, vector<128x128xbf16>, vector<584x128xf32> -> vector<584x128xf32>
    %33 = arith.addf %28, %32 : vector<584x128xf32>
    %34 = vector.extract_strided_slice %4 {offsets = [64, 0], sizes = [584, 128], strides = [1, 1]} : vector<672x128xbf16> to vector<584x128xbf16>
    %c6 = arith.constant 6 : index
    %c0_19 = arith.constant 0 : index
    %c0_20 = arith.constant 0 : index
    %35 = vector.load %arg4[%c6, %c0_19, %c0_20] : memref<9x128x128xbf16, #tpu.memory_space<vmem>>, vector<1x128x128xbf16>
    %36 = vector.shape_cast %35 : vector<1x128x128xbf16> to vector<128x128xbf16>
    %cst_21 = arith.constant dense<0.000000e+00> : vector<584x128xf32>
    %37 = tpu.matmul %34, %36, %cst_21 {dimension_numbers = #tpu.dot_dimension_numbers<[1], [0], [0], [1], [0, 0, 1, 1], [], []>} : vector<584x128xbf16>, vector<128x128xbf16>, vector<584x128xf32> -> vector<584x128xf32>
    %38 = arith.addf %33, %37 : vector<584x128xf32>
    %39 = vector.extract_strided_slice %4 {offsets = [65, 0], sizes = [584, 128], strides = [1, 1]} : vector<672x128xbf16> to vector<584x128xbf16>
    %c7 = arith.constant 7 : index
    %c0_22 = arith.constant 0 : index
    %c0_23 = arith.constant 0 : index
    %40 = vector.load %arg4[%c7, %c0_22, %c0_23] : memref<9x128x128xbf16, #tpu.memory_space<vmem>>, vector<1x128x128xbf16>
    %41 = vector.shape_cast %40 : vector<1x128x128xbf16> to vector<128x128xbf16>
    %cst_24 = arith.constant dense<0.000000e+00> : vector<584x128xf32>
    %42 = tpu.matmul %39, %41, %cst_24 {dimension_numbers = #tpu.dot_dimension_numbers<[1], [0], [0], [1], [0, 0, 1, 1], [], []>} : vector<584x128xbf16>, vector<128x128xbf16>, vector<584x128xf32> -> vector<584x128xf32>
    %43 = arith.addf %38, %42 : vector<584x128xf32>
    %44 = vector.extract_strided_slice %4 {offsets = [66, 0], sizes = [584, 128], strides = [1, 1]} : vector<672x128xbf16> to vector<584x128xbf16>
    %c8 = arith.constant 8 : index
    %c0_25 = arith.constant 0 : index
    %c0_26 = arith.constant 0 : index
    %45 = vector.load %arg4[%c8, %c0_25, %c0_26] : memref<9x128x128xbf16, #tpu.memory_space<vmem>>, vector<1x128x128xbf16>
    %46 = vector.shape_cast %45 : vector<1x128x128xbf16> to vector<128x128xbf16>
    %cst_27 = arith.constant dense<0.000000e+00> : vector<584x128xf32>
    %47 = tpu.matmul %44, %46, %cst_27 {dimension_numbers = #tpu.dot_dimension_numbers<[1], [0], [0], [1], [0, 0, 1, 1], [], []>} : vector<584x128xbf16>, vector<128x128xbf16>, vector<584x128xf32> -> vector<584x128xf32>
    %48 = arith.addf %43, %47 : vector<584x128xf32>
    %c0_28 = arith.constant 0 : index
    %c0_29 = arith.constant 0 : index
    %49 = vector.load %arg5[%c0_28, %c0_29] : memref<1x128xf32, #tpu.memory_space<vmem>>, vector<1x128xf32>
    %50 = vector.broadcast %49 : vector<1x128xf32> to vector<584x128xf32>
    %51 = arith.addf %48, %50 : vector<584x128xf32>
    %cst_30 = arith.constant 0.000000e+00 : f32
    %52 = vector.broadcast %cst_30 : f32 to vector<584x128xf32>
    %53 = arith.maximumf %51, %52 : vector<584x128xf32>
    %c0_31 = arith.constant 0 : index
    %c0_32 = arith.constant 0 : index
    %c0_33 = arith.constant 0 : index
    %54 = vector.load %arg3[%c0_31, %c0_32, %c0_33] : memref<1x584x1xf32, #tpu.memory_space<vmem>>, vector<1x584x1xf32>
    %55 = vector.shape_cast %54 : vector<1x584x1xf32> to vector<584x1xf32>
    %56 = vector.broadcast %55 : vector<584x1xf32> to vector<584x128xf32>
    %57 = arith.mulf %53, %56 : vector<584x128xf32>
    %58 = arith.truncf %57 : vector<584x128xf32> to vector<584x128xbf16>
    %59 = vector.extract_strided_slice %58 {offsets = [0, 0], sizes = [512, 128], strides = [1, 1]} : vector<584x128xbf16> to vector<512x128xbf16>
    %c0_34 = arith.constant 0 : index
    %c0_35 = arith.constant 0 : index
    %c0_36 = arith.constant 0 : index
    %60 = vector.load %arg6[%c0_34, %c0_35, %c0_36] : memref<9x128x128xbf16, #tpu.memory_space<vmem>>, vector<1x128x128xbf16>
    %61 = vector.shape_cast %60 : vector<1x128x128xbf16> to vector<128x128xbf16>
    %cst_37 = arith.constant dense<0.000000e+00> : vector<512x128xf32>
    %62 = tpu.matmul %59, %61, %cst_37 {dimension_numbers = #tpu.dot_dimension_numbers<[1], [0], [0], [1], [0, 0, 1, 1], [], []>} : vector<512x128xbf16>, vector<128x128xbf16>, vector<512x128xf32> -> vector<512x128xf32>
    %63 = vector.extract_strided_slice %58 {offsets = [1, 0], sizes = [512, 128], strides = [1, 1]} : vector<584x128xbf16> to vector<512x128xbf16>
    %c1_38 = arith.constant 1 : index
    %c0_39 = arith.constant 0 : index
    %c0_40 = arith.constant 0 : index
    %64 = vector.load %arg6[%c1_38, %c0_39, %c0_40] : memref<9x128x128xbf16, #tpu.memory_space<vmem>>, vector<1x128x128xbf16>
    %65 = vector.shape_cast %64 : vector<1x128x128xbf16> to vector<128x128xbf16>
    %cst_41 = arith.constant dense<0.000000e+00> : vector<512x128xf32>
    %66 = tpu.matmul %63, %65, %cst_41 {dimension_numbers = #tpu.dot_dimension_numbers<[1], [0], [0], [1], [0, 0, 1, 1], [], []>} : vector<512x128xbf16>, vector<128x128xbf16>, vector<512x128xf32> -> vector<512x128xf32>
    %67 = arith.addf %62, %66 : vector<512x128xf32>
    %68 = vector.extract_strided_slice %58 {offsets = [2, 0], sizes = [512, 128], strides = [1, 1]} : vector<584x128xbf16> to vector<512x128xbf16>
    %c2_42 = arith.constant 2 : index
    %c0_43 = arith.constant 0 : index
    %c0_44 = arith.constant 0 : index
    %69 = vector.load %arg6[%c2_42, %c0_43, %c0_44] : memref<9x128x128xbf16, #tpu.memory_space<vmem>>, vector<1x128x128xbf16>
    %70 = vector.shape_cast %69 : vector<1x128x128xbf16> to vector<128x128xbf16>
    %cst_45 = arith.constant dense<0.000000e+00> : vector<512x128xf32>
    %71 = tpu.matmul %68, %70, %cst_45 {dimension_numbers = #tpu.dot_dimension_numbers<[1], [0], [0], [1], [0, 0, 1, 1], [], []>} : vector<512x128xbf16>, vector<128x128xbf16>, vector<512x128xf32> -> vector<512x128xf32>
    %72 = arith.addf %67, %71 : vector<512x128xf32>
    %73 = vector.extract_strided_slice %58 {offsets = [32, 0], sizes = [512, 128], strides = [1, 1]} : vector<584x128xbf16> to vector<512x128xbf16>
    %c3_46 = arith.constant 3 : index
    %c0_47 = arith.constant 0 : index
    %c0_48 = arith.constant 0 : index
    %74 = vector.load %arg6[%c3_46, %c0_47, %c0_48] : memref<9x128x128xbf16, #tpu.memory_space<vmem>>, vector<1x128x128xbf16>
    %75 = vector.shape_cast %74 : vector<1x128x128xbf16> to vector<128x128xbf16>
    %cst_49 = arith.constant dense<0.000000e+00> : vector<512x128xf32>
    %76 = tpu.matmul %73, %75, %cst_49 {dimension_numbers = #tpu.dot_dimension_numbers<[1], [0], [0], [1], [0, 0, 1, 1], [], []>} : vector<512x128xbf16>, vector<128x128xbf16>, vector<512x128xf32> -> vector<512x128xf32>
    %77 = arith.addf %72, %76 : vector<512x128xf32>
    %78 = vector.extract_strided_slice %58 {offsets = [33, 0], sizes = [512, 128], strides = [1, 1]} : vector<584x128xbf16> to vector<512x128xbf16>
    %c4_50 = arith.constant 4 : index
    %c0_51 = arith.constant 0 : index
    %c0_52 = arith.constant 0 : index
    %79 = vector.load %arg6[%c4_50, %c0_51, %c0_52] : memref<9x128x128xbf16, #tpu.memory_space<vmem>>, vector<1x128x128xbf16>
    %80 = vector.shape_cast %79 : vector<1x128x128xbf16> to vector<128x128xbf16>
    %cst_53 = arith.constant dense<0.000000e+00> : vector<512x128xf32>
    %81 = tpu.matmul %78, %80, %cst_53 {dimension_numbers = #tpu.dot_dimension_numbers<[1], [0], [0], [1], [0, 0, 1, 1], [], []>} : vector<512x128xbf16>, vector<128x128xbf16>, vector<512x128xf32> -> vector<512x128xf32>
    %82 = arith.addf %77, %81 : vector<512x128xf32>
    %83 = vector.extract_strided_slice %58 {offsets = [34, 0], sizes = [512, 128], strides = [1, 1]} : vector<584x128xbf16> to vector<512x128xbf16>
    %c5_54 = arith.constant 5 : index
    %c0_55 = arith.constant 0 : index
    %c0_56 = arith.constant 0 : index
    %84 = vector.load %arg6[%c5_54, %c0_55, %c0_56] : memref<9x128x128xbf16, #tpu.memory_space<vmem>>, vector<1x128x128xbf16>
    %85 = vector.shape_cast %84 : vector<1x128x128xbf16> to vector<128x128xbf16>
    %cst_57 = arith.constant dense<0.000000e+00> : vector<512x128xf32>
    %86 = tpu.matmul %83, %85, %cst_57 {dimension_numbers = #tpu.dot_dimension_numbers<[1], [0], [0], [1], [0, 0, 1, 1], [], []>} : vector<512x128xbf16>, vector<128x128xbf16>, vector<512x128xf32> -> vector<512x128xf32>
    %87 = arith.addf %82, %86 : vector<512x128xf32>
    %88 = vector.extract_strided_slice %58 {offsets = [64, 0], sizes = [512, 128], strides = [1, 1]} : vector<584x128xbf16> to vector<512x128xbf16>
    %c6_58 = arith.constant 6 : index
    %c0_59 = arith.constant 0 : index
    %c0_60 = arith.constant 0 : index
    %89 = vector.load %arg6[%c6_58, %c0_59, %c0_60] : memref<9x128x128xbf16, #tpu.memory_space<vmem>>, vector<1x128x128xbf16>
    %90 = vector.shape_cast %89 : vector<1x128x128xbf16> to vector<128x128xbf16>
    %cst_61 = arith.constant dense<0.000000e+00> : vector<512x128xf32>
    %91 = tpu.matmul %88, %90, %cst_61 {dimension_numbers = #tpu.dot_dimension_numbers<[1], [0], [0], [1], [0, 0, 1, 1], [], []>} : vector<512x128xbf16>, vector<128x128xbf16>, vector<512x128xf32> -> vector<512x128xf32>
    %92 = arith.addf %87, %91 : vector<512x128xf32>
    %93 = vector.extract_strided_slice %58 {offsets = [65, 0], sizes = [512, 128], strides = [1, 1]} : vector<584x128xbf16> to vector<512x128xbf16>
    %c7_62 = arith.constant 7 : index
    %c0_63 = arith.constant 0 : index
    %c0_64 = arith.constant 0 : index
    %94 = vector.load %arg6[%c7_62, %c0_63, %c0_64] : memref<9x128x128xbf16, #tpu.memory_space<vmem>>, vector<1x128x128xbf16>
    %95 = vector.shape_cast %94 : vector<1x128x128xbf16> to vector<128x128xbf16>
    %cst_65 = arith.constant dense<0.000000e+00> : vector<512x128xf32>
    %96 = tpu.matmul %93, %95, %cst_65 {dimension_numbers = #tpu.dot_dimension_numbers<[1], [0], [0], [1], [0, 0, 1, 1], [], []>} : vector<512x128xbf16>, vector<128x128xbf16>, vector<512x128xf32> -> vector<512x128xf32>
    %97 = arith.addf %92, %96 : vector<512x128xf32>
    %98 = vector.extract_strided_slice %58 {offsets = [66, 0], sizes = [512, 128], strides = [1, 1]} : vector<584x128xbf16> to vector<512x128xbf16>
    %c8_66 = arith.constant 8 : index
    %c0_67 = arith.constant 0 : index
    %c0_68 = arith.constant 0 : index
    %99 = vector.load %arg6[%c8_66, %c0_67, %c0_68] : memref<9x128x128xbf16, #tpu.memory_space<vmem>>, vector<1x128x128xbf16>
    %100 = vector.shape_cast %99 : vector<1x128x128xbf16> to vector<128x128xbf16>
    %cst_69 = arith.constant dense<0.000000e+00> : vector<512x128xf32>
    %101 = tpu.matmul %98, %100, %cst_69 {dimension_numbers = #tpu.dot_dimension_numbers<[1], [0], [0], [1], [0, 0, 1, 1], [], []>} : vector<512x128xbf16>, vector<128x128xbf16>, vector<512x128xf32> -> vector<512x128xf32>
    %102 = arith.addf %97, %101 : vector<512x128xf32>
    %c0_70 = arith.constant 0 : index
    %c0_71 = arith.constant 0 : index
    %103 = vector.load %arg7[%c0_70, %c0_71] : memref<1x128xf32, #tpu.memory_space<vmem>>, vector<1x128xf32>
    %104 = vector.broadcast %103 : vector<1x128xf32> to vector<512x128xf32>
    %105 = arith.addf %102, %104 : vector<512x128xf32>
    %cst_72 = arith.constant 0.000000e+00 : f32
    %106 = vector.broadcast %cst_72 : f32 to vector<512x128xf32>
    %107 = arith.maximumf %105, %106 : vector<512x128xf32>
    %108 = arith.truncf %107 : vector<512x128xf32> to vector<512x128xbf16>
    %c0_73 = arith.constant 0 : index
    %c0_74 = arith.constant 0 : index
    %109 = vector.load %arg8[%c0_73, %c0_74] : memref<128x128xbf16, #tpu.memory_space<vmem>>, vector<128x128xbf16>
    %cst_75 = arith.constant dense<0.000000e+00> : vector<512x128xf32>
    %110 = tpu.matmul %108, %109, %cst_75 {dimension_numbers = #tpu.dot_dimension_numbers<[1], [0], [0], [1], [0, 0, 1, 1], [], []>} : vector<512x128xbf16>, vector<128x128xbf16>, vector<512x128xf32> -> vector<512x128xf32>
    %c0_76 = arith.constant 0 : index
    %c0_77 = arith.constant 0 : index
    %111 = vector.load %arg9[%c0_76, %c0_77] : memref<1x128xf32, #tpu.memory_space<vmem>>, vector<1x128xf32>
    %112 = vector.broadcast %111 : vector<1x128xf32> to vector<512x128xf32>
    %113 = arith.addf %110, %112 : vector<512x128xf32>
    %114 = arith.truncf %113 : vector<512x128xf32> to vector<512x128xbf16>
    %c0_78 = arith.constant 0 : index
    %c0_79 = arith.constant 0 : index
    %c0_80 = arith.constant 0 : index
    %c0_81 = arith.constant 0 : index
    %115 = vector.load %arg10[%c0_78, %c0_79, %c0_80, %c0_81] : memref<1x1x512x128xbf16, #tpu.memory_space<vmem>>, vector<1x1x512x128xbf16>
    %116 = vector.shape_cast %115 : vector<1x1x512x128xbf16> to vector<512x128xbf16>
    %117 = vector.shape_cast %114 : vector<512x128xbf16> to vector<1x1x512x128xbf16>
    tpu.vector_store %arg10[%c0_78, %c0_79, %c0_80, %c0_81], %117 {strides = array<i32>} : memref<1x1x512x128xbf16, #tpu.memory_space<vmem>>, vector<1x1x512x128xbf16>,
    return
  }
  func.func @transform_0(%arg0: i32, %arg1: i32) -> (i32, i32, i32) {
    %c0_i32 = arith.constant 0 : i32
    %c0_i32_0 = arith.constant 0 : i32
    %c0_i32_1 = arith.constant 0 : i32
    return %arg0, %c0_i32, %c0_i32_0 : i32, i32, i32
  }
  func.func @transform_1(%arg0: i32, %arg1: i32) -> (i32, i32, i32) {
    %c0_i32 = arith.constant 0 : i32
    %c0_i32_0 = arith.constant 0 : i32
    %c0_i32_1 = arith.constant 0 : i32
    return %arg1, %c0_i32, %c0_i32_0 : i32, i32, i32
  }
  func.func @transform_2(%arg0: i32, %arg1: i32) -> (i32, i32, i32) {
    %c0_i32 = arith.constant 0 : i32
    %c0_i32_0 = arith.constant 0 : i32
    %c0_i32_1 = arith.constant 0 : i32
    %c0_i32_2 = arith.constant 0 : i32
    return %c0_i32, %c0_i32_0, %c0_i32_1 : i32, i32, i32
  }
  func.func @transform_3(%arg0: i32, %arg1: i32) -> (i32, i32) {
    %c0_i32 = arith.constant 0 : i32
    %c0_i32_0 = arith.constant 0 : i32
    %c0_i32_1 = arith.constant 0 : i32
    return %c0_i32, %c0_i32_0 : i32, i32
  }
  func.func @transform_4(%arg0: i32, %arg1: i32) -> (i32, i32, i32) {
    %c0_i32 = arith.constant 0 : i32
    %c0_i32_0 = arith.constant 0 : i32
    %c0_i32_1 = arith.constant 0 : i32
    %c0_i32_2 = arith.constant 0 : i32
    return %c0_i32, %c0_i32_0, %c0_i32_1 : i32, i32, i32
  }
  func.func @transform_5(%arg0: i32, %arg1: i32) -> (i32, i32) {
    %c0_i32 = arith.constant 0 : i32
    %c0_i32_0 = arith.constant 0 : i32
    %c0_i32_1 = arith.constant 0 : i32
    return %c0_i32, %c0_i32_0 : i32, i32
  }
  func.func @transform_6(%arg0: i32, %arg1: i32) -> (i32, i32) {
    %c0_i32 = arith.constant 0 : i32
    %c0_i32_0 = arith.constant 0 : i32
    %c0_i32_1 = arith.constant 0 : i32
    return %c0_i32, %c0_i32_0 : i32, i32
  }
  func.func @transform_7(%arg0: i32, %arg1: i32) -> (i32, i32) {
    %c0_i32 = arith.constant 0 : i32
    %c0_i32_0 = arith.constant 0 : i32
    %c0_i32_1 = arith.constant 0 : i32
    return %c0_i32, %c0_i32_0 : i32, i32
  }
  func.func @transform_8(%arg0: i32, %arg1: i32) -> (i32, i32, i32, i32) {
    %c0_i32 = arith.constant 0 : i32
    %c0_i32_0 = arith.constant 0 : i32
    %c0_i32_1 = arith.constant 0 : i32
    return %arg0, %arg1, %c0_i32, %c0_i32_0 : i32, i32, i32, i32
  }
}

</mosaic_0001>

<bundles_post_ra>
// kernel: bev_seg_head_forward.1
= control target key start
LH: loop header
LB: loop body
LE: loop exit
PB: predicated region body
PF: predicated region fallthrough
CT: control target
= control target key end

     0   :  { %s15241_s27 = smov 0   ;;  %s15243_s28 = smov 0   ;;  %s20631_s0 = inlined_call_operand.vmem [shape: bf16[2,672,128], index: 0, kind: input, shape index: {}]   ;;  %s20632_s1 = inlined_call_operand.vmem [shape: f32[1,584,1], index: 1, kind: input, shape index: {}]   ;;  %s20633_s2 = inlined_call_operand.vmem [shape: bf16[9,128,128], index: 2, kind: input, shape index: {}]   ;;  %s20634_s3 = inlined_call_operand.vmem [shape: f32[1,128], index: 3, kind: input, shape index: {}]   ;;  %s20635_s4 = inlined_call_operand.vmem [shape: bf16[9,128,128], index: 4, kind: input, shape index: {}]   ;;  %s20636_s5 = inlined_call_operand.vmem [shape: f32[1,128], index: 5, kind: input, shape index: {}]   ;;  %s20637_s6 = inlined_call_operand.vmem [shape: bf16[128,128], index: 6, kind: input, shape index: {}]   ;;  %s20638_s7 = inlined_call_operand.vmem [shape: f32[1,128], index: 7, kind: input, shape index: {}]   ;;  %s20639_s8 = inlined_call_operand.vmem [shape: bf16[2,1,512,128], index: 8, kind: output, shape index: {}]  }
   0x1   :  { %s15245_s29 = smov 0  }
   0x2 LB: > { %s30_s30 = sadd.s32 1, %s15187_s28  ;;  %p10991_p0 = scmp.ge.s32.totalorder %s15191_s29, 1  ;;  %s15191_s29 = sphi %s15245_s29, %s18_s29   ;;  %s15187_s28 = sphi %s15243_s28, %s22096_s28   ;;  %s15183_s27 = sphi %s15241_s27, %s22095_s27  }
   0x3   : > { %p32_p1 = scmp.ge.s32.totalorder %s30_s30, 2  ;;  %p286_p2 = scmp.lt.s32.totalorder %s15191_s29, 3 }
   0x5   : > { %s22098_s30 = smov (%p32_p1, %s30_s30), 0  ;;  %p287_p3 = pnand %p10991_p0, %p286_p2 }
   0x7   : > { %290 = sbr.rel (%p287_p3) target bundleno = 2749 (0xabd), region = 52 }
   0xc   : > { %v14899_v0 = vld [vmem:[%s20633_s2 + $0x78] sm:$0xff]   ;;  %v20662_v1 = vmov 0.0   ;;  %v14901_v3 = vld [vmem:[%s20633_s2 + $0x70] sm:$0xff]   ;;  %vm15194_vm0 = vmmov 0   ;;  %p329_p4 = scmp.lt.s32.totalorder %s15183_s27, 1  ;;  %v14903_v5 = vld [vmem:[%s20633_s2 + $0x68] sm:$0xff]  }
   0xd   : > { %12577 = vmatprep.subr.bf16.mxu0 %v20662_v1  ;;  %12741 = vmatprep.subr.bf16.mxu1 %v20662_v1  ;;  %v14900_v2 = vld [vmem:[%s20633_s2 + $0x38] sm:$0xff]   ;;  %v14902_v4 = vld [vmem:[%s20633_s2 + $0x30] sm:$0xff]   ;;  %v14904_v6 = vld [vmem:[%s20633_s2 + $0x28] sm:$0xff]   ;;  %vm654_vm1 = vsmask.f32 7424  ;;  %vm1794_vm2 = vcmask 1046528  }
   0xe   : > { %12578 = vmatpush3.bf16.msra.mxu0 %v14899_v0  ;;  %12593 = vmatprep.mubr.msk.bf16.mxu0 %vm15194_vm0, %v20662_v1  ;;  %s22100_s27 = smov (!%p329_p4, %s15183_s27), 1  ;;  %v14905_v7 = vld [vmem:[%s20633_s2 + $0x60] sm:$0xff]   ;;  %v14907_v9 = vld [vmem:[%s20633_s2 + $0x58] sm:$0xff]   ;;  %v14909_v11 = vld [vmem:[%s20633_s2 + $0x50] sm:$0xff]  }
   0xf   : > { %12742 = vmatpush3.bf16.msra.mxu1 %v14900_v2  ;;  %12579 = vmatprep.subr.bf16.mxu0 %v20662_v1  ;;  %s14869_s23 = smul.u32 336, %s22100_s27  ;;  %v14906_v8 = vld [vmem:[%s20633_s2 + $0x20] sm:$0xff]   ;;  %v14908_v10 = vld [vmem:[%s20633_s2 + $0x18] sm:$0xff]   ;;  %v14910_v14 = vld [vmem:[%s20633_s2 + $0x10] sm:$0xff]   ;;  %s11516_s22 = sshll.u32 %s22100_s27, 8 }
  0x10   : > { %12743 = vmatprep.subr.bf16.mxu1 %v20662_v1  ;;  %12757 = vmatprep.mubr.msk.bf16.mxu1 %vm15194_vm0, %v20662_v1  ;;  %v14911_v16 = vld [vmem:[%s20633_s2 + $0x48] sm:$0xff]   ;;  %v14913_v21 = vld [vmem:[%s20633_s2 + $0x40] sm:$0xff]   ;;  %v14917_v26 = vld [vmem:[%s20633_s2 + $0xb8] sm:$0xff]   ;;  %s20526_s25 = scalar_lea.vmem %s20639_s8, %s11516_s22 }
  0x11   : > { %s15304_s12 = scalar_lea.vmem %s20631_s0, %s14869_s23  ;;  %v14912_v20 = vld [vmem:[%s20633_s2 + $0x8] sm:$0xff]   ;;  %v14914_v22 = vld [vmem:[%s20633_s2] sm:$0xff]   ;;  %v14922_v33 = vld [vmem:[%s20633_s2 + $0xb0] sm:$0xff]  }
  0x12   : > { %12580 = vmatpush3.bf16.msra.mxu0 %v14901_v3  ;;  %v14915_v12 = vld [vmem:[%s15304_s12] sm:$0xff]   ;;  %v14916_v13 = vld [vmem:[%s15304_s12 + $0x8] sm:$0xff]   ;;  %v14918_v25 = vld [vmem:[%s15304_s12 + $0x10] sm:$0xff]  }
  0x13   : > { %12744 = vmatpush3.bf16.msra.mxu1 %v14902_v4  ;;  %12581 = vmatprep.subr.bf16.mxu0 %v20662_v1  ;;  %v658_v15 = vshll.u32 %v14915_v12, 16  ;;  %v656_v17 = vshrl.u32 %v14915_v12, 16  ;;  %v663_v19 = vshll.u32 %v14916_v13, 16  ;;  %v667_v28 = vshrl.u32 %v14916_v13, 16  ;;  %v14919_v30 = vld [vmem:[%s15304_s12 + $0x18] sm:$0xff]   ;;  %v14928_v37 = vld [vmem:[%s20633_s2 + $0xa8] sm:$0xff]  }
  0x14   : > { %12745 = vmatprep.subr.bf16.mxu1 %v20662_v1  ;;  %v671_v29 = vshll.u32 %v14918_v25, 16  ;;  %v675_v35 = vshrl.u32 %v14918_v25, 16  ;;  %v679_v36 = vshll.u32 %v14919_v30, 16  ;;  %v14920_v40 = vld [vmem:[%s15304_s12 + $0x20] sm:$0xff]   ;;  %v683_v43 = vshrl.u32 %v14919_v30, 16  ;;  %v14921_v45 = vld [vmem:[%s15304_s12 + $0x28] sm:$0xff]  }
  0x15   : > { %v660_v18 = vrot.slane %v658_v15, 1  ;;  %v665_v24 = vrot.slane %v663_v19, 1  ;;  %v14934_v41 = vld [vmem:[%s20633_s2 + $0xa0] sm:$0xff]   ;;  %v687_v44 = vshll.u32 %v14920_v40, 16  ;;  %v14939_v48 = vld [vmem:[%s20633_s2 + $0x98] sm:$0xff]   ;;  %v695_v49 = vshll.u32 %v14921_v45, 16 }
  0x16   : > { %12582 = vmatpush3.bf16.msra.mxu0 %v14903_v5  ;;  %v673_v32 = vrot.slane %v671_v29, 1  ;;  %v681_v39 = vrot.slane %v679_v36, 1  ;;  %v691_v50 = vshrl.u32 %v14920_v40, 16  ;;  %v14923_v53 = vld [vmem:[%s15304_s12 + $0x30] sm:$0xff]   ;;  %v699_v56 = vshrl.u32 %v14921_v45, 16  ;;  %v14924_v59 = vld [vmem:[%s15304_s12 + $0x38] sm:$0xff]  }
  0x17   : > { %12746 = vmatpush3.bf16.msra.mxu1 %v14904_v6  ;;  %12583 = vmatprep.subr.bf16.mxu0 %v20662_v1  ;;  %v661_v23 = vor.u32 %v660_v18, %v656_v17  ;;  %v669_v31 = vor.u32 %v667_v28, %v665_v24  ;;  %v689_v47 = vrot.slane %v687_v44, 1  ;;  %v697_v52 = vrot.slane %v695_v49, 1  ;;  %v14925_v2 = vld [vmem:[%s15304_s12 + $0x40] sm:$0xff]  }
  0x18   : > { %12747 = vmatprep.subr.bf16.mxu1 %v20662_v1  ;;  %v677_v38 = vor.u32 %v675_v35, %v673_v32  ;;  %v685_v46 = vor.u32 %v683_v43, %v681_v39  ;;  %v703_v55 = vshll.u32 %v14923_v53, 16  ;;  %v711_v61 = vshll.u32 %v14924_v59, 16 }
  0x19   : > { %v666_v27 = vsel %vm654_vm1, %v661_v23, %v665_v24  ;;  %v674_v34 = vsel %vm654_vm1, %v669_v31, %v673_v32  ;;  %v693_v54 = vor.u32 %v691_v50, %v689_v47  ;;  %v701_v60 = vor.u32 %v699_v56, %v697_v52 }
  0x1a   : > { %12584 = vmatpush3.bf16.msra.mxu0 %v14905_v7  ;;  %v15368_v42 = vsel %vm654_vm1, %v677_v38, %v681_v39  ;;  %v15382_v51 = vsel %vm654_vm1, %v685_v46, %v689_v47  ;;  %v705_v58 = vrot.slane %v703_v55, 1  ;;  %v707_v62 = vshrl.u32 %v14923_v53, 16  ;;  %v14932_v39 = vld [vmem:[%s15304_s12 + $0x70] sm:$0xff]   ;;  %v14950_v47 = vld [vmem:[%s20633_s2 + $0x88] sm:$0xff]  }
  0x1b   : > { %12748 = vmatpush3.bf16.msra.mxu1 %v14906_v8  ;;  %12585 = vmatprep.subr.bf16.mxu0 %v20662_v1  ;;  %v15391_v57 = vsel %vm654_vm1, %v693_v54, %v697_v52  ;;  %v713_v0 = vrot.slane %v711_v61, 1  ;;  %v719_v4 = vshll.u32 %v14925_v2, 16  ;;  %v715_v5 = vshrl.u32 %v14924_v59, 16  ;;  %v14926_v8 = vld [vmem:[%s15304_s12 + $0x48] sm:$0xff]   ;;  %v14935_v54 = vld [vmem:[%s15304_s12 + $0x80] sm:$0xff]  }
  0x1c   : > { %12749 = vmatprep.subr.bf16.mxu1 %v20662_v1  ;;  %v15400_v63 = vsel %vm654_vm1, %v701_v60, %v705_v58  ;;  %v709_v3 = vor.u32 %v707_v62, %v705_v58  ;;  %v731_v18 = vshrl.u32 %v14926_v8, 16  ;;  %v771_v50 = vshrl.u32 %v14932_v39, 16  ;;  %v14936_v61 = vld [vmem:[%s15304_s12 + $0x88] sm:$0xff]  }
  0x1d   : > { %v721_v7 = vrot.slane %v719_v4, 1  ;;  %v783_v56 = vshll.u32 %v14935_v54, 16 }
  0x1e   : > { %12586 = vmatpush3.bf16.msra.mxu0 %v14907_v9  ;;  %v15409_v6 = vsel %vm654_vm1, %v709_v3, %v713_v0  ;;  %v717_v9 = vor.u32 %v715_v5, %v713_v0  ;;  %v791_v0 = vshll.u32 %v14936_v61, 16  ;;  %v14937_v5 = vld [vmem:[%s15304_s12 + $0x90] sm:$0xff]  }
  0x1f   : > { %12750 = vmatpush3.bf16.msra.mxu1 %v14908_v10  ;;  %12587 = vmatprep.subr.bf16.mxu0 %v20662_v1  ;;  %v723_v10 = vshrl.u32 %v14925_v2, 16  ;;  %v785_v60 = vrot.slane %v783_v56, 1 }
  0x20   : > { %12751 = vmatprep.subr.bf16.mxu1 %v20662_v1  ;;  %v793_v4 = vrot.slane %v791_v0, 1  ;;  %v14944_v0 = vld [vmem:[%s15304_s12 + $0xc0] sm:$0xff]  }
  0x22   : > { %12588 = vmatpush3.bf16.msra.mxu0 %v14909_v11  ;;  %v727_v11 = vshll.u32 %v14926_v8, 16 }
  0x23   : > { %12752 = vmatpush3.bf16.msra.mxu1 %v14910_v14  ;;  %12589 = vmatprep.subr.bf16.mxu0 %v20662_v1  ;;  %v725_v14 = vor.u32 %v723_v10, %v721_v7 }
  0x24   : > { %12753 = vmatprep.subr.bf16.mxu1 %v20662_v1  ;;  %v729_v15 = vrot.slane %v727_v11, 1 }
  0x26   : > { %12590 = vmatpush3.bf16.msra.mxu0 %v14911_v16  ;;  %v14945_v16 = vld [vmem:[%s20633_s2 + $0x90] sm:$0xff]   ;;  %v15431_v19 = vsel %vm654_vm1, %v725_v14, %v729_v15  ;;  %v14938_v14 = vld [vmem:[%s15304_s12 + $0x98] sm:$0xff]  }
  0x27   : > { %12754 = vmatpush3.bf16.msra.mxu1 %v14912_v20  ;;  %12591 = vmatprep.subr.bf16.mxu0 %v20662_v1  ;;  %20868 = vst [vmem:[#allocation2_spill] sm:$0xff] %v15431_v19 }
  0x28   : > { %12755 = vmatprep.subr.bf16.mxu1 %v20662_v1 }
  0x2a   : > { %12592 = vmatpush3.bf16.msra.mxu0 %v14913_v21  ;;  %v14929_v21 = vld [vmem:[%s15304_s12 + $0x58] sm:$0xff]  }
  0x2b   : > { %12756 = vmatpush3.bf16.msra.mxu1 %v14914_v22  ;;  %12905 = vmatprep.subr.bf16.mxu0 %v20662_v1  ;;  %v733_v22 = vor.u32 %v731_v18, %v729_v15  ;;  %v743_v23 = vshll.u32 %v14929_v21, 16  ;;  %v14956_v18 = vld [vmem:[%s20633_s2 + $0x80] sm:$0xff]  }
  0x2c   : > { %13069 = vmatprep.subr.bf16.mxu1 %v20662_v1 }
  0x2d   : > { %12594 = vmatmul.mubr.bf16.vlgmr.msra.gmra.mxu0 %v666_v27  ;;  %v14930_v27 = vld [vmem:[%s15304_s12 + $0x60] sm:$0xff]  }
  0x2e   : > { %12758 = vmatmul.mubr.bf16.vlgmr.msra.gmra.mxu1 %v14915_v12  ;;  %12906 = vmatpush3.bf16.msra.mxu0 %v14917_v26  ;;  %v15418_v12 = vsel %vm654_vm1, %v717_v9, %v721_v7  ;;  %v745_v26 = vrot.slane %v743_v23, 1  ;;  %v751_v29 = vshll.u32 %v14930_v27, 16  ;;  %v755_v36 = vshrl.u32 %v14930_v27, 16  ;;  %v14958_v23 = vld [vmem:[%s20633_s2 + $0xf8] sm:$0xff]  }
  0x2f   : > { %12597 = vmatprep.mubr.msk.bf16.mxu0 %vm15194_vm0, %v20662_v1  ;;  %12761 = vmatprep.mubr.msk.bf16.mxu1 %vm15194_vm0, %v20662_v1  ;;  %v799_v9 = vshll.u32 %v14937_v5, 16 }
  0x30   : > { %12907 = vmatprep.subr.bf16.mxu0 %v20662_v1  ;;  %v753_v32 = vrot.slane %v751_v29, 1  ;;  %13070 = vmatpush3.bf16.msra.mxu1 %v14958_v23 }
  0x31   : > { %13071 = vmatprep.subr.bf16.mxu1 %v20662_v1 }
  0x32   : > { %12908 = vmatpush3.bf16.msra.mxu0 %v14922_v33  ;;  %v14931_v33 = vld [vmem:[%s15304_s12 + $0x68] sm:$0xff]  }
  0x33   : > { %12909 = vmatprep.subr.bf16.mxu0 %v20662_v1  ;;  %v759_v35 = vshll.u32 %v14931_v33, 16  ;;  %v763_v43 = vshrl.u32 %v14931_v33, 16 }
  0x35   : > { %12598 = vmatmul.mubr.bf16.gmra.mxu0 %v674_v34  ;;  %v761_v38 = vrot.slane %v759_v35, 1 }
  0x36   : > { %12762 = vmatmul.mubr.bf16.gmra.mxu1 %v14916_v13  ;;  %12601 = vmatprep.mubr.msk.bf16.mxu0 %vm15194_vm0, %v20662_v1  ;;  %v14927_v13 = vld [vmem:[%s15304_s12 + $0x50] sm:$0xff]  }
  0x37   : > { %12765 = vmatprep.mubr.msk.bf16.mxu1 %vm15194_vm0, %v20662_v1  ;;  %12910 = vmatpush3.bf16.msra.mxu0 %v14928_v37  ;;  %v735_v17 = vshll.u32 %v14927_v13, 16  ;;  %v739_v24 = vshrl.u32 %v14927_v13, 16 }
  0x38   : > { %12911 = vmatprep.subr.bf16.mxu0 %v20662_v1 }
  0x39   : > { %v737_v20 = vrot.slane %v735_v17, 1  ;;  %v807_v17 = vshll.u32 %v14938_v14, 16 }
  0x3b   : > { %12912 = vmatpush3.bf16.msra.mxu0 %v14934_v41  ;;  %v741_v28 = vor.u32 %v739_v24, %v737_v20  ;;  %v767_v41 = vshll.u32 %v14932_v39, 16 }
  0x3c   : > { %12913 = vmatprep.subr.bf16.mxu0 %v20662_v1 }
  0x3d   : > { %12602 = vmatmul.mubr.bf16.gmra.mxu0 %v15368_v42  ;;  %v15449_v31 = vsel %vm654_vm1, %v741_v28, %v745_v26  ;;  %v769_v46 = vrot.slane %v767_v41, 1  ;;  %v14959_v28 = vld [vmem:[%s20633_s2 + $0xf0] sm:$0xff]  }
  0x3e   : > { %12766 = vmatmul.mubr.bf16.gmra.mxu1 %v14918_v25  ;;  %12605 = vmatprep.mubr.msk.bf16.mxu0 %vm15194_vm0, %v20662_v1  ;;  %v15440_v25 = vsel %vm654_vm1, %v733_v22, %v737_v20  ;;  %20870 = vst [vmem:[#allocation4_spill] sm:$0xff] %v15449_v31  ;;  %v14940_v22 = vld [vmem:[%s15304_s12 + $0xa0] sm:$0xff]   ;;  %v14942_v41 = vld [vmem:[%s15304_s12 + $0xb0] sm:$0xff]  }
  0x3f   : > { %12769 = vmatprep.mubr.msk.bf16.mxu1 %vm15194_vm0, %v20662_v1  ;;  %12914 = vmatpush3.bf16.msra.mxu0 %v14939_v48  ;;  %20869 = vst [vmem:[#allocation3_spill] sm:$0xff] %v15440_v25  ;;  %v765_v48 = vor.u32 %v763_v43, %v761_v38  ;;  %v773_v55 = vor.u32 %v771_v50, %v769_v46  ;;  %v819_v35 = vshrl.u32 %v14940_v22, 16  ;;  %v14964_v43 = vld [vmem:[%s20633_s2 + $0xd8] sm:$0xff]   ;;  %v835_v56 = vshrl.u32 %v14942_v41, 16 }
  0x40   : > { %12915 = vmatprep.subr.bf16.mxu0 %v20662_v1  ;;  %13072 = vmatpush3.bf16.msra.mxu1 %v14959_v28 }
  0x41   : > { %v15480_v52 = vsel %vm654_vm1, %v765_v48, %v769_v46  ;;  %13073 = vmatprep.subr.bf16.mxu1 %v20662_v1  ;;  %v14965_v48 = vld [vmem:[%s20633_s2 + $0xd0] sm:$0xff]  }
  0x42   : > { %20873 = vst [vmem:[#allocation7_spill] sm:$0xff] %v15480_v52 }
  0x43   : > { %12916 = vmatpush3.bf16.msra.mxu0 %v14945_v16  ;;  %v803_v16 = vshrl.u32 %v14937_v5, 16 }
  0x44   : > { %12917 = vmatprep.subr.bf16.mxu0 %v20662_v1 }
  0x45   : > { %12606 = vmatmul.mubr.bf16.gmra.mxu0 %v15382_v51 }
  0x46   : > { %12770 = vmatmul.mubr.bf16.gmra.mxu1 %v14919_v30  ;;  %12609 = vmatprep.mubr.msk.bf16.mxu0 %vm15194_vm0, %v20662_v1  ;;  %v747_v30 = vshrl.u32 %v14929_v21, 16 }
  0x47   : > { %12773 = vmatprep.mubr.msk.bf16.mxu1 %vm15194_vm0, %v20662_v1  ;;  %12918 = vmatpush3.bf16.msra.mxu0 %v14950_v47  ;;  %v831_v47 = vshll.u32 %v14942_v41, 16 }
  0x48   : > { %v749_v34 = vor.u32 %v747_v30, %v745_v26  ;;  %12919 = vmatprep.subr.bf16.mxu0 %v20662_v1  ;;  %v811_v26 = vshrl.u32 %v14938_v14, 16 }
  0x49   : > { %v833_v50 = vrot.slane %v831_v47, 1 }
  0x4a   : > { %v15458_v37 = vsel %vm654_vm1, %v749_v34, %v753_v32 }
  0x4b   : > { %20871 = vst [vmem:[#allocation5_spill] sm:$0xff] %v15458_v37  ;;  %12920 = vmatpush3.bf16.msra.mxu0 %v14956_v18  ;;  %v14947_v18 = vld [vmem:[%s15304_s12 + $0xd0] sm:$0xff]  }
  0x4c   : > { %13233 = vmatprep.subr.bf16.mxu0 %v20662_v1 }
  0x4d   : > { %12610 = vmatmul.mubr.bf16.gmra.mxu0 %v15391_v57 }
  0x4e   : > { %12774 = vmatmul.mubr.bf16.gmra.mxu1 %v14920_v40  ;;  %12613 = vmatprep.mubr.msk.bf16.mxu0 %vm15194_vm0, %v20662_v1  ;;  %v757_v40 = vor.u32 %v755_v36, %v753_v32  ;;  %v14941_v32 = vld [vmem:[%s15304_s12 + $0xa8] sm:$0xff]  }
  0x4f   : > { %12777 = vmatprep.mubr.msk.bf16.mxu1 %vm15194_vm0, %v20662_v1  ;;  %v823_v36 = vshll.u32 %v14941_v32, 16  ;;  %v827_v46 = vshrl.u32 %v14941_v32, 16 }
  0x50   : > { %v15467_v44 = vsel %vm654_vm1, %v757_v40, %v761_v38  ;;  %v14962_v38 = vld [vmem:[%s20633_s2 + $0xe0] sm:$0xff]  }
  0x51   : > { %20872 = vst [vmem:[#allocation6_spill] sm:$0xff] %v15467_v44  ;;  %v825_v40 = vrot.slane %v823_v36, 1 }
  0x55   : > { %12614 = vmatmul.mubr.bf16.gmra.mxu0 %v15400_v63 }
  0x56   : > { %12778 = vmatmul.mubr.bf16.gmra.mxu1 %v14921_v45  ;;  %12617 = vmatprep.mubr.msk.bf16.mxu0 %vm15194_vm0, %v20662_v1  ;;  %v14933_v45 = vld [vmem:[%s15304_s12 + $0x78] sm:$0xff]  }
  0x57   : > { %12781 = vmatprep.mubr.msk.bf16.mxu1 %vm15194_vm0, %v20662_v1  ;;  %v775_v49 = vshll.u32 %v14933_v45, 16  ;;  %v779_v58 = vshrl.u32 %v14933_v45, 16 }
  0x5d   : > { %12618 = vmatmul.mubr.bf16.gmra.mxu0 %v15409_v6 }
  0x5e   : > { %12782 = vmatmul.mubr.bf16.gmra.mxu1 %v14923_v53  ;;  %12621 = vmatprep.mubr.msk.bf16.mxu0 %vm15194_vm0, %v20662_v1  ;;  %v777_v53 = vrot.slane %v775_v49, 1  ;;  %v829_v49 = vor.u32 %v827_v46, %v825_v40 }
  0x5f   : > { %12785 = vmatprep.mubr.msk.bf16.mxu1 %vm15194_vm0, %v20662_v1 }
  0x60   : > { %v781_v62 = vor.u32 %v779_v58, %v777_v53 }
  0x62   : > { %v15498_v3 = vsel %vm654_vm1, %v781_v62, %v785_v60 }
  0x63   : > { %20875 = vst [vmem:[#allocation9_spill] sm:$0xff] %v15498_v3 }
  0x65   : > { %12622 = vmatmul.mubr.bf16.gmra.mxu0 %v15418_v12 }
  0x66   : > { %12786 = vmatmul.mubr.bf16.gmra.mxu1 %v14924_v59  ;;  %12625 = vmatprep.mubr.msk.bf16.mxu0 %vm15194_vm0, %v20662_v1  ;;  %v15489_v59 = vsel %vm654_vm1, %v773_v55, %v777_v53  ;;  %v14943_v53 = vld [vmem:[%s15304_s12 + $0xb8] sm:$0xff]   ;;  %v15583_v55 = vsel %vm654_vm1, %v829_v49, %v833_v50 }
  0x67   : > { %12789 = vmatprep.mubr.msk.bf16.mxu1 %vm15194_vm0, %v20662_v1  ;;  %20874 = vst [vmem:[#allocation8_spill] sm:$0xff] %v15489_v59  ;;  %20881 = vst [vmem:[#allocation15_spill] sm:$0xff] %v15583_v55  ;;  %v839_v58 = vshll.u32 %v14943_v53, 16 }
  0x69   : > { %v841_v62 = vrot.slane %v839_v58, 1 }
  0x6d   : > { %12626 = vmatmul.mubr.bf16.gmra.mxu0 %v15431_v19 }
  0x6e   : > { %12790 = vmatmul.mubr.bf16.gmra.mxu1 %v14925_v2  ;;  %12629 = vmatprep.mubr.msk.bf16.mxu0 %vm15194_vm0, %v20662_v1  ;;  %v787_v2 = vshrl.u32 %v14935_v54, 16 }
  0x6f   : > { %12793 = vmatprep.mubr.msk.bf16.mxu1 %vm15194_vm0, %v20662_v1 }
  0x70   : > { %v789_v7 = vor.u32 %v787_v2, %v785_v60  ;;  %v14968_v60 = vld [vmem:[%s20633_s2 + $0xc0] sm:$0xff]  }
  0x72   : > { %v15507_v10 = vsel %vm654_vm1, %v789_v7, %v793_v4 }
  0x73   : > { %20876 = vst [vmem:[#allocation10_spill] sm:$0xff] %v15507_v10 }
  0x75   : > { %12630 = vmatmul.mubr.bf16.gmra.mxu0 %v15440_v25 }
  0x76   : > { %12794 = vmatmul.mubr.bf16.gmra.mxu1 %v14926_v8  ;;  %12633 = vmatprep.mubr.msk.bf16.mxu0 %vm15194_vm0, %v20662_v1  ;;  %v795_v8 = vshrl.u32 %v14936_v61, 16 }
  0x77   : > { %12797 = vmatprep.mubr.msk.bf16.mxu1 %vm15194_vm0, %v20662_v1 }
  0x78   : > { %v797_v11 = vor.u32 %v795_v8, %v793_v4  ;;  %v843_v4 = vshrl.u32 %v14943_v53, 16 }
  0x7a   : > { %v845_v7 = vor.u32 %v843_v4, %v841_v62 }
  0x7d   : > { %12634 = vmatmul.mubr.bf16.gmra.mxu0 %v15449_v31 }
  0x7e   : > { %12798 = vmatmul.mubr.bf16.gmra.mxu1 %v14927_v13  ;;  %12637 = vmatprep.mubr.msk.bf16.mxu0 %vm15194_vm0, %v20662_v1  ;;  %v801_v13 = vrot.slane %v799_v9, 1  ;;  %v14946_v9 = vld [vmem:[%s15304_s12 + $0xc8] sm:$0xff]  }
  0x7f   : > { %12801 = vmatprep.mubr.msk.bf16.mxu1 %vm15194_vm0, %v20662_v1 }
  0x80   : > { %v15516_v15 = vsel %vm654_vm1, %v797_v11, %v801_v13  ;;  %v805_v20 = vor.u32 %v803_v16, %v801_v13  ;;  %v851_v13 = vshrl.u32 %v14944_v0, 16 }
  0x81   : > { %20877 = vst [vmem:[#allocation11_spill] sm:$0xff] %v15516_v15 }
  0x85   : > { %12638 = vmatmul.mubr.bf16.gmra.mxu0 %v15458_v37 }
  0x86   : > { %12802 = vmatmul.mubr.bf16.gmra.mxu1 %v14929_v21  ;;  %12641 = vmatprep.mubr.msk.bf16.mxu0 %vm15194_vm0, %v20662_v1  ;;  %v809_v21 = vrot.slane %v807_v17, 1 }
  0x87   : > { %12805 = vmatprep.mubr.msk.bf16.mxu1 %vm15194_vm0, %v20662_v1 }
  0x88   : > { %v15532_v24 = vsel %vm654_vm1, %v805_v20, %v809_v21  ;;  %v813_v29 = vor.u32 %v811_v26, %v809_v21  ;;  %v859_v21 = vshrl.u32 %v14946_v9, 16 }
  0x89   : > { %20878 = vst [vmem:[#allocation12_spill] sm:$0xff] %v15532_v24 }
  0x8d   : > { %12642 = vmatmul.mubr.bf16.gmra.mxu0 %v15467_v44 }
  0x8e   : > { %12806 = vmatmul.mubr.bf16.gmra.mxu1 %v14930_v27  ;;  %12645 = vmatprep.mubr.msk.bf16.mxu0 %vm15194_vm0, %v20662_v1  ;;  %v815_v27 = vshll.u32 %v14940_v22, 16 }
  0x8f   : > { %12809 = vmatprep.mubr.msk.bf16.mxu1 %vm15194_vm0, %v20662_v1 }
  0x90   : > { %v817_v30 = vrot.slane %v815_v27, 1 }
  0x92   : > { %v15549_v34 = vsel %vm654_vm1, %v813_v29, %v817_v30  ;;  %v14948_v29 = vld [vmem:[%s15304_s12 + $0xd8] sm:$0xff]  }
  0x93   : > { %20879 = vst [vmem:[#allocation13_spill] sm:$0xff] %v15549_v34 }
  0x95   : > { %12646 = vmatmul.mubr.bf16.gmra.mxu0 %v15480_v52 }
  0x96   : > { %12810 = vmatmul.mubr.bf16.gmra.mxu1 %v14931_v33  ;;  %12649 = vmatprep.mubr.msk.bf16.mxu0 %vm15194_vm0, %v20662_v1  ;;  %v14961_v33 = vld [vmem:[%s20633_s2 + $0xe8] sm:$0xff]  }
  0x97   : > { %12813 = vmatprep.mubr.msk.bf16.mxu1 %vm15194_vm0, %v20662_v1  ;;  %13074 = vmatpush3.bf16.msra.mxu1 %v14961_v33 }
  0x98   : > { %13075 = vmatprep.subr.bf16.mxu1 %v20662_v1 }
  0x9b   : > { %13076 = vmatpush3.bf16.msra.mxu1 %v14962_v38 }
  0x9c   : > { %13077 = vmatprep.subr.bf16.mxu1 %v20662_v1 }
  0x9d   : > { %12650 = vmatmul.mubr.bf16.gmra.mxu0 %v15489_v59 }
  0x9e   : > { %12814 = vmatmul.mubr.bf16.gmra.mxu1 %v14932_v39  ;;  %12653 = vmatprep.mubr.msk.bf16.mxu0 %vm15194_vm0, %v20662_v1  ;;  %v821_v39 = vor.u32 %v819_v35, %v817_v30 }
  0x9f   : > { %12817 = vmatprep.mubr.msk.bf16.mxu1 %vm15194_vm0, %v20662_v1  ;;  %13078 = vmatpush3.bf16.msra.mxu1 %v14964_v43 }
  0xa0   : > { %13079 = vmatprep.subr.bf16.mxu1 %v20662_v1 }
  0xa3   : > { %13080 = vmatpush3.bf16.msra.mxu1 %v14965_v48 }
  0xa4   : > { %13081 = vmatprep.subr.bf16.mxu1 %v20662_v1 }
  0xa5   : > { %12654 = vmatmul.mubr.bf16.gmra.mxu0 %v15498_v3 }
  0xa6   : > { %12818 = vmatmul.mubr.bf16.gmra.mxu1 %v14933_v45  ;;  %12657 = vmatprep.mubr.msk.bf16.mxu0 %vm15194_vm0, %v20662_v1  ;;  %v15566_v45 = vsel %vm654_vm1, %v821_v39, %v825_v40  ;;  %v867_v39 = vshrl.u32 %v14947_v18, 16  ;;  %v871_v40 = vshll.u32 %v14948_v29, 16 }
  0xa7   : > { %12821 = vmatprep.mubr.msk.bf16.mxu1 %vm15194_vm0, %v20662_v1  ;;  %20880 = vst [vmem:[#allocation14_spill] sm:$0xff] %v15566_v45 }
  0xad   : > { %12658 = vmatmul.mubr.bf16.gmra.mxu0 %v15507_v10 }
  0xae   : > { %12822 = vmatmul.mubr.bf16.gmra.mxu1 %v14935_v54  ;;  %12661 = vmatprep.mubr.msk.bf16.mxu0 %vm15194_vm0, %v20662_v1  ;;  %v14967_v54 = vld [vmem:[%s20633_s2 + $0xc8] sm:$0xff]  }
  0xaf   : > { %12825 = vmatprep.mubr.msk.bf16.mxu1 %vm15194_vm0, %v20662_v1  ;;  %13082 = vmatpush3.bf16.msra.mxu1 %v14967_v54 }
  0xb0   : > { %13083 = vmatprep.subr.bf16.mxu1 %v20662_v1 }
  0xb3   : > { %13084 = vmatpush3.bf16.msra.mxu1 %v14968_v60 }
  0xb4   : > { %13397 = vmatprep.subr.bf16.mxu1 %v20662_v1 }
  0xb5   : > { %12662 = vmatmul.mubr.bf16.gmra.mxu0 %v15516_v15 }
  0xb6   : > { %12826 = vmatmul.mubr.bf16.gmra.mxu1 %v14936_v61  ;;  %12665 = vmatprep.mubr.msk.bf16.mxu0 %vm15194_vm0, %v20662_v1  ;;  %v837_v61 = vor.u32 %v835_v56, %v833_v50  ;;  %v873_v50 = vrot.slane %v871_v40, 1 }
  0xb7   : > { %12829 = vmatprep.mubr.msk.bf16.mxu1 %vm15194_vm0, %v20662_v1 }
  0xb8   : > { %v15597_v2 = vsel %vm654_vm1, %v837_v61, %v841_v62 }
  0xb9   : > { %20882 = vst [vmem:[#allocation16_spill] sm:$0xff] %v15597_v2 }
  0xbd   : > { %12666 = vmatmul.mubr.bf16.gmra.mxu0 %v15532_v24 }
  0xbe   : > { %12830 = vmatmul.mubr.bf16.gmra.mxu1 %v14937_v5  ;;  %12669 = vmatprep.mubr.msk.bf16.mxu0 %vm15194_vm0, %v20662_v1  ;;  %v847_v5 = vshll.u32 %v14944_v0, 16 }
  0xbf   : > { %12833 = vmatprep.mubr.msk.bf16.mxu1 %vm15194_vm0, %v20662_v1 }
  0xc0   : > { %v849_v8 = vrot.slane %v847_v5, 1 }
  0xc2   : > { %v15606_v11 = vsel %vm654_vm1, %v845_v7, %v849_v8  ;;  %v853_v16 = vor.u32 %v851_v13, %v849_v8 }
  0xc3   : > { %20883 = vst [vmem:[#allocation17_spill] sm:$0xff] %v15606_v11 }
  0xc5   : > { %12670 = vmatmul.mubr.bf16.gmra.mxu0 %v15549_v34  ;;  %v14973_v34 = vld [vmem:[%s20633_s2 + $0x118] sm:$0xff]  }
  0xc6   : > { %12834 = vmatmul.mubr.bf16.gmra.mxu1 %v14938_v14  ;;  %12673 = vmatprep.mubr.msk.bf16.mxu0 %vm15194_vm0, %v20662_v1  ;;  %v855_v14 = vshll.u32 %v14946_v9, 16 }
  0xc7   : > { %12837 = vmatprep.mubr.msk.bf16.mxu1 %vm15194_vm0, %v20662_v1 }
  0xc8   : > { %v857_v17 = vrot.slane %v855_v14, 1 }
  0xca   : > { %v15615_v20 = vsel %vm654_vm1, %v853_v16, %v857_v17  ;;  %v861_v27 = vor.u32 %v859_v21, %v857_v17  ;;  %v14951_v17 = vld [vmem:[%s15304_s12 + $0xe8] sm:$0xff]  }
  0xcb   : > { %20884 = vst [vmem:[#allocation18_spill] sm:$0xff] %v15615_v20 }
  0xcd   : > { %12674 = vmatmul.mubr.bf16.gmra.mxu0 %v15566_v45 }
  0xce   : > { %12838 = vmatmul.mubr.bf16.gmra.mxu1 %v14940_v22  ;;  %12677 = vmatprep.mubr.msk.bf16.mxu0 %vm15194_vm0, %v20662_v1  ;;  %v863_v22 = vshll.u32 %v14947_v18, 16 }
  0xcf   : > { %12841 = vmatprep.mubr.msk.bf16.mxu1 %vm15194_vm0, %v20662_v1 }
  0xd0   : > { %v865_v28 = vrot.slane %v863_v22, 1 }
  0xd2   : > { %v15626_v38 = vsel %vm654_vm1, %v861_v27, %v865_v28  ;;  %v869_v49 = vor.u32 %v867_v39, %v865_v28 }
  0xd3   : > { %20885 = vst [vmem:[#allocation19_spill] sm:$0xff] %v15626_v38 }
  0xd4   : > { %v15639_v62 = vsel %vm654_vm1, %v869_v49, %v873_v50 }
  0xd5   : > { %12678 = vmatmul.mubr.bf16.gmra.mxu0 %v15583_v55  ;;  %20886 = vst [vmem:[#allocation20_spill] sm:$0xff] %v15639_v62 }
  0xd6   : > { %12842 = vmatmul.mubr.bf16.gmra.mxu1 %v14941_v32  ;;  %12681 = vmatprep.mubr.msk.bf16.mxu0 %vm15194_vm0, %v20662_v1 }
  0xd7   : > { %12845 = vmatprep.mubr.msk.bf16.mxu1 %vm15194_vm0, %v20662_v1 }
  0xdd   : > { %12682 = vmatmul.mubr.bf16.gmra.mxu0 %v15597_v2  ;;  %v15099_v2 = vld [vmem:[%s15304_s12 + $0x20] sm:$0xff]  }
  0xde   : > { %12846 = vmatmul.mubr.bf16.gmra.mxu1 %v14942_v41  ;;  %12685 = vmatprep.mubr.msk.bf16.mxu0 %vm15194_vm0, %v20662_v1 }
  0xdf   : > { %12849 = vmatprep.mubr.msk.bf16.mxu1 %vm15194_vm0, %v20662_v1 }
  0xe5   : > { %12686 = vmatmul.mubr.bf16.gmra.mxu0 %v15606_v11 }
  0xe6   : > { %12850 = vmatmul.mubr.bf16.gmra.mxu1 %v14943_v53  ;;  %12689 = vmatprep.mubr.msk.bf16.mxu0 %vm15194_vm0, %v20662_v1  ;;  %v14949_v53 = vld [vmem:[%s15304_s12 + $0xe0] sm:$0xff]  }
  0xe7   : > { %12853 = vmatprep.mubr.msk.bf16.mxu1 %vm15194_vm0, %v20662_v1  ;;  %v879_v4 = vshll.u32 %v14949_v53, 16 }
  0xe9   : > { %v881_v16 = vrot.slane %v879_v4, 1 }
  0xed   : > { %v1069_v23 = vpop.f32.mrf.mxu0  ;;  %12690 = vmatmul.mubr.bf16.gmra.mxu0 %v15615_v20  ;;  %v20898_v20 = vmov 0.0  }
  0xee   : > { %v1483_v26 = vpop.f32.mrf.mxu1  ;;  %12854 = vmatmul.mubr.bf16.gmra.mxu1 %v14944_v0  ;;  %12693 = vmatprep.mubr.msk.bf16.mxu0 %vm15194_vm0, %v20662_v1  ;;  %v875_v0 = vshrl.u32 %v14948_v29, 16 }
  0xef   : > { %v15621_v30 = vadd.f32 %v1483_v26, %v1069_v23  ;;  %v12595_v32 = vpop.f32.mrf.mxu0  ;;  %12857 = vmatprep.mubr.msk.bf16.mxu1 %vm15194_vm0, %v20662_v1 }
  0xf0   : > { %v12759_v33 = vpop.f32.mrf.mxu1  ;;  %v877_v14 = vor.u32 %v875_v0, %v873_v50  ;;  %v887_v32 = vshll.u32 %v14951_v17, 16 }
  0xf1   : > { %v1072_v35 = vpop.f32.mrf.mxu0 }
  0xf2   : > { %v1486_v36 = vpop.f32.mrf.mxu1  ;;  %v15652_v28 = vsel %vm654_vm1, %v877_v14, %v881_v16 }
  0xf3   : > { %v15628_v41 = vadd.f32 %v1486_v36, %v1072_v35  ;;  %v12596_v43 = vpop.f32.mrf.mxu0  ;;  %20887 = vst [vmem:[#allocation21_spill] sm:$0xff] %v15652_v28 }
  0xf4   : > { %v12760_v46 = vpop.f32.mrf.mxu1 }
  0xf5   : > { %v1077_v47 = vpop.f32.mrf.mxu0  ;;  %12694 = vmatmul.mubr.bf16.gmra.mxu0 %v15626_v38  ;;  %v889_v46 = vrot.slane %v887_v32, 1 }
  0xf6   : > { %v1491_v48 = vpop.f32.mrf.mxu1  ;;  %12858 = vmatmul.mubr.bf16.gmra.mxu1 %v14946_v9  ;;  %12697 = vmatprep.mubr.msk.bf16.mxu0 %vm15194_vm0, %v20662_v1 }
  0xf7   : > { %v15634_v54 = vadd.f32 %v1491_v48, %v1077_v47  ;;  %v12599_v56 = vpop.f32.mrf.mxu0  ;;  %12861 = vmatprep.mubr.msk.bf16.mxu1 %vm15194_vm0, %v20662_v1  ;;  %v14952_v47 = vld [vmem:[%s15304_s12 + $0xf0] sm:$0xff]  }
  0xf8   : > { %v12763_v58 = vpop.f32.mrf.mxu1 }
  0xf9   : > { %v1080_v60 = vpop.f32.mrf.mxu0 }
  0xfa   : > { %v1494_v61 = vpop.f32.mrf.mxu1 }
  0xfb   : > { %v15641_v5 = vadd.f32 %v1494_v61, %v1080_v60  ;;  %v12600_v7 = vpop.f32.mrf.mxu0  ;;  %v895_v61 = vshll.u32 %v14952_v47, 16 }
  0xfc   : > { %v12764_v8 = vpop.f32.mrf.mxu1 }
  0xfd   : > { %v1085_v9 = vpop.f32.mrf.mxu0  ;;  %12698 = vmatmul.mubr.bf16.gmra.mxu0 %v15639_v62  ;;  %v897_v14 = vrot.slane %v895_v61, 1 }
  0xfe   : > { %v1499_v13 = vpop.f32.mrf.mxu1  ;;  %12862 = vmatmul.mubr.bf16.gmra.mxu1 %v14947_v18  ;;  %12701 = vmatprep.mubr.msk.bf16.mxu0 %vm15194_vm0, %v20662_v1  ;;  %v883_v18 = vshrl.u32 %v14949_v53, 16 }
  0xff   : > { %v15647_v21 = vadd.f32 %v1499_v13, %v1085_v9  ;;  %v12603_v22 = vpop.f32.mrf.mxu0  ;;  %12865 = vmatprep.mubr.msk.bf16.mxu1 %vm15194_vm0, %v20662_v1 }
 0x100   : > { %v12767_v23 = vpop.f32.mrf.mxu1  ;;  %v885_v43 = vor.u32 %v883_v18, %v881_v16  ;;  %v14953_v16 = vld [vmem:[%s15304_s12 + $0xf8] sm:$0xff]  }
 0x101   : > { %v1088_v26 = vpop.f32.mrf.mxu0 }
 0x102   : > { %v1502_v27 = vpop.f32.mrf.mxu1  ;;  %v15665_v60 = vsel %vm654_vm1, %v885_v43, %v889_v46 }
 0x103   : > { %v15654_v33 = vadd.f32 %v1502_v27, %v1088_v26  ;;  %v12604_v35 = vpop.f32.mrf.mxu0  ;;  %20888 = vst [vmem:[#allocation22_spill] sm:$0xff] %v15665_v60 }
 0x104   : > { %v12768_v36 = vpop.f32.mrf.mxu1  ;;  %v903_v35 = vshll.u32 %v14953_v16, 16 }
 0x105   : > { %v1093_v39 = vpop.f32.mrf.mxu0  ;;  %12702 = vmatmul.mubr.bf16.gmra.mxu0 %v15652_v28 }
 0x106   : > { %v1507_v40 = vpop.f32.mrf.mxu1  ;;  %12866 = vmatmul.mubr.bf16.gmra.mxu1 %v14948_v29  ;;  %12705 = vmatprep.mubr.msk.bf16.mxu0 %vm15194_vm0, %v20662_v1  ;;  %v891_v29 = vshrl.u32 %v14951_v17, 16 }
 0x107   : > { %v15660_v48 = vadd.f32 %v1507_v40, %v1093_v39  ;;  %v12607_v49 = vpop.f32.mrf.mxu0  ;;  %12869 = vmatprep.mubr.msk.bf16.mxu1 %vm15194_vm0, %v20662_v1 }
 0x108   : > { %v12771_v50 = vpop.f32.mrf.mxu1  ;;  %v893_v13 = vor.u32 %v891_v29, %v889_v46 }
 0x109   : > { %v1096_v56 = vpop.f32.mrf.mxu0  ;;  %v905_v50 = vrot.slane %v903_v35, 1  ;;  %v14955_v35 = vld [vmem:[%s15304_s12 + $0x108] sm:$0xff]  }
 0x10a   : > { %v1510_v58 = vpop.f32.mrf.mxu1  ;;  %v15678_v32 = vsel %vm654_vm1, %v893_v13, %v897_v14 }
 0x10b   : > { %v15667_v0 = vadd.f32 %v1510_v58, %v1096_v56  ;;  %v12608_v4 = vpop.f32.mrf.mxu0  ;;  %20889 = vst [vmem:[#allocation23_spill] sm:$0xff] %v15678_v32  ;;  %v14954_v56 = vld [vmem:[%s15304_s12 + $0x100] sm:$0xff]  }
 0x10c   : > { %v12772_v7 = vpop.f32.mrf.mxu1 }
 0x10d   : > { %v1101_v8 = vpop.f32.mrf.mxu0  ;;  %12706 = vmatmul.mubr.bf16.gmra.mxu0 %v15665_v60 }
 0x10e   : > { %v1515_v9 = vpop.f32.mrf.mxu1  ;;  %12870 = vmatmul.mubr.bf16.gmra.mxu1 %v14949_v53  ;;  %12709 = vmatprep.mubr.msk.bf16.mxu0 %vm15194_vm0, %v20662_v1  ;;  %v899_v53 = vshrl.u32 %v14952_v47, 16 }
 0x10f   : > { %v15673_v22 = vadd.f32 %v1515_v9, %v1101_v8  ;;  %v12611_v23 = vpop.f32.mrf.mxu0  ;;  %12873 = vmatprep.mubr.msk.bf16.mxu1 %vm15194_vm0, %v20662_v1  ;;  %v911_v9 = vshll.u32 %v14954_v56, 16 }
 0x110   : > { %v12775_v26 = vpop.f32.mrf.mxu1  ;;  %v901_v49 = vor.u32 %v899_v53, %v897_v14 }
 0x111   : > { %v1104_v27 = vpop.f32.mrf.mxu0  ;;  %v913_v53 = vrot.slane %v911_v9, 1 }
 0x112   : > { %v1518_v18 = vpop.f32.mrf.mxu1  ;;  %v15691_v8 = vsel %vm654_vm1, %v901_v49, %v905_v50 }
 0x113   : > { %v15680_v36 = vadd.f32 %v1518_v18, %v1104_v27  ;;  %v12612_v39 = vpop.f32.mrf.mxu0  ;;  %20890 = vst [vmem:[#allocation24_spill] sm:$0xff] %v15691_v8 }
 0x114   : > { %v12776_v40 = vpop.f32.mrf.mxu1 }
 0x115   : > { %v1109_v43 = vpop.f32.mrf.mxu0  ;;  %12710 = vmatmul.mubr.bf16.gmra.mxu0 %v15678_v32 }
 0x116   : > { %v1523_v46 = vpop.f32.mrf.mxu1  ;;  %12874 = vmatmul.mubr.bf16.gmra.mxu1 %v14951_v17  ;;  %12713 = vmatprep.mubr.msk.bf16.mxu0 %vm15194_vm0, %v20662_v1  ;;  %v907_v17 = vshrl.u32 %v14953_v16, 16 }
 0x117   : > { %v15686_v58 = vadd.f32 %v1523_v46, %v1109_v43  ;;  %v12615_v29 = vpop.f32.mrf.mxu0  ;;  %12877 = vmatprep.mubr.msk.bf16.mxu1 %vm15194_vm0, %v20662_v1 }
 0x118   : > { %v12779_v61 = vpop.f32.mrf.mxu1  ;;  %v909_v18 = vor.u32 %v907_v17, %v905_v50 }
 0x119   : > { %v1112_v4 = vpop.f32.mrf.mxu0  ;;  %v919_v61 = vshll.u32 %v14955_v35, 16 }
 0x11a   : > { %v1526_v7 = vpop.f32.mrf.mxu1  ;;  %v15704_v29 = vsel %vm654_vm1, %v909_v18, %v913_v53 }
 0x11b   : > { %v15693_v13 = vadd.f32 %v1526_v7, %v1112_v4  ;;  %v12616_v14 = vpop.f32.mrf.mxu0  ;;  %20891 = vst [vmem:[#allocation25_spill] sm:$0xff] %v15704_v29 }
 0x11c   : > { %v12780_v23 = vpop.f32.mrf.mxu1 }
 0x11d   : > { %v1117_v26 = vpop.f32.mrf.mxu0  ;;  %12714 = vmatmul.mubr.bf16.gmra.mxu0 %v15691_v8  ;;  %v921_v23 = vrot.slane %v919_v61, 1 }
 0x11e   : > { %v1531_v27 = vpop.f32.mrf.mxu1  ;;  %12878 = vmatmul.mubr.bf16.gmra.mxu1 %v14952_v47  ;;  %12717 = vmatprep.mubr.msk.bf16.mxu0 %vm15194_vm0, %v20662_v1  ;;  %v915_v47 = vshrl.u32 %v14954_v56, 16 }
 0x11f   : > { %v15699_v39 = vadd.f32 %v1531_v27, %v1117_v26  ;;  %v12619_v40 = vpop.f32.mrf.mxu0  ;;  %12881 = vmatprep.mubr.msk.bf16.mxu1 %vm15194_vm0, %v20662_v1  ;;  %v14957_v26 = vld [vmem:[%s15304_s12 + $0x110] sm:$0xff]  }
 0x120   : > { %v12783_v43 = vpop.f32.mrf.mxu1  ;;  %v917_v14 = vor.u32 %v915_v47, %v913_v53 }
 0x121   : > { %v1120_v46 = vpop.f32.mrf.mxu0 }
 0x122   : > { %v1534_v49 = vpop.f32.mrf.mxu1 }
 0x123   : > { %v15706_v4 = vadd.f32 %v1534_v49, %v1120_v46  ;;  %v12620_v50 = vpop.f32.mrf.mxu0  ;;  %v15717_v49 = vsel %vm654_vm1, %v917_v14, %v921_v23  ;;  %v14960_v14 = vld [vmem:[%s15304_s12 + $0x118] sm:$0xff]  }
 0x124   : > { %v12784_v7 = vpop.f32.mrf.mxu1  ;;  %20892 = vst [vmem:[#allocation26_spill] sm:$0xff] %v15717_v49  ;;  %v927_v50 = vshll.u32 %v14957_v26, 16 }
 0x125   : > { %v1125_v17 = vpop.f32.mrf.mxu0  ;;  %12718 = vmatmul.mubr.bf16.gmra.mxu0 %v15704_v29 }
 0x126   : > { %v1539_v9 = vpop.f32.mrf.mxu1  ;;  %12882 = vmatmul.mubr.bf16.gmra.mxu1 %v14953_v16  ;;  %12721 = vmatprep.mubr.msk.bf16.mxu0 %vm15194_vm0, %v20662_v1  ;;  %v923_v16 = vshrl.u32 %v14955_v35, 16 }
 0x127   : > { %v15712_v27 = vadd.f32 %v1539_v9, %v1125_v17  ;;  %v12623_v18 = vpop.f32.mrf.mxu0  ;;  %12885 = vmatprep.mubr.msk.bf16.mxu1 %vm15194_vm0, %v20662_v1 }
 0x128   : > { %v12787_v40 = vpop.f32.mrf.mxu1  ;;  %v925_v9 = vor.u32 %v923_v16, %v921_v23  ;;  %v929_v18 = vrot.slane %v927_v50, 1  ;;  %v426_v23 = vld [vmem:[%s15304_s12 + $0x120] sm:$0xf]  ;;  %v427_v16 = vld [vmem:[%s15304_s12 + $0x124] sm:$0xf] }
 0x129   : > { %v1128_v43 = vpop.f32.mrf.mxu0 }
 0x12a   : > { %v1542_v46 = vpop.f32.mrf.mxu1 }
 0x12b   : > { %v15719_v7 = vadd.f32 %v1542_v46, %v1128_v43  ;;  %v12624_v53 = vpop.f32.mrf.mxu0 }
 0x12c   : > { %v12788_v47 = vpop.f32.mrf.mxu1 }
 0x12d   : > { %v1133_v61 = vpop.f32.mrf.mxu0  ;;  %12722 = vmatmul.mubr.bf16.gmra.mxu0 %v15717_v49  ;;  %v15730_v47 = vsel %vm654_vm1, %v925_v9, %v929_v18  ;;  %v935_v49 = vshll.u32 %v14960_v14, 16  ;;  %v15739_v9 = vcombine.low %v426_v23, %v427_v16 }
 0x12e   : > { %v1547_v17 = vpop.f32.mrf.mxu1  ;;  %12886 = vmatmul.mubr.bf16.gmra.mxu1 %v14954_v56  ;;  %12725 = vmatprep.mubr.msk.bf16.mxu0 %vm15194_vm0, %v20662_v1  ;;  %20893 = vst [vmem:[#allocation27_spill] sm:$0xff] %v15730_v47  ;;  %v931_v56 = vshrl.u32 %v14957_v26, 16 }
 0x12f   : > { %v15725_v40 = vadd.f32 %v1547_v17, %v1133_v61  ;;  %v12627_v29 = vpop.f32.mrf.mxu0  ;;  %12889 = vmatprep.mubr.msk.bf16.mxu1 %vm15194_vm0, %v20662_v1  ;;  %20894 = vst [vmem:[#allocation28_spill] sm:$0xff] %v15739_v9  ;;  %v943_v28 = vshll.u32 %v15739_v9, 16 }
 0x130   : > { %v12791_v43 = vpop.f32.mrf.mxu1  ;;  %v933_v17 = vor.u32 %v931_v56, %v929_v18 }
 0x131   : > { %v1136_v46 = vpop.f32.mrf.mxu0  ;;  %v937_v43 = vrot.slane %v935_v49, 1 }
 0x132   : > { %v1550_v53 = vpop.f32.mrf.mxu1 }
 0x133   : > { %v15732_v8 = vadd.f32 %v1550_v53, %v1136_v46  ;;  %v12628_v32 = vpop.f32.mrf.mxu0 }
 0x134   : > { %v12792_v50 = vpop.f32.mrf.mxu1 }
 0x135   : > { %v1141_v61 = vpop.f32.mrf.mxu0  ;;  %12726 = vmatmul.mubr.bf16.gmra.mxu0 %v15730_v47  ;;  %v15746_v47 = vsel %vm654_vm1, %v933_v17, %v937_v43 }
 0x136   : > { %v1555_v29 = vpop.f32.mrf.mxu1  ;;  %12890 = vmatmul.mubr.bf16.gmra.mxu1 %v14955_v35  ;;  %12729 = vmatprep.mubr.msk.bf16.mxu0 %vm15194_vm0, %v20662_v1  ;;  %20895 = vst [vmem:[#allocation29_spill] sm:$0xff] %v15746_v47  ;;  %v939_v35 = vshrl.u32 %v14960_v14, 16 }
 0x137   : > { %v15741_v60 = vadd.f32 %v1555_v29, %v1141_v61  ;;  %v12631_v46 = vpop.f32.mrf.mxu0  ;;  %12893 = vmatprep.mubr.msk.bf16.mxu1 %vm15194_vm0, %v20662_v1  ;;  %v945_v29 = vrot.slane %v943_v28, 1  ;;  %v947_v28 = vshrl.u32 %v15739_v9, 16 }
 0x138   : > { %v12795_v32 = vpop.f32.mrf.mxu1  ;;  %v941_v61 = vor.u32 %v939_v35, %v937_v43 }
 0x139   : > { %v1144_v53 = vpop.f32.mrf.mxu0 }
 0x13a   : > { %v1558_v50 = vpop.f32.mrf.mxu1 }
 0x13b   : > { %v15749_v62 = vadd.f32 %v1558_v50, %v1144_v53  ;;  %v12632_v49 = vpop.f32.mrf.mxu0 }
 0x13c   : > { %v12796_v18 = vpop.f32.mrf.mxu1  ;;  %v15759_v49 = vsel %vm654_vm1, %v941_v61, %v945_v29  ;;  %v15771_v61 = vor.u32 %v947_v28, %v945_v29 }
 0x13d   : > { %v1149_v56 = vpop.f32.mrf.mxu0  ;;  %12730 = vmatmul.mubr.bf16.gmra.mxu0 %v15746_v47  ;;  %20896 = vst [vmem:[#allocation30_spill] sm:$0xff] %v15759_v49 }
 0x13e   : > { %v1563_v16 = vpop.f32.mrf.mxu1  ;;  %12894 = vmatmul.mubr.bf16.gmra.mxu1 %v14957_v26  ;;  %12733 = vmatprep.mubr.msk.bf16.mxu0 %vm15194_vm0, %v20662_v1  ;;  %20897 = vst [vmem:[#allocation31_spill] sm:$0xff] %v15771_v61 }
 0x13f   : > { %v15754_v46 = vadd.f32 %v1563_v16, %v1149_v56  ;;  %v12635_v17 = vpop.f32.mrf.mxu0  ;;  %12897 = vmatprep.mubr.msk.bf16.mxu1 %vm15194_vm0, %v20662_v1 }
 0x140   : > { %v12799_v32 = vpop.f32.mrf.mxu1 }
 0x141   : > { %v1152_v53 = vpop.f32.mrf.mxu0  ;;  %v11056_v32 = vcombine.low %v426_v23, %v426_v23 }
 0x142   : > { %v1566_v50 = vpop.f32.mrf.mxu1 }
 0x143   : > { %v15761_v18 = vadd.f32 %v1566_v50, %v1152_v53  ;;  %v12636_v26 = vpop.f32.mrf.mxu0 }
 0x144   : > { %v12800_v47 = vpop.f32.mrf.mxu1 }
 0x145   : > { %v1157_v38 = vpop.f32.mrf.mxu0  ;;  %12734 = vmatmul.mubr.bf16.gmra.mxu0 %v15759_v49 }
 0x146   : > { %v1571_v43 = vpop.f32.mrf.mxu1  ;;  %12898 = vmatmul.mubr.bf16.gmra.mxu1 %v14960_v14  ;;  %12737 = vmatprep.mubr.msk.bf16.mxu0 %vm15194_vm0, %v20662_v1 }
 0x147   : > { %v15767_v35 = vadd.f32 %v1571_v43, %v1157_v38  ;;  %v12639_v56 = vpop.f32.mrf.mxu0  ;;  %12901 = vmatprep.mubr.msk.bf16.mxu1 %vm15194_vm0, %v20662_v1  ;;  %v15095_v43 = vld [vmem:[%s15304_s12] sm:$0xff]  }
 0x148   : > { %v12803_v16 = vpop.f32.mrf.mxu1  ;;  %v1795_v56 = vrot.slane %v15095_v43, 1 }
 0x149   : > { %v1160_v47 = vpop.f32.mrf.mxu0  ;;  %v15096_v16 = vld [vmem:[%s15304_s12 + $0x8] sm:$0xff]  }
 0x14a   : > { %v1574_v17 = vpop.f32.mrf.mxu1  ;;  %v1796_v49 = vrot.slane %v15096_v16, 1 }
 0x14b   : > { %v15773_v53 = vadd.f32 %v1574_v17, %v1160_v47  ;;  %v12640_v14 = vpop.f32.mrf.mxu0 }
 0x14c   : > { %v12804_v50 = vpop.f32.mrf.mxu1  ;;  %v14969_v14 = vld [vmem:[%s20633_s2 + $0x138] sm:$0xff]  }
 0x14d   : > { %v1165_v26 = vpop.f32.mrf.mxu0  ;;  %12738 = vmatmul.mubr.bf16.gmra.mxu0 %v15771_v61 }
 0x14e   : > { %v1579_v38 = vpop.f32.mrf.mxu1  ;;  %12902 = vmatmul.mubr.bf16.gmra.mxu1 %v11056_v32  ;;  %12921 = vmatprep.mubr.msk.bf16.mxu0 %vm15194_vm0, %v20662_v1  ;;  %v1797_v32 = vsel %vm1794_vm2, %v1795_v56, %v1796_v49 }
 0x14f   : > { %v15780_v29 = vadd.f32 %v1579_v38, %v1165_v26  ;;  %v12643_v23 = vpop.f32.mrf.mxu0  ;;  %13085 = vmatprep.mubr.msk.bf16.mxu1 %vm15194_vm0, %v20662_v1 }
 0x150   : > { %v12807_v28 = vpop.f32.mrf.mxu1  ;;  %v15097_v23 = vld [vmem:[%s15304_s12 + $0x10] sm:$0xff]  }
 0x151   : > { %v1168_v47 = vpop.f32.mrf.mxu0  ;;  %v1798_v1 = vrot.slane %v15097_v23, 1  ;;  %v14970_v28 = vld [vmem:[%s20633_s2 + $0x130] sm:$0xff]  }
 0x152   : > { %v1582_v17 = vpop.f32.mrf.mxu1 }
 0x153   : > { %v15788_v50 = vadd.f32 %v1582_v17, %v1168_v47  ;;  %v12644_v43 = vpop.f32.mrf.mxu0 }
 0x154   : > { %v12808_v26 = vpop.f32.mrf.mxu1 }
 0x155   : > { %v1173_v38 = vpop.f32.mrf.mxu0  ;;  %12922 = vmatmul.mubr.bf16.vlgmr.msra.gmra.mxu0 %v1797_v32 }
 0x156   : > { %v1587_v16 = vpop.f32.mrf.mxu1  ;;  %13234 = vmatpush3.bf16.msra.mxu0 %v14969_v14  ;;  %13086 = vmatmul.mubr.bf16.vlgmr.msra.gmra.mxu1 %v15097_v23  ;;  %v1799_v14 = vsel %vm1794_vm2, %v1796_v49, %v1798_v1 }
 0x157   : > { %v15794_v56 = vadd.f32 %v1587_v16, %v1173_v38  ;;  %v12647_v61 = vpop.f32.mrf.mxu0  ;;  %12925 = vmatprep.mubr.msk.bf16.mxu0 %vm15194_vm0, %v20898_v20  ;;  %13089 = vmatprep.mubr.msk.bf16.mxu1 %vm15194_vm0, %v20898_v20 }
 0x158   : > { %v12811_v47 = vpop.f32.mrf.mxu1  ;;  %13235 = vmatprep.subr.bf16.mxu0 %v20898_v20  ;;  %v14971_v61 = vld [vmem:[%s20633_s2 + $0x128] sm:$0xff]  }
 0x159   : > { %v1176_v17 = vpop.f32.mrf.mxu0  ;;  %v15098_v47 = vld [vmem:[%s15304_s12 + $0x18] sm:$0xff]  }
 0x15a   : > { %v1590_v32 = vpop.f32.mrf.mxu1  ;;  %13236 = vmatpush3.bf16.msra.mxu0 %v14970_v28  ;;  %v1800_v49 = vrot.slane %v15098_v47, 1 }
 0x15b   : > { %v15802_v43 = vadd.f32 %v1590_v32, %v1176_v17  ;;  %v12648_v26 = vpop.f32.mrf.mxu0  ;;  %13237 = vmatprep.subr.bf16.mxu0 %v20898_v20  ;;  %v14972_v32 = vld [vmem:[%s20633_s2 + $0x120] sm:$0xff]  }
 0x15c   : > { %v12812_v38 = vpop.f32.mrf.mxu1  ;;  %v15820_v11 = vsel %vm1794_vm2, %v1798_v1, %v1800_v49 }
 0x15d   : > { %v1181_v16 = vpop.f32.mrf.mxu0  ;;  %12926 = vmatmul.mubr.bf16.gmra.mxu0 %v1799_v14 }
 0x15e   : > { %v1595_v23 = vpop.f32.mrf.mxu1  ;;  %13090 = vmatmul.mubr.bf16.gmra.mxu1 %v15098_v47  ;;  %12929 = vmatprep.mubr.msk.bf16.mxu0 %vm15194_vm0, %v20898_v20 }
 0x15f   : > { %v15811_v28 = vadd.f32 %v1595_v23, %v1181_v16  ;;  %v12651_v17 = vpop.f32.mrf.mxu0  ;;  %13093 = vmatprep.mubr.msk.bf16.mxu1 %vm15194_vm0, %v20898_v20  ;;  %13238 = vmatpush3.bf16.msra.mxu0 %v14971_v61 }
 0x160   : > { %v12815_v14 = vpop.f32.mrf.mxu1  ;;  %13239 = vmatprep.subr.bf16.mxu0 %v20898_v20 }
 0x161   : > { %v1184_v26 = vpop.f32.mrf.mxu0  ;;  %v1802_v14 = vrot.slane %v15099_v2, 1 }
 0x162   : > { %v1598_v38 = vpop.f32.mrf.mxu1 }
 0x163   : > { %v15822_v16 = vadd.f32 %v1598_v38, %v1184_v26  ;;  %v12652_v23 = vpop.f32.mrf.mxu0  ;;  %13240 = vmatpush3.bf16.msra.mxu0 %v14972_v32 }
 0x164   : > { %v12816_v47 = vpop.f32.mrf.mxu1  ;;  %13241 = vmatprep.subr.bf16.mxu0 %v20898_v20 }
 0x165   : > { %v1189_v61 = vpop.f32.mrf.mxu0  ;;  %12930 = vmatmul.mubr.bf16.gmra.mxu0 %v15820_v11  ;;  %v15834_v47 = vsel %vm1794_vm2, %v1800_v49, %v1802_v14 }
 0x166   : > { %v1603_v17 = vpop.f32.mrf.mxu1  ;;  %13094 = vmatmul.mubr.bf16.gmra.mxu1 %v15099_v2  ;;  %12933 = vmatprep.mubr.msk.bf16.mxu0 %vm15194_vm0, %v20898_v20 }
 0x167   : > { %v15829_v1 = vadd.f32 %v1603_v17, %v1189_v61  ;;  %v12655_v26 = vpop.f32.mrf.mxu0  ;;  %13097 = vmatprep.mubr.msk.bf16.mxu1 %vm15194_vm0, %v20898_v20  ;;  %13242 = vmatpush3.bf16.msra.mxu0 %v14973_v34 }
 0x168   : > { %v12819_v32 = vpop.f32.mrf.mxu1  ;;  %v15100_v26 = vld [vmem:[%s15304_s12 + $0x28] sm:$0xff]   ;;  %13243 = vmatprep.subr.bf16.mxu0 %v20898_v20 }
 0x169   : > { %v1192_v38 = vpop.f32.mrf.mxu0  ;;  %v1804_v32 = vrot.slane %v15100_v26, 1 }
 0x16a   : > { %v1606_v23 = vpop.f32.mrf.mxu1 }
 0x16b   : > { %v15836_v55 = vadd.f32 %v1606_v23, %v1192_v38  ;;  %v12656_v45 = vpop.f32.mrf.mxu0  ;;  %v15851_v24 = vsel %vm1794_vm2, %v1802_v14, %v1804_v32 }
 0x16c   : > { %v12820_v2 = vpop.f32.mrf.mxu1  ;;  %20899 = vst [vmem:[#allocation32_spill] sm:$0xff] %v15851_v24 }
 0x16d   : > { %v1197_v61 = vpop.f32.mrf.mxu0  ;;  %12934 = vmatmul.mubr.bf16.gmra.mxu0 %v15834_v47 }
 0x16e   : > { %v1611_v17 = vpop.f32.mrf.mxu1  ;;  %13098 = vmatmul.mubr.bf16.gmra.mxu1 %v15100_v26  ;;  %12937 = vmatprep.mubr.msk.bf16.mxu0 %vm15194_vm0, %v20898_v20 }
 0x16f   : > { %v15845_v49 = vadd.f32 %v1611_v17, %v1197_v61  ;;  %v12659_v38 = vpop.f32.mrf.mxu0  ;;  %13101 = vmatprep.mubr.msk.bf16.mxu1 %vm15194_vm0, %v20898_v20  ;;  %v15101_v17 = vld [vmem:[%s15304_s12 + $0x30] sm:$0xff]  }
 0x170   : > { %v12823_v45 = vpop.f32.mrf.mxu1  ;;  %v1806_v34 = vrot.slane %v15101_v17, 1 }
 0x171   : > { %v1200_v23 = vpop.f32.mrf.mxu0 }
 0x172   : > { %v1614_v2 = vpop.f32.mrf.mxu1 }
 0x173   : > { %v15853_v15 = vadd.f32 %v1614_v2, %v1200_v23  ;;  %v12660_v10 = vpop.f32.mrf.mxu0  ;;  %v15864_v2 = vsel %vm1794_vm2, %v1804_v32, %v1806_v34 }
 0x174   : > { %v12824_v26 = vpop.f32.mrf.mxu1  ;;  %20900 = vst [vmem:[#allocation33_spill] sm:$0xff] %v15864_v2 }
 0x175   : > { %v1205_v3 = vpop.f32.mrf.mxu0  ;;  %12938 = vmatmul.mubr.bf16.gmra.mxu0 %v15851_v24 }
 0x176   : > { %v1619_v61 = vpop.f32.mrf.mxu1  ;;  %13102 = vmatmul.mubr.bf16.gmra.mxu1 %v15101_v17  ;;  %12941 = vmatprep.mubr.msk.bf16.mxu0 %vm15194_vm0, %v20898_v20 }
 0x177   : > { %v15859_v38 = vadd.f32 %v1619_v61, %v1205_v3  ;;  %v12663_v45 = vpop.f32.mrf.mxu0  ;;  %13105 = vmatprep.mubr.msk.bf16.mxu1 %vm15194_vm0, %v20898_v20  ;;  %v15102_v3 = vld [vmem:[%s15304_s12 + $0x38] sm:$0xff]  }
 0x178   : > { %v12827_v14 = vpop.f32.mrf.mxu1  ;;  %v1808_v61 = vrot.slane %v15102_v3, 1 }
 0x179   : > { %v1208_v10 = vpop.f32.mrf.mxu0 }
 0x17a   : > { %v1622_v23 = vpop.f32.mrf.mxu1 }
 0x17b   : > { %v15866_v26 = vadd.f32 %v1622_v23, %v1208_v10  ;;  %v12664_v59 = vpop.f32.mrf.mxu0  ;;  %v15877_v10 = vsel %vm1794_vm2, %v1806_v34, %v1808_v61 }
 0x17c   : > { %v12828_v52 = vpop.f32.mrf.mxu1  ;;  %20902 = vst [vmem:[#allocation35_spill] sm:$0xff] %v15877_v10 }
 0x17d   : > { %v1213_v44 = vpop.f32.mrf.mxu0  ;;  %12942 = vmatmul.mubr.bf16.gmra.mxu0 %v15864_v2 }
 0x17e   : > { %v1627_v17 = vpop.f32.mrf.mxu1  ;;  %13106 = vmatmul.mubr.bf16.gmra.mxu1 %v15102_v3  ;;  %12945 = vmatprep.mubr.msk.bf16.mxu0 %vm15194_vm0, %v20898_v20 }
 0x17f   : > { %v15872_v45 = vadd.f32 %v1627_v17, %v1213_v44  ;;  %v12667_v14 = vpop.f32.mrf.mxu0  ;;  %13109 = vmatprep.mubr.msk.bf16.mxu1 %vm15194_vm0, %v20898_v20  ;;  %v15103_v44 = vld [vmem:[%s15304_s12 + $0x40] sm:$0xff]  }
 0x180   : > { %v12831_v32 = vpop.f32.mrf.mxu1  ;;  %v1810_v17 = vrot.slane %v15103_v44, 1 }
 0x181   : > { %20901 = vst [vmem:[#allocation34_spill] sm:$0xff] %v15872_v45  ;;  %v1216_v59 = vpop.f32.mrf.mxu0 }
 0x182   : > { %v1630_v52 = vpop.f32.mrf.mxu1 }
 0x183   : > { %v15879_v23 = vadd.f32 %v1630_v52, %v1216_v59  ;;  %v12668_v37 = vpop.f32.mrf.mxu0  ;;  %v15890_v59 = vsel %vm1794_vm2, %v1808_v61, %v1810_v17 }
 0x184   : > { %v12832_v31 = vpop.f32.mrf.mxu1  ;;  %20905 = vst [vmem:[#allocation38_spill] sm:$0xff] %v15890_v59 }
 0x185   : > { %20903 = vst [vmem:[#allocation36_spill] sm:$0xff] %v15879_v23  ;;  %v1221_v25 = vpop.f32.mrf.mxu0  ;;  %12946 = vmatmul.mubr.bf16.gmra.mxu0 %v15877_v10 }
 0x186   : > { %v1635_v3 = vpop.f32.mrf.mxu1  ;;  %13110 = vmatmul.mubr.bf16.gmra.mxu1 %v15103_v44  ;;  %12949 = vmatprep.mubr.msk.bf16.mxu0 %vm15194_vm0, %v20898_v20 }
 0x187   : > { %v15885_v14 = vadd.f32 %v1635_v3, %v1221_v25  ;;  %v12671_v32 = vpop.f32.mrf.mxu0  ;;  %13113 = vmatprep.mubr.msk.bf16.mxu1 %vm15194_vm0, %v20898_v20  ;;  %v15104_v25 = vld [vmem:[%s15304_s12 + $0x48] sm:$0xff]  }
 0x188   : > { %v12835_v34 = vpop.f32.mrf.mxu1  ;;  %v1812_v3 = vrot.slane %v15104_v25, 1 }
 0x189   : > { %20904 = vst [vmem:[#allocation37_spill] sm:$0xff] %v15885_v14  ;;  %v1224_v37 = vpop.f32.mrf.mxu0 }
 0x18a   : > { %v1638_v31 = vpop.f32.mrf.mxu1 }
 0x18b   : > { %v15892_v52 = vadd.f32 %v1638_v31, %v1224_v37  ;;  %v12672_v19 = vpop.f32.mrf.mxu0  ;;  %v15906_v31 = vsel %vm1794_vm2, %v1810_v17, %v1812_v3 }
 0x18c   : > { %v12836_v23 = vpop.f32.mrf.mxu1  ;;  %v14974_v19 = vld [vmem:[%s20633_s2 + $0x110] sm:$0xff]   ;;  %20908 = vst [vmem:[#allocation41_spill] sm:$0xff] %v15906_v31 }
 0x18d   : > { %20906 = vst [vmem:[#allocation39_spill] sm:$0xff] %v15892_v52  ;;  %v1229_v45 = vpop.f32.mrf.mxu0  ;;  %12950 = vmatmul.mubr.bf16.gmra.mxu0 %v15890_v59  ;;  %v15105_v52 = vld [vmem:[%s15304_s12 + $0x50] sm:$0xff]  }
 0x18e   : > { %v1643_v44 = vpop.f32.mrf.mxu1  ;;  %13114 = vmatmul.mubr.bf16.gmra.mxu1 %v15104_v25  ;;  %12953 = vmatprep.mubr.msk.bf16.mxu0 %vm15194_vm0, %v20898_v20 }
 0x18f   : > { %v15898_v32 = vadd.f32 %v1643_v44, %v1229_v45  ;;  %v12675_v34 = vpop.f32.mrf.mxu0  ;;  %13117 = vmatprep.mubr.msk.bf16.mxu1 %vm15194_vm0, %v20898_v20  ;;  %13244 = vmatpush3.bf16.msra.mxu0 %v14974_v19  ;;  %v1814_v19 = vrot.slane %v15105_v52, 1 }
 0x190   : > { %v12839_v61 = vpop.f32.mrf.mxu1  ;;  %13245 = vmatprep.subr.bf16.mxu0 %v20898_v20 }
 0x191   : > { %20907 = vst [vmem:[#allocation40_spill] sm:$0xff] %v15898_v32  ;;  %v1232_v23 = vpop.f32.mrf.mxu0 }
 0x192   : > { %v1646_v37 = vpop.f32.mrf.mxu1 }
 0x193   : > { %v15909_v45 = vadd.f32 %v1646_v37, %v1232_v23  ;;  %v12676_v44 = vpop.f32.mrf.mxu0 }
 0x194   : > { %v12840_v25 = vpop.f32.mrf.mxu1 }
 0x195   : > { %20909 = vst [vmem:[#allocation42_spill] sm:$0xff] %v15909_v45  ;;  %v1237_v34 = vpop.f32.mrf.mxu0  ;;  %12954 = vmatmul.mubr.bf16.gmra.mxu0 %v15906_v31  ;;  %v15920_v25 = vsel %vm1794_vm2, %v1812_v3, %v1814_v19 }
 0x196   : > { %v1651_v32 = vpop.f32.mrf.mxu1  ;;  %13118 = vmatmul.mubr.bf16.gmra.mxu1 %v15105_v52  ;;  %12957 = vmatprep.mubr.msk.bf16.mxu0 %vm15194_vm0, %v20898_v20  ;;  %20911 = vst [vmem:[#allocation44_spill] sm:$0xff] %v15920_v25 }
 0x197   : > { %v15915_v61 = vadd.f32 %v1651_v32, %v1237_v34  ;;  %v12679_v17 = vpop.f32.mrf.mxu0  ;;  %13121 = vmatprep.mubr.msk.bf16.mxu1 %vm15194_vm0, %v20898_v20  ;;  %v15106_v32 = vld [vmem:[%s15304_s12 + $0x58] sm:$0xff]  }
 0x198   : > { %v12843_v23 = vpop.f32.mrf.mxu1  ;;  %v1816_v34 = vrot.slane %v15106_v32, 1 }
 0x199   : > { %20910 = vst [vmem:[#allocation43_spill] sm:$0xff] %v15915_v61  ;;  %v1240_v37 = vpop.f32.mrf.mxu0 }
 0x19a   : > { %v1654_v44 = vpop.f32.mrf.mxu1 }
 0x19b   : > { %v15922_v45 = vadd.f32 %v1654_v44, %v1240_v37  ;;  %v12680_v31 = vpop.f32.mrf.mxu0  ;;  %v15933_v37 = vsel %vm1794_vm2, %v1814_v19, %v1816_v34 }
 0x19c   : > { %v12844_v14 = vpop.f32.mrf.mxu1  ;;  %20914 = vst [vmem:[#allocation47_spill] sm:$0xff] %v15933_v37 }
 0x19d   : > { %20912 = vst [vmem:[#allocation45_spill] sm:$0xff] %v15922_v45  ;;  %v1245_v59 = vpop.f32.mrf.mxu0  ;;  %12958 = vmatmul.mubr.bf16.gmra.mxu0 %v15920_v25 }
 0x19e   : > { %v1659_v52 = vpop.f32.mrf.mxu1  ;;  %13122 = vmatmul.mubr.bf16.gmra.mxu1 %v15106_v32  ;;  %12961 = vmatprep.mubr.msk.bf16.mxu0 %vm15194_vm0, %v20898_v20 }
 0x19f   : > { %v15928_v17 = vadd.f32 %v1659_v52, %v1245_v59  ;;  %v12683_v23 = vpop.f32.mrf.mxu0  ;;  %13125 = vmatprep.mubr.msk.bf16.mxu1 %vm15194_vm0, %v20898_v20  ;;  %v15107_v59 = vld [vmem:[%s15304_s12 + $0x60] sm:$0xff]  }
 0x1a0   : > { %v12847_v3 = vpop.f32.mrf.mxu1  ;;  %v1818_v52 = vrot.slane %v15107_v59, 1 }
 0x1a1   : > { %20913 = vst [vmem:[#allocation46_spill] sm:$0xff] %v15928_v17  ;;  %v1248_v31 = vpop.f32.mrf.mxu0 }
 0x1a2   : > { %v1662_v14 = vpop.f32.mrf.mxu1 }
 0x1a3   : > { %v15935_v44 = vadd.f32 %v1662_v14, %v1248_v31  ;;  %v12684_v45 = vpop.f32.mrf.mxu0  ;;  %v15946_v31 = vsel %vm1794_vm2, %v1816_v34, %v1818_v52 }
 0x1a4   : > { %v12848_v61 = vpop.f32.mrf.mxu1  ;;  %20917 = vst [vmem:[#allocation50_spill] sm:$0xff] %v15946_v31 }
 0x1a5   : > { %20915 = vst [vmem:[#allocation48_spill] sm:$0xff] %v15935_v44  ;;  %v1253_v25 = vpop.f32.mrf.mxu0  ;;  %12962 = vmatmul.mubr.bf16.gmra.mxu0 %v15933_v37 }
 0x1a6   : > { %v1667_v32 = vpop.f32.mrf.mxu1  ;;  %13126 = vmatmul.mubr.bf16.gmra.mxu1 %v15107_v59  ;;  %12965 = vmatprep.mubr.msk.bf16.mxu0 %vm15194_vm0, %v20898_v20 }
 0x1a7   : > { %v15941_v23 = vadd.f32 %v1667_v32, %v1253_v25  ;;  %v12687_v3 = vpop.f32.mrf.mxu0  ;;  %13129 = vmatprep.mubr.msk.bf16.mxu1 %vm15194_vm0, %v20898_v20  ;;  %v15108_v25 = vld [vmem:[%s15304_s12 + $0x68] sm:$0xff]  }
 0x1a8   : > { %v12851_v19 = vpop.f32.mrf.mxu1  ;;  %v1820_v32 = vrot.slane %v15108_v25, 1 }
 0x1a9   : > { %20916 = vst [vmem:[#allocation49_spill] sm:$0xff] %v15941_v23  ;;  %v1256_v45 = vpop.f32.mrf.mxu0 }
 0x1aa   : > { %v1670_v61 = vpop.f32.mrf.mxu1 }
 0x1ab   : > { %v15948_v14 = vadd.f32 %v1670_v61, %v1256_v45  ;;  %v12688_v44 = vpop.f32.mrf.mxu0  ;;  %v15959_v45 = vsel %vm1794_vm2, %v1818_v52, %v1820_v32 }
 0x1ac   : > { %v12852_v17 = vpop.f32.mrf.mxu1  ;;  %20920 = vst [vmem:[#allocation53_spill] sm:$0xff] %v15959_v45 }
 0x1ad   : > { %20918 = vst [vmem:[#allocation51_spill] sm:$0xff] %v15948_v14  ;;  %v1261_v37 = vpop.f32.mrf.mxu0  ;;  %12966 = vmatmul.mubr.bf16.gmra.mxu0 %v15946_v31 }
 0x1ae   : > { %v1675_v59 = vpop.f32.mrf.mxu1  ;;  %13130 = vmatmul.mubr.bf16.gmra.mxu1 %v15108_v25  ;;  %12969 = vmatprep.mubr.msk.bf16.mxu0 %vm15194_vm0, %v20898_v20  ;;  %v14975_v25 = vld [vmem:[%s20633_s2 + $0x108] sm:$0xff]  }
 0x1af   : > { %v15954_v3 = vadd.f32 %v1675_v59, %v1261_v37  ;;  %v12691_v19 = vpop.f32.mrf.mxu0  ;;  %13133 = vmatprep.mubr.msk.bf16.mxu1 %vm15194_vm0, %v20898_v20  ;;  %13246 = vmatpush3.bf16.msra.mxu0 %v14975_v25 }
 0x1b0   : > { %v12855_v34 = vpop.f32.mrf.mxu1  ;;  %v15109_v19 = vld [vmem:[%s15304_s12 + $0x70] sm:$0xff]   ;;  %13247 = vmatprep.subr.bf16.mxu0 %v20898_v20 }
 0x1b1   : > { %20919 = vst [vmem:[#allocation52_spill] sm:$0xff] %v15954_v3  ;;  %v1264_v44 = vpop.f32.mrf.mxu0  ;;  %v1822_v34 = vrot.slane %v15109_v19, 1 }
 0x1b2   : > { %v1678_v17 = vpop.f32.mrf.mxu1 }
 0x1b3   : > { %v15961_v61 = vadd.f32 %v1678_v17, %v1264_v44  ;;  %v12692_v14 = vpop.f32.mrf.mxu0 }
 0x1b4   : > { %v12856_v23 = vpop.f32.mrf.mxu1 }
 0x1b5   : > { %20921 = vst [vmem:[#allocation54_spill] sm:$0xff] %v15961_v61  ;;  %v1269_v37 = vpop.f32.mrf.mxu0  ;;  %12970 = vmatmul.mubr.bf16.gmra.mxu0 %v15959_v45  ;;  %v15976_v61 = vsel %vm1794_vm2, %v1820_v32, %v1822_v34 }
 0x1b6   : > { %v1683_v59 = vpop.f32.mrf.mxu1  ;;  %13134 = vmatmul.mubr.bf16.gmra.mxu1 %v15109_v19  ;;  %12973 = vmatprep.mubr.msk.bf16.mxu0 %vm15194_vm0, %v20898_v20  ;;  %20923 = vst [vmem:[#allocation56_spill] sm:$0xff] %v15976_v61 }
 0x1b7   : > { %v15970_v52 = vadd.f32 %v1683_v59, %v1269_v37  ;;  %v12695_v44 = vpop.f32.mrf.mxu0  ;;  %13137 = vmatprep.mubr.msk.bf16.mxu1 %vm15194_vm0, %v20898_v20  ;;  %v15110_v59 = vld [vmem:[%s15304_s12 + $0x78] sm:$0xff]  }
 0x1b8   : > { %v12859_v23 = vpop.f32.mrf.mxu1  ;;  %v1824_v25 = vrot.slane %v15110_v59, 1 }
 0x1b9   : > { %20922 = vst [vmem:[#allocation55_spill] sm:$0xff] %v15970_v52  ;;  %v1272_v14 = vpop.f32.mrf.mxu0 }
 0x1ba   : > { %v1686_v17 = vpop.f32.mrf.mxu1 }
 0x1bb   : > { %v15978_v3 = vadd.f32 %v1686_v17, %v1272_v14  ;;  %v12696_v45 = vpop.f32.mrf.mxu0  ;;  %v15989_v17 = vsel %vm1794_vm2, %v1822_v34, %v1824_v25 }
 0x1bc   : > { %v12860_v19 = vpop.f32.mrf.mxu1  ;;  %20926 = vst [vmem:[#allocation59_spill] sm:$0xff] %v15989_v17 }
 0x1bd   : > { %20924 = vst [vmem:[#allocation57_spill] sm:$0xff] %v15978_v3  ;;  %v1277_v31 = vpop.f32.mrf.mxu0  ;;  %12974 = vmatmul.mubr.bf16.gmra.mxu0 %v15976_v61 }
 0x1be   : > { %v1691_v37 = vpop.f32.mrf.mxu1  ;;  %13138 = vmatmul.mubr.bf16.gmra.mxu1 %v15110_v59  ;;  %12977 = vmatprep.mubr.msk.bf16.mxu0 %vm15194_vm0, %v20898_v20 }
 0x1bf   : > { %v15984_v44 = vadd.f32 %v1691_v37, %v1277_v31  ;;  %v12699_v23 = vpop.f32.mrf.mxu0  ;;  %13141 = vmatprep.mubr.msk.bf16.mxu1 %vm15194_vm0, %v20898_v20  ;;  %v15111_v31 = vld [vmem:[%s15304_s12 + $0x80] sm:$0xff]  }
 0x1c0   : > { %v12863_v32 = vpop.f32.mrf.mxu1  ;;  %v1826_v37 = vrot.slane %v15111_v31, 1 }
 0x1c1   : > { %20925 = vst [vmem:[#allocation58_spill] sm:$0xff] %v15984_v44  ;;  %v1280_v45 = vpop.f32.mrf.mxu0 }
 0x1c2   : > { %v1694_v14 = vpop.f32.mrf.mxu1 }
 0x1c3   : > { %v15991_v19 = vadd.f32 %v1694_v14, %v1280_v45  ;;  %v12700_v3 = vpop.f32.mrf.mxu0  ;;  %v16002_v45 = vsel %vm1794_vm2, %v1824_v25, %v1826_v37 }
 0x1c4   : > { %v12864_v52 = vpop.f32.mrf.mxu1  ;;  %20929 = vst [vmem:[#allocation62_spill] sm:$0xff] %v16002_v45 }
 0x1c5   : > { %20927 = vst [vmem:[#allocation60_spill] sm:$0xff] %v15991_v19  ;;  %v1285_v61 = vpop.f32.mrf.mxu0  ;;  %12978 = vmatmul.mubr.bf16.gmra.mxu0 %v15989_v17 }
 0x1c6   : > { %v1699_v59 = vpop.f32.mrf.mxu1  ;;  %13142 = vmatmul.mubr.bf16.gmra.mxu1 %v15111_v31  ;;  %12981 = vmatprep.mubr.msk.bf16.mxu0 %vm15194_vm0, %v20898_v20 }
 0x1c7   : > { %v15997_v23 = vadd.f32 %v1699_v59, %v1285_v61  ;;  %v12703_v32 = vpop.f32.mrf.mxu0  ;;  %13145 = vmatprep.mubr.msk.bf16.mxu1 %vm15194_vm0, %v20898_v20  ;;  %v15112_v61 = vld [vmem:[%s15304_s12 + $0x88] sm:$0xff]  }
 0x1c8   : > { %v12867_v34 = vpop.f32.mrf.mxu1  ;;  %v1828_v59 = vrot.slane %v15112_v61, 1 }
 0x1c9   : > { %20928 = vst [vmem:[#allocation61_spill] sm:$0xff] %v15997_v23  ;;  %v1288_v3 = vpop.f32.mrf.mxu0 }
 0x1ca   : > { %v1702_v52 = vpop.f32.mrf.mxu1 }
 0x1cb   : > { %v16004_v14 = vadd.f32 %v1702_v52, %v1288_v3  ;;  %v12704_v19 = vpop.f32.mrf.mxu0  ;;  %v16015_v3 = vsel %vm1794_vm2, %v1826_v37, %v1828_v59 }
 0x1cc   : > { %v12868_v44 = vpop.f32.mrf.mxu1  ;;  %20932 = vst [vmem:[#allocation65_spill] sm:$0xff] %v16015_v3 }
 0x1cd   : > { %20930 = vst [vmem:[#allocation63_spill] sm:$0xff] %v16004_v14  ;;  %v1293_v17 = vpop.f32.mrf.mxu0  ;;  %12982 = vmatmul.mubr.bf16.gmra.mxu0 %v16002_v45 }
 0x1ce   : > { %v1707_v31 = vpop.f32.mrf.mxu1  ;;  %13146 = vmatmul.mubr.bf16.gmra.mxu1 %v15112_v61  ;;  %12985 = vmatprep.mubr.msk.bf16.mxu0 %vm15194_vm0, %v20898_v20 }
 0x1cf   : > { %v16010_v32 = vadd.f32 %v1707_v31, %v1293_v17  ;;  %v12707_v34 = vpop.f32.mrf.mxu0  ;;  %13149 = vmatprep.mubr.msk.bf16.mxu1 %vm15194_vm0, %v20898_v20  ;;  %v15113_v17 = vld [vmem:[%s15304_s12 + $0x90] sm:$0xff]  }
 0x1d0   : > { %v12871_v25 = vpop.f32.mrf.mxu1  ;;  %v1830_v31 = vrot.slane %v15113_v17, 1 }
 0x1d1   : > { %20931 = vst [vmem:[#allocation64_spill] sm:$0xff] %v16010_v32  ;;  %v1296_v19 = vpop.f32.mrf.mxu0 }
 0x1d2   : > { %v1710_v44 = vpop.f32.mrf.mxu1 }
 0x1d3   : > { %v16017_v52 = vadd.f32 %v1710_v44, %v1296_v19  ;;  %v12708_v14 = vpop.f32.mrf.mxu0  ;;  %v16028_v19 = vsel %vm1794_vm2, %v1828_v59, %v1830_v31  ;;  %v14976_v44 = vld [vmem:[%s20633_s2 + $0x100] sm:$0xff]  }
 0x1d4   : > { %v12872_v23 = vpop.f32.mrf.mxu1  ;;  %20935 = vst [vmem:[#allocation68_spill] sm:$0xff] %v16028_v19  ;;  %13248 = vmatpush3.bf16.msra.mxu0 %v14976_v44 }
 0x1d5   : > { %20933 = vst [vmem:[#allocation66_spill] sm:$0xff] %v16017_v52  ;;  %v1301_v45 = vpop.f32.mrf.mxu0  ;;  %12986 = vmatmul.mubr.bf16.gmra.mxu0 %v16015_v3  ;;  %13561 = vmatprep.subr.bf16.mxu0 %v20898_v20 }
 0x1d6   : > { %v1715_v61 = vpop.f32.mrf.mxu1  ;;  %13150 = vmatmul.mubr.bf16.gmra.mxu1 %v15113_v17  ;;  %12989 = vmatprep.mubr.msk.bf16.mxu0 %vm15194_vm0, %v20898_v20 }
 0x1d7   : > { %v16023_v34 = vadd.f32 %v1715_v61, %v1301_v45  ;;  %v12711_v25 = vpop.f32.mrf.mxu0  ;;  %13153 = vmatprep.mubr.msk.bf16.mxu1 %vm15194_vm0, %v20898_v20 }
 0x1d8   : > { %v12875_v37 = vpop.f32.mrf.mxu1 }
 0x1d9   : > { %20934 = vst [vmem:[#allocation67_spill] sm:$0xff] %v16023_v34  ;;  %v1304_v14 = vpop.f32.mrf.mxu0  ;;  %v15114_v37 = vld [vmem:[%s15304_s12 + $0x98] sm:$0xff]  }
 0x1da   : > { %v1718_v23 = vpop.f32.mrf.mxu1  ;;  %v1832_v59 = vrot.slane %v15114_v37, 1 }
 0x1db   : > { %v16033_v52 = vadd.f32 %v1718_v23, %v1304_v14  ;;  %v12712_v17 = vpop.f32.mrf.mxu0  ;;  %v14977_v14 = vld [vmem:[%s20633_s2 + $0x178] sm:$0xff]  }
 0x1dc   : > { %v12876_v45 = vpop.f32.mrf.mxu1  ;;  %13398 = vmatpush3.bf16.msra.mxu1 %v14977_v14  ;;  %v15115_v14 = vld [vmem:[%s15304_s12 + $0xa0] sm:$0xff]  }
 0x1dd   : > { %20936 = vst [vmem:[#allocation69_spill] sm:$0xff] %v16033_v52  ;;  %v1309_v61 = vpop.f32.mrf.mxu0  ;;  %12990 = vmatmul.mubr.bf16.gmra.mxu0 %v16028_v19  ;;  %v16048_v45 = vsel %vm1794_vm2, %v1830_v31, %v1832_v59  ;;  %13399 = vmatprep.subr.bf16.mxu1 %v20898_v20  ;;  %v1834_v31 = vrot.slane %v15115_v14, 1 }
 0x1de   : > { %v1723_v25 = vpop.f32.mrf.mxu1  ;;  %13154 = vmatmul.mubr.bf16.gmra.mxu1 %v15114_v37  ;;  %12993 = vmatprep.mubr.msk.bf16.mxu0 %vm15194_vm0, %v20898_v20  ;;  %20938 = vst [vmem:[#allocation71_spill] sm:$0xff] %v16048_v45 }
 0x1df   : > { %v16040_v34 = vadd.f32 %v1723_v25, %v1309_v61  ;;  %v12715_v32 = vpop.f32.mrf.mxu0  ;;  %13157 = vmatprep.mubr.msk.bf16.mxu1 %vm15194_vm0, %v20898_v20  ;;  %v14978_v25 = vld [vmem:[%s20633_s2 + $0x170] sm:$0xff]  }
 0x1e0   : > { %v12879_v23 = vpop.f32.mrf.mxu1  ;;  %13400 = vmatpush3.bf16.msra.mxu1 %v14978_v25 }
 0x1e1   : > { %20937 = vst [vmem:[#allocation70_spill] sm:$0xff] %v16040_v34  ;;  %v1312_v44 = vpop.f32.mrf.mxu0  ;;  %13401 = vmatprep.subr.bf16.mxu1 %v20898_v20 }
 0x1e2   : > { %v1726_v17 = vpop.f32.mrf.mxu1 }
 0x1e3   : > { %v16051_v61 = vadd.f32 %v1726_v17, %v1312_v44  ;;  %v12716_v32 = vpop.f32.mrf.mxu0  ;;  %v14979_v17 = vld [vmem:[%s20633_s2 + $0x168] sm:$0xff]  }
 0x1e4   : > { %v12880_v37 = vpop.f32.mrf.mxu1  ;;  %13402 = vmatpush3.bf16.msra.mxu1 %v14979_v17  ;;  %v15116_v17 = vld [vmem:[%s15304_s12 + $0xa8] sm:$0xff]  }
 0x1e5   : > { %20939 = vst [vmem:[#allocation72_spill] sm:$0xff] %v16051_v61  ;;  %v1317_v34 = vpop.f32.mrf.mxu0  ;;  %12994 = vmatmul.mubr.bf16.gmra.mxu0 %v16048_v45  ;;  %v16069_v61 = vsel %vm1794_vm2, %v1832_v59, %v1834_v31  ;;  %13403 = vmatprep.subr.bf16.mxu1 %v20898_v20  ;;  %v1836_v59 = vrot.slane %v15116_v17, 1 }
 0x1e6   : > { %v1731_v23 = vpop.f32.mrf.mxu1  ;;  %13158 = vmatmul.mubr.bf16.gmra.mxu1 %v15115_v14  ;;  %12997 = vmatprep.mubr.msk.bf16.mxu0 %vm15194_vm0, %v20898_v20  ;;  %20941 = vst [vmem:[#allocation74_spill] sm:$0xff] %v16069_v61  ;;  %v14980_v14 = vld [vmem:[%s20633_s2 + $0x160] sm:$0xff]  }
 0x1e7   : > { %v16060_v52 = vadd.f32 %v1731_v23, %v1317_v34  ;;  %v12719_v44 = vpop.f32.mrf.mxu0  ;;  %13161 = vmatprep.mubr.msk.bf16.mxu1 %vm15194_vm0, %v20898_v20 }
 0x1e8   : > { %v12883_v32 = vpop.f32.mrf.mxu1  ;;  %13404 = vmatpush3.bf16.msra.mxu1 %v14980_v14 }
 0x1e9   : > { %20940 = vst [vmem:[#allocation73_spill] sm:$0xff] %v16060_v52  ;;  %v1320_v25 = vpop.f32.mrf.mxu0  ;;  %13405 = vmatprep.subr.bf16.mxu1 %v20898_v20 }
 0x1ea   : > { %v1734_v37 = vpop.f32.mrf.mxu1 }
 0x1eb   : > { %v16072_v34 = vadd.f32 %v1734_v37, %v1320_v25  ;;  %v12720_v23 = vpop.f32.mrf.mxu0  ;;  %v14982_v37 = vld [vmem:[%s20633_s2 + $0x158] sm:$0xff]  }
 0x1ec   : > { %v12884_v44 = vpop.f32.mrf.mxu1  ;;  %13406 = vmatpush3.bf16.msra.mxu1 %v14982_v37  ;;  %v15117_v37 = vld [vmem:[%s15304_s12 + $0xb0] sm:$0xff]  }
 0x1ed   : > { %20942 = vst [vmem:[#allocation75_spill] sm:$0xff] %v16072_v34  ;;  %v1325_v52 = vpop.f32.mrf.mxu0  ;;  %12998 = vmatmul.mubr.bf16.gmra.mxu0 %v16069_v61  ;;  %v16090_v34 = vsel %vm1794_vm2, %v1834_v31, %v1836_v59  ;;  %13407 = vmatprep.subr.bf16.mxu1 %v20898_v20  ;;  %v1838_v31 = vrot.slane %v15117_v37, 1 }
 0x1ee   : > { %v1739_v32 = vpop.f32.mrf.mxu1  ;;  %13162 = vmatmul.mubr.bf16.gmra.mxu1 %v15116_v17  ;;  %13001 = vmatprep.mubr.msk.bf16.mxu0 %vm15194_vm0, %v20898_v20  ;;  %20944 = vst [vmem:[#allocation77_spill] sm:$0xff] %v16090_v34  ;;  %v14983_v17 = vld [vmem:[%s20633_s2 + $0x150] sm:$0xff]  }
 0x1ef   : > { %v16081_v45 = vadd.f32 %v1739_v32, %v1325_v52  ;;  %v12723_v25 = vpop.f32.mrf.mxu0  ;;  %13165 = vmatprep.mubr.msk.bf16.mxu1 %vm15194_vm0, %v20898_v20 }
 0x1f0   : > { %v12887_v23 = vpop.f32.mrf.mxu1  ;;  %13408 = vmatpush3.bf16.msra.mxu1 %v14983_v17 }
 0x1f1   : > { %20943 = vst [vmem:[#allocation76_spill] sm:$0xff] %v16081_v45  ;;  %v1328_v14 = vpop.f32.mrf.mxu0  ;;  %13409 = vmatprep.subr.bf16.mxu1 %v20898_v20 }
 0x1f2   : > { %v1742_v44 = vpop.f32.mrf.mxu1 }
 0x1f3   : > { %v16093_v52 = vadd.f32 %v1742_v44, %v1328_v14  ;;  %v12724_v32 = vpop.f32.mrf.mxu0  ;;  %v14986_v44 = vld [vmem:[%s20633_s2 + $0x148] sm:$0xff]  }
 0x1f4   : > { %v12888_v25 = vpop.f32.mrf.mxu1  ;;  %13410 = vmatpush3.bf16.msra.mxu1 %v14986_v44  ;;  %v15118_v44 = vld [vmem:[%s15304_s12 + $0xb8] sm:$0xff]  }
 0x1f5   : > { %20945 = vst [vmem:[#allocation78_spill] sm:$0xff] %v16093_v52  ;;  %v1333_v45 = vpop.f32.mrf.mxu0  ;;  %13002 = vmatmul.mubr.bf16.gmra.mxu0 %v16090_v34  ;;  %v16111_v52 = vsel %vm1794_vm2, %v1836_v59, %v1838_v31  ;;  %13411 = vmatprep.subr.bf16.mxu1 %v20898_v20  ;;  %v1840_v59 = vrot.slane %v15118_v44, 1 }
 0x1f6   : > { %v1747_v23 = vpop.f32.mrf.mxu1  ;;  %13166 = vmatmul.mubr.bf16.gmra.mxu1 %v15117_v37  ;;  %13005 = vmatprep.mubr.msk.bf16.mxu0 %vm15194_vm0, %v20898_v20  ;;  %20947 = vst [vmem:[#allocation80_spill] sm:$0xff] %v16111_v52  ;;  %v14987_v37 = vld [vmem:[%s20633_s2 + $0x140] sm:$0xff]  }
 0x1f7   : > { %v16102_v61 = vadd.f32 %v1747_v23, %v1333_v45  ;;  %v12727_v14 = vpop.f32.mrf.mxu0  ;;  %13169 = vmatprep.mubr.msk.bf16.mxu1 %vm15194_vm0, %v20898_v20 }
 0x1f8   : > { %v12891_v32 = vpop.f32.mrf.mxu1  ;;  %13412 = vmatpush3.bf16.msra.mxu1 %v14987_v37  ;;  %v16129_v37 = vsel %vm1794_vm2, %v1838_v31, %v1840_v59 }
 0x1f9   : > { %20946 = vst [vmem:[#allocation79_spill] sm:$0xff] %v16102_v61  ;;  %v1336_v17 = vpop.f32.mrf.mxu0  ;;  %13725 = vmatprep.subr.bf16.mxu1 %v20898_v20  ;;  %20950 = vst [vmem:[#allocation83_spill] sm:$0xff] %v16129_v37 }
 0x1fa   : > { %v1750_v25 = vpop.f32.mrf.mxu1 }
 0x1fb   : > { %v16114_v45 = vadd.f32 %v1750_v25, %v1336_v17  ;;  %v12728_v23 = vpop.f32.mrf.mxu0 }
 0x1fc   : > { %v12892_v14 = vpop.f32.mrf.mxu1 }
 0x1fd   : > { %20948 = vst [vmem:[#allocation81_spill] sm:$0xff] %v16114_v45  ;;  %v1341_v61 = vpop.f32.mrf.mxu0  ;;  %13006 = vmatmul.mubr.bf16.gmra.mxu0 %v16111_v52 }
 0x1fe   : > { %v1755_v32 = vpop.f32.mrf.mxu1  ;;  %13170 = vmatmul.mubr.bf16.gmra.mxu1 %v15118_v44  ;;  %13009 = vmatprep.mubr.msk.bf16.mxu0 %vm15194_vm0, %v20898_v20 }
 0x1ff   : > { %v16123_v17 = vadd.f32 %v1755_v32, %v1341_v61  ;;  %v12731_v25 = vpop.f32.mrf.mxu0  ;;  %13173 = vmatprep.mubr.msk.bf16.mxu1 %vm15194_vm0, %v20898_v20  ;;  %v15119_v32 = vld [vmem:[%s15304_s12 + $0xc0] sm:$0xff]  }
 0x200   : > { %v12895_v23 = vpop.f32.mrf.mxu1  ;;  %v1842_v44 = vrot.slane %v15119_v32, 1 }
 0x201   : > { %20949 = vst [vmem:[#allocation82_spill] sm:$0xff] %v16123_v17  ;;  %v1344_v14 = vpop.f32.mrf.mxu0 }
 0x202   : > { %v1758_v45 = vpop.f32.mrf.mxu1 }
 0x203   : > { %v16131_v52 = vadd.f32 %v1758_v45, %v1344_v14  ;;  %v12732_v34 = vpop.f32.mrf.mxu0  ;;  %v16142_v45 = vsel %vm1794_vm2, %v1840_v59, %v1842_v44 }
 0x204   : > { %v12896_v19 = vpop.f32.mrf.mxu1  ;;  %20953 = vst [vmem:[#allocation86_spill] sm:$0xff] %v16142_v45 }
 0x205   : > { %20951 = vst [vmem:[#allocation84_spill] sm:$0xff] %v16131_v52  ;;  %v1349_v3 = vpop.f32.mrf.mxu0  ;;  %13010 = vmatmul.mubr.bf16.gmra.mxu0 %v16129_v37 }
 0x206   : > { %v1763_v61 = vpop.f32.mrf.mxu1  ;;  %13174 = vmatmul.mubr.bf16.gmra.mxu1 %v15119_v32  ;;  %13013 = vmatprep.mubr.msk.bf16.mxu0 %vm15194_vm0, %v20898_v20 }
 0x207   : > { %v16137_v25 = vadd.f32 %v1763_v61, %v1349_v3  ;;  %v12735_v23 = vpop.f32.mrf.mxu0  ;;  %13177 = vmatprep.mubr.msk.bf16.mxu1 %vm15194_vm0, %v20898_v20  ;;  %v15120_v3 = vld [vmem:[%s15304_s12 + $0xc8] sm:$0xff]  }
 0x208   : > { %v12899_v31 = vpop.f32.mrf.mxu1  ;;  %v1844_v61 = vrot.slane %v15120_v3, 1 }
 0x209   : > { %20952 = vst [vmem:[#allocation85_spill] sm:$0xff] %v16137_v25  ;;  %v1352_v34 = vpop.f32.mrf.mxu0 }
 0x20a   : > { %v1766_v19 = vpop.f32.mrf.mxu1 }
 0x20b   : > { %v16144_v14 = vadd.f32 %v1766_v19, %v1352_v34  ;;  %v12736_v52 = vpop.f32.mrf.mxu0  ;;  %v16155_v34 = vsel %vm1794_vm2, %v1842_v44, %v1844_v61 }
 0x20c   : > { %v12900_v17 = vpop.f32.mrf.mxu1  ;;  %20956 = vst [vmem:[#allocation89_spill] sm:$0xff] %v16155_v34 }
 0x20d   : > { %20954 = vst [vmem:[#allocation87_spill] sm:$0xff] %v16144_v14  ;;  %v1357_v37 = vpop.f32.mrf.mxu0  ;;  %13014 = vmatmul.mubr.bf16.gmra.mxu0 %v16142_v45 }
 0x20e   : > { %v1771_v32 = vpop.f32.mrf.mxu1  ;;  %13178 = vmatmul.mubr.bf16.gmra.mxu1 %v15120_v3  ;;  %13017 = vmatprep.mubr.msk.bf16.mxu0 %vm15194_vm0, %v20898_v20 }
 0x20f   : > { %v16150_v23 = vadd.f32 %v1771_v32, %v1357_v37  ;;  %v12739_v31 = vpop.f32.mrf.mxu0  ;;  %13181 = vmatprep.mubr.msk.bf16.mxu1 %vm15194_vm0, %v20898_v20  ;;  %v15121_v37 = vld [vmem:[%s15304_s12 + $0xd0] sm:$0xff]  }
 0x210   : > { %v12903_v59 = vpop.f32.mrf.mxu1  ;;  %v1846_v32 = vrot.slane %v15121_v37, 1 }
 0x211   : > { %20955 = vst [vmem:[#allocation88_spill] sm:$0xff] %v16150_v23  ;;  %v1360_v52 = vpop.f32.mrf.mxu0 }
 0x212   : > { %v1774_v17 = vpop.f32.mrf.mxu1 }
 0x213   : > { %v12740_v19 = vpop.f32.mrf.mxu0 }
 0x214   : > { %v12904_v14 = vpop.f32.mrf.mxu1 }
 0x215   : > { %v1987_v25 = vpop.f32.mrf.mxu0  ;;  %13018 = vmatmul.mubr.bf16.gmra.mxu0 %v16155_v34 }
 0x216   : > { %v2281_v45 = vadd.f32 %v1987_v25, %v15621_v30  ;;  %v2464_v3 = vpop.f32.mrf.mxu1  ;;  %13182 = vmatmul.mubr.bf16.gmra.mxu1 %v15121_v37  ;;  %13021 = vmatprep.mubr.msk.bf16.mxu0 %vm15194_vm0, %v20898_v20  ;;  %v16168_v30 = vsel %vm1794_vm2, %v1844_v61, %v1846_v32 }
 0x217   : > { %v12923_v31 = vpop.f32.mrf.mxu0  ;;  %13185 = vmatprep.mubr.msk.bf16.mxu1 %vm15194_vm0, %v20898_v20  ;;  %20957 = vst [vmem:[#allocation90_spill] sm:$0xff] %v16168_v30 }
 0x218   : > { %v16164_v44 = vadd.f32 %v2464_v3, %v2281_v45  ;;  %v13087_v14 = vpop.f32.mrf.mxu1  ;;  %v15122_v45 = vld [vmem:[%s15304_s12 + $0xd8] sm:$0xff]  }
 0x219   : > { %v1990_v59 = vpop.f32.mrf.mxu0 }
 0x21a   : > { %v2282_v52 = vadd.f32 %v1990_v59, %v15628_v41  ;;  %v2467_v17 = vpop.f32.mrf.mxu1  ;;  %v1848_v41 = vrot.slane %v15122_v45, 1 }
 0x21b   : > { %v12924_v25 = vpop.f32.mrf.mxu0 }
 0x21c   : > { %v16170_v19 = vadd.f32 %v2467_v17, %v2282_v52  ;;  %v13088_v23 = vpop.f32.mrf.mxu1 }
 0x21d   : > { %v1995_v37 = vpop.f32.mrf.mxu0  ;;  %13022 = vmatmul.mubr.bf16.gmra.mxu0 %v16168_v30 }
 0x21e   : > { %20958 = vst [vmem:[#allocation91_spill] sm:$0xff] %v16170_v19  ;;  %v2283_v31 = vadd.f32 %v1995_v37, %v15634_v54  ;;  %v2472_v34 = vpop.f32.mrf.mxu1  ;;  %13186 = vmatmul.mubr.bf16.gmra.mxu1 %v15122_v45  ;;  %13025 = vmatprep.mubr.msk.bf16.mxu0 %vm15194_vm0, %v20898_v20  ;;  %v16183_v54 = vsel %vm1794_vm2, %v1846_v32, %v1848_v41 }
 0x21f   : > { %v12927_v3 = vpop.f32.mrf.mxu0  ;;  %13189 = vmatprep.mubr.msk.bf16.mxu1 %vm15194_vm0, %v20898_v20  ;;  %20959 = vst [vmem:[#allocation92_spill] sm:$0xff] %v16183_v54 }
 0x220   : > { %v16179_v61 = vadd.f32 %v2472_v34, %v2283_v31  ;;  %v13091_v23 = vpop.f32.mrf.mxu1  ;;  %v15123_v34 = vld [vmem:[%s15304_s12 + $0xe0] sm:$0xff]  }
 0x221   : > { %v1998_v14 = vpop.f32.mrf.mxu0 }
 0x222   : > { %v2284_v59 = vadd.f32 %v1998_v14, %v15641_v5  ;;  %v2475_v52 = vpop.f32.mrf.mxu1  ;;  %v1850_v5 = vrot.slane %v15123_v34, 1 }
 0x223   : > { %v12928_v17 = vpop.f32.mrf.mxu0 }
 0x224   : > { %v16185_v25 = vadd.f32 %v2475_v52, %v2284_v59  ;;  %v13092_v37 = vpop.f32.mrf.mxu1 }
 0x225   : > { %v2003_v45 = vpop.f32.mrf.mxu0  ;;  %13026 = vmatmul.mubr.bf16.gmra.mxu0 %v16183_v54 }
 0x226   : > { %20960 = vst [vmem:[#allocation93_spill] sm:$0xff] %v16185_v25  ;;  %v2285_v3 = vadd.f32 %v2003_v45, %v15647_v21  ;;  %v2480_v19 = vpop.f32.mrf.mxu1  ;;  %13190 = vmatmul.mubr.bf16.gmra.mxu1 %v15123_v34  ;;  %13029 = vmatprep.mubr.msk.bf16.mxu0 %vm15194_vm0, %v20898_v20  ;;  %v16198_v21 = vsel %vm1794_vm2, %v1848_v41, %v1850_v5 }
 0x227   : > { %v12931_v31 = vpop.f32.mrf.mxu0  ;;  %13193 = vmatprep.mubr.msk.bf16.mxu1 %vm15194_vm0, %v20898_v20  ;;  %20961 = vst [vmem:[#allocation94_spill] sm:$0xff] %v16198_v21 }
 0x228   : > { %v16194_v32 = vadd.f32 %v2480_v19, %v2285_v3  ;;  %v13095_v23 = vpop.f32.mrf.mxu1  ;;  %v15124_v19 = vld [vmem:[%s15304_s12 + $0xe8] sm:$0xff]  }
 0x229   : > { %v2006_v14 = vpop.f32.mrf.mxu0 }
 0x22a   : > { %v2286_v59 = vadd.f32 %v2006_v14, %v15654_v33  ;;  %v2483_v52 = vpop.f32.mrf.mxu1  ;;  %v1852_v33 = vrot.slane %v15124_v19, 1 }
 0x22b   : > { %v12932_v17 = vpop.f32.mrf.mxu0 }
 0x22c   : > { %v16200_v37 = vadd.f32 %v2483_v52, %v2286_v59  ;;  %v13096_v45 = vpop.f32.mrf.mxu1 }
 0x22d   : > { %v2011_v34 = vpop.f32.mrf.mxu0  ;;  %13030 = vmatmul.mubr.bf16.gmra.mxu0 %v16198_v21 }
 0x22e   : > { %20962 = vst [vmem:[#allocation95_spill] sm:$0xff] %v16200_v37  ;;  %v2287_v31 = vadd.f32 %v2011_v34, %v15660_v48  ;;  %v2488_v25 = vpop.f32.mrf.mxu1  ;;  %13194 = vmatmul.mubr.bf16.gmra.mxu1 %v15124_v19  ;;  %13033 = vmatprep.mubr.msk.bf16.mxu0 %vm15194_vm0, %v20898_v20  ;;  %v16213_v48 = vsel %vm1794_vm2, %v1850_v5, %v1852_v33 }
 0x22f   : > { %v12935_v3 = vpop.f32.mrf.mxu0  ;;  %13197 = vmatprep.mubr.msk.bf16.mxu1 %vm15194_vm0, %v20898_v20  ;;  %20963 = vst [vmem:[#allocation96_spill] sm:$0xff] %v16213_v48 }
 0x230   : > { %v16209_v41 = vadd.f32 %v2488_v25, %v2287_v31  ;;  %v13099_v23 = vpop.f32.mrf.mxu1  ;;  %v15125_v25 = vld [vmem:[%s15304_s12 + $0xf0] sm:$0xff]  }
 0x231   : > { %v2014_v14 = vpop.f32.mrf.mxu0 }
 0x232   : > { %v2288_v59 = vadd.f32 %v2014_v14, %v15667_v0  ;;  %v2491_v52 = vpop.f32.mrf.mxu1  ;;  %v1854_v0 = vrot.slane %v15125_v25, 1 }
 0x233   : > { %v12936_v17 = vpop.f32.mrf.mxu0 }
 0x234   : > { %v16215_v45 = vadd.f32 %v2491_v52, %v2288_v59  ;;  %v13100_v34 = vpop.f32.mrf.mxu1 }
 0x235   : > { %v2019_v19 = vpop.f32.mrf.mxu0  ;;  %13034 = vmatmul.mubr.bf16.gmra.mxu0 %v16213_v48 }
 0x236   : > { %20964 = vst [vmem:[#allocation97_spill] sm:$0xff] %v16215_v45  ;;  %v2289_v3 = vadd.f32 %v2019_v19, %v15673_v22  ;;  %v2496_v37 = vpop.f32.mrf.mxu1  ;;  %13198 = vmatmul.mubr.bf16.gmra.mxu1 %v15125_v25  ;;  %13037 = vmatprep.mubr.msk.bf16.mxu0 %vm15194_vm0, %v20898_v20  ;;  %v16228_v22 = vsel %vm1794_vm2, %v1852_v33, %v1854_v0 }
 0x237   : > { %v12939_v31 = vpop.f32.mrf.mxu0  ;;  %13201 = vmatprep.mubr.msk.bf16.mxu1 %vm15194_vm0, %v20898_v20  ;;  %20965 = vst [vmem:[#allocation98_spill] sm:$0xff] %v16228_v22 }
 0x238   : > { %v16224_v5 = vadd.f32 %v2496_v37, %v2289_v3  ;;  %v13103_v23 = vpop.f32.mrf.mxu1  ;;  %v15126_v37 = vld [vmem:[%s15304_s12 + $0xf8] sm:$0xff]  }
 0x239   : > { %v2022_v14 = vpop.f32.mrf.mxu0 }
 0x23a   : > { %v2290_v59 = vadd.f32 %v2022_v14, %v15680_v36  ;;  %v2499_v52 = vpop.f32.mrf.mxu1  ;;  %v1856_v36 = vrot.slane %v15126_v37, 1 }
 0x23b   : > { %v12940_v17 = vpop.f32.mrf.mxu0 }
 0x23c   : > { %v16230_v34 = vadd.f32 %v2499_v52, %v2290_v59  ;;  %v13104_v19 = vpop.f32.mrf.mxu1 }
 0x23d   : > { %v2027_v25 = vpop.f32.mrf.mxu0  ;;  %13038 = vmatmul.mubr.bf16.gmra.mxu0 %v16228_v22 }
 0x23e   : > { %20966 = vst [vmem:[#allocation99_spill] sm:$0xff] %v16230_v34  ;;  %v2291_v31 = vadd.f32 %v2027_v25, %v15686_v58  ;;  %v2504_v45 = vpop.f32.mrf.mxu1  ;;  %13202 = vmatmul.mubr.bf16.gmra.mxu1 %v15126_v37  ;;  %13041 = vmatprep.mubr.msk.bf16.mxu0 %vm15194_vm0, %v20898_v20  ;;  %v16243_v58 = vsel %vm1794_vm2, %v1854_v0, %v1856_v36 }
 0x23f   : > { %v12943_v3 = vpop.f32.mrf.mxu0  ;;  %13205 = vmatprep.mubr.msk.bf16.mxu1 %vm15194_vm0, %v20898_v20  ;;  %20967 = vst [vmem:[#allocation100_spill] sm:$0xff] %v16243_v58 }
 0x240   : > { %v16239_v33 = vadd.f32 %v2504_v45, %v2291_v31  ;;  %v13107_v23 = vpop.f32.mrf.mxu1  ;;  %v15127_v45 = vld [vmem:[%s15304_s12 + $0x100] sm:$0xff]  }
 0x241   : > { %v2030_v14 = vpop.f32.mrf.mxu0 }
 0x242   : > { %v2292_v59 = vadd.f32 %v2030_v14, %v15693_v13  ;;  %v2507_v52 = vpop.f32.mrf.mxu1  ;;  %v1858_v13 = vrot.slane %v15127_v45, 1 }
 0x243   : > { %v12944_v17 = vpop.f32.mrf.mxu0 }
 0x244   : > { %v16245_v19 = vadd.f32 %v2507_v52, %v2292_v59  ;;  %v13108_v25 = vpop.f32.mrf.mxu1 }
 0x245   : > { %v2035_v37 = vpop.f32.mrf.mxu0  ;;  %13042 = vmatmul.mubr.bf16.gmra.mxu0 %v16243_v58 }
 0x246   : > { %20968 = vst [vmem:[#allocation101_spill] sm:$0xff] %v16245_v19  ;;  %v2293_v3 = vadd.f32 %v2035_v37, %v15699_v39  ;;  %v2512_v34 = vpop.f32.mrf.mxu1  ;;  %13206 = vmatmul.mubr.bf16.gmra.mxu1 %v15127_v45  ;;  %13045 = vmatprep.mubr.msk.bf16.mxu0 %vm15194_vm0, %v20898_v20  ;;  %v16258_v39 = vsel %vm1794_vm2, %v1856_v36, %v1858_v13 }
 0x247   : > { %v12947_v31 = vpop.f32.mrf.mxu0  ;;  %13209 = vmatprep.mubr.msk.bf16.mxu1 %vm15194_vm0, %v20898_v20  ;;  %20969 = vst [vmem:[#allocation102_spill] sm:$0xff] %v16258_v39 }
 0x248   : > { %v16254_v0 = vadd.f32 %v2512_v34, %v2293_v3  ;;  %v13111_v23 = vpop.f32.mrf.mxu1  ;;  %v15128_v34 = vld [vmem:[%s15304_s12 + $0x108] sm:$0xff]  }
 0x249   : > { %v2038_v14 = vpop.f32.mrf.mxu0 }
 0x24a   : > { %v2294_v59 = vadd.f32 %v2038_v14, %v15706_v4  ;;  %v2515_v52 = vpop.f32.mrf.mxu1  ;;  %v1860_v4 = vrot.slane %v15128_v34, 1 }
 0x24b   : > { %v12948_v17 = vpop.f32.mrf.mxu0 }
 0x24c   : > { %v16260_v25 = vadd.f32 %v2515_v52, %v2294_v59  ;;  %v13112_v37 = vpop.f32.mrf.mxu1 }
 0x24d   : > { %v2043_v45 = vpop.f32.mrf.mxu0  ;;  %13046 = vmatmul.mubr.bf16.gmra.mxu0 %v16258_v39 }
 0x24e   : > { %20970 = vst [vmem:[#allocation103_spill] sm:$0xff] %v16260_v25  ;;  %v2295_v31 = vadd.f32 %v2043_v45, %v15712_v27  ;;  %v2520_v19 = vpop.f32.mrf.mxu1  ;;  %13210 = vmatmul.mubr.bf16.gmra.mxu1 %v15128_v34  ;;  %13049 = vmatprep.mubr.msk.bf16.mxu0 %vm15194_vm0, %v20898_v20  ;;  %v16273_v27 = vsel %vm1794_vm2, %v1858_v13, %v1860_v4 }
 0x24f   : > { %v12951_v3 = vpop.f32.mrf.mxu0  ;;  %13213 = vmatprep.mubr.msk.bf16.mxu1 %vm15194_vm0, %v20898_v20  ;;  %20971 = vst [vmem:[#allocation104_spill] sm:$0xff] %v16273_v27 }
 0x250   : > { %v16269_v36 = vadd.f32 %v2520_v19, %v2295_v31  ;;  %v13115_v23 = vpop.f32.mrf.mxu1  ;;  %v15129_v19 = vld [vmem:[%s15304_s12 + $0x110] sm:$0xff]  }
 0x251   : > { %v2046_v14 = vpop.f32.mrf.mxu0 }
 0x252   : > { %v2296_v59 = vadd.f32 %v2046_v14, %v15719_v7  ;;  %v2523_v52 = vpop.f32.mrf.mxu1  ;;  %v1862_v7 = vrot.slane %v15129_v19, 1 }
 0x253   : > { %v12952_v17 = vpop.f32.mrf.mxu0 }
 0x254   : > { %v16275_v37 = vadd.f32 %v2523_v52, %v2296_v59  ;;  %v13116_v45 = vpop.f32.mrf.mxu1 }
 0x255   : > { %v2051_v34 = vpop.f32.mrf.mxu0  ;;  %13050 = vmatmul.mubr.bf16.gmra.mxu0 %v16273_v27 }
 0x256   : > { %20972 = vst [vmem:[#allocation105_spill] sm:$0xff] %v16275_v37  ;;  %v2297_v3 = vadd.f32 %v2051_v34, %v15725_v40  ;;  %v2528_v25 = vpop.f32.mrf.mxu1  ;;  %13214 = vmatmul.mubr.bf16.gmra.mxu1 %v15129_v19  ;;  %13053 = vmatprep.mubr.msk.bf16.mxu0 %vm15194_vm0, %v20898_v20  ;;  %v16288_v40 = vsel %vm1794_vm2, %v1860_v4, %v1862_v7 }
 0x257   : > { %v12955_v31 = vpop.f32.mrf.mxu0  ;;  %13217 = vmatprep.mubr.msk.bf16.mxu1 %vm15194_vm0, %v20898_v20  ;;  %20973 = vst [vmem:[#allocation106_spill] sm:$0xff] %v16288_v40 }
 0x258   : > { %v16284_v13 = vadd.f32 %v2528_v25, %v2297_v3  ;;  %v13119_v23 = vpop.f32.mrf.mxu1  ;;  %v15130_v25 = vld [vmem:[%s15304_s12 + $0x118] sm:$0xff]  }
 0x259   : > { %v2054_v14 = vpop.f32.mrf.mxu0 }
 0x25a   : > { %v2298_v59 = vadd.f32 %v2054_v14, %v15732_v8  ;;  %v2531_v52 = vpop.f32.mrf.mxu1  ;;  %v1864_v8 = vrot.slane %v15130_v25, 1 }
 0x25b   : > { %v12956_v17 = vpop.f32.mrf.mxu0 }
 0x25c   : > { %v16290_v45 = vadd.f32 %v2531_v52, %v2298_v59  ;;  %v13120_v34 = vpop.f32.mrf.mxu1 }
 0x25d   : > { %v2059_v19 = vpop.f32.mrf.mxu0  ;;  %13054 = vmatmul.mubr.bf16.gmra.mxu0 %v16288_v40 }
 0x25e   : > { %v2299_v31 = vadd.f32 %v2059_v19, %v15741_v60  ;;  %v2536_v37 = vpop.f32.mrf.mxu1  ;;  %13218 = vmatmul.mubr.bf16.gmra.mxu1 %v15130_v25  ;;  %13057 = vmatprep.mubr.msk.bf16.mxu0 %vm15194_vm0, %v20898_v20  ;;  %v16303_v60 = vsel %vm1794_vm2, %v1862_v7, %v1864_v8 }
 0x25f   : > { %v12959_v3 = vpop.f32.mrf.mxu0  ;;  %13221 = vmatprep.mubr.msk.bf16.mxu1 %vm15194_vm0, %v20898_v20  ;;  %20974 = vst [vmem:[#allocation107_spill] sm:$0xff] %v16303_v60 }
 0x260   : > { %v16299_v4 = vadd.f32 %v2536_v37, %v2299_v31  ;;  %v13123_v23 = vpop.f32.mrf.mxu1 }
 0x261   : > { %v2062_v14 = vpop.f32.mrf.mxu0 }
 0x262   : > { %v2300_v59 = vadd.f32 %v2062_v14, %v15749_v62  ;;  %v2539_v52 = vpop.f32.mrf.mxu1  ;;  %v16313_v62 = vrot.slane %v15739_v9, 1 }
 0x263   : > { %v12960_v17 = vpop.f32.mrf.mxu0 }
 0x264   : > { %v16305_v34 = vadd.f32 %v2539_v52, %v2300_v59  ;;  %v13124_v19 = vpop.f32.mrf.mxu1  ;;  %v16322_v52 = vsel %vm1794_vm2, %v1864_v8, %v16313_v62  ;;  %v14981_v17 = vld [vmem:[%s15304_s12 + $0x128] sm:$0xff]   ;;  %v430_v8 = vld [vmem:[%s15304_s12 + $0x130] sm:$0xf] }
 0x265   : > { %v2067_v25 = vpop.f32.mrf.mxu0  ;;  %13058 = vmatmul.mubr.bf16.gmra.mxu0 %v16303_v60  ;;  %20976 = vst [vmem:[#allocation109_spill] sm:$0xff] %v16322_v52 }
 0x266   : > { %v2301_v3 = vadd.f32 %v2067_v25, %v15754_v46  ;;  %v2544_v37 = vpop.f32.mrf.mxu1  ;;  %13222 = vmatmul.mubr.bf16.gmra.mxu1 %v15739_v9  ;;  %13061 = vmatprep.mubr.msk.bf16.mxu0 %vm15194_vm0, %v20898_v20 }
 0x267   : > { %v12963_v7 = vpop.f32.mrf.mxu0  ;;  %13225 = vmatprep.mubr.msk.bf16.mxu1 %vm15194_vm0, %v20898_v20 }
 0x268   : > { %v16317_v31 = vadd.f32 %v2544_v37, %v2301_v3  ;;  %v13127_v23 = vpop.f32.mrf.mxu1 }
 0x269   : > { %v2070_v14 = vpop.f32.mrf.mxu0 }
 0x26a   : > { %20975 = vst [vmem:[#allocation108_spill] sm:$0xff] %v16317_v31  ;;  %v2302_v46 = vadd.f32 %v2070_v14, %v15761_v18  ;;  %v2547_v59 = vpop.f32.mrf.mxu1 }
 0x26b   : > { %v12964_v19 = vpop.f32.mrf.mxu0 }
 0x26c   : > { %v16325_v25 = vadd.f32 %v2547_v59, %v2302_v46  ;;  %v13128_v7 = vpop.f32.mrf.mxu1 }
 0x26d   : > { %v2075_v9 = vpop.f32.mrf.mxu0  ;;  %13062 = vmatmul.mubr.bf16.gmra.mxu0 %v16322_v52  ;;  %v11106_v7 = vcombine.low %v430_v8, %v430_v8 }
 0x26e   : > { %20977 = vst [vmem:[#allocation110_spill] sm:$0xff] %v16325_v25  ;;  %v2303_v3 = vadd.f32 %v2075_v9, %v15767_v35  ;;  %v2552_v37 = vpop.f32.mrf.mxu1  ;;  %13226 = vmatmul.mubr.bf16.gmra.mxu1 %v14981_v17  ;;  %13065 = vmatprep.mubr.msk.bf16.mxu0 %vm15194_vm0, %v20898_v20 }
 0x26f   : > { %v12967_v18 = vpop.f32.mrf.mxu0  ;;  %13229 = vmatprep.mubr.msk.bf16.mxu1 %vm15194_vm0, %v20898_v20 }
 0x270   : > { %v16334_v23 = vadd.f32 %v2552_v37, %v2303_v3  ;;  %v13131_v14 = vpop.f32.mrf.mxu1 }
 0x271   : > { %v2078_v46 = vpop.f32.mrf.mxu0 }
 0x272   : > { %v2304_v59 = vadd.f32 %v2078_v46, %v15773_v53  ;;  %v2555_v19 = vpop.f32.mrf.mxu1 }
 0x273   : > { %v12968_v25 = vpop.f32.mrf.mxu0 }
 0x274   : > { %v16337_v9 = vadd.f32 %v2555_v19, %v2304_v59  ;;  %v13132_v35 = vpop.f32.mrf.mxu1 }
 0x275   : > { %v2083_v17 = vpop.f32.mrf.mxu0  ;;  %13066 = vmatmul.mubr.bf16.gmra.mxu0 %v16313_v62 }
 0x276   : > { %v2305_v18 = vadd.f32 %v2083_v17, %v15780_v29  ;;  %v2560_v31 = vpop.f32.mrf.mxu1  ;;  %13230 = vmatmul.mubr.bf16.gmra.mxu1 %v11106_v7  ;;  %13249 = vmatprep.mubr.msk.bf16.mxu0 %vm15194_vm0, %v20898_v20  ;;  %v14988_v29 = vld [vmem:[%s20633_s2 + $0x1b8] sm:$0xff]  }
 0x277   : > { %v12971_v3 = vpop.f32.mrf.mxu0  ;;  %13413 = vmatprep.mubr.msk.bf16.mxu1 %vm15194_vm0, %v20898_v20 }
 0x278   : > { %v16345_v53 = vadd.f32 %v2560_v31, %v2305_v18  ;;  %v13135_v25 = vpop.f32.mrf.mxu1 }
 0x279   : > { %v2086_v37 = vpop.f32.mrf.mxu0 }
 0x27a   : > { %v2306_v8 = vadd.f32 %v2086_v37, %v15788_v50  ;;  %v2563_v14 = vpop.f32.mrf.mxu1  ;;  %v14989_v50 = vld [vmem:[%s20633_s2 + $0x1b0] sm:$0xff]   ;;  %v14990_v37 = vld [vmem:[%s20633_s2 + $0x1a8] sm:$0xff]  }
 0x27b   : > { %v12972_v46 = vpop.f32.mrf.mxu0 }
 0x27c   : > { %v16351_v59 = vadd.f32 %v2563_v14, %v2306_v8  ;;  %v13136_v19 = vpop.f32.mrf.mxu1 }
 0x27d   : > { %v2091_v7 = vpop.f32.mrf.mxu0  ;;  %13250 = vmatmul.mubr.bf16.vlgmr.msra.gmra.mxu0 %v15368_v42 }
 0x27e   : > { %v2307_v35 = vadd.f32 %v2091_v7, %v15794_v56  ;;  %13562 = vmatpush3.bf16.msra.mxu0 %v14988_v29  ;;  %v2568_v31 = vpop.f32.mrf.mxu1  ;;  %13414 = vmatmul.mubr.bf16.vlgmr.msra.gmra.mxu1 %v15820_v11  ;;  %v14991_v7 = vld [vmem:[%s20633_s2 + $0x1a0] sm:$0xff]  }
 0x27f   : > { %v12975_v17 = vpop.f32.mrf.mxu0  ;;  %13253 = vmatprep.mubr.msk.bf16.mxu0 %vm15194_vm0, %v20898_v20  ;;  %13417 = vmatprep.mubr.msk.bf16.mxu1 %vm15194_vm0, %v20898_v20 }
 0x280   : > { %v16363_v18 = vadd.f32 %v2568_v31, %v2307_v35  ;;  %v13139_v42 = vpop.f32.mrf.mxu1  ;;  %13563 = vmatprep.subr.bf16.mxu0 %v20898_v20 }
 0x281   : > { %v2094_v56 = vpop.f32.mrf.mxu0 }
 0x282   : > { %v2308_v3 = vadd.f32 %v2094_v56, %v15802_v43  ;;  %v2571_v11 = vpop.f32.mrf.mxu1  ;;  %13564 = vmatpush3.bf16.msra.mxu0 %v14989_v50 }
 0x283   : > { %v12976_v25 = vpop.f32.mrf.mxu0  ;;  %13565 = vmatprep.subr.bf16.mxu0 %v20898_v20 }
 0x284   : > { %v16371_v8 = vadd.f32 %v2571_v11, %v2308_v3  ;;  %v13140_v14 = vpop.f32.mrf.mxu1 }
 0x285   : > { %v2099_v29 = vpop.f32.mrf.mxu0  ;;  %13254 = vmatmul.mubr.bf16.gmra.mxu0 %v15382_v51 }
 0x286   : > { %v2309_v46 = vadd.f32 %v2099_v29, %v15811_v28  ;;  %v2576_v19 = vpop.f32.mrf.mxu1  ;;  %13418 = vmatmul.mubr.bf16.gmra.mxu1 %v15834_v47  ;;  %13257 = vmatprep.mubr.msk.bf16.mxu0 %vm15194_vm0, %v20898_v20 }
 0x287   : > { %v12979_v43 = vpop.f32.mrf.mxu0  ;;  %13421 = vmatprep.mubr.msk.bf16.mxu1 %vm15194_vm0, %v20898_v20  ;;  %13566 = vmatpush3.bf16.msra.mxu0 %v14990_v37 }
 0x288   : > { %v16383_v35 = vadd.f32 %v2576_v19, %v2309_v46  ;;  %v13143_v51 = vpop.f32.mrf.mxu1  ;;  %13567 = vmatprep.subr.bf16.mxu0 %v20898_v20 }
 0x289   : > { %v2102_v28 = vpop.f32.mrf.mxu0 }
 0x28a   : > { %v2310_v47 = vadd.f32 %v2102_v28, %v15822_v16  ;;  %v2579_v31 = vpop.f32.mrf.mxu1 }
 0x28b   : > { %v12980_v50 = vpop.f32.mrf.mxu0  ;;  %13568 = vmatpush3.bf16.msra.mxu0 %v14991_v7 }
 0x28c   : > { %v16387_v17 = vadd.f32 %v2579_v31, %v2310_v47  ;;  %v13144_v42 = vpop.f32.mrf.mxu1  ;;  %13569 = vmatprep.subr.bf16.mxu0 %v20898_v20 }
 0x28d   : > { %v2107_v56 = vpop.f32.mrf.mxu0  ;;  %13258 = vmatmul.mubr.bf16.gmra.mxu0 %v15391_v57 }
 0x28e   : > { %v2311_v3 = vadd.f32 %v2107_v56, %v15829_v1  ;;  %v2584_v11 = vpop.f32.mrf.mxu1  ;;  %13422 = vmatmul.mubr.bf16.gmra.mxu1 %v15851_v24  ;;  %13261 = vmatprep.mubr.msk.bf16.mxu0 %vm15194_vm0, %v20898_v20  ;;  %v14992_v1 = vld [vmem:[%s20633_s2 + $0x198] sm:$0xff]   ;;  %v20995_v24 = vld [vmem:[#allocation47_spill] sm:$0xff] }
 0x28f   : > { %v12983_v16 = vpop.f32.mrf.mxu0  ;;  %13425 = vmatprep.mubr.msk.bf16.mxu1 %vm15194_vm0, %v20898_v20  ;;  %13570 = vmatpush3.bf16.msra.mxu0 %v14992_v1 }
 0x290   : > { %v16397_v25 = vadd.f32 %v2584_v11, %v2311_v3  ;;  %v13147_v37 = vpop.f32.mrf.mxu1  ;;  %13571 = vmatprep.subr.bf16.mxu0 %v20898_v20 }
 0x291   : > { %v2110_v14 = vpop.f32.mrf.mxu0 }
 0x292   : > { %v2312_v29 = vadd.f32 %v2110_v14, %v15836_v55  ;;  %v2587_v46 = vpop.f32.mrf.mxu1 }
 0x293   : > { %v12984_v19 = vpop.f32.mrf.mxu0 }
 0x294   : > { %v16403_v43 = vadd.f32 %v2587_v46, %v2312_v29  ;;  %v13148_v7 = vpop.f32.mrf.mxu1 }
 0x295   : > { %v2115_v51 = vpop.f32.mrf.mxu0  ;;  %13262 = vmatmul.mubr.bf16.gmra.mxu0 %v15400_v63 }
 0x296   : > { %v2313_v28 = vadd.f32 %v2115_v51, %v15845_v49  ;;  %v2592_v47 = vpop.f32.mrf.mxu1  ;;  %13426 = vmatmul.mubr.bf16.gmra.mxu1 %v15864_v2  ;;  %13265 = vmatprep.mubr.msk.bf16.mxu0 %vm15194_vm0, %v20898_v20  ;;  %v20989_v2 = vld [vmem:[#allocation44_spill] sm:$0xff] }
 0x297   : > { %v12987_v55 = vpop.f32.mrf.mxu0  ;;  %13429 = vmatprep.mubr.msk.bf16.mxu1 %vm15194_vm0, %v20898_v20 }
 0x298   : > { %v16413_v31 = vadd.f32 %v2592_v47, %v2313_v28  ;;  %v13151_v50 = vpop.f32.mrf.mxu1 }
 0x299   : > { %v2118_v42 = vpop.f32.mrf.mxu0  ;;  %v20978_v50 = vld [vmem:[#allocation34_spill] sm:$0xff] }
 0x29a   : > { %v2314_v56 = vadd.f32 %v2118_v42, %v15853_v15  ;;  %v2595_v3 = vpop.f32.mrf.mxu1 }
 0x29b   : > { %v12988_v11 = vpop.f32.mrf.mxu0 }
 0x29c   : > { %v16416_v16 = vadd.f32 %v2595_v3, %v2314_v56  ;;  %v13152_v49 = vpop.f32.mrf.mxu1  ;;  %v20979_v3 = vld [vmem:[#allocation38_spill] sm:$0xff] }
 0x29d   : > { %v2123_v37 = vpop.f32.mrf.mxu0  ;;  %13266 = vmatmul.mubr.bf16.gmra.mxu0 %v15409_v6 }
 0x29e   : > { %v2315_v14 = vadd.f32 %v2123_v37, %v15859_v38  ;;  %v2600_v29 = vpop.f32.mrf.mxu1  ;;  %13430 = vmatmul.mubr.bf16.gmra.mxu1 %v15877_v10  ;;  %13269 = vmatprep.mubr.msk.bf16.mxu0 %vm15194_vm0, %v20898_v20 }
 0x29f   : > { %v12991_v46 = vpop.f32.mrf.mxu0  ;;  %13433 = vmatprep.mubr.msk.bf16.mxu1 %vm15194_vm0, %v20898_v20 }
 0x2a0   : > { %v16425_v15 = vadd.f32 %v2600_v29, %v2315_v14  ;;  %v13155_v1 = vpop.f32.mrf.mxu1  ;;  %v20980_v14 = vld [vmem:[#allocation36_spill] sm:$0xff] }
 0x2a1   : > { %v2126_v19 = vpop.f32.mrf.mxu0 }
 0x2a2   : > { %v2316_v7 = vadd.f32 %v2126_v19, %v15866_v26  ;;  %v2603_v51 = vpop.f32.mrf.mxu1 }
 0x2a3   : > { %v12992_v28 = vpop.f32.mrf.mxu0 }
 0x2a4   : > { %v16428_v47 = vadd.f32 %v2603_v51, %v2316_v7  ;;  %v13156_v38 = vpop.f32.mrf.mxu1  ;;  %v20981_v28 = vld [vmem:[#allocation2_spill] sm:$0xff] }
 0x2a5   : > { %v2131_v55 = vpop.f32.mrf.mxu0  ;;  %13270 = vmatmul.mubr.bf16.gmra.mxu0 %v15418_v12  ;;  %v20982_v38 = vld [vmem:[#allocation37_spill] sm:$0xff] }
 0x2a6   : > { %v2317_v42 = vadd.f32 %v2131_v55, %v20978_v50  ;;  %v2608_v56 = vpop.f32.mrf.mxu1  ;;  %13434 = vmatmul.mubr.bf16.gmra.mxu1 %v20979_v3  ;;  %13273 = vmatprep.mubr.msk.bf16.mxu0 %vm15194_vm0, %v20898_v20  ;;  %v20988_v3 = vld [vmem:[#allocation40_spill] sm:$0xff] }
 0x2a7   : > { %v12995_v11 = vpop.f32.mrf.mxu0  ;;  %13437 = vmatprep.mubr.msk.bf16.mxu1 %vm15194_vm0, %v20898_v20 }
 0x2a8   : > { %v16437_v26 = vadd.f32 %v2608_v56, %v2317_v42  ;;  %v13159_v49 = vpop.f32.mrf.mxu1  ;;  %v20983_v11 = vld [vmem:[#allocation41_spill] sm:$0xff] }
 0x2a9   : > { %v2134_v37 = vpop.f32.mrf.mxu0 }
 0x2aa   : > { %v2318_v29 = vadd.f32 %v2134_v37, %v20980_v14  ;;  %v2611_v46 = vpop.f32.mrf.mxu1  ;;  %v20985_v14 = vld [vmem:[#allocation39_spill] sm:$0xff] }
 0x2ab   : > { %v12996_v1 = vpop.f32.mrf.mxu0 }
 0x2ac   : > { %v16440_v19 = vadd.f32 %v2611_v46, %v2318_v29  ;;  %v13160_v7 = vpop.f32.mrf.mxu1 }
 0x2ad   : > { %v2139_v51 = vpop.f32.mrf.mxu0  ;;  %13274 = vmatmul.mubr.bf16.gmra.mxu0 %v20981_v28 }
 0x2ae   : > { %v2319_v55 = vadd.f32 %v2139_v51, %v20982_v38  ;;  %v2616_v50 = vpop.f32.mrf.mxu1  ;;  %13438 = vmatmul.mubr.bf16.gmra.mxu1 %v20983_v11  ;;  %13277 = vmatprep.mubr.msk.bf16.mxu0 %vm15194_vm0, %v20898_v20  ;;  %v20987_v11 = vld [vmem:[#allocation3_spill] sm:$0xff] }
 0x2af   : > { %v12999_v42 = vpop.f32.mrf.mxu0  ;;  %13441 = vmatprep.mubr.msk.bf16.mxu1 %vm15194_vm0, %v20898_v20 }
 0x2b0   : > { %v16449_v56 = vadd.f32 %v2616_v50, %v2319_v55  ;;  %v13163_v49 = vpop.f32.mrf.mxu1 }
 0x2b1   : > { %v2142_v37 = vpop.f32.mrf.mxu0 }
 0x2b2   : > { %20984 = vst [vmem:[#allocation34_spill] sm:$0xff] %v16449_v56  ;;  %v2320_v29 = vadd.f32 %v2142_v37, %v20985_v14  ;;  %v2619_v46 = vpop.f32.mrf.mxu1  ;;  %v14993_v37 = vld [vmem:[%s20633_s2 + $0x190] sm:$0xff]   ;;  %v21001_v56 = vld [vmem:[#allocation50_spill] sm:$0xff] }
 0x2b3   : > { %v13000_v1 = vpop.f32.mrf.mxu0  ;;  %13572 = vmatpush3.bf16.msra.mxu0 %v14993_v37 }
 0x2b4   : > { %v16452_v7 = vadd.f32 %v2619_v46, %v2320_v29  ;;  %v13164_v51 = vpop.f32.mrf.mxu1  ;;  %v20991_v29 = vld [vmem:[#allocation42_spill] sm:$0xff]  ;;  %13573 = vmatprep.subr.bf16.mxu0 %v20898_v20 }
 0x2b5   : > { %v2147_v38 = vpop.f32.mrf.mxu0  ;;  %13278 = vmatmul.mubr.bf16.gmra.mxu0 %v20987_v11 }
 0x2b6   : > { %20986 = vst [vmem:[#allocation36_spill] sm:$0xff] %v16452_v7  ;;  %v2321_v10 = vadd.f32 %v2147_v38, %v20988_v3  ;;  %v2624_v42 = vpop.f32.mrf.mxu1  ;;  %13442 = vmatmul.mubr.bf16.gmra.mxu1 %v20989_v2  ;;  %13281 = vmatprep.mubr.msk.bf16.mxu0 %vm15194_vm0, %v20898_v20  ;;  %v20993_v2 = vld [vmem:[#allocation4_spill] sm:$0xff]  ;;  %v21000_v7 = vld [vmem:[#allocation46_spill] sm:$0xff] }
 0x2b7   : > { %v13003_v55 = vpop.f32.mrf.mxu0  ;;  %13445 = vmatprep.mubr.msk.bf16.mxu1 %vm15194_vm0, %v20898_v20 }
 0x2b8   : > { %v16461_v50 = vadd.f32 %v2624_v42, %v2321_v10  ;;  %v13167_v49 = vpop.f32.mrf.mxu1  ;;  %v20994_v10 = vld [vmem:[#allocation43_spill] sm:$0xff] }
 0x2b9   : > { %v2150_v14 = vpop.f32.mrf.mxu0 }
 0x2ba   : > { %20990 = vst [vmem:[#allocation2_spill] sm:$0xff] %v16461_v50  ;;  %v2322_v3 = vadd.f32 %v2150_v14, %v20991_v29  ;;  %v2627_v46 = vpop.f32.mrf.mxu1 }
 0x2bb   : > { %v13004_v1 = vpop.f32.mrf.mxu0 }
 0x2bc   : > { %v16468_v51 = vadd.f32 %v2627_v46, %v2322_v3  ;;  %v13168_v38 = vpop.f32.mrf.mxu1  ;;  %v20997_v46 = vld [vmem:[#allocation45_spill] sm:$0xff] }
 0x2bd   : > { %v2155_v55 = vpop.f32.mrf.mxu0  ;;  %13282 = vmatmul.mubr.bf16.gmra.mxu0 %v20993_v2 }
 0x2be   : > { %20992 = vst [vmem:[#allocation37_spill] sm:$0xff] %v16468_v51  ;;  %v2323_v42 = vadd.f32 %v2155_v55, %v20994_v10  ;;  %v2632_v49 = vpop.f32.mrf.mxu1  ;;  %13446 = vmatmul.mubr.bf16.gmra.mxu1 %v20995_v24  ;;  %13285 = vmatprep.mubr.msk.bf16.mxu0 %vm15194_vm0, %v20898_v20  ;;  %v20999_v24 = vld [vmem:[#allocation5_spill] sm:$0xff] }
 0x2bf   : > { %v13007_v14 = vpop.f32.mrf.mxu0  ;;  %13449 = vmatprep.mubr.msk.bf16.mxu1 %vm15194_vm0, %v20898_v20 }
 0x2c0   : > { %v16477_v37 = vadd.f32 %v2632_v49, %v2323_v42  ;;  %v13171_v29 = vpop.f32.mrf.mxu1 }
 0x2c1   : > { %v2158_v3 = vpop.f32.mrf.mxu0 }
 0x2c2   : > { %20996 = vst [vmem:[#allocation39_spill] sm:$0xff] %v16477_v37  ;;  %v2324_v1 = vadd.f32 %v2158_v3, %v20997_v46  ;;  %v2635_v38 = vpop.f32.mrf.mxu1  ;;  %v21003_v3 = vld [vmem:[#allocation48_spill] sm:$0xff] }
 0x2c3   : > { %v13008_v51 = vpop.f32.mrf.mxu0 }
 0x2c4   : > { %v16480_v50 = vadd.f32 %v2635_v38, %v2324_v1  ;;  %v13172_v55 = vpop.f32.mrf.mxu1 }
 0x2c5   : > { %v2163_v10 = vpop.f32.mrf.mxu0  ;;  %13286 = vmatmul.mubr.bf16.gmra.mxu0 %v20999_v24  ;;  %v21007_v24 = vld [vmem:[#allocation53_spill] sm:$0xff] }
 0x2c6   : > { %20998 = vst [vmem:[#allocation3_spill] sm:$0xff] %v16480_v50  ;;  %v2325_v2 = vadd.f32 %v2163_v10, %v21000_v7  ;;  %v2640_v14 = vpop.f32.mrf.mxu1  ;;  %13450 = vmatmul.mubr.bf16.gmra.mxu1 %v21001_v56  ;;  %13289 = vmatprep.mubr.msk.bf16.mxu0 %vm15194_vm0, %v20898_v20  ;;  %v21005_v56 = vld [vmem:[#allocation6_spill] sm:$0xff]  ;;  %v21006_v50 = vld [vmem:[#allocation49_spill] sm:$0xff] }
 0x2c7   : > { %v13011_v42 = vpop.f32.mrf.mxu0  ;;  %13453 = vmatprep.mubr.msk.bf16.mxu1 %vm15194_vm0, %v20898_v20 }
 0x2c8   : > { %v16489_v49 = vadd.f32 %v2640_v14, %v2325_v2  ;;  %v13175_v51 = vpop.f32.mrf.mxu1 }
 0x2c9   : > { %v2166_v29 = vpop.f32.mrf.mxu0 }
 0x2ca   : > { %21002 = vst [vmem:[#allocation40_spill] sm:$0xff] %v16489_v49  ;;  %v2326_v46 = vadd.f32 %v2166_v29, %v21003_v3  ;;  %v2643_v1 = vpop.f32.mrf.mxu1  ;;  %v21009_v3 = vld [vmem:[#allocation51_spill] sm:$0xff] }
 0x2cb   : > { %v13012_v38 = vpop.f32.mrf.mxu0 }
 0x2cc   : > { %v16492_v55 = vadd.f32 %v2643_v1, %v2326_v46  ;;  %v13176_v7 = vpop.f32.mrf.mxu1 }
 0x2cd   : > { %v2171_v10 = vpop.f32.mrf.mxu0  ;;  %13290 = vmatmul.mubr.bf16.gmra.mxu0 %v21005_v56  ;;  %v21013_v56 = vld [vmem:[#allocation56_spill] sm:$0xff] }
 0x2ce   : > { %21004 = vst [vmem:[#allocation42_spill] sm:$0xff] %v16492_v55  ;;  %v2327_v37 = vadd.f32 %v2171_v10, %v21006_v50  ;;  %v2648_v42 = vpop.f32.mrf.mxu1  ;;  %13454 = vmatmul.mubr.bf16.gmra.mxu1 %v21007_v24  ;;  %13293 = vmatprep.mubr.msk.bf16.mxu0 %vm15194_vm0, %v20898_v20  ;;  %v21011_v24 = vld [vmem:[#allocation7_spill] sm:$0xff]  ;;  %v21012_v55 = vld [vmem:[#allocation52_spill] sm:$0xff] }
 0x2cf   : > { %v13015_v2 = vpop.f32.mrf.mxu0  ;;  %13457 = vmatprep.mubr.msk.bf16.mxu1 %vm15194_vm0, %v20898_v20 }
 0x2d0   : > { %v16501_v14 = vadd.f32 %v2648_v42, %v2327_v37  ;;  %v13179_v51 = vpop.f32.mrf.mxu1 }
 0x2d1   : > { %v2174_v29 = vpop.f32.mrf.mxu0 }
 0x2d2   : > { %21008 = vst [vmem:[#allocation43_spill] sm:$0xff] %v16501_v14  ;;  %v2328_v46 = vadd.f32 %v2174_v29, %v21009_v3  ;;  %v2651_v1 = vpop.f32.mrf.mxu1  ;;  %v21015_v3 = vld [vmem:[#allocation54_spill] sm:$0xff] }
 0x2d3   : > { %v13016_v38 = vpop.f32.mrf.mxu0 }
 0x2d4   : > { %v16504_v7 = vadd.f32 %v2651_v1, %v2328_v46  ;;  %v13180_v50 = vpop.f32.mrf.mxu1 }
 0x2d5   : > { %v2179_v10 = vpop.f32.mrf.mxu0  ;;  %13294 = vmatmul.mubr.bf16.gmra.mxu0 %v21011_v24 }
 0x2d6   : > { %21010 = vst [vmem:[#allocation45_spill] sm:$0xff] %v16504_v7  ;;  %v2329_v49 = vadd.f32 %v2179_v10, %v21012_v55  ;;  %v2656_v2 = vpop.f32.mrf.mxu1  ;;  %13458 = vmatmul.mubr.bf16.gmra.mxu1 %v21013_v56  ;;  %13297 = vmatprep.mubr.msk.bf16.mxu0 %vm15194_vm0, %v20898_v20  ;;  %v14994_v10 = vld [vmem:[%s20633_s2 + $0x188] sm:$0xff]  }
 0x2d7   : > { %v13019_v37 = vpop.f32.mrf.mxu0  ;;  %13461 = vmatprep.mubr.msk.bf16.mxu1 %vm15194_vm0, %v20898_v20  ;;  %v21018_v7 = vld [vmem:[#allocation55_spill] sm:$0xff]  ;;  %13574 = vmatpush3.bf16.msra.mxu0 %v14994_v10  ;;  %v21025_v10 = vld [vmem:[#allocation62_spill] sm:$0xff] }
 0x2d8   : > { %v16513_v42 = vadd.f32 %v2656_v2, %v2329_v49  ;;  %v13183_v51 = vpop.f32.mrf.mxu1  ;;  %v21017_v37 = vld [vmem:[#allocation8_spill] sm:$0xff]  ;;  %v21019_v2 = vld [vmem:[#allocation59_spill] sm:$0xff]  ;;  %13575 = vmatprep.subr.bf16.mxu0 %v20898_v20 }
 0x2d9   : > { %v2182_v29 = vpop.f32.mrf.mxu0 }
 0x2da   : > { %21014 = vst [vmem:[#allocation46_spill] sm:$0xff] %v16513_v42  ;;  %v2330_v46 = vadd.f32 %v2182_v29, %v21015_v3  ;;  %v2659_v1 = vpop.f32.mrf.mxu1  ;;  %v21023_v42 = vld [vmem:[#allocation9_spill] sm:$0xff] }
 0x2db   : > { %v13020_v38 = vpop.f32.mrf.mxu0 }
 0x2dc   : > { %v16516_v50 = vadd.f32 %v2659_v1, %v2330_v46  ;;  %v13184_v55 = vpop.f32.mrf.mxu1  ;;  %v21021_v1 = vld [vmem:[#allocation57_spill] sm:$0xff] }
 0x2dd   : > { %v2187_v56 = vpop.f32.mrf.mxu0  ;;  %13298 = vmatmul.mubr.bf16.gmra.mxu0 %v21017_v37 }
 0x2de   : > { %21016 = vst [vmem:[#allocation48_spill] sm:$0xff] %v16516_v50  ;;  %v2331_v14 = vadd.f32 %v2187_v56, %v21018_v7  ;;  %v2664_v49 = vpop.f32.mrf.mxu1  ;;  %13462 = vmatmul.mubr.bf16.gmra.mxu1 %v21019_v2  ;;  %13301 = vmatprep.mubr.msk.bf16.mxu0 %vm15194_vm0, %v20898_v20 }
 0x2df   : > { %v13023_v51 = vpop.f32.mrf.mxu0  ;;  %13465 = vmatprep.mubr.msk.bf16.mxu1 %vm15194_vm0, %v20898_v20 }
 0x2e0   : > { %v16528_v29 = vadd.f32 %v2664_v49, %v2331_v14  ;;  %v13187_v3 = vpop.f32.mrf.mxu1  ;;  %v21024_v51 = vld [vmem:[#allocation58_spill] sm:$0xff] }
 0x2e1   : > { %v2190_v46 = vpop.f32.mrf.mxu0 }
 0x2e2   : > { %21020 = vst [vmem:[#allocation49_spill] sm:$0xff] %v16528_v29  ;;  %v2332_v38 = vadd.f32 %v2190_v46, %v21021_v1  ;;  %v2667_v56 = vpop.f32.mrf.mxu1 }
 0x2e3   : > { %v13024_v7 = vpop.f32.mrf.mxu0 }
 0x2e4   : > { %v16532_v55 = vadd.f32 %v2667_v56, %v2332_v38  ;;  %v13188_v2 = vpop.f32.mrf.mxu1 }
 0x2e5   : > { %v2195_v50 = vpop.f32.mrf.mxu0  ;;  %13302 = vmatmul.mubr.bf16.gmra.mxu0 %v21023_v42  ;;  %v21027_v2 = vld [vmem:[#allocation60_spill] sm:$0xff]  ;;  %v21031_v42 = vld [vmem:[#allocation65_spill] sm:$0xff] }
 0x2e6   : > { %21022 = vst [vmem:[#allocation51_spill] sm:$0xff] %v16532_v55  ;;  %v2333_v37 = vadd.f32 %v2195_v50, %v21024_v51  ;;  %v2672_v24 = vpop.f32.mrf.mxu1  ;;  %13466 = vmatmul.mubr.bf16.gmra.mxu1 %v21025_v10  ;;  %13305 = vmatprep.mubr.msk.bf16.mxu0 %vm15194_vm0, %v20898_v20  ;;  %v21029_v10 = vld [vmem:[#allocation10_spill] sm:$0xff]  ;;  %v21030_v55 = vld [vmem:[#allocation61_spill] sm:$0xff] }
 0x2e7   : > { %v13027_v14 = vpop.f32.mrf.mxu0  ;;  %13469 = vmatprep.mubr.msk.bf16.mxu1 %vm15194_vm0, %v20898_v20 }
 0x2e8   : > { %v16541_v49 = vadd.f32 %v2672_v24, %v2333_v37  ;;  %v13191_v3 = vpop.f32.mrf.mxu1 }
 0x2e9   : > { %v2198_v46 = vpop.f32.mrf.mxu0 }
 0x2ea   : > { %21026 = vst [vmem:[#allocation52_spill] sm:$0xff] %v16541_v49  ;;  %v2334_v1 = vadd.f32 %v2198_v46, %v21027_v2  ;;  %v2675_v38 = vpop.f32.mrf.mxu1  ;;  %v21033_v2 = vld [vmem:[#allocation63_spill] sm:$0xff] }
 0x2eb   : > { %v13028_v56 = vpop.f32.mrf.mxu0 }
 0x2ec   : > { %v16544_v7 = vadd.f32 %v2675_v38, %v2334_v1  ;;  %v13192_v50 = vpop.f32.mrf.mxu1 }
 0x2ed   : > { %v2203_v51 = vpop.f32.mrf.mxu0  ;;  %13306 = vmatmul.mubr.bf16.gmra.mxu0 %v21029_v10  ;;  %v21037_v10 = vld [vmem:[#allocation68_spill] sm:$0xff] }
 0x2ee   : > { %21028 = vst [vmem:[#allocation54_spill] sm:$0xff] %v16544_v7  ;;  %v2335_v29 = vadd.f32 %v2203_v51, %v21030_v55  ;;  %v2680_v14 = vpop.f32.mrf.mxu1  ;;  %13470 = vmatmul.mubr.bf16.gmra.mxu1 %v21031_v42  ;;  %13309 = vmatprep.mubr.msk.bf16.mxu0 %vm15194_vm0, %v20898_v20  ;;  %v21035_v42 = vld [vmem:[#allocation11_spill] sm:$0xff]  ;;  %v21036_v7 = vld [vmem:[#allocation64_spill] sm:$0xff] }
 0x2ef   : > { %v13031_v24 = vpop.f32.mrf.mxu0  ;;  %13473 = vmatprep.mubr.msk.bf16.mxu1 %vm15194_vm0, %v20898_v20 }
 0x2f0   : > { %v16553_v37 = vadd.f32 %v2680_v14, %v2335_v29  ;;  %v13195_v3 = vpop.f32.mrf.mxu1 }
 0x2f1   : > { %v2206_v46 = vpop.f32.mrf.mxu0 }
 0x2f2   : > { %21032 = vst [vmem:[#allocation55_spill] sm:$0xff] %v16553_v37  ;;  %v2336_v1 = vadd.f32 %v2206_v46, %v21033_v2  ;;  %v2683_v38 = vpop.f32.mrf.mxu1  ;;  %v21039_v2 = vld [vmem:[#allocation66_spill] sm:$0xff] }
 0x2f3   : > { %v13032_v56 = vpop.f32.mrf.mxu0 }
 0x2f4   : > { %v16556_v50 = vadd.f32 %v2683_v38, %v2336_v1  ;;  %v13196_v55 = vpop.f32.mrf.mxu1 }
 0x2f5   : > { %v2211_v51 = vpop.f32.mrf.mxu0  ;;  %13310 = vmatmul.mubr.bf16.gmra.mxu0 %v21035_v42  ;;  %v21043_v42 = vld [vmem:[#allocation71_spill] sm:$0xff] }
 0x2f6   : > { %21034 = vst [vmem:[#allocation57_spill] sm:$0xff] %v16556_v50  ;;  %v2337_v49 = vadd.f32 %v2211_v51, %v21036_v7  ;;  %v2688_v24 = vpop.f32.mrf.mxu1  ;;  %13474 = vmatmul.mubr.bf16.gmra.mxu1 %v21037_v10  ;;  %13313 = vmatprep.mubr.msk.bf16.mxu0 %vm15194_vm0, %v20898_v20  ;;  %v21041_v10 = vld [vmem:[#allocation12_spill] sm:$0xff]  ;;  %v21042_v50 = vld [vmem:[#allocation67_spill] sm:$0xff] }
 0x2f7   : > { %v13035_v29 = vpop.f32.mrf.mxu0  ;;  %13477 = vmatprep.mubr.msk.bf16.mxu1 %vm15194_vm0, %v20898_v20 }
 0x2f8   : > { %v16565_v14 = vadd.f32 %v2688_v24, %v2337_v49  ;;  %v13199_v3 = vpop.f32.mrf.mxu1 }
 0x2f9   : > { %v2214_v46 = vpop.f32.mrf.mxu0 }
 0x2fa   : > { %21038 = vst [vmem:[#allocation58_spill] sm:$0xff] %v16565_v14  ;;  %v2338_v1 = vadd.f32 %v2214_v46, %v21039_v2  ;;  %v2691_v38 = vpop.f32.mrf.mxu1  ;;  %v21045_v2 = vld [vmem:[#allocation69_spill] sm:$0xff] }
 0x2fb   : > { %v13036_v56 = vpop.f32.mrf.mxu0 }
 0x2fc   : > { %v16568_v55 = vadd.f32 %v2691_v38, %v2338_v1  ;;  %v13200_v7 = vpop.f32.mrf.mxu1 }
 0x2fd   : > { %v2219_v51 = vpop.f32.mrf.mxu0  ;;  %13314 = vmatmul.mubr.bf16.gmra.mxu0 %v21041_v10  ;;  %v21079_v10 = vld [vmem:[#allocation89_spill] sm:$0xff] }
 0x2fe   : > { %21040 = vst [vmem:[#allocation60_spill] sm:$0xff] %v16568_v55  ;;  %v2339_v37 = vadd.f32 %v2219_v51, %v21042_v50  ;;  %v2696_v29 = vpop.f32.mrf.mxu1  ;;  %13478 = vmatmul.mubr.bf16.gmra.mxu1 %v21043_v42  ;;  %13317 = vmatprep.mubr.msk.bf16.mxu0 %vm15194_vm0, %v20898_v20  ;;  %v14995_v50 = vld [vmem:[%s20633_s2 + $0x180] sm:$0xff]   ;;  %v21047_v42 = vld [vmem:[#allocation13_spill] sm:$0xff] }
 0x2ff   : > { %v13039_v49 = vpop.f32.mrf.mxu0  ;;  %13481 = vmatprep.mubr.msk.bf16.mxu1 %vm15194_vm0, %v20898_v20  ;;  %13576 = vmatpush3.bf16.msra.mxu0 %v14995_v50 }
 0x300   : > { %v16577_v24 = vadd.f32 %v2696_v29, %v2339_v37  ;;  %v13203_v3 = vpop.f32.mrf.mxu1  ;;  %13889 = vmatprep.subr.bf16.mxu0 %v20898_v20  ;;  %v21048_v37 = vld [vmem:[#allocation70_spill] sm:$0xff] }
 0x301   : > { %v2222_v46 = vpop.f32.mrf.mxu0 }
 0x302   : > { %21044 = vst [vmem:[#allocation61_spill] sm:$0xff] %v16577_v24  ;;  %v2340_v1 = vadd.f32 %v2222_v46, %v21045_v2  ;;  %v2699_v38 = vpop.f32.mrf.mxu1  ;;  %v21049_v24 = vld [vmem:[#allocation74_spill] sm:$0xff]  ;;  %v14996_v2 = vld [vmem:[%s20633_s2 + $0x1f8] sm:$0xff]  }
 0x303   : > { %v13040_v56 = vpop.f32.mrf.mxu0  ;;  %13726 = vmatpush3.bf16.msra.mxu1 %v14996_v2 }
 0x304   : > { %v16583_v7 = vadd.f32 %v2699_v38, %v2340_v1  ;;  %v13204_v51 = vpop.f32.mrf.mxu1  ;;  %v21051_v56 = vld [vmem:[#allocation72_spill] sm:$0xff]  ;;  %13727 = vmatprep.subr.bf16.mxu1 %v20898_v20 }
 0x305   : > { %v2227_v49 = vpop.f32.mrf.mxu0  ;;  %13318 = vmatmul.mubr.bf16.gmra.mxu0 %v21047_v42  ;;  %v21053_v42 = vld [vmem:[#allocation14_spill] sm:$0xff] }
 0x306   : > { %21046 = vst [vmem:[#allocation63_spill] sm:$0xff] %v16583_v7  ;;  %v2341_v29 = vadd.f32 %v2227_v49, %v21048_v37  ;;  %v2704_v3 = vpop.f32.mrf.mxu1  ;;  %13482 = vmatmul.mubr.bf16.gmra.mxu1 %v21049_v24  ;;  %13321 = vmatprep.mubr.msk.bf16.mxu0 %vm15194_vm0, %v20898_v20 }
 0x307   : > { %v13043_v46 = vpop.f32.mrf.mxu0  ;;  %13485 = vmatprep.mubr.msk.bf16.mxu1 %vm15194_vm0, %v20898_v20 }
 0x308   : > { %v16596_v1 = vadd.f32 %v2704_v3, %v2341_v29  ;;  %v13207_v38 = vpop.f32.mrf.mxu1  ;;  %v14997_v46 = vld [vmem:[%s20633_s2 + $0x1f0] sm:$0xff]   ;;  %v21054_v29 = vld [vmem:[#allocation73_spill] sm:$0xff] }
 0x309   : > { %v2230_v50 = vpop.f32.mrf.mxu0  ;;  %13728 = vmatpush3.bf16.msra.mxu1 %v14997_v46  ;;  %v21055_v38 = vld [vmem:[#allocation77_spill] sm:$0xff] }
 0x30a   : > { %21050 = vst [vmem:[#allocation64_spill] sm:$0xff] %v16596_v1  ;;  %v2342_v51 = vadd.f32 %v2230_v50, %v21051_v56  ;;  %v2707_v49 = vpop.f32.mrf.mxu1  ;;  %13729 = vmatprep.subr.bf16.mxu1 %v20898_v20 }
 0x30b   : > { %v13044_v37 = vpop.f32.mrf.mxu0 }
 0x30c   : > { %v16603_v24 = vadd.f32 %v2707_v49, %v2342_v51  ;;  %v13208_v7 = vpop.f32.mrf.mxu1  ;;  %v21057_v49 = vld [vmem:[#allocation75_spill] sm:$0xff] }
 0x30d   : > { %v2235_v55 = vpop.f32.mrf.mxu0  ;;  %13322 = vmatmul.mubr.bf16.gmra.mxu0 %v21053_v42  ;;  %v14998_v7 = vld [vmem:[%s20633_s2 + $0x1e8] sm:$0xff]  }
 0x30e   : > { %21052 = vst [vmem:[#allocation66_spill] sm:$0xff] %v16603_v24  ;;  %v2343_v3 = vadd.f32 %v2235_v55, %v21054_v29  ;;  %v2712_v2 = vpop.f32.mrf.mxu1  ;;  %13486 = vmatmul.mubr.bf16.gmra.mxu1 %v21055_v38  ;;  %13325 = vmatprep.mubr.msk.bf16.mxu0 %vm15194_vm0, %v20898_v20  ;;  %v21059_v42 = vld [vmem:[#allocation15_spill] sm:$0xff] }
 0x30f   : > { %v13047_v50 = vpop.f32.mrf.mxu0  ;;  %13489 = vmatprep.mubr.msk.bf16.mxu1 %vm15194_vm0, %v20898_v20  ;;  %13730 = vmatpush3.bf16.msra.mxu1 %v14998_v7 }
 0x310   : > { %v16616_v56 = vadd.f32 %v2712_v2, %v2343_v3  ;;  %v13211_v51 = vpop.f32.mrf.mxu1  ;;  %13731 = vmatprep.subr.bf16.mxu1 %v20898_v20  ;;  %v14999_v50 = vld [vmem:[%s20633_s2 + $0x1e0] sm:$0xff]   ;;  %v21060_v3 = vld [vmem:[#allocation76_spill] sm:$0xff] }
 0x311   : > { %v2238_v55 = vpop.f32.mrf.mxu0  ;;  %v21061_v51 = vld [vmem:[#allocation80_spill] sm:$0xff] }
 0x312   : > { %21056 = vst [vmem:[#allocation67_spill] sm:$0xff] %v16616_v56  ;;  %v2344_v37 = vadd.f32 %v2238_v55, %v21057_v49  ;;  %v2715_v46 = vpop.f32.mrf.mxu1 }
 0x313   : > { %v13048_v29 = vpop.f32.mrf.mxu0  ;;  %13732 = vmatpush3.bf16.msra.mxu1 %v14999_v50 }
 0x314   : > { %v16623_v38 = vadd.f32 %v2715_v46, %v2344_v37  ;;  %v13212_v24 = vpop.f32.mrf.mxu1  ;;  %13733 = vmatprep.subr.bf16.mxu1 %v20898_v20  ;;  %v21063_v46 = vld [vmem:[#allocation78_spill] sm:$0xff] }
 0x315   : > { %v2243_v1 = vpop.f32.mrf.mxu0  ;;  %13326 = vmatmul.mubr.bf16.gmra.mxu0 %v21059_v42  ;;  %v15000_v24 = vld [vmem:[%s20633_s2 + $0x1d8] sm:$0xff]   ;;  %v21065_v42 = vld [vmem:[#allocation16_spill] sm:$0xff] }
 0x316   : > { %21058 = vst [vmem:[#allocation69_spill] sm:$0xff] %v16623_v38  ;;  %v2345_v2 = vadd.f32 %v2243_v1, %v21060_v3  ;;  %v2720_v7 = vpop.f32.mrf.mxu1  ;;  %13490 = vmatmul.mubr.bf16.gmra.mxu1 %v21061_v51  ;;  %13329 = vmatprep.mubr.msk.bf16.mxu0 %vm15194_vm0, %v20898_v20 }
 0x317   : > { %v13051_v55 = vpop.f32.mrf.mxu0  ;;  %13493 = vmatprep.mubr.msk.bf16.mxu1 %vm15194_vm0, %v20898_v20  ;;  %13734 = vmatpush3.bf16.msra.mxu1 %v15000_v24 }
 0x318   : > { %v16636_v49 = vadd.f32 %v2720_v7, %v2345_v2  ;;  %v13215_v37 = vpop.f32.mrf.mxu1  ;;  %13735 = vmatprep.subr.bf16.mxu1 %v20898_v20  ;;  %v15001_v55 = vld [vmem:[%s20633_s2 + $0x1d0] sm:$0xff]   ;;  %v21066_v2 = vld [vmem:[#allocation79_spill] sm:$0xff] }
 0x319   : > { %v2246_v1 = vpop.f32.mrf.mxu0  ;;  %v21067_v37 = vld [vmem:[#allocation83_spill] sm:$0xff] }
 0x31a   : > { %21062 = vst [vmem:[#allocation70_spill] sm:$0xff] %v16636_v49  ;;  %v2346_v29 = vadd.f32 %v2246_v1, %v21063_v46  ;;  %v2723_v50 = vpop.f32.mrf.mxu1 }
 0x31b   : > { %v13052_v3 = vpop.f32.mrf.mxu0  ;;  %13736 = vmatpush3.bf16.msra.mxu1 %v15001_v55 }
 0x31c   : > { %v16643_v51 = vadd.f32 %v2723_v50, %v2346_v29  ;;  %v13216_v38 = vpop.f32.mrf.mxu1  ;;  %13737 = vmatprep.subr.bf16.mxu1 %v20898_v20  ;;  %v21069_v50 = vld [vmem:[#allocation81_spill] sm:$0xff] }
 0x31d   : > { %v2251_v56 = vpop.f32.mrf.mxu0  ;;  %13330 = vmatmul.mubr.bf16.gmra.mxu0 %v21065_v42  ;;  %v15002_v38 = vld [vmem:[%s20633_s2 + $0x1c8] sm:$0xff]   ;;  %v21071_v42 = vld [vmem:[#allocation17_spill] sm:$0xff] }
 0x31e   : > { %21064 = vst [vmem:[#allocation72_spill] sm:$0xff] %v16643_v51  ;;  %v2347_v7 = vadd.f32 %v2251_v56, %v21066_v2  ;;  %v2728_v24 = vpop.f32.mrf.mxu1  ;;  %13494 = vmatmul.mubr.bf16.gmra.mxu1 %v21067_v37  ;;  %13333 = vmatprep.mubr.msk.bf16.mxu0 %vm15194_vm0, %v20898_v20 }
 0x31f   : > { %v13055_v1 = vpop.f32.mrf.mxu0  ;;  %13497 = vmatprep.mubr.msk.bf16.mxu1 %vm15194_vm0, %v20898_v20  ;;  %13738 = vmatpush3.bf16.msra.mxu1 %v15002_v38 }
 0x320   : > { %v16656_v46 = vadd.f32 %v2728_v24, %v2347_v7  ;;  %v13219_v29 = vpop.f32.mrf.mxu1  ;;  %13739 = vmatprep.subr.bf16.mxu1 %v20898_v20  ;;  %v15003_v1 = vld [vmem:[%s20633_s2 + $0x1c0] sm:$0xff]  }
 0x321   : > { %v2254_v56 = vpop.f32.mrf.mxu0  ;;  %v21072_v7 = vld [vmem:[#allocation82_spill] sm:$0xff] }
 0x322   : > { %21068 = vst [vmem:[#allocation73_spill] sm:$0xff] %v16656_v46  ;;  %v2348_v3 = vadd.f32 %v2254_v56, %v21069_v50  ;;  %v2731_v55 = vpop.f32.mrf.mxu1  ;;  %v21073_v29 = vld [vmem:[#allocation86_spill] sm:$0xff] }
 0x323   : > { %v13056_v2 = vpop.f32.mrf.mxu0  ;;  %13740 = vmatpush3.bf16.msra.mxu1 %v15003_v1 }
 0x324   : > { %v16663_v37 = vadd.f32 %v2731_v55, %v2348_v3  ;;  %v13220_v51 = vpop.f32.mrf.mxu1  ;;  %v21075_v55 = vld [vmem:[#allocation84_spill] sm:$0xff] }
 0x325   : > { %v2259_v49 = vpop.f32.mrf.mxu0  ;;  %13334 = vmatmul.mubr.bf16.gmra.mxu0 %v21071_v42  ;;  %v21078_v42 = vld [vmem:[#allocation85_spill] sm:$0xff] }
 0x326   : > { %21070 = vst [vmem:[#allocation75_spill] sm:$0xff] %v16663_v37  ;;  %v2349_v24 = vadd.f32 %v2259_v49, %v21072_v7  ;;  %v2736_v38 = vpop.f32.mrf.mxu1  ;;  %13498 = vmatmul.mubr.bf16.gmra.mxu1 %v21073_v29  ;;  %13337 = vmatprep.mubr.msk.bf16.mxu0 %vm15194_vm0, %v20898_v20  ;;  %v21077_v29 = vld [vmem:[#allocation18_spill] sm:$0xff] }
 0x327   : > { %v13059_v56 = vpop.f32.mrf.mxu0  ;;  %13501 = vmatprep.mubr.msk.bf16.mxu1 %vm15194_vm0, %v20898_v20 }
 0x328   : > { %v16672_v50 = vadd.f32 %v2736_v38, %v2349_v24  ;;  %v13223_v3 = vpop.f32.mrf.mxu1 }
 0x329   : > { %v2262_v51 = vpop.f32.mrf.mxu0 }
 0x32a   : > { %21074 = vst [vmem:[#allocation76_spill] sm:$0xff] %v16672_v50  ;;  %v2350_v2 = vadd.f32 %v2262_v51, %v21075_v55  ;;  %v2739_v37 = vpop.f32.mrf.mxu1  ;;  %v21080_v51 = vld [vmem:[#allocation87_spill] sm:$0xff] }
 0x32b   : > { %v13060_v1 = vpop.f32.mrf.mxu0 }
 0x32c   : > { %v16675_v46 = vadd.f32 %v2739_v37, %v2350_v2  ;;  %v13224_v49 = vpop.f32.mrf.mxu1 }
 0x32d   : > { %v2267_v7 = vpop.f32.mrf.mxu0  ;;  %13338 = vmatmul.mubr.bf16.gmra.mxu0 %v21077_v29 }
 0x32e   : > { %21076 = vst [vmem:[#allocation78_spill] sm:$0xff] %v16675_v46  ;;  %v2351_v14 = vadd.f32 %v2267_v7, %v21078_v42  ;;  %v2744_v56 = vpop.f32.mrf.mxu1  ;;  %13502 = vmatmul.mubr.bf16.gmra.mxu1 %v21079_v10  ;;  %13341 = vmatprep.mubr.msk.bf16.mxu0 %vm15194_vm0, %v20898_v20  ;;  %v21081_v10 = vld [vmem:[#allocation19_spill] sm:$0xff]  ;;  %v21082_v46 = vld [vmem:[#allocation88_spill] sm:$0xff] }
 0x32f   : > { %v13063_v24 = vpop.f32.mrf.mxu0  ;;  %13505 = vmatprep.mubr.msk.bf16.mxu1 %vm15194_vm0, %v20898_v20 }
 0x330   : > { %v16684_v38 = vadd.f32 %v2744_v56, %v2351_v14  ;;  %v13227_v37 = vpop.f32.mrf.mxu1 }
 0x331   : > { %v2270_v3 = vpop.f32.mrf.mxu0 }
 0x332   : > { %v2352_v55 = vadd.f32 %v2270_v3, %v21080_v51  ;;  %v2747_v2 = vpop.f32.mrf.mxu1 }
 0x333   : > { %v13064_v1 = vpop.f32.mrf.mxu0 }
 0x334   : > { %v16687_v49 = vadd.f32 %v2747_v2, %v2352_v55  ;;  %v13228_v42 = vpop.f32.mrf.mxu1 }
 0x335   : > { %v2275_v7 = vpop.f32.mrf.mxu0  ;;  %13342 = vmatmul.mubr.bf16.gmra.mxu0 %v21081_v10  ;;  %v21084_v42 = vld [vmem:[#allocation20_spill] sm:$0xff] }
 0x336   : > { %v2353_v50 = vadd.f32 %v2275_v7, %v21082_v46  ;;  %v2752_v24 = vpop.f32.mrf.mxu1  ;;  %13506 = vmatmul.mubr.bf16.gmra.mxu1 %v16168_v30  ;;  %13345 = vmatprep.mubr.msk.bf16.mxu0 %vm15194_vm0, %v20898_v20 }
 0x337   : > { %v13067_v14 = vpop.f32.mrf.mxu0  ;;  %13509 = vmatprep.mubr.msk.bf16.mxu1 %vm15194_vm0, %v20898_v20 }
 0x338   : > { %v16696_v56 = vadd.f32 %v2752_v24, %v2353_v50  ;;  %v13231_v37 = vpop.f32.mrf.mxu1 }
 0x339   : > { %v2278_v3 = vpop.f32.mrf.mxu0 }
 0x33a   : > { %21083 = vst [vmem:[#allocation79_spill] sm:$0xff] %v16696_v56  ;;  %v2755_v51 = vpop.f32.mrf.mxu1  ;;  %v21085_v3 = vld [vmem:[#allocation91_spill] sm:$0xff] }
 0x33b   : > { %v13068_v55 = vpop.f32.mrf.mxu0 }
 0x33c   : > { %v13232_v2 = vpop.f32.mrf.mxu1 }
 0x33d   : > { %v2952_v1 = vpop.f32.mrf.mxu0  ;;  %13346 = vmatmul.mubr.bf16.gmra.mxu0 %v21084_v42 }
 0x33e   : > { %v3246_v46 = vadd.f32 %v2952_v1, %v16164_v44  ;;  %v3425_v7 = vpop.f32.mrf.mxu1  ;;  %13510 = vmatmul.mubr.bf16.gmra.mxu1 %v16183_v54  ;;  %13349 = vmatprep.mubr.msk.bf16.mxu0 %vm15194_vm0, %v20898_v20  ;;  %v21087_v54 = vld [vmem:[#allocation21_spill] sm:$0xff] }
 0x33f   : > { %v13251_v14 = vpop.f32.mrf.mxu0  ;;  %13513 = vmatprep.mubr.msk.bf16.mxu1 %vm15194_vm0, %v20898_v20 }
 0x340   : > { %v16705_v50 = vadd.f32 %v3425_v7, %v3246_v46  ;;  %v13415_v24 = vpop.f32.mrf.mxu1 }
 0x341   : > { %v2955_v37 = vpop.f32.mrf.mxu0 }
 0x342   : > { %v3247_v51 = vadd.f32 %v2955_v37, %v21085_v3  ;;  %v3428_v55 = vpop.f32.mrf.mxu1  ;;  %v21088_v3 = vld [vmem:[#allocation93_spill] sm:$0xff] }
 0x343   : > { %v13252_v2 = vpop.f32.mrf.mxu0 }
 0x344   : > { %v16708_v30 = vadd.f32 %v3428_v55, %v3247_v51  ;;  %v13416_v44 = vpop.f32.mrf.mxu1 }
 0x345   : > { %v2960_v1 = vpop.f32.mrf.mxu0  ;;  %13350 = vmatmul.mubr.bf16.gmra.mxu0 %v21087_v54 }
 0x346   : > { %21086 = vst [vmem:[#allocation81_spill] sm:$0xff] %v16708_v30  ;;  %v3248_v56 = vadd.f32 %v2960_v1, %v16179_v61  ;;  %v3433_v14 = vpop.f32.mrf.mxu1  ;;  %13514 = vmatmul.mubr.bf16.gmra.mxu1 %v16198_v21  ;;  %13353 = vmatprep.mubr.msk.bf16.mxu0 %vm15194_vm0, %v20898_v20  ;;  %v21090_v21 = vld [vmem:[#allocation22_spill] sm:$0xff] }
 0x347   : > { %v13255_v46 = vpop.f32.mrf.mxu0  ;;  %13517 = vmatprep.mubr.msk.bf16.mxu1 %vm15194_vm0, %v20898_v20 }
 0x348   : > { %v16717_v7 = vadd.f32 %v3433_v14, %v3248_v56  ;;  %v13419_v24 = vpop.f32.mrf.mxu1 }
 0x349   : > { %v2963_v37 = vpop.f32.mrf.mxu0 }
 0x34a   : > { %v3249_v51 = vadd.f32 %v2963_v37, %v21088_v3  ;;  %v3436_v55 = vpop.f32.mrf.mxu1  ;;  %v21091_v3 = vld [vmem:[#allocation95_spill] sm:$0xff] }
 0x34b   : > { %v13256_v2 = vpop.f32.mrf.mxu0 }
 0x34c   : > { %v16720_v44 = vadd.f32 %v3436_v55, %v3249_v51  ;;  %v13420_v61 = vpop.f32.mrf.mxu1 }
 0x34d   : > { %v2968_v1 = vpop.f32.mrf.mxu0  ;;  %13354 = vmatmul.mubr.bf16.gmra.mxu0 %v21090_v21 }
 0x34e   : > { %21089 = vst [vmem:[#allocation82_spill] sm:$0xff] %v16720_v44  ;;  %v3250_v30 = vadd.f32 %v2968_v1, %v16194_v32  ;;  %v3441_v46 = vpop.f32.mrf.mxu1  ;;  %13518 = vmatmul.mubr.bf16.gmra.mxu1 %v16213_v48  ;;  %13357 = vmatprep.mubr.msk.bf16.mxu0 %vm15194_vm0, %v20898_v20  ;;  %v21093_v48 = vld [vmem:[#allocation23_spill] sm:$0xff] }
 0x34f   : > { %v13259_v56 = vpop.f32.mrf.mxu0  ;;  %13521 = vmatprep.mubr.msk.bf16.mxu1 %vm15194_vm0, %v20898_v20 }
 0x350   : > { %v16729_v14 = vadd.f32 %v3441_v46, %v3250_v30  ;;  %v13423_v24 = vpop.f32.mrf.mxu1 }
 0x351   : > { %v2971_v37 = vpop.f32.mrf.mxu0 }
 0x352   : > { %v3251_v51 = vadd.f32 %v2971_v37, %v21091_v3  ;;  %v3444_v55 = vpop.f32.mrf.mxu1  ;;  %v21094_v3 = vld [vmem:[#allocation97_spill] sm:$0xff] }
 0x353   : > { %v13260_v2 = vpop.f32.mrf.mxu0 }
 0x354   : > { %v16732_v61 = vadd.f32 %v3444_v55, %v3251_v51  ;;  %v13424_v32 = vpop.f32.mrf.mxu1 }
 0x355   : > { %v2976_v1 = vpop.f32.mrf.mxu0  ;;  %13358 = vmatmul.mubr.bf16.gmra.mxu0 %v21093_v48 }
 0x356   : > { %21092 = vst [vmem:[#allocation84_spill] sm:$0xff] %v16732_v61  ;;  %v3252_v44 = vadd.f32 %v2976_v1, %v16209_v41  ;;  %v3449_v56 = vpop.f32.mrf.mxu1  ;;  %13522 = vmatmul.mubr.bf16.gmra.mxu1 %v16228_v22  ;;  %13361 = vmatprep.mubr.msk.bf16.mxu0 %vm15194_vm0, %v20898_v20  ;;  %v21096_v22 = vld [vmem:[#allocation24_spill] sm:$0xff] }
 0x357   : > { %v13263_v30 = vpop.f32.mrf.mxu0  ;;  %13525 = vmatprep.mubr.msk.bf16.mxu1 %vm15194_vm0, %v20898_v20 }
 0x358   : > { %v16741_v46 = vadd.f32 %v3449_v56, %v3252_v44  ;;  %v13427_v24 = vpop.f32.mrf.mxu1 }
 0x359   : > { %v2979_v37 = vpop.f32.mrf.mxu0 }
 0x35a   : > { %v3253_v51 = vadd.f32 %v2979_v37, %v21094_v3  ;;  %v3452_v55 = vpop.f32.mrf.mxu1  ;;  %v21097_v3 = vld [vmem:[#allocation99_spill] sm:$0xff] }
 0x35b   : > { %v13264_v2 = vpop.f32.mrf.mxu0 }
 0x35c   : > { %v16744_v32 = vadd.f32 %v3452_v55, %v3253_v51  ;;  %v13428_v41 = vpop.f32.mrf.mxu1 }
 0x35d   : > { %v2984_v1 = vpop.f32.mrf.mxu0  ;;  %13362 = vmatmul.mubr.bf16.gmra.mxu0 %v21096_v22 }
 0x35e   : > { %21095 = vst [vmem:[#allocation18_spill] sm:$0xff] %v16744_v32  ;;  %v3254_v61 = vadd.f32 %v2984_v1, %v16224_v5  ;;  %v3457_v30 = vpop.f32.mrf.mxu1  ;;  %13526 = vmatmul.mubr.bf16.gmra.mxu1 %v16243_v58  ;;  %13365 = vmatprep.mubr.msk.bf16.mxu0 %vm15194_vm0, %v20898_v20  ;;  %v21099_v58 = vld [vmem:[#allocation25_spill] sm:$0xff] }
 0x35f   : > { %v13267_v44 = vpop.f32.mrf.mxu0  ;;  %13529 = vmatprep.mubr.msk.bf16.mxu1 %vm15194_vm0, %v20898_v20 }
 0x360   : > { %v16753_v56 = vadd.f32 %v3457_v30, %v3254_v61  ;;  %v13431_v24 = vpop.f32.mrf.mxu1 }
 0x361   : > { %v2987_v37 = vpop.f32.mrf.mxu0 }
 0x362   : > { %v3255_v51 = vadd.f32 %v2987_v37, %v21097_v3  ;;  %v3460_v55 = vpop.f32.mrf.mxu1  ;;  %v21100_v3 = vld [vmem:[#allocation101_spill] sm:$0xff] }
 0x363   : > { %v13268_v2 = vpop.f32.mrf.mxu0 }
 0x364   : > { %v16756_v41 = vadd.f32 %v3460_v55, %v3255_v51  ;;  %v13432_v5 = vpop.f32.mrf.mxu1 }
 0x365   : > { %v2992_v1 = vpop.f32.mrf.mxu0  ;;  %13366 = vmatmul.mubr.bf16.gmra.mxu0 %v21099_v58 }
 0x366   : > { %21098 = vst [vmem:[#allocation85_spill] sm:$0xff] %v16756_v41  ;;  %v3256_v32 = vadd.f32 %v2992_v1, %v16239_v33  ;;  %v3465_v44 = vpop.f32.mrf.mxu1  ;;  %13530 = vmatmul.mubr.bf16.gmra.mxu1 %v16258_v39  ;;  %13369 = vmatprep.mubr.msk.bf16.mxu0 %vm15194_vm0, %v20898_v20  ;;  %v21102_v39 = vld [vmem:[#allocation26_spill] sm:$0xff] }
 0x367   : > { %v13271_v61 = vpop.f32.mrf.mxu0  ;;  %13533 = vmatprep.mubr.msk.bf16.mxu1 %vm15194_vm0, %v20898_v20 }
 0x368   : > { %v16765_v30 = vadd.f32 %v3465_v44, %v3256_v32  ;;  %v13435_v24 = vpop.f32.mrf.mxu1 }
 0x369   : > { %v2995_v37 = vpop.f32.mrf.mxu0 }
 0x36a   : > { %v3257_v51 = vadd.f32 %v2995_v37, %v21100_v3  ;;  %v3468_v55 = vpop.f32.mrf.mxu1  ;;  %v21103_v3 = vld [vmem:[#allocation103_spill] sm:$0xff] }
 0x36b   : > { %v13272_v2 = vpop.f32.mrf.mxu0 }
 0x36c   : > { %v16768_v5 = vadd.f32 %v3468_v55, %v3257_v51  ;;  %v13436_v33 = vpop.f32.mrf.mxu1 }
 0x36d   : > { %v3000_v1 = vpop.f32.mrf.mxu0  ;;  %13370 = vmatmul.mubr.bf16.gmra.mxu0 %v21102_v39 }
 0x36e   : > { %21101 = vst [vmem:[#allocation87_spill] sm:$0xff] %v16768_v5  ;;  %v3258_v41 = vadd.f32 %v3000_v1, %v16254_v0  ;;  %v3473_v61 = vpop.f32.mrf.mxu1  ;;  %13534 = vmatmul.mubr.bf16.gmra.mxu1 %v16273_v27  ;;  %13373 = vmatprep.mubr.msk.bf16.mxu0 %vm15194_vm0, %v20898_v20  ;;  %v21105_v27 = vld [vmem:[#allocation27_spill] sm:$0xff] }
 0x36f   : > { %v13275_v32 = vpop.f32.mrf.mxu0  ;;  %13537 = vmatprep.mubr.msk.bf16.mxu1 %vm15194_vm0, %v20898_v20 }
 0x370   : > { %v16777_v44 = vadd.f32 %v3473_v61, %v3258_v41  ;;  %v13439_v24 = vpop.f32.mrf.mxu1 }
 0x371   : > { %v3003_v37 = vpop.f32.mrf.mxu0 }
 0x372   : > { %v3259_v51 = vadd.f32 %v3003_v37, %v21103_v3  ;;  %v3476_v55 = vpop.f32.mrf.mxu1  ;;  %v21107_v3 = vld [vmem:[#allocation105_spill] sm:$0xff] }
 0x373   : > { %v13276_v2 = vpop.f32.mrf.mxu0 }
 0x374   : > { %v16780_v33 = vadd.f32 %v3476_v55, %v3259_v51  ;;  %v13440_v0 = vpop.f32.mrf.mxu1 }
 0x375   : > { %v3008_v1 = vpop.f32.mrf.mxu0  ;;  %13374 = vmatmul.mubr.bf16.gmra.mxu0 %v21105_v27 }
 0x376   : > { %21104 = vst [vmem:[#allocation19_spill] sm:$0xff] %v16780_v33  ;;  %v3260_v5 = vadd.f32 %v3008_v1, %v16269_v36  ;;  %v3481_v32 = vpop.f32.mrf.mxu1  ;;  %13538 = vmatmul.mubr.bf16.gmra.mxu1 %v16288_v40  ;;  %13377 = vmatprep.mubr.msk.bf16.mxu0 %vm15194_vm0, %v20898_v20  ;;  %v21109_v40 = vld [vmem:[#allocation29_spill] sm:$0xff] }
 0x377   : > { %v13279_v41 = vpop.f32.mrf.mxu0  ;;  %13541 = vmatprep.mubr.msk.bf16.mxu1 %vm15194_vm0, %v20898_v20 }
 0x378   : > { %v16789_v61 = vadd.f32 %v3481_v32, %v3260_v5  ;;  %v13443_v24 = vpop.f32.mrf.mxu1 }
 0x379   : > { %v3011_v37 = vpop.f32.mrf.mxu0 }
 0x37a   : > { %21106 = vst [vmem:[#allocation88_spill] sm:$0xff] %v16789_v61  ;;  %v3261_v51 = vadd.f32 %v3011_v37, %v21107_v3  ;;  %v3484_v55 = vpop.f32.mrf.mxu1  ;;  %v21111_v61 = vld [vmem:[#allocation30_spill] sm:$0xff] }
 0x37b   : > { %v13280_v2 = vpop.f32.mrf.mxu0 }
 0x37c   : > { %v16792_v36 = vadd.f32 %v3484_v55, %v3261_v51  ;;  %v13444_v0 = vpop.f32.mrf.mxu1  ;;  %v15131_v55 = vld [vmem:[%s15304_s12 + $0x128] sm:$0xff]   ;;  %v431_v2 = vld [vmem:[%s15304_s12 + $0x134] sm:$0xf] }
 0x37d   : > { %v3016_v1 = vpop.f32.mrf.mxu0  ;;  %13378 = vmatmul.mubr.bf16.gmra.mxu0 %v21109_v40 }
 0x37e   : > { %21108 = vst [vmem:[#allocation20_spill] sm:$0xff] %v16792_v36  ;;  %v3262_v41 = vadd.f32 %v3016_v1, %v16284_v13  ;;  %v3489_v33 = vpop.f32.mrf.mxu1  ;;  %13542 = vmatmul.mubr.bf16.gmra.mxu1 %v16303_v60  ;;  %13381 = vmatprep.mubr.msk.bf16.mxu0 %vm15194_vm0, %v20898_v20  ;;  %v2852_v13 = vshll.u32 %v15131_v55, 16 }
 0x37f   : > { %v13283_v5 = vpop.f32.mrf.mxu0  ;;  %13545 = vmatprep.mubr.msk.bf16.mxu1 %vm15194_vm0, %v20898_v20 }
 0x380   : > { %v16801_v32 = vadd.f32 %v3489_v33, %v3262_v41  ;;  %v13447_v24 = vpop.f32.mrf.mxu1  ;;  %v15132_v5 = vld [vmem:[%s15304_s12 + $0x130] sm:$0xf] }
 0x381   : > { %v3019_v37 = vpop.f32.mrf.mxu0  ;;  %v16810_v40 = vcombine.low %v15132_v5, %v431_v2  ;;  %v2856_v5 = vshrl.u32 %v15131_v55, 16 }
 0x382   : > { %v3263_v3 = vadd.f32 %v3019_v37, %v16290_v45  ;;  %v3492_v51 = vpop.f32.mrf.mxu1  ;;  %v2854_v45 = vrot.slane %v2852_v13, 1 }
 0x383   : > { %v13284_v0 = vpop.f32.mrf.mxu0 }
 0x384   : > { %v16806_v1 = vadd.f32 %v3492_v51, %v3263_v3  ;;  %v13448_v60 = vpop.f32.mrf.mxu1 }
 0x385   : > { %v3024_v36 = vpop.f32.mrf.mxu0  ;;  %13382 = vmatmul.mubr.bf16.gmra.mxu0 %v21111_v61  ;;  %v3336_v60 = vrot.slane %v15131_v55, 1  ;;  %v2858_v55 = vor.u32 %v2856_v5, %v2854_v45 }
 0x386   : > { %21110 = vst [vmem:[#allocation91_spill] sm:$0xff] %v16806_v1  ;;  %v3264_v33 = vadd.f32 %v3024_v36, %v16299_v4  ;;  %v3497_v41 = vpop.f32.mrf.mxu1  ;;  %13546 = vmatmul.mubr.bf16.gmra.mxu1 %v16322_v52  ;;  %13385 = vmatprep.mubr.msk.bf16.mxu0 %vm15194_vm0, %v20898_v20  ;;  %v21113_v4 = vld [vmem:[#allocation31_spill] sm:$0xff]  ;;  %v2860_v52 = vshll.u32 %v16810_v40, 16 }
 0x387   : > { %v13287_v24 = vpop.f32.mrf.mxu0  ;;  %13549 = vmatprep.mubr.msk.bf16.mxu1 %vm15194_vm0, %v20898_v20  ;;  %v16823_v36 = vsel %vm654_vm1, %v21113_v4, %v2854_v45 }
 0x388   : > { %v16818_v37 = vadd.f32 %v3497_v41, %v3264_v33  ;;  %v13451_v3 = vpop.f32.mrf.mxu1  ;;  %v16828_v24 = vsel %vm1794_vm2, %v16313_v62, %v3336_v60  ;;  %v2862_v4 = vrot.slane %v2860_v52, 1  ;;  %v16840_v62 = vrot.slane %v16810_v40, 1 }
 0x389   : > { %v3027_v51 = vpop.f32.mrf.mxu0  ;;  %21114 = vst [vmem:[#allocation93_spill] sm:$0xff] %v16828_v24 }
 0x38a   : > { %21112 = vst [vmem:[#allocation21_spill] sm:$0xff] %v16818_v37  ;;  %v3265_v2 = vadd.f32 %v3027_v51, %v16305_v34  ;;  %v3500_v0 = vpop.f32.mrf.mxu1  ;;  %v21116_v34 = vld [vmem:[#allocation108_spill] sm:$0xff]  ;;  %21117 = vst [vmem:[#allocation95_spill] sm:$0xff] %v16840_v62  ;;  %v16850_v52 = vsel %vm1794_vm2, %v3336_v60, %v16840_v62 }
 0x38b   : > { %v13288_v13 = vpop.f32.mrf.mxu0  ;;  %21119 = vst [vmem:[#allocation23_spill] sm:$0xff] %v16850_v52 }
 0x38c   : > { %v16830_v1 = vadd.f32 %v3500_v0, %v3265_v2  ;;  %v13452_v33 = vpop.f32.mrf.mxu1 }
 0x38d   : > { %v3032_v41 = vpop.f32.mrf.mxu0  ;;  %13386 = vmatmul.mubr.bf16.gmra.mxu0 %v16823_v36 }
 0x38e   : > { %21115 = vst [vmem:[#allocation22_spill] sm:$0xff] %v16830_v1  ;;  %v3266_v3 = vadd.f32 %v3032_v41, %v21116_v34  ;;  %v3505_v51 = vpop.f32.mrf.mxu1  ;;  %13550 = vmatmul.mubr.bf16.gmra.mxu1 %v16828_v24  ;;  %13389 = vmatprep.mubr.msk.bf16.mxu0 %vm15194_vm0, %v20898_v20  ;;  %v21118_v41 = vld [vmem:[#allocation110_spill] sm:$0xff]  ;;  %v16846_v24 = vsel %vm654_vm1, %v2858_v55, %v2862_v4 }
 0x38f   : > { %v13291_v13 = vpop.f32.mrf.mxu0  ;;  %13553 = vmatprep.mubr.msk.bf16.mxu1 %vm15194_vm0, %v20898_v20 }
 0x390   : > { %v16842_v2 = vadd.f32 %v3505_v51, %v3266_v3  ;;  %v13455_v0 = vpop.f32.mrf.mxu1  ;;  %v2864_v3 = vshrl.u32 %v16810_v40, 16 }
 0x391   : > { %v3035_v33 = vpop.f32.mrf.mxu0 }
 0x392   : > { %v3267_v34 = vadd.f32 %v3035_v33, %v21118_v41  ;;  %v3508_v1 = vpop.f32.mrf.mxu1  ;;  %v16864_v33 = vor.u32 %v2864_v3, %v2862_v4 }
 0x393   : > { %v13292_v37 = vpop.f32.mrf.mxu0 }
 0x394   : > { %v16852_v45 = vadd.f32 %v3508_v1, %v3267_v34  ;;  %v13456_v5 = vpop.f32.mrf.mxu1 }
 0x395   : > { %v3040_v13 = vpop.f32.mrf.mxu0  ;;  %13390 = vmatmul.mubr.bf16.gmra.mxu0 %v16846_v24 }
 0x396   : > { %21120 = vst [vmem:[#allocation97_spill] sm:$0xff] %v16852_v45  ;;  %v3268_v51 = vadd.f32 %v3040_v13, %v16334_v23  ;;  %v3513_v0 = vpop.f32.mrf.mxu1  ;;  %13554 = vmatmul.mubr.bf16.gmra.mxu1 %v16850_v52  ;;  %13393 = vmatprep.mubr.msk.bf16.mxu0 %vm15194_vm0, %v20898_v20 }
 0x397   : > { %v13295_v37 = vpop.f32.mrf.mxu0  ;;  %13557 = vmatprep.mubr.msk.bf16.mxu1 %vm15194_vm0, %v20898_v20 }
 0x398   : > { %v16862_v1 = vadd.f32 %v3513_v0, %v3268_v51  ;;  %v13459_v60 = vpop.f32.mrf.mxu1 }
 0x399   : > { %v3043_v55 = vpop.f32.mrf.mxu0 }
 0x39a   : > { %v3269_v41 = vadd.f32 %v3043_v55, %v16337_v9  ;;  %v3516_v34 = vpop.f32.mrf.mxu1 }
 0x39b   : > { %v13296_v23 = vpop.f32.mrf.mxu0 }
 0x39c   : > { %v16867_v5 = vadd.f32 %v3516_v34, %v3269_v41  ;;  %v13460_v13 = vpop.f32.mrf.mxu1  ;;  %v15133_v23 = vld [vmem:[%s15304_s12 + $0x20] sm:$0xff]  }
 0x39d   : > { %v3048_v52 = vpop.f32.mrf.mxu0  ;;  %13394 = vmatmul.mubr.bf16.gmra.mxu0 %v16864_v33 }
 0x39e   : > { %v3270_v37 = vadd.f32 %v3048_v52, %v16345_v53  ;;  %v3521_v45 = vpop.f32.mrf.mxu1  ;;  %13558 = vmatmul.mubr.bf16.gmra.mxu1 %v16840_v62  ;;  %13577 = vmatprep.mubr.msk.bf16.mxu0 %vm15194_vm0, %v20898_v20  ;;  %v15004_v53 = vld [vmem:[%s20633_s2 + $0x238] sm:$0xff]   ;;  %v21133_v62 = vld [vmem:[#allocation7_spill] sm:$0xff] }
 0x39f   : > { %v13299_v4 = vpop.f32.mrf.mxu0  ;;  %13741 = vmatprep.mubr.msk.bf16.mxu1 %vm15194_vm0, %v20898_v20 }
 0x3a0   : > { %v16876_v9 = vadd.f32 %v3521_v45, %v3270_v37  ;;  %v13463_v3 = vpop.f32.mrf.mxu1 }
 0x3a1   : > { %v3051_v51 = vpop.f32.mrf.mxu0 }
 0x3a2   : > { %v3271_v0 = vadd.f32 %v3051_v51, %v16351_v59  ;;  %v3524_v60 = vpop.f32.mrf.mxu1  ;;  %v15005_v59 = vld [vmem:[%s20633_s2 + $0x230] sm:$0xff]  }
 0x3a3   : > { %v13300_v52 = vpop.f32.mrf.mxu0 }
 0x3a4   : > { %v16882_v55 = vadd.f32 %v3524_v60, %v3271_v0  ;;  %v13464_v41 = vpop.f32.mrf.mxu1  ;;  %v15006_v60 = vld [vmem:[%s20633_s2 + $0x228] sm:$0xff]  }
 0x3a5   : > { %v3056_v34 = vpop.f32.mrf.mxu0  ;;  %13578 = vmatmul.mubr.bf16.vlgmr.msra.gmra.mxu0 %v15133_v23 }
 0x3a6   : > { %v3272_v13 = vadd.f32 %v3056_v34, %v16363_v18  ;;  %13890 = vmatpush3.bf16.msra.mxu0 %v15004_v53  ;;  %v3529_v45 = vpop.f32.mrf.mxu1  ;;  %13742 = vmatmul.mubr.bf16.vlgmr.msra.gmra.mxu1 %v15391_v57  ;;  %v15134_v34 = vld [vmem:[%s15304_s12 + $0x28] sm:$0xff]  }
 0x3a7   : > { %v13303_v37 = vpop.f32.mrf.mxu0  ;;  %13581 = vmatprep.mubr.msk.bf16.mxu0 %vm15194_vm0, %v20898_v20  ;;  %13745 = vmatprep.mubr.msk.bf16.mxu1 %vm15194_vm0, %v20898_v20 }
 0x3a8   : > { %v16894_v4 = vadd.f32 %v3529_v45, %v3272_v13  ;;  %v13467_v3 = vpop.f32.mrf.mxu1  ;;  %13891 = vmatprep.subr.bf16.mxu0 %v20898_v20  ;;  %v15007_v45 = vld [vmem:[%s20633_s2 + $0x220] sm:$0xff]  }
 0x3a9   : > { %v3059_v18 = vpop.f32.mrf.mxu0 }
 0x3aa   : > { %v3273_v57 = vadd.f32 %v3059_v18, %v16371_v8  ;;  %v3532_v51 = vpop.f32.mrf.mxu1  ;;  %13892 = vmatpush3.bf16.msra.mxu0 %v15005_v59 }
 0x3ab   : > { %v13304_v0 = vpop.f32.mrf.mxu0  ;;  %13893 = vmatprep.subr.bf16.mxu0 %v20898_v20 }
 0x3ac   : > { %v16902_v53 = vadd.f32 %v3532_v51, %v3273_v57  ;;  %v13468_v52 = vpop.f32.mrf.mxu1 }
 0x3ad   : > { %v3064_v41 = vpop.f32.mrf.mxu0  ;;  %13582 = vmatmul.mubr.bf16.gmra.mxu0 %v15134_v34 }
 0x3ae   : > { %v3274_v23 = vadd.f32 %v3064_v41, %v16383_v35  ;;  %v3537_v13 = vpop.f32.mrf.mxu1  ;;  %13746 = vmatmul.mubr.bf16.gmra.mxu1 %v15400_v63  ;;  %13585 = vmatprep.mubr.msk.bf16.mxu0 %vm15194_vm0, %v20898_v20 }
 0x3af   : > { %v13307_v8 = vpop.f32.mrf.mxu0  ;;  %13749 = vmatprep.mubr.msk.bf16.mxu1 %vm15194_vm0, %v20898_v20  ;;  %13894 = vmatpush3.bf16.msra.mxu0 %v15006_v60  ;;  %v15135_v60 = vld [vmem:[%s15304_s12 + $0x30] sm:$0xff]  }
 0x3b0   : > { %v16914_v59 = vadd.f32 %v3537_v13, %v3274_v23  ;;  %v13471_v37 = vpop.f32.mrf.mxu1  ;;  %13895 = vmatprep.subr.bf16.mxu0 %v20898_v20 }
 0x3b1   : > { %v3067_v35 = vpop.f32.mrf.mxu0 }
 0x3b2   : > { %v3275_v63 = vadd.f32 %v3067_v35, %v16387_v17  ;;  %v3540_v3 = vpop.f32.mrf.mxu1 }
 0x3b3   : > { %v13308_v18 = vpop.f32.mrf.mxu0  ;;  %13896 = vmatpush3.bf16.msra.mxu0 %v15007_v45 }
 0x3b4   : > { %v16918_v57 = vadd.f32 %v3540_v3, %v3275_v63  ;;  %v13472_v51 = vpop.f32.mrf.mxu1  ;;  %13897 = vmatprep.subr.bf16.mxu0 %v20898_v20  ;;  %v15136_v3 = vld [vmem:[%s15304_s12 + $0x38] sm:$0xff]  }
 0x3b5   : > { %v3072_v0 = vpop.f32.mrf.mxu0  ;;  %13586 = vmatmul.mubr.bf16.gmra.mxu0 %v15135_v60 }
 0x3b6   : > { %v3276_v52 = vadd.f32 %v3072_v0, %v16397_v25  ;;  %v3545_v41 = vpop.f32.mrf.mxu1  ;;  %13750 = vmatmul.mubr.bf16.gmra.mxu1 %v15409_v6  ;;  %13589 = vmatprep.mubr.msk.bf16.mxu0 %vm15194_vm0, %v20898_v20  ;;  %v15008_v25 = vld [vmem:[%s20633_s2 + $0x218] sm:$0xff]  }
 0x3b7   : > { %v13311_v17 = vpop.f32.mrf.mxu0  ;;  %13753 = vmatprep.mubr.msk.bf16.mxu1 %vm15194_vm0, %v20898_v20  ;;  %13898 = vmatpush3.bf16.msra.mxu0 %v15008_v25 }
 0x3b8   : > { %v16928_v34 = vadd.f32 %v3545_v41, %v3276_v52  ;;  %v13475_v23 = vpop.f32.mrf.mxu1  ;;  %13899 = vmatprep.subr.bf16.mxu0 %v20898_v20 }
 0x3b9   : > { %v3075_v13 = vpop.f32.mrf.mxu0 }
 0x3ba   : > { %v3277_v8 = vadd.f32 %v3075_v13, %v16403_v43  ;;  %v3548_v45 = vpop.f32.mrf.mxu1 }
 0x3bb   : > { %v13312_v37 = vpop.f32.mrf.mxu0 }
 0x3bc   : > { %v16934_v6 = vadd.f32 %v3548_v45, %v3277_v8  ;;  %v13476_v35 = vpop.f32.mrf.mxu1 }
 0x3bd   : > { %v3080_v63 = vpop.f32.mrf.mxu0  ;;  %13590 = vmatmul.mubr.bf16.gmra.mxu0 %v15136_v3 }
 0x3be   : > { %v3278_v18 = vadd.f32 %v3080_v63, %v16413_v31  ;;  %v3553_v51 = vpop.f32.mrf.mxu1  ;;  %13754 = vmatmul.mubr.bf16.gmra.mxu1 %v15418_v12  ;;  %13593 = vmatprep.mubr.msk.bf16.mxu0 %vm15194_vm0, %v20898_v20  ;;  %v15137_v12 = vld [vmem:[%s15304_s12 + $0x40] sm:$0xff]  }
 0x3bf   : > { %v13315_v43 = vpop.f32.mrf.mxu0  ;;  %13757 = vmatprep.mubr.msk.bf16.mxu1 %vm15194_vm0, %v20898_v20 }
 0x3c0   : > { %v16944_v0 = vadd.f32 %v3553_v51, %v3278_v18  ;;  %v13479_v60 = vpop.f32.mrf.mxu1 }
 0x3c1   : > { %v3083_v52 = vpop.f32.mrf.mxu0 }
 0x3c2   : > { %v3279_v41 = vadd.f32 %v3083_v52, %v16416_v16  ;;  %v3556_v17 = vpop.f32.mrf.mxu1 }
 0x3c3   : > { %v13316_v23 = vpop.f32.mrf.mxu0 }
 0x3c4   : > { %v16947_v13 = vadd.f32 %v3556_v17, %v3279_v41  ;;  %v13480_v31 = vpop.f32.mrf.mxu1 }
 0x3c5   : > { %v3088_v8 = vpop.f32.mrf.mxu0  ;;  %13594 = vmatmul.mubr.bf16.gmra.mxu0 %v15137_v12 }
 0x3c6   : > { %v3280_v45 = vadd.f32 %v3088_v8, %v16425_v15  ;;  %v3561_v25 = vpop.f32.mrf.mxu1  ;;  %13758 = vmatmul.mubr.bf16.gmra.mxu1 %v20981_v28  ;;  %13597 = vmatprep.mubr.msk.bf16.mxu0 %vm15194_vm0, %v20898_v20  ;;  %v15138_v28 = vld [vmem:[%s15304_s12 + $0x48] sm:$0xff]  }
 0x3c7   : > { %v13319_v37 = vpop.f32.mrf.mxu0  ;;  %13761 = vmatprep.mubr.msk.bf16.mxu1 %vm15194_vm0, %v20898_v20 }
 0x3c8   : > { %v16956_v16 = vadd.f32 %v3561_v25, %v3280_v45  ;;  %v13483_v35 = vpop.f32.mrf.mxu1 }
 0x3c9   : > { %v3091_v63 = vpop.f32.mrf.mxu0  ;;  %v21121_v35 = vld [vmem:[#allocation34_spill] sm:$0xff] }
 0x3ca   : > { %v3281_v3 = vadd.f32 %v3091_v63, %v16428_v47  ;;  %v3564_v18 = vpop.f32.mrf.mxu1 }
 0x3cb   : > { %v13320_v51 = vpop.f32.mrf.mxu0 }
 0x3cc   : > { %v16959_v43 = vadd.f32 %v3564_v18, %v3281_v3  ;;  %v13484_v15 = vpop.f32.mrf.mxu1  ;;  %v21122_v18 = vld [vmem:[#allocation4_spill] sm:$0xff] }
 0x3cd   : > { %v3096_v60 = vpop.f32.mrf.mxu0  ;;  %13598 = vmatmul.mubr.bf16.gmra.mxu0 %v15138_v28  ;;  %v21123_v28 = vld [vmem:[#allocation36_spill] sm:$0xff] }
 0x3ce   : > { %v3282_v52 = vadd.f32 %v3096_v60, %v16437_v26  ;;  %v3569_v41 = vpop.f32.mrf.mxu1  ;;  %13762 = vmatmul.mubr.bf16.gmra.mxu1 %v20987_v11  ;;  %13601 = vmatprep.mubr.msk.bf16.mxu0 %vm15194_vm0, %v20898_v20  ;;  %v15139_v11 = vld [vmem:[%s15304_s12 + $0x50] sm:$0xff]  }
 0x3cf   : > { %v13323_v17 = vpop.f32.mrf.mxu0  ;;  %13765 = vmatprep.mubr.msk.bf16.mxu1 %vm15194_vm0, %v20898_v20 }
 0x3d0   : > { %v16968_v47 = vadd.f32 %v3569_v41, %v3282_v52  ;;  %v13487_v23 = vpop.f32.mrf.mxu1 }
 0x3d1   : > { %v3099_v31 = vpop.f32.mrf.mxu0 }
 0x3d2   : > { %v3283_v8 = vadd.f32 %v3099_v31, %v16440_v19  ;;  %v3572_v12 = vpop.f32.mrf.mxu1 }
 0x3d3   : > { %v13324_v45 = vpop.f32.mrf.mxu0 }
 0x3d4   : > { %v16971_v25 = vadd.f32 %v3572_v12, %v3283_v8  ;;  %v13488_v26 = vpop.f32.mrf.mxu1  ;;  %v15140_v12 = vld [vmem:[%s15304_s12 + $0x58] sm:$0xff]   ;;  %v21124_v45 = vld [vmem:[#allocation2_spill] sm:$0xff] }
 0x3d5   : > { %v3104_v37 = vpop.f32.mrf.mxu0  ;;  %13602 = vmatmul.mubr.bf16.gmra.mxu0 %v15139_v11  ;;  %v21125_v11 = vld [vmem:[#allocation5_spill] sm:$0xff] }
 0x3d6   : > { %v3284_v63 = vadd.f32 %v3104_v37, %v21121_v35  ;;  %v3577_v3 = vpop.f32.mrf.mxu1  ;;  %13766 = vmatmul.mubr.bf16.gmra.mxu1 %v21122_v18  ;;  %13605 = vmatprep.mubr.msk.bf16.mxu0 %vm15194_vm0, %v20898_v20  ;;  %v15009_v18 = vld [vmem:[%s20633_s2 + $0x210] sm:$0xff]  }
 0x3d7   : > { %v13327_v51 = vpop.f32.mrf.mxu0  ;;  %13769 = vmatprep.mubr.msk.bf16.mxu1 %vm15194_vm0, %v20898_v20  ;;  %13900 = vmatpush3.bf16.msra.mxu0 %v15009_v18 }
 0x3d8   : > { %v16980_v19 = vadd.f32 %v3577_v3, %v3284_v63  ;;  %v13491_v15 = vpop.f32.mrf.mxu1  ;;  %13901 = vmatprep.subr.bf16.mxu0 %v20898_v20 }
 0x3d9   : > { %v3107_v60 = vpop.f32.mrf.mxu0  ;;  %v21126_v15 = vld [vmem:[#allocation37_spill] sm:$0xff] }
 0x3da   : > { %v3285_v52 = vadd.f32 %v3107_v60, %v21123_v28  ;;  %v3580_v41 = vpop.f32.mrf.mxu1 }
 0x3db   : > { %v13328_v17 = vpop.f32.mrf.mxu0 }
 0x3dc   : > { %v16983_v23 = vadd.f32 %v3580_v41, %v3285_v52  ;;  %v13492_v31 = vpop.f32.mrf.mxu1 }
 0x3dd   : > { %v3112_v8 = vpop.f32.mrf.mxu0  ;;  %13606 = vmatmul.mubr.bf16.gmra.mxu0 %v15140_v12  ;;  %v21127_v12 = vld [vmem:[#allocation39_spill] sm:$0xff] }
 0x3de   : > { %v3286_v26 = vadd.f32 %v3112_v8, %v21124_v45  ;;  %v3585_v37 = vpop.f32.mrf.mxu1  ;;  %13770 = vmatmul.mubr.bf16.gmra.mxu1 %v21125_v11  ;;  %13609 = vmatprep.mubr.msk.bf16.mxu0 %vm15194_vm0, %v20898_v20  ;;  %v15141_v8 = vld [vmem:[%s15304_s12 + $0x60] sm:$0xff]  }
 0x3df   : > { %v13331_v35 = vpop.f32.mrf.mxu0  ;;  %13773 = vmatprep.mubr.msk.bf16.mxu1 %vm15194_vm0, %v20898_v20 }
 0x3e0   : > { %v16992_v63 = vadd.f32 %v3585_v37, %v3286_v26  ;;  %v13495_v3 = vpop.f32.mrf.mxu1  ;;  %v21128_v37 = vld [vmem:[#allocation6_spill] sm:$0xff] }
 0x3e1   : > { %v3115_v51 = vpop.f32.mrf.mxu0 }
 0x3e2   : > { %v3287_v60 = vadd.f32 %v3115_v51, %v21126_v15  ;;  %v3588_v28 = vpop.f32.mrf.mxu1  ;;  %v21130_v51 = vld [vmem:[#allocation3_spill] sm:$0xff] }
 0x3e3   : > { %v13332_v52 = vpop.f32.mrf.mxu0 }
 0x3e4   : > { %v16999_v41 = vadd.f32 %v3588_v28, %v3287_v60  ;;  %v13496_v17 = vpop.f32.mrf.mxu1 }
 0x3e5   : > { %v3120_v31 = vpop.f32.mrf.mxu0  ;;  %13610 = vmatmul.mubr.bf16.gmra.mxu0 %v15141_v8  ;;  %v15142_v8 = vld [vmem:[%s15304_s12 + $0x68] sm:$0xff]  }
 0x3e6   : > { %v3288_v45 = vadd.f32 %v3120_v31, %v21127_v12  ;;  %v3593_v26 = vpop.f32.mrf.mxu1  ;;  %13774 = vmatmul.mubr.bf16.gmra.mxu1 %v21128_v37  ;;  %13613 = vmatprep.mubr.msk.bf16.mxu0 %vm15194_vm0, %v20898_v20  ;;  %v21132_v12 = vld [vmem:[#allocation40_spill] sm:$0xff] }
 0x3e7   : > { %v13335_v11 = vpop.f32.mrf.mxu0  ;;  %13777 = vmatprep.mubr.msk.bf16.mxu1 %vm15194_vm0, %v20898_v20 }
 0x3e8   : > { %v17008_v35 = vadd.f32 %v3593_v26, %v3288_v45  ;;  %v13499_v3 = vpop.f32.mrf.mxu1 }
 0x3e9   : > { %v3123_v18 = vpop.f32.mrf.mxu0 }
 0x3ea   : > { %21129 = vst [vmem:[#allocation24_spill] sm:$0xff] %v17008_v35  ;;  %v3289_v15 = vadd.f32 %v3123_v18, %v21130_v51  ;;  %v3596_v60 = vpop.f32.mrf.mxu1  ;;  %v21135_v51 = vld [vmem:[#allocation42_spill] sm:$0xff]  ;;  %v21138_v35 = vld [vmem:[#allocation8_spill] sm:$0xff] }
 0x3eb   : > { %v13336_v28 = vpop.f32.mrf.mxu0 }
 0x3ec   : > { %v17011_v52 = vadd.f32 %v3596_v60, %v3289_v15  ;;  %v13500_v17 = vpop.f32.mrf.mxu1 }
 0x3ed   : > { %v3128_v31 = vpop.f32.mrf.mxu0  ;;  %13614 = vmatmul.mubr.bf16.gmra.mxu0 %v15142_v8 }
 0x3ee   : > { %21131 = vst [vmem:[#allocation99_spill] sm:$0xff] %v17011_v52  ;;  %v3290_v37 = vadd.f32 %v3128_v31, %v21132_v12  ;;  %v3601_v11 = vpop.f32.mrf.mxu1  ;;  %13778 = vmatmul.mubr.bf16.gmra.mxu1 %v21133_v62  ;;  %13617 = vmatprep.mubr.msk.bf16.mxu0 %vm15194_vm0, %v20898_v20  ;;  %v15143_v62 = vld [vmem:[%s15304_s12 + $0x70] sm:$0xff]   ;;  %v21137_v12 = vld [vmem:[#allocation43_spill] sm:$0xff] }
 0x3ef   : > { %v13339_v45 = vpop.f32.mrf.mxu0  ;;  %13781 = vmatprep.mubr.msk.bf16.mxu1 %vm15194_vm0, %v20898_v20 }
 0x3f0   : > { %v17020_v26 = vadd.f32 %v3601_v11, %v3290_v37  ;;  %v13503_v3 = vpop.f32.mrf.mxu1 }
 0x3f1   : > { %v3131_v18 = vpop.f32.mrf.mxu0 }
 0x3f2   : > { %21134 = vst [vmem:[#allocation25_spill] sm:$0xff] %v17020_v26  ;;  %v3291_v15 = vadd.f32 %v3131_v18, %v21135_v51  ;;  %v3604_v60 = vpop.f32.mrf.mxu1  ;;  %v21140_v51 = vld [vmem:[#allocation45_spill] sm:$0xff] }
 0x3f3   : > { %v13340_v28 = vpop.f32.mrf.mxu0  ;;  %v21143_v26 = vld [vmem:[#allocation9_spill] sm:$0xff] }
 0x3f4   : > { %v17023_v17 = vadd.f32 %v3604_v60, %v3291_v15  ;;  %v13504_v31 = vpop.f32.mrf.mxu1 }
 0x3f5   : > { %v3136_v8 = vpop.f32.mrf.mxu0  ;;  %13618 = vmatmul.mubr.bf16.gmra.mxu0 %v15143_v62 }
 0x3f6   : > { %21136 = vst [vmem:[#allocation101_spill] sm:$0xff] %v17023_v17  ;;  %v3292_v45 = vadd.f32 %v3136_v8, %v21137_v12  ;;  %v3609_v52 = vpop.f32.mrf.mxu1  ;;  %13782 = vmatmul.mubr.bf16.gmra.mxu1 %v21138_v35  ;;  %13621 = vmatprep.mubr.msk.bf16.mxu0 %vm15194_vm0, %v20898_v20  ;;  %v15144_v35 = vld [vmem:[%s15304_s12 + $0x78] sm:$0xff]   ;;  %v21142_v12 = vld [vmem:[#allocation46_spill] sm:$0xff] }
 0x3f7   : > { %v13343_v37 = vpop.f32.mrf.mxu0  ;;  %13785 = vmatprep.mubr.msk.bf16.mxu1 %vm15194_vm0, %v20898_v20 }
 0x3f8   : > { %v17032_v11 = vadd.f32 %v3609_v52, %v3292_v45  ;;  %v13507_v3 = vpop.f32.mrf.mxu1 }
 0x3f9   : > { %v3139_v18 = vpop.f32.mrf.mxu0 }
 0x3fa   : > { %21139 = vst [vmem:[#allocation26_spill] sm:$0xff] %v17032_v11  ;;  %v3293_v15 = vadd.f32 %v3139_v18, %v21140_v51  ;;  %v3612_v60 = vpop.f32.mrf.mxu1  ;;  %v21145_v51 = vld [vmem:[#allocation48_spill] sm:$0xff] }
 0x3fb   : > { %v13344_v28 = vpop.f32.mrf.mxu0  ;;  %v21158_v11 = vld [vmem:[#allocation12_spill] sm:$0xff] }
 0x3fc   : > { %v17035_v31 = vadd.f32 %v3612_v60, %v3293_v15  ;;  %v13508_v8 = vpop.f32.mrf.mxu1 }
 0x3fd   : > { %v3144_v62 = vpop.f32.mrf.mxu0  ;;  %13622 = vmatmul.mubr.bf16.gmra.mxu0 %v15144_v35 }
 0x3fe   : > { %21141 = vst [vmem:[#allocation103_spill] sm:$0xff] %v17035_v31  ;;  %v3294_v17 = vadd.f32 %v3144_v62, %v21142_v12  ;;  %v3617_v37 = vpop.f32.mrf.mxu1  ;;  %13786 = vmatmul.mubr.bf16.gmra.mxu1 %v21143_v26  ;;  %13625 = vmatprep.mubr.msk.bf16.mxu0 %vm15194_vm0, %v20898_v20  ;;  %v15010_v26 = vld [vmem:[%s20633_s2 + $0x208] sm:$0xff]   ;;  %v15145_v12 = vld [vmem:[%s15304_s12 + $0x80] sm:$0xff]  }
 0x3ff   : > { %v13347_v52 = vpop.f32.mrf.mxu0  ;;  %13789 = vmatprep.mubr.msk.bf16.mxu1 %vm15194_vm0, %v20898_v20  ;;  %13902 = vmatpush3.bf16.msra.mxu0 %v15010_v26 }
 0x400   : > { %v17044_v45 = vadd.f32 %v3617_v37, %v3294_v17  ;;  %v13511_v3 = vpop.f32.mrf.mxu1  ;;  %v21147_v52 = vld [vmem:[#allocation49_spill] sm:$0xff]  ;;  %v21148_v37 = vld [vmem:[#allocation10_spill] sm:$0xff]  ;;  %13903 = vmatprep.subr.bf16.mxu0 %v20898_v20 }
 0x401   : > { %v3147_v18 = vpop.f32.mrf.mxu0 }
 0x402   : > { %21144 = vst [vmem:[#allocation27_spill] sm:$0xff] %v17044_v45  ;;  %v3295_v15 = vadd.f32 %v3147_v18, %v21145_v51  ;;  %v3620_v60 = vpop.f32.mrf.mxu1 }
 0x403   : > { %v13348_v28 = vpop.f32.mrf.mxu0 }
 0x404   : > { %v17047_v8 = vadd.f32 %v3620_v60, %v3295_v15  ;;  %v13512_v62 = vpop.f32.mrf.mxu1  ;;  %v21150_v60 = vld [vmem:[#allocation51_spill] sm:$0xff] }
 0x405   : > { %v3152_v35 = vpop.f32.mrf.mxu0  ;;  %13626 = vmatmul.mubr.bf16.gmra.mxu0 %v15145_v12 }
 0x406   : > { %21146 = vst [vmem:[#allocation105_spill] sm:$0xff] %v17047_v8  ;;  %v3296_v31 = vadd.f32 %v3152_v35, %v21147_v52  ;;  %v3625_v17 = vpop.f32.mrf.mxu1  ;;  %13790 = vmatmul.mubr.bf16.gmra.mxu1 %v21148_v37  ;;  %13629 = vmatprep.mubr.msk.bf16.mxu0 %vm15194_vm0, %v20898_v20  ;;  %v15146_v8 = vld [vmem:[%s15304_s12 + $0x88] sm:$0xff]  }
 0x407   : > { %v13351_v3 = vpop.f32.mrf.mxu0  ;;  %13793 = vmatprep.mubr.msk.bf16.mxu1 %vm15194_vm0, %v20898_v20 }
 0x408   : > { %v17059_v18 = vadd.f32 %v3625_v17, %v3296_v31  ;;  %v13515_v51 = vpop.f32.mrf.mxu1  ;;  %v21152_v3 = vld [vmem:[#allocation52_spill] sm:$0xff]  ;;  %v21153_v31 = vld [vmem:[#allocation11_spill] sm:$0xff] }
 0x409   : > { %v3155_v15 = vpop.f32.mrf.mxu0 }
 0x40a   : > { %21149 = vst [vmem:[#allocation30_spill] sm:$0xff] %v17059_v18  ;;  %v3297_v28 = vadd.f32 %v3155_v15, %v21150_v60  ;;  %v3628_v62 = vpop.f32.mrf.mxu1 }
 0x40b   : > { %v13352_v35 = vpop.f32.mrf.mxu0 }
 0x40c   : > { %v17063_v12 = vadd.f32 %v3628_v62, %v3297_v28  ;;  %v13516_v52 = vpop.f32.mrf.mxu1  ;;  %v21155_v28 = vld [vmem:[#allocation54_spill] sm:$0xff] }
 0x40d   : > { %v3160_v37 = vpop.f32.mrf.mxu0  ;;  %13630 = vmatmul.mubr.bf16.gmra.mxu0 %v15146_v8 }
 0x40e   : > { %21151 = vst [vmem:[#allocation31_spill] sm:$0xff] %v17063_v12  ;;  %v3298_v45 = vadd.f32 %v3160_v37, %v21152_v3  ;;  %v3633_v26 = vpop.f32.mrf.mxu1  ;;  %13794 = vmatmul.mubr.bf16.gmra.mxu1 %v21153_v31  ;;  %13633 = vmatprep.mubr.msk.bf16.mxu0 %vm15194_vm0, %v20898_v20  ;;  %v15147_v31 = vld [vmem:[%s15304_s12 + $0x90] sm:$0xff]   ;;  %v21157_v12 = vld [vmem:[#allocation55_spill] sm:$0xff] }
 0x40f   : > { %v13355_v17 = vpop.f32.mrf.mxu0  ;;  %13797 = vmatprep.mubr.msk.bf16.mxu1 %vm15194_vm0, %v20898_v20 }
 0x410   : > { %v17072_v51 = vadd.f32 %v3633_v26, %v3298_v45  ;;  %v13519_v15 = vpop.f32.mrf.mxu1 }
 0x411   : > { %v3163_v60 = vpop.f32.mrf.mxu0 }
 0x412   : > { %21154 = vst [vmem:[#allocation108_spill] sm:$0xff] %v17072_v51  ;;  %v3299_v62 = vadd.f32 %v3163_v60, %v21155_v28  ;;  %v3636_v8 = vpop.f32.mrf.mxu1  ;;  %v21160_v28 = vld [vmem:[#allocation57_spill] sm:$0xff] }
 0x413   : > { %v13356_v35 = vpop.f32.mrf.mxu0  ;;  %v21163_v51 = vld [vmem:[#allocation13_spill] sm:$0xff] }
 0x414   : > { %v17075_v52 = vadd.f32 %v3636_v8, %v3299_v62  ;;  %v13520_v37 = vpop.f32.mrf.mxu1 }
 0x415   : > { %v3168_v3 = vpop.f32.mrf.mxu0  ;;  %13634 = vmatmul.mubr.bf16.gmra.mxu0 %v15147_v31  ;;  %v21162_v31 = vld [vmem:[#allocation58_spill] sm:$0xff] }
 0x416   : > { %21156 = vst [vmem:[#allocation110_spill] sm:$0xff] %v17075_v52  ;;  %v3300_v17 = vadd.f32 %v3168_v3, %v21157_v12  ;;  %v3641_v18 = vpop.f32.mrf.mxu1  ;;  %13798 = vmatmul.mubr.bf16.gmra.mxu1 %v21158_v11  ;;  %13637 = vmatprep.mubr.msk.bf16.mxu0 %vm15194_vm0, %v20898_v20  ;;  %v15148_v11 = vld [vmem:[%s15304_s12 + $0x98] sm:$0xff]  }
 0x417   : > { %v13359_v45 = vpop.f32.mrf.mxu0  ;;  %13801 = vmatprep.mubr.msk.bf16.mxu1 %vm15194_vm0, %v20898_v20 }
 0x418   : > { %v17084_v26 = vadd.f32 %v3641_v18, %v3300_v17  ;;  %v13523_v15 = vpop.f32.mrf.mxu1 }
 0x419   : > { %v3171_v60 = vpop.f32.mrf.mxu0 }
 0x41a   : > { %21159 = vst [vmem:[#allocation34_spill] sm:$0xff] %v17084_v26  ;;  %v3301_v62 = vadd.f32 %v3171_v60, %v21160_v28  ;;  %v3644_v8 = vpop.f32.mrf.mxu1  ;;  %v21165_v28 = vld [vmem:[#allocation60_spill] sm:$0xff]  ;;  %v21168_v26 = vld [vmem:[#allocation14_spill] sm:$0xff] }
 0x41b   : > { %v13360_v35 = vpop.f32.mrf.mxu0 }
 0x41c   : > { %v17087_v37 = vadd.f32 %v3644_v8, %v3301_v62  ;;  %v13524_v12 = vpop.f32.mrf.mxu1 }
 0x41d   : > { %v3176_v3 = vpop.f32.mrf.mxu0  ;;  %13638 = vmatmul.mubr.bf16.gmra.mxu0 %v15148_v11 }
 0x41e   : > { %21161 = vst [vmem:[#allocation4_spill] sm:$0xff] %v17087_v37  ;;  %v3302_v45 = vadd.f32 %v3176_v3, %v21162_v31  ;;  %v3649_v52 = vpop.f32.mrf.mxu1  ;;  %13802 = vmatmul.mubr.bf16.gmra.mxu1 %v21163_v51  ;;  %13641 = vmatprep.mubr.msk.bf16.mxu0 %vm15194_vm0, %v20898_v20  ;;  %v15149_v51 = vld [vmem:[%s15304_s12 + $0xa0] sm:$0xff]   ;;  %v21167_v31 = vld [vmem:[#allocation61_spill] sm:$0xff] }
 0x41f   : > { %v13363_v18 = vpop.f32.mrf.mxu0  ;;  %13805 = vmatprep.mubr.msk.bf16.mxu1 %vm15194_vm0, %v20898_v20 }
 0x420   : > { %v17096_v17 = vadd.f32 %v3649_v52, %v3302_v45  ;;  %v13527_v15 = vpop.f32.mrf.mxu1 }
 0x421   : > { %v3179_v60 = vpop.f32.mrf.mxu0 }
 0x422   : > { %21164 = vst [vmem:[#allocation36_spill] sm:$0xff] %v17096_v17  ;;  %v3303_v62 = vadd.f32 %v3179_v60, %v21165_v28  ;;  %v3652_v8 = vpop.f32.mrf.mxu1  ;;  %v21170_v28 = vld [vmem:[#allocation63_spill] sm:$0xff]  ;;  %v21178_v17 = vld [vmem:[#allocation16_spill] sm:$0xff] }
 0x423   : > { %v13364_v35 = vpop.f32.mrf.mxu0 }
 0x424   : > { %v17099_v12 = vadd.f32 %v3652_v8, %v3303_v62  ;;  %v13528_v3 = vpop.f32.mrf.mxu1  ;;  %v15011_v35 = vld [vmem:[%s20633_s2 + $0x200] sm:$0xff]  }
 0x425   : > { %v3184_v11 = vpop.f32.mrf.mxu0  ;;  %13642 = vmatmul.mubr.bf16.gmra.mxu0 %v15149_v51 }
 0x426   : > { %21166 = vst [vmem:[#allocation2_spill] sm:$0xff] %v17099_v12  ;;  %v3304_v37 = vadd.f32 %v3184_v11, %v21167_v31  ;;  %v3657_v18 = vpop.f32.mrf.mxu1  ;;  %13806 = vmatmul.mubr.bf16.gmra.mxu1 %v21168_v26  ;;  %13645 = vmatprep.mubr.msk.bf16.mxu0 %vm15194_vm0, %v20898_v20  ;;  %v15150_v31 = vld [vmem:[%s15304_s12 + $0xa8] sm:$0xff]  }
 0x427   : > { %v13367_v52 = vpop.f32.mrf.mxu0  ;;  %13809 = vmatprep.mubr.msk.bf16.mxu1 %vm15194_vm0, %v20898_v20  ;;  %13904 = vmatpush3.bf16.msra.mxu0 %v15011_v35  ;;  %v21175_v35 = vld [vmem:[#allocation66_spill] sm:$0xff] }
 0x428   : > { %v17108_v45 = vadd.f32 %v3657_v18, %v3304_v37  ;;  %v13531_v15 = vpop.f32.mrf.mxu1  ;;  %v21172_v52 = vld [vmem:[#allocation64_spill] sm:$0xff] }
 0x429   : > { %v3187_v60 = vpop.f32.mrf.mxu0  ;;  %v21173_v15 = vld [vmem:[#allocation15_spill] sm:$0xff] }
 0x42a   : > { %21169 = vst [vmem:[#allocation5_spill] sm:$0xff] %v17108_v45  ;;  %v3305_v62 = vadd.f32 %v3187_v60, %v21170_v28  ;;  %v3660_v8 = vpop.f32.mrf.mxu1  ;;  %v21177_v45 = vld [vmem:[#allocation67_spill] sm:$0xff] }
 0x42b   : > { %v13368_v3 = vpop.f32.mrf.mxu0 }
 0x42c   : > { %v17114_v26 = vadd.f32 %v3660_v8, %v3305_v62  ;;  %v13532_v11 = vpop.f32.mrf.mxu1 }
 0x42d   : > { %v3192_v51 = vpop.f32.mrf.mxu0  ;;  %13646 = vmatmul.mubr.bf16.gmra.mxu0 %v15150_v31 }
 0x42e   : > { %21171 = vst [vmem:[#allocation37_spill] sm:$0xff] %v17114_v26  ;;  %v3306_v37 = vadd.f32 %v3192_v51, %v21172_v52  ;;  %v3665_v18 = vpop.f32.mrf.mxu1  ;;  %13810 = vmatmul.mubr.bf16.gmra.mxu1 %v21173_v15  ;;  %13649 = vmatprep.mubr.msk.bf16.mxu0 %vm15194_vm0, %v20898_v20  ;;  %v15151_v15 = vld [vmem:[%s15304_s12 + $0xb0] sm:$0xff]  }
 0x42f   : > { %v13371_v60 = vpop.f32.mrf.mxu0  ;;  %13813 = vmatprep.mubr.msk.bf16.mxu1 %vm15194_vm0, %v20898_v20 }
 0x430   : > { %v17123_v28 = vadd.f32 %v3665_v18, %v3306_v37  ;;  %v13535_v62 = vpop.f32.mrf.mxu1 }
 0x431   : > { %v3195_v8 = vpop.f32.mrf.mxu0 }
 0x432   : > { %21174 = vst [vmem:[#allocation39_spill] sm:$0xff] %v17123_v28  ;;  %v3307_v3 = vadd.f32 %v3195_v8, %v21175_v35  ;;  %v3668_v11 = vpop.f32.mrf.mxu1  ;;  %v21179_v35 = vld [vmem:[#allocation69_spill] sm:$0xff] }
 0x433   : > { %v13372_v31 = vpop.f32.mrf.mxu0  ;;  %v21182_v28 = vld [vmem:[#allocation17_spill] sm:$0xff] }
 0x434   : > { %v17126_v26 = vadd.f32 %v3668_v11, %v3307_v3  ;;  %v13536_v51 = vpop.f32.mrf.mxu1 }
 0x435   : > { %v3200_v52 = vpop.f32.mrf.mxu0  ;;  %13650 = vmatmul.mubr.bf16.gmra.mxu0 %v15151_v15  ;;  %v21181_v15 = vld [vmem:[#allocation70_spill] sm:$0xff] }
 0x436   : > { %21176 = vst [vmem:[#allocation6_spill] sm:$0xff] %v17126_v26  ;;  %v3308_v60 = vadd.f32 %v3200_v52, %v21177_v45  ;;  %v3673_v12 = vpop.f32.mrf.mxu1  ;;  %13814 = vmatmul.mubr.bf16.gmra.mxu1 %v21178_v17  ;;  %13653 = vmatprep.mubr.msk.bf16.mxu0 %vm15194_vm0, %v20898_v20  ;;  %v15152_v17 = vld [vmem:[%s15304_s12 + $0xb8] sm:$0xff]  }
 0x437   : > { %v13375_v37 = vpop.f32.mrf.mxu0  ;;  %13817 = vmatprep.mubr.msk.bf16.mxu1 %vm15194_vm0, %v20898_v20 }
 0x438   : > { %v17135_v18 = vadd.f32 %v3673_v12, %v3308_v60  ;;  %v13539_v62 = vpop.f32.mrf.mxu1 }
 0x439   : > { %v3203_v8 = vpop.f32.mrf.mxu0 }
 0x43a   : > { %v3309_v3 = vadd.f32 %v3203_v8, %v21179_v35  ;;  %v3676_v11 = vpop.f32.mrf.mxu1  ;;  %v21183_v35 = vld [vmem:[#allocation72_spill] sm:$0xff] }
 0x43b   : > { %v13376_v31 = vpop.f32.mrf.mxu0 }
 0x43c   : > { %v17138_v51 = vadd.f32 %v3676_v11, %v3309_v3  ;;  %v13540_v45 = vpop.f32.mrf.mxu1 }
 0x43d   : > { %v3208_v52 = vpop.f32.mrf.mxu0  ;;  %13654 = vmatmul.mubr.bf16.gmra.mxu0 %v15152_v17 }
 0x43e   : > { %21180 = vst [vmem:[#allocation3_spill] sm:$0xff] %v17138_v51  ;;  %v3310_v37 = vadd.f32 %v3208_v52, %v21181_v15  ;;  %v3681_v26 = vpop.f32.mrf.mxu1  ;;  %13818 = vmatmul.mubr.bf16.gmra.mxu1 %v21182_v28  ;;  %13657 = vmatprep.mubr.msk.bf16.mxu0 %vm15194_vm0, %v20898_v20  ;;  %v15153_v28 = vld [vmem:[%s15304_s12 + $0xc0] sm:$0xff]   ;;  %v21185_v15 = vld [vmem:[#allocation73_spill] sm:$0xff] }
 0x43f   : > { %v13379_v12 = vpop.f32.mrf.mxu0  ;;  %13821 = vmatprep.mubr.msk.bf16.mxu1 %vm15194_vm0, %v20898_v20 }
 0x440   : > { %v17147_v60 = vadd.f32 %v3681_v26, %v3310_v37  ;;  %v13543_v62 = vpop.f32.mrf.mxu1 }
 0x441   : > { %v3211_v8 = vpop.f32.mrf.mxu0 }
 0x442   : > { %v3311_v3 = vadd.f32 %v3211_v8, %v21183_v35  ;;  %v3684_v11 = vpop.f32.mrf.mxu1  ;;  %v21186_v35 = vld [vmem:[#allocation75_spill] sm:$0xff] }
 0x443   : > { %v13380_v31 = vpop.f32.mrf.mxu0 }
 0x444   : > { %v17150_v45 = vadd.f32 %v3684_v11, %v3311_v3  ;;  %v13544_v52 = vpop.f32.mrf.mxu1 }
 0x445   : > { %v3216_v17 = vpop.f32.mrf.mxu0  ;;  %13658 = vmatmul.mubr.bf16.gmra.mxu0 %v15153_v28 }
 0x446   : > { %21184 = vst [vmem:[#allocation40_spill] sm:$0xff] %v17150_v45  ;;  %v3312_v12 = vadd.f32 %v3216_v17, %v21185_v15  ;;  %v3689_v51 = vpop.f32.mrf.mxu1  ;;  %13822 = vmatmul.mubr.bf16.gmra.mxu1 %v21077_v29  ;;  %13661 = vmatprep.mubr.msk.bf16.mxu0 %vm15194_vm0, %v20898_v20  ;;  %v15154_v29 = vld [vmem:[%s15304_s12 + $0xc8] sm:$0xff]   ;;  %v21187_v15 = vld [vmem:[#allocation76_spill] sm:$0xff] }
 0x447   : > { %v13383_v26 = vpop.f32.mrf.mxu0  ;;  %13825 = vmatprep.mubr.msk.bf16.mxu1 %vm15194_vm0, %v20898_v20 }
 0x448   : > { %v17159_v37 = vadd.f32 %v3689_v51, %v3312_v12  ;;  %v13547_v62 = vpop.f32.mrf.mxu1 }
 0x449   : > { %v3219_v8 = vpop.f32.mrf.mxu0 }
 0x44a   : > { %v3313_v3 = vadd.f32 %v3219_v8, %v21186_v35  ;;  %v3692_v11 = vpop.f32.mrf.mxu1  ;;  %v21188_v35 = vld [vmem:[#allocation78_spill] sm:$0xff] }
 0x44b   : > { %v13384_v31 = vpop.f32.mrf.mxu0 }
 0x44c   : > { %v17162_v52 = vadd.f32 %v3692_v11, %v3313_v3  ;;  %v13548_v17 = vpop.f32.mrf.mxu1 }
 0x44d   : > { %v3224_v28 = vpop.f32.mrf.mxu0  ;;  %13662 = vmatmul.mubr.bf16.gmra.mxu0 %v15154_v29 }
 0x44e   : > { %v3314_v26 = vadd.f32 %v3224_v28, %v21187_v15  ;;  %v3697_v45 = vpop.f32.mrf.mxu1  ;;  %13826 = vmatmul.mubr.bf16.gmra.mxu1 %v21081_v10  ;;  %13665 = vmatprep.mubr.msk.bf16.mxu0 %vm15194_vm0, %v20898_v20  ;;  %v15155_v10 = vld [vmem:[%s15304_s12 + $0xd0] sm:$0xff]  }
 0x44f   : > { %v13387_v51 = vpop.f32.mrf.mxu0  ;;  %13829 = vmatprep.mubr.msk.bf16.mxu1 %vm15194_vm0, %v20898_v20 }
 0x450   : > { %v17171_v12 = vadd.f32 %v3697_v45, %v3314_v26  ;;  %v13551_v62 = vpop.f32.mrf.mxu1 }
 0x451   : > { %v3227_v8 = vpop.f32.mrf.mxu0 }
 0x452   : > { %v3315_v3 = vadd.f32 %v3227_v8, %v21188_v35  ;;  %v3700_v11 = vpop.f32.mrf.mxu1 }
 0x453   : > { %v13388_v31 = vpop.f32.mrf.mxu0 }
 0x454   : > { %v17174_v17 = vadd.f32 %v3700_v11, %v3315_v3  ;;  %v13552_v28 = vpop.f32.mrf.mxu1 }
 0x455   : > { %v3232_v29 = vpop.f32.mrf.mxu0  ;;  %13666 = vmatmul.mubr.bf16.gmra.mxu0 %v15155_v10 }
 0x456   : > { %v3316_v15 = vadd.f32 %v3232_v29, %v16684_v38  ;;  %v3705_v51 = vpop.f32.mrf.mxu1  ;;  %13830 = vmatmul.mubr.bf16.gmra.mxu1 %v21084_v42  ;;  %13669 = vmatprep.mubr.msk.bf16.mxu0 %vm15194_vm0, %v20898_v20  ;;  %v15156_v42 = vld [vmem:[%s15304_s12 + $0xd8] sm:$0xff]   ;;  %v21189_v29 = vld [vmem:[#allocation79_spill] sm:$0xff] }
 0x457   : > { %v13391_v45 = vpop.f32.mrf.mxu0  ;;  %13833 = vmatprep.mubr.msk.bf16.mxu1 %vm15194_vm0, %v20898_v20 }
 0x458   : > { %v17183_v26 = vadd.f32 %v3705_v51, %v3316_v15  ;;  %v13555_v62 = vpop.f32.mrf.mxu1 }
 0x459   : > { %v3235_v8 = vpop.f32.mrf.mxu0 }
 0x45a   : > { %v3317_v35 = vadd.f32 %v3235_v8, %v16687_v49  ;;  %v3708_v3 = vpop.f32.mrf.mxu1 }
 0x45b   : > { %v13392_v11 = vpop.f32.mrf.mxu0 }
 0x45c   : > { %v17186_v31 = vadd.f32 %v3708_v3, %v3317_v35  ;;  %v13556_v38 = vpop.f32.mrf.mxu1 }
 0x45d   : > { %v3240_v28 = vpop.f32.mrf.mxu0  ;;  %13670 = vmatmul.mubr.bf16.gmra.mxu0 %v15156_v42  ;;  %v15157_v38 = vld [vmem:[%s15304_s12 + $0xe0] sm:$0xff]  }
 0x45e   : > { %v3318_v10 = vadd.f32 %v3240_v28, %v21189_v29  ;;  %v3713_v45 = vpop.f32.mrf.mxu1  ;;  %13834 = vmatmul.mubr.bf16.gmra.mxu1 %v21087_v54  ;;  %13673 = vmatprep.mubr.msk.bf16.mxu0 %vm15194_vm0, %v20898_v20 }
 0x45f   : > { %v13395_v15 = vpop.f32.mrf.mxu0  ;;  %13837 = vmatprep.mubr.msk.bf16.mxu1 %vm15194_vm0, %v20898_v20 }
 0x460   : > { %v17195_v49 = vadd.f32 %v3713_v45, %v3318_v10  ;;  %v13559_v51 = vpop.f32.mrf.mxu1  ;;  %v21190_v15 = vld [vmem:[#allocation81_spill] sm:$0xff] }
 0x461   : > { %v3243_v62 = vpop.f32.mrf.mxu0 }
 0x462   : > { %v3716_v8 = vpop.f32.mrf.mxu1 }
 0x463   : > { %v13396_v35 = vpop.f32.mrf.mxu0 }
 0x464   : > { %v13560_v3 = vpop.f32.mrf.mxu1 }
 0x465   : > { %v3902_v11 = vpop.f32.mrf.mxu0  ;;  %13674 = vmatmul.mubr.bf16.gmra.mxu0 %v15157_v38 }
 0x466   : > { %v4196_v54 = vadd.f32 %v3902_v11, %v16705_v50  ;;  %v4390_v28 = vpop.f32.mrf.mxu1  ;;  %13838 = vmatmul.mubr.bf16.gmra.mxu1 %v21090_v21  ;;  %13677 = vmatprep.mubr.msk.bf16.mxu0 %vm15194_vm0, %v20898_v20  ;;  %v15158_v21 = vld [vmem:[%s15304_s12 + $0xe8] sm:$0xff]  }
 0x467   : > { %v13579_v42 = vpop.f32.mrf.mxu0  ;;  %13841 = vmatprep.mubr.msk.bf16.mxu1 %vm15194_vm0, %v20898_v20 }
 0x468   : > { %v17204_v29 = vadd.f32 %v4390_v28, %v4196_v54  ;;  %v13743_v10 = vpop.f32.mrf.mxu1 }
 0x469   : > { %v3905_v45 = vpop.f32.mrf.mxu0 }
 0x46a   : > { %v4197_v51 = vadd.f32 %v3905_v45, %v21190_v15  ;;  %v4393_v62 = vpop.f32.mrf.mxu1  ;;  %v21191_v45 = vld [vmem:[#allocation82_spill] sm:$0xff] }
 0x46b   : > { %v13580_v8 = vpop.f32.mrf.mxu0 }
 0x46c   : > { %v17207_v35 = vadd.f32 %v4393_v62, %v4197_v51  ;;  %v13744_v50 = vpop.f32.mrf.mxu1 }
 0x46d   : > { %v3910_v3 = vpop.f32.mrf.mxu0  ;;  %13678 = vmatmul.mubr.bf16.gmra.mxu0 %v15158_v21 }
 0x46e   : > { %v4198_v11 = vadd.f32 %v3910_v3, %v16717_v7  ;;  %v4398_v38 = vpop.f32.mrf.mxu1  ;;  %13842 = vmatmul.mubr.bf16.gmra.mxu1 %v21093_v48  ;;  %13681 = vmatprep.mubr.msk.bf16.mxu0 %vm15194_vm0, %v20898_v20  ;;  %v15159_v48 = vld [vmem:[%s15304_s12 + $0xf0] sm:$0xff]  }
 0x46f   : > { %v13583_v54 = vpop.f32.mrf.mxu0  ;;  %13845 = vmatprep.mubr.msk.bf16.mxu1 %vm15194_vm0, %v20898_v20 }
 0x470   : > { %v17216_v28 = vadd.f32 %v4398_v38, %v4198_v11  ;;  %v13747_v42 = vpop.f32.mrf.mxu1 }
 0x471   : > { %v3913_v10 = vpop.f32.mrf.mxu0 }
 0x472   : > { %v4199_v15 = vadd.f32 %v3913_v10, %v21191_v45  ;;  %v4401_v51 = vpop.f32.mrf.mxu1  ;;  %v21192_v10 = vld [vmem:[#allocation84_spill] sm:$0xff] }
 0x473   : > { %v13584_v62 = vpop.f32.mrf.mxu0 }
 0x474   : > { %v17219_v8 = vadd.f32 %v4401_v51, %v4199_v15  ;;  %v13748_v7 = vpop.f32.mrf.mxu1 }
 0x475   : > { %v3918_v50 = vpop.f32.mrf.mxu0  ;;  %13682 = vmatmul.mubr.bf16.gmra.mxu0 %v15159_v48 }
 0x476   : > { %v4200_v3 = vadd.f32 %v3918_v50, %v16729_v14  ;;  %v4406_v21 = vpop.f32.mrf.mxu1  ;;  %13846 = vmatmul.mubr.bf16.gmra.mxu1 %v21096_v22  ;;  %13685 = vmatprep.mubr.msk.bf16.mxu0 %vm15194_vm0, %v20898_v20  ;;  %v15160_v22 = vld [vmem:[%s15304_s12 + $0xf8] sm:$0xff]  }
 0x477   : > { %v13587_v11 = vpop.f32.mrf.mxu0  ;;  %13849 = vmatprep.mubr.msk.bf16.mxu1 %vm15194_vm0, %v20898_v20 }
 0x478   : > { %v17228_v38 = vadd.f32 %v4406_v21, %v4200_v3  ;;  %v13751_v54 = vpop.f32.mrf.mxu1 }
 0x479   : > { %v3921_v42 = vpop.f32.mrf.mxu0 }
 0x47a   : > { %v4201_v45 = vadd.f32 %v3921_v42, %v21192_v10  ;;  %v4409_v15 = vpop.f32.mrf.mxu1  ;;  %v21193_v42 = vld [vmem:[#allocation18_spill] sm:$0xff] }
 0x47b   : > { %v13588_v51 = vpop.f32.mrf.mxu0 }
 0x47c   : > { %v17231_v62 = vadd.f32 %v4409_v15, %v4201_v45  ;;  %v13752_v14 = vpop.f32.mrf.mxu1 }
 0x47d   : > { %v3926_v7 = vpop.f32.mrf.mxu0  ;;  %13686 = vmatmul.mubr.bf16.gmra.mxu0 %v15160_v22 }
 0x47e   : > { %v4202_v50 = vadd.f32 %v3926_v7, %v16741_v46  ;;  %v4414_v48 = vpop.f32.mrf.mxu1  ;;  %13850 = vmatmul.mubr.bf16.gmra.mxu1 %v21099_v58  ;;  %13689 = vmatprep.mubr.msk.bf16.mxu0 %vm15194_vm0, %v20898_v20  ;;  %v15015_v46 = vld [vmem:[%s20635_s4 + $0x78] sm:$0xff]   ;;  %v15161_v7 = vld [vmem:[%s15304_s12 + $0x100] sm:$0xff]  }
 0x47f   : > { %v13591_v3 = vpop.f32.mrf.mxu0  ;;  %13853 = vmatprep.mubr.msk.bf16.mxu1 %vm15194_vm0, %v20898_v20  ;;  %14053 = vmatprep.subr.bf16.mxu1 %v15015_v46 }
 0x480   : > { %v17240_v21 = vadd.f32 %v4414_v48, %v4202_v50  ;;  %v13755_v11 = vpop.f32.mrf.mxu1  ;;  %14054 = vmatpush3.bf16.msra.mxu1 %v15015_v46 }
 0x481   : > { %v3929_v54 = vpop.f32.mrf.mxu0 }
 0x482   : > { %v4203_v10 = vadd.f32 %v3929_v54, %v21193_v42  ;;  %v4417_v45 = vpop.f32.mrf.mxu1  ;;  %v21194_v42 = vld [vmem:[#allocation85_spill] sm:$0xff] }
 0x483   : > { %v13592_v15 = vpop.f32.mrf.mxu0 }
 0x484   : > { %v17246_v58 = vadd.f32 %v4417_v45, %v4203_v10  ;;  %v13756_v51 = vpop.f32.mrf.mxu1 }
 0x485   : > { %v3934_v14 = vpop.f32.mrf.mxu0  ;;  %13690 = vmatmul.mubr.bf16.gmra.mxu0 %v15161_v7  ;;  %v5383_v51 = vld [vmem:[%s20632_s1] sm:$0xff]  ;;  %v15162_v7 = vld [vmem:[%s15304_s12 + $0x108] sm:$0xff]  }
 0x486   : > { %v4204_v22 = vadd.f32 %v3934_v14, %v16753_v56  ;;  %v4422_v50 = vpop.f32.mrf.mxu1  ;;  %13854 = vmatmul.mubr.bf16.gmra.mxu1 %v21102_v39  ;;  %13693 = vmatprep.mubr.msk.bf16.mxu0 %vm15194_vm0, %v20898_v20  ;;  %v15195_v39 = vmov 0  }
 0x487   : > { %v13595_v48 = vpop.f32.mrf.mxu0  ;;  %13857 = vmatprep.mubr.msk.bf16.mxu1 %vm15194_vm0, %v20898_v20  ;;  %14897 = vset.pattern.permute.xlu0 %v15195_v39 }
 0x488   : > { %v17255_v3 = vadd.f32 %v4422_v50, %v4204_v22  ;;  %v13759_v11 = vpop.f32.mrf.mxu1  ;;  %14898 = vset.pattern.permute.xlu1 %v15195_v39  ;;  %5458 = vperm.xlu0 %14897, %v5383_v51  }
 0x489   : > { %v3937_v54 = vpop.f32.mrf.mxu0 }
 0x48a   : > { %v4205_v10 = vadd.f32 %v3937_v54, %v21194_v42  ;;  %v4425_v45 = vpop.f32.mrf.mxu1  ;;  %v5385_v42 = vld [vmem:[%s20632_s1 + $0x10] sm:$0xff] }
 0x48b   : > { %v13596_v46 = vpop.f32.mrf.mxu0  ;;  %5468 = vperm.xlu1 %14898, %v5385_v42   ;;  %v21196_v42 = vld [vmem:[#allocation29_spill] sm:$0xff] }
 0x48c   : > { %v17258_v56 = vadd.f32 %v4425_v45, %v4205_v10  ;;  %v13760_v15 = vpop.f32.mrf.mxu1  ;;  %v21195_v10 = vld [vmem:[#allocation87_spill] sm:$0xff] }
 0x48d   : > { %v3942_v14 = vpop.f32.mrf.mxu0  ;;  %13694 = vmatmul.mubr.bf16.gmra.mxu0 %v15162_v7  ;;  %v5387_v7 = vld [vmem:[%s20632_s1 + $0x20] sm:$0xff] }
 0x48e   : > { %v4206_v22 = vadd.f32 %v3942_v14, %v16765_v30  ;;  %v4430_v50 = vpop.f32.mrf.mxu1  ;;  %13858 = vmatmul.mubr.bf16.gmra.mxu1 %v21105_v27  ;;  %13697 = vmatprep.mubr.msk.bf16.mxu0 %vm15194_vm0, %v20898_v20  ;;  %v5384_v30 = vld [vmem:[%s20632_s1 + $0x8] sm:$0xff]  ;;  %v5386_v14 = vld [vmem:[%s20632_s1 + $0x18] sm:$0xff] }
 0x48f   : > { %v13599_v48 = vpop.f32.mrf.mxu0  ;;  %13861 = vmatprep.mubr.msk.bf16.mxu1 %vm15194_vm0, %v20898_v20  ;;  %5463 = vperm.xlu0 %14897, %v5384_v30  }
 0x490   : > { %v17270_v11 = vadd.f32 %v4430_v50, %v4206_v22  ;;  %v13763_v54 = vpop.f32.mrf.mxu1  ;;  %v15163_v50 = vld [vmem:[%s15304_s12 + $0x110] sm:$0xff]   ;;  %5473 = vperm.xlu1 %14898, %v5386_v14  }
 0x491   : > { %v3945_v27 = vpop.f32.mrf.mxu0 }
 0x492   : > { %v4207_v45 = vadd.f32 %v3945_v27, %v21195_v10  ;;  %v4433_v46 = vpop.f32.mrf.mxu1 }
 0x493   : > { %v13600_v15 = vpop.f32.mrf.mxu0  ;;  %5478 = vperm.xlu0 %14897, %v5387_v7  }
 0x494   : > { %v17279_v39 = vadd.f32 %v4433_v46, %v4207_v45  ;;  %v13764_v51 = vpop.f32.mrf.mxu1  ;;  %v5388_v45 = vld [vmem:[%s20632_s1 + $0x28] sm:$0xff] }
 0x495   : > { %v3950_v22 = vpop.f32.mrf.mxu0  ;;  %13698 = vmatmul.mubr.bf16.gmra.mxu0 %v15163_v50  ;;  %5483 = vperm.xlu1 %14898, %v5388_v45   ;;  %v21197_v15 = vld [vmem:[#allocation19_spill] sm:$0xff] }
 0x496   : > { %v4208_v48 = vadd.f32 %v3950_v22, %v16777_v44  ;;  %v4438_v54 = vpop.f32.mrf.mxu1  ;;  %13862 = vmatmul.mubr.bf16.gmra.mxu1 %v21196_v42  ;;  %13701 = vmatprep.mubr.msk.bf16.mxu0 %vm15194_vm0, %v20898_v20  ;;  %v5389_v44 = vld [vmem:[%s20632_s1 + $0x30] sm:$0xff] }
 0x497   : > { %v13603_v30 = vpop.f32.mrf.mxu0  ;;  %13865 = vmatprep.mubr.msk.bf16.mxu1 %vm15194_vm0, %v20898_v20  ;;  %5488 = vperm.xlu0 %14897, %v5389_v44  }
 0x498   : > { %v17294_v27 = vadd.f32 %v4438_v54, %v4208_v48  ;;  %v13767_v10 = vpop.f32.mrf.mxu1  ;;  %v5390_v48 = vld [vmem:[%s20632_s1 + $0x38] sm:$0xff]  ;;  %v5391_v54 = vld [vmem:[%s20632_s1 + $0x40] sm:$0xff] }
 0x499   : > { %v3953_v46 = vpop.f32.mrf.mxu0  ;;  %v15164_v30 = vld [vmem:[%s15304_s12 + $0x118] sm:$0xff]   ;;  %5493 = vperm.xlu1 %14898, %v5390_v48   ;;  %v21198_v10 = vld [vmem:[#allocation88_spill] sm:$0xff] }
 0x49a   : > { %v4209_v51 = vadd.f32 %v3953_v46, %v21197_v15  ;;  %v4441_v14 = vpop.f32.mrf.mxu1 }
 0x49b   : > { %v13604_v22 = vpop.f32.mrf.mxu0  ;;  %5498 = vperm.xlu0 %14897, %v5391_v54  }
 0x49c   : > { %v17303_v7 = vadd.f32 %v4441_v14, %v4209_v51  ;;  %v13768_v50 = vpop.f32.mrf.mxu1  ;;  %v5392_v14 = vld [vmem:[%s20632_s1 + $0x48] sm:$0xff]  ;;  %v5393_v22 = vld [vmem:[%s20632_s1 + $0x50] sm:$0xff] }
 0x49d   : > { %v3958_v42 = vpop.f32.mrf.mxu0  ;;  %13702 = vmatmul.mubr.bf16.gmra.mxu0 %v15164_v30  ;;  %5503 = vperm.xlu1 %14898, %v5392_v14   ;;  %v21200_v50 = vld [vmem:[#allocation20_spill] sm:$0xff] }
 0x49e   : > { %v4210_v45 = vadd.f32 %v3958_v42, %v21198_v10  ;;  %v4446_v46 = vpop.f32.mrf.mxu1  ;;  %13866 = vmatmul.mubr.bf16.gmra.mxu1 %v21111_v61  ;;  %13705 = vmatprep.mubr.msk.bf16.mxu0 %vm15194_vm0, %v20898_v20 }
 0x49f   : > { %v13607_v44 = vpop.f32.mrf.mxu0  ;;  %13869 = vmatprep.mubr.msk.bf16.mxu1 %vm15194_vm0, %v20898_v20  ;;  %5508 = vperm.xlu0 %14897, %v5393_v22   ;;  %v15016_v22 = vld [vmem:[%s20635_s4 + $0x70] sm:$0xff]  }
 0x4a0   : > { %v17318_v15 = vadd.f32 %v4446_v46, %v4210_v45  ;;  %v13771_v51 = vpop.f32.mrf.mxu1  ;;  %v5394_v45 = vld [vmem:[%s20632_s1 + $0x58] sm:$0xff]  ;;  %v5395_v46 = vld [vmem:[%s20632_s1 + $0x60] sm:$0xff]  ;;  %14055 = vmatprep.subr.bf16.mxu1 %v15016_v22 }
 0x4a1   : > { %v3961_v61 = vpop.f32.mrf.mxu0  ;;  %v21202_v51 = vld [vmem:[#allocation28_spill] sm:$0xff]  ;;  %5513 = vperm.xlu1 %14898, %v5394_v45   ;;  %14056 = vmatpush3.bf16.msra.mxu1 %v15016_v22  ;;  %v21204_v45 = vld [vmem:[#allocation91_spill] sm:$0xff]  ;;  %v5399_v22 = vld [vmem:[%s20632_s1 + $0x80] sm:$0xff] }
 0x4a2   : > { %21199 = vst [vmem:[#allocation7_spill] sm:$0xff] %v17318_v15  ;;  %v4211_v48 = vadd.f32 %v3961_v61, %v21200_v50  ;;  %v4449_v42 = vpop.f32.mrf.mxu1 }
 0x4a3   : > { %v13608_v30 = vpop.f32.mrf.mxu0  ;;  %5518 = vperm.xlu0 %14897, %v5395_v46  }
 0x4a4   : > { %v17327_v54 = vadd.f32 %v4449_v42, %v4211_v48  ;;  %v13772_v10 = vpop.f32.mrf.mxu1  ;;  %v17346_v48 = vld [vmem:[%s15304_s12 + $0x138] sm:$0xff]   ;;  %v5397_v30 = vld [vmem:[%s20632_s1 + $0x70] sm:$0xff] }
 0x4a5   : > { %v3966_v44 = vpop.f32.mrf.mxu0  ;;  %13706 = vmatmul.mubr.bf16.gmra.mxu0 %v21202_v51 }
 0x4a6   : > { %21201 = vst [vmem:[#allocation42_spill] sm:$0xff] %v17327_v54  ;;  %v4212_v14 = vadd.f32 %v3966_v44, %v16801_v32  ;;  %v4454_v61 = vpop.f32.mrf.mxu1  ;;  %13870 = vmatmul.mubr.bf16.gmra.mxu1 %v16823_v36  ;;  %13709 = vmatprep.mubr.msk.bf16.mxu0 %vm15194_vm0, %v20898_v20  ;;  %v5396_v36 = vld [vmem:[%s20632_s1 + $0x68] sm:$0xff]  ;;  %v5398_v54 = vld [vmem:[%s20632_s1 + $0x78] sm:$0xff] }
 0x4a7   : > { %v13611_v50 = vpop.f32.mrf.mxu0  ;;  %13873 = vmatprep.mubr.msk.bf16.mxu1 %vm15194_vm0, %v20898_v20  ;;  %5523 = vperm.xlu1 %14898, %v5396_v36  }
 0x4a8   : > { %v17348_v42 = vadd.f32 %v4454_v61, %v4212_v14  ;;  %v13775_v32 = vpop.f32.mrf.mxu1  ;;  %v4290_v14 = vshll.u32 %v17346_v48, 16  ;;  %v17359_v61 = vld [vmem:[%s15304_s12 + $0x140] sm:$0xf]  ;;  %5528 = vperm.xlu0 %14897, %v5397_v30  }
 0x4a9   : > { %v3969_v10 = vpop.f32.mrf.mxu0 }
 0x4aa   : > { %21203 = vst [vmem:[#allocation43_spill] sm:$0xff] %v17348_v42  ;;  %v4213_v44 = vadd.f32 %v3969_v10, %v21204_v45  ;;  %v4457_v46 = vpop.f32.mrf.mxu1  ;;  %v435_v42 = vld [vmem:[%s15304_s12 + $0x144] sm:$0xf]  ;;  %v15165_v10 = vld [vmem:[%s15304_s12 + $0x128] sm:$0xff]   ;;  %v21206_v45 = vld [vmem:[#allocation21_spill] sm:$0xff] }
 0x4ab   : > { %v13612_v51 = vpop.f32.mrf.mxu0  ;;  %5533 = vperm.xlu1 %14898, %v5398_v54  }
 0x4ac   : > { %v17361_v50 = vadd.f32 %v4457_v46, %v4213_v44  ;;  %v13776_v32 = vpop.f32.mrf.mxu1  ;;  %v4292_v44 = vrot.slane %v4290_v14, 1  ;;  %v17378_v46 = vcombine.low %v17359_v61, %v435_v42  ;;  %5538 = vperm.xlu0 %14897, %v5399_v22  }
 0x4ad   : > { %v3974_v36 = vpop.f32.mrf.mxu0  ;;  %13710 = vmatmul.mubr.bf16.gmra.mxu0 %v15165_v10 }
 0x4ae   : > { %21205 = vst [vmem:[#allocation8_spill] sm:$0xff] %v17361_v50  ;;  %v4214_v51 = vadd.f32 %v3974_v36, %v21206_v45  ;;  %v4462_v15 = vpop.f32.mrf.mxu1  ;;  %13874 = vmatmul.mubr.bf16.gmra.mxu1 %v16846_v24  ;;  %13713 = vmatprep.mubr.msk.bf16.mxu0 %vm15194_vm0, %v20898_v20  ;;  %v5400_v36 = vld [vmem:[%s20632_s1 + $0x88] sm:$0xff]  ;;  %v5401_v24 = vld [vmem:[%s20632_s1 + $0x90] sm:$0xff]  ;;  %v21208_v45 = vld [vmem:[#allocation22_spill] sm:$0xff]  ;;  %v4293_v42 = vsel %vm654_vm1, %v16864_v33, %v4292_v44  ;;  %v4298_v22 = vshll.u32 %v17378_v46, 16 }
 0x4af   : > { %v13615_v30 = vpop.f32.mrf.mxu0  ;;  %13877 = vmatprep.mubr.msk.bf16.mxu1 %vm15194_vm0, %v20898_v20  ;;  %5543 = vperm.xlu1 %14898, %v5400_v36   ;;  %v5403_v36 = vld [vmem:[%s20632_s1 + $0xa0] sm:$0xff] }
 0x4b0   : > { %v17380_v32 = vadd.f32 %v4462_v15, %v4214_v51  ;;  %v13779_v54 = vpop.f32.mrf.mxu1  ;;  %v4294_v15 = vshrl.u32 %v17346_v48, 16  ;;  %5548 = vperm.xlu0 %14897, %v5401_v24  }
 0x4b1   : > { %v3977_v10 = vpop.f32.mrf.mxu0 }
 0x4b2   : > { %21207 = vst [vmem:[#allocation45_spill] sm:$0xff] %v17380_v32  ;;  %v4215_v30 = vadd.f32 %v3977_v10, %v21208_v45  ;;  %v4465_v14 = vpop.f32.mrf.mxu1  ;;  %v5402_v32 = vld [vmem:[%s20632_s1 + $0x98] sm:$0xff]  ;;  %v4296_v45 = vor.u32 %v4294_v15, %v4292_v44 }
 0x4b3   : > { %v13616_v50 = vpop.f32.mrf.mxu0  ;;  %5553 = vperm.xlu1 %14898, %v5402_v32  }
 0x4b4   : > { %v17393_v51 = vadd.f32 %v4465_v14, %v4215_v30  ;;  %v13780_v54 = vpop.f32.mrf.mxu1  ;;  %v4300_v30 = vrot.slane %v4298_v22, 1  ;;  %5558 = vperm.xlu0 %14897, %v5403_v36   ;;  %v5406_v36 = vld [vmem:[%s20632_s1 + $0xb8] sm:$0xff] }
 0x4b5   : > { %v3982_v50 = vpop.f32.mrf.mxu0  ;;  %13714 = vmatmul.mubr.bf16.gmra.mxu0 %v16810_v40  ;;  %v5404_v40 = vld [vmem:[%s20632_s1 + $0xa8] sm:$0xff] }
 0x4b6   : > { %21209 = vst [vmem:[#allocation46_spill] sm:$0xff] %v17393_v51  ;;  %v4216_v33 = vadd.f32 %v3982_v50, %v16842_v2  ;;  %v4470_v10 = vpop.f32.mrf.mxu1  ;;  %13878 = vmatmul.mubr.bf16.gmra.mxu1 %v4293_v42  ;;  %13717 = vmatprep.mubr.msk.bf16.mxu0 %vm15194_vm0, %v20898_v20  ;;  %v5405_v2 = vld [vmem:[%s20632_s1 + $0xb0] sm:$0xff]  ;;  %v21210_v42 = vld [vmem:[#allocation97_spill] sm:$0xff]  ;;  %v4301_v44 = vsel %vm654_vm1, %v4296_v45, %v4300_v30  ;;  %v4302_v45 = vshrl.u32 %v17378_v46, 16 }
 0x4b7   : > { %v13619_v24 = vpop.f32.mrf.mxu0  ;;  %13881 = vmatprep.mubr.msk.bf16.mxu1 %vm15194_vm0, %v20898_v20  ;;  %5563 = vperm.xlu1 %14898, %v5404_v40  }
 0x4b8   : > { %v17407_v14 = vadd.f32 %v4470_v10, %v4216_v33  ;;  %v13783_v54 = vpop.f32.mrf.mxu1  ;;  %5568 = vperm.xlu0 %14897, %v5405_v2   ;;  %v5407_v33 = vld [vmem:[%s20632_s1 + $0xc0] sm:$0xff] }
 0x4b9   : > { %v3985_v32 = vpop.f32.mrf.mxu0 }
 0x4ba   : > { %v4217_v50 = vadd.f32 %v3985_v32, %v21210_v42  ;;  %v4473_v24 = vpop.f32.mrf.mxu1 }
 0x4bb   : > { %v13620_v51 = vpop.f32.mrf.mxu0  ;;  %5573 = vperm.xlu1 %14898, %v5406_v36  }
 0x4bc   : > { %v17417_v15 = vadd.f32 %v4473_v24, %v4217_v50  ;;  %v13784_v22 = vpop.f32.mrf.mxu1  ;;  %5578 = vperm.xlu0 %14897, %v5407_v33   ;;  %v11181_v50 = vcombine.low %v17359_v61, %v17359_v61 }
 0x4bd   : > { %v3990_v10 = vpop.f32.mrf.mxu0  ;;  %13718 = vmatmul.mubr.bf16.gmra.mxu0 %v17346_v48  ;;  %v5408_v48 = vld [vmem:[%s20632_s1 + $0xc8] sm:$0xff]  ;;  %v4304_v22 = vor.u32 %v4302_v45, %v4300_v30 }
 0x4be   : > { %v4218_v51 = vadd.f32 %v3990_v10, %v16862_v1  ;;  %v4478_v54 = vpop.f32.mrf.mxu1  ;;  %13882 = vmatmul.mubr.bf16.gmra.mxu1 %v4301_v44  ;;  %13721 = vmatprep.mubr.msk.bf16.mxu0 %vm15194_vm0, %v20898_v20  ;;  %v5409_v1 = vld [vmem:[%s20632_s1 + $0xd0] sm:$0xff] }
 0x4bf   : > { %v13623_v40 = vpop.f32.mrf.mxu0  ;;  %13885 = vmatprep.mubr.msk.bf16.mxu1 %vm15194_vm0, %v20898_v20  ;;  %5583 = vperm.xlu1 %14898, %v5408_v48   ;;  %v5412_v48 = vld [vmem:[%s20632_s1 + $0xe8] sm:$0xff] }
 0x4c0   : > { %v17432_v2 = vadd.f32 %v4478_v54, %v4218_v51  ;;  %v13787_v32 = vpop.f32.mrf.mxu1  ;;  %5588 = vperm.xlu0 %14897, %v5409_v1   ;;  %v5410_v51 = vld [vmem:[%s20632_s1 + $0xd8] sm:$0xff]  ;;  %v5411_v54 = vld [vmem:[%s20632_s1 + $0xe0] sm:$0xff]  ;;  %v5413_v1 = vld [vmem:[%s20632_s1 + $0xf0] sm:$0xff] }
 0x4c1   : > { %v3993_v42 = vpop.f32.mrf.mxu0 }
 0x4c2   : > { %v4219_v24 = vadd.f32 %v3993_v42, %v16867_v5  ;;  %v4481_v44 = vpop.f32.mrf.mxu1 }
 0x4c3   : > { %v13624_v36 = vpop.f32.mrf.mxu0  ;;  %5593 = vperm.xlu1 %14898, %v5410_v51   ;;  %v5415_v51 = vld [vmem:[%s20632_s1 + $0x100] sm:$0xff] }
 0x4c4   : > { %v17443_v33 = vadd.f32 %v4481_v44, %v4219_v24  ;;  %v13788_v10 = vpop.f32.mrf.mxu1  ;;  %5598 = vperm.xlu0 %14897, %v5411_v54   ;;  %v15017_v36 = vld [vmem:[%s20635_s4 + $0x68] sm:$0xff]  }
 0x4c5   : > { %v3998_v40 = vpop.f32.mrf.mxu0  ;;  %13722 = vmatmul.mubr.bf16.gmra.mxu0 %v11181_v50  ;;  %v5414_v10 = vld [vmem:[%s20632_s1 + $0xf8] sm:$0xff]  ;;  %14057 = vmatprep.subr.bf16.mxu1 %v15017_v36 }
 0x4c6   : > { %v4220_v5 = vadd.f32 %v3998_v40, %v16876_v9  ;;  %v4486_v61 = vpop.f32.mrf.mxu1  ;;  %13886 = vmatmul.mubr.bf16.gmra.mxu1 %v4304_v22  ;;  %13905 = vmatprep.mubr.msk.bf16.mxu0 %vm15194_vm0, %v20898_v20 }
 0x4c7   : > { %v13627_v30 = vpop.f32.mrf.mxu0  ;;  %5603 = vperm.xlu1 %14898, %v5412_v48   ;;  %14058 = vmatpush3.bf16.msra.mxu1 %v15017_v36  ;;  %v5416_v48 = vld [vmem:[%s20632_s1 + $0x108] sm:$0xff]  ;;  %v5418_v36 = vld [vmem:[%s20632_s1 + $0x118] sm:$0xff] }
 0x4c8   : > { %v17454_v45 = vadd.f32 %v4486_v61, %v4220_v5  ;;  %v13791_v32 = vpop.f32.mrf.mxu1  ;;  %5608 = vperm.xlu0 %14897, %v5413_v1   ;;  %v5417_v1 = vld [vmem:[%s20632_s1 + $0x110] sm:$0xff] }
 0x4c9   : > { %v4001_v42 = vpop.f32.mrf.mxu0 }
 0x4ca   : > { %v4221_v9 = vadd.f32 %v4001_v42, %v16882_v55  ;;  %v4489_v50 = vpop.f32.mrf.mxu1  ;;  %v21211_v55 = vld [vmem:[#allocation32_spill] sm:$0xff] }
 0x4cb   : > { %v13628_v24 = vpop.f32.mrf.mxu0  ;;  %5613 = vperm.xlu1 %14898, %v5414_v10   ;;  %v5419_v10 = vld [vmem:[%s20632_s1 + $0x120] sm:$0xff] }
 0x4cc   : > { %v17463_v44 = vadd.f32 %v4489_v50, %v4221_v9  ;;  %v13792_v22 = vpop.f32.mrf.mxu1  ;;  %5618 = vperm.xlu0 %14897, %v5415_v51  }
 0x4cd   : > { %v4006_v54 = vpop.f32.mrf.mxu0  ;;  %13906 = vmatmul.mubr.bf16.vlgmr.msra.gmra.mxu0 %v21211_v55 }
 0x4ce   : > { %v4222_v40 = vadd.f32 %v4006_v54, %v16894_v4  ;;  %v4494_v5 = vpop.f32.mrf.mxu1  ;;  %13909 = vmatprep.mubr.msk.bf16.mxu0 %vm15194_vm0, %v20898_v20  ;;  %v21212_v54 = vld [vmem:[#allocation33_spill] sm:$0xff] }
 0x4cf   : > { %v13631_v61 = vpop.f32.mrf.mxu0  ;;  %5623 = vperm.xlu1 %14898, %v5416_v48   ;;  %v5421_v48 = vld [vmem:[%s20632_s1 + $0x130] sm:$0xff] }
 0x4d0   : > { %v17478_v30 = vadd.f32 %v4494_v5, %v4222_v40  ;;  %v13795_v32 = vpop.f32.mrf.mxu1  ;;  %5628 = vperm.xlu0 %14897, %v5417_v1  }
 0x4d1   : > { %v4009_v4 = vpop.f32.mrf.mxu0  ;;  %v5420_v32 = vld [vmem:[%s20632_s1 + $0x128] sm:$0xff] }
 0x4d2   : > { %v4223_v42 = vadd.f32 %v4009_v4, %v16902_v53  ;;  %v4497_v9 = vpop.f32.mrf.mxu1 }
 0x4d3   : > { %v13632_v50 = vpop.f32.mrf.mxu0  ;;  %5633 = vperm.xlu1 %14898, %v5418_v36   ;;  %v5423_v36 = vld [vmem:[%s20632_s1 + $0x140] sm:$0xff] }
 0x4d4   : > { %v17487_v24 = vadd.f32 %v4497_v9, %v4223_v42  ;;  %v13796_v22 = vpop.f32.mrf.mxu1  ;;  %5638 = vperm.xlu0 %14897, %v5419_v10  }
 0x4d5   : > { %v4014_v51 = vpop.f32.mrf.mxu0  ;;  %13910 = vmatmul.mubr.bf16.gmra.mxu0 %v21212_v54  ;;  %v5422_v22 = vld [vmem:[%s20632_s1 + $0x138] sm:$0xff] }
 0x4d6   : > { %v4224_v53 = vadd.f32 %v4014_v51, %v16914_v59  ;;  %v4502_v55 = vpop.f32.mrf.mxu1  ;;  %13913 = vmatprep.mubr.msk.bf16.mxu0 %vm15194_vm0, %v20898_v20  ;;  %v21213_v51 = vld [vmem:[#allocation35_spill] sm:$0xff] }
 0x4d7   : > { %v13635_v40 = vpop.f32.mrf.mxu0  ;;  %5643 = vperm.xlu1 %14898, %v5420_v32   ;;  %v5425_v32 = vld [vmem:[%s20632_s1 + $0x150] sm:$0xff] }
 0x4d8   : > { %v17499_v5 = vadd.f32 %v4502_v55, %v4224_v53  ;;  %v13799_v61 = vpop.f32.mrf.mxu1  ;;  %5648 = vperm.xlu0 %14897, %v5421_v48  }
 0x4d9   : > { %v4017_v1 = vpop.f32.mrf.mxu0  ;;  %v5424_v61 = vld [vmem:[%s20632_s1 + $0x148] sm:$0xff] }
 0x4da   : > { %v4225_v59 = vadd.f32 %v4017_v1, %v16918_v57  ;;  %v4505_v4 = vpop.f32.mrf.mxu1 }
 0x4db   : > { %v13636_v42 = vpop.f32.mrf.mxu0  ;;  %5653 = vperm.xlu1 %14898, %v5422_v22   ;;  %v5427_v22 = vld [vmem:[%s20632_s1 + $0x160] sm:$0xff] }
 0x4dc   : > { %v17508_v9 = vadd.f32 %v4505_v4, %v4225_v59  ;;  %v13800_v50 = vpop.f32.mrf.mxu1  ;;  %5658 = vperm.xlu0 %14897, %v5423_v36  }
 0x4dd   : > { %v4022_v10 = vpop.f32.mrf.mxu0  ;;  %13914 = vmatmul.mubr.bf16.gmra.mxu0 %v21213_v51  ;;  %v5426_v50 = vld [vmem:[%s20632_s1 + $0x158] sm:$0xff] }
 0x4de   : > { %v4226_v57 = vadd.f32 %v4022_v10, %v16928_v34  ;;  %v4510_v54 = vpop.f32.mrf.mxu1  ;;  %13917 = vmatprep.mubr.msk.bf16.mxu0 %vm15194_vm0, %v20898_v20  ;;  %v21214_v10 = vld [vmem:[#allocation38_spill] sm:$0xff] }
 0x4df   : > { %v13639_v53 = vpop.f32.mrf.mxu0  ;;  %5663 = vperm.xlu1 %14898, %v5424_v61   ;;  %v5429_v61 = vld [vmem:[%s20632_s1 + $0x170] sm:$0xff] }
 0x4e0   : > { %v17520_v55 = vadd.f32 %v4510_v54, %v4226_v57  ;;  %v13803_v40 = vpop.f32.mrf.mxu1  ;;  %5668 = vperm.xlu0 %14897, %v5425_v32  }
 0x4e1   : > { %v4025_v48 = vpop.f32.mrf.mxu0  ;;  %v5428_v40 = vld [vmem:[%s20632_s1 + $0x168] sm:$0xff] }
 0x4e2   : > { %v4227_v34 = vadd.f32 %v4025_v48, %v16934_v6  ;;  %v4513_v1 = vpop.f32.mrf.mxu1 }
 0x4e3   : > { %v13640_v59 = vpop.f32.mrf.mxu0  ;;  %5673 = vperm.xlu1 %14898, %v5426_v50   ;;  %v5431_v50 = vld [vmem:[%s20632_s1 + $0x180] sm:$0xff] }
 0x4e4   : > { %v17529_v4 = vadd.f32 %v4513_v1, %v4227_v34  ;;  %v13804_v42 = vpop.f32.mrf.mxu1  ;;  %5678 = vperm.xlu0 %14897, %v5427_v22  }
 0x4e5   : > { %v4030_v36 = vpop.f32.mrf.mxu0  ;;  %13918 = vmatmul.mubr.bf16.gmra.mxu0 %v21214_v10  ;;  %v5430_v42 = vld [vmem:[%s20632_s1 + $0x178] sm:$0xff] }
 0x4e6   : > { %v4228_v6 = vadd.f32 %v4030_v36, %v16944_v0  ;;  %v4518_v51 = vpop.f32.mrf.mxu1  ;;  %13921 = vmatprep.mubr.msk.bf16.mxu0 %vm15194_vm0, %v20898_v20  ;;  %v21215_v36 = vld [vmem:[#allocation41_spill] sm:$0xff] }
 0x4e7   : > { %v13643_v57 = vpop.f32.mrf.mxu0  ;;  %5683 = vperm.xlu1 %14898, %v5428_v40   ;;  %v5432_v40 = vld [vmem:[%s20632_s1 + $0x188] sm:$0xff] }
 0x4e8   : > { %v17541_v54 = vadd.f32 %v4518_v51, %v4228_v6  ;;  %v13807_v53 = vpop.f32.mrf.mxu1  ;;  %5688 = vperm.xlu0 %14897, %v5429_v61  }
 0x4e9   : > { %v4033_v32 = vpop.f32.mrf.mxu0  ;;  %v15018_v53 = vld [vmem:[%s20635_s4 + $0x60] sm:$0xff]  }
 0x4ea   : > { %v4229_v0 = vadd.f32 %v4033_v32, %v16947_v13  ;;  %v4521_v48 = vpop.f32.mrf.mxu1  ;;  %14059 = vmatprep.subr.bf16.mxu1 %v15018_v53 }
 0x4eb   : > { %v13644_v34 = vpop.f32.mrf.mxu0  ;;  %5693 = vperm.xlu1 %14898, %v5430_v42   ;;  %14060 = vmatpush3.bf16.msra.mxu1 %v15018_v53  ;;  %v5434_v42 = vld [vmem:[%s20632_s1 + $0x198] sm:$0xff]  ;;  %v5436_v53 = vld [vmem:[%s20632_s1 + $0x1a8] sm:$0xff] }
 0x4ec   : > { %v17550_v1 = vadd.f32 %v4521_v48, %v4229_v0  ;;  %v13808_v59 = vpop.f32.mrf.mxu1  ;;  %5698 = vperm.xlu0 %14897, %v5431_v50   ;;  %v5435_v50 = vld [vmem:[%s20632_s1 + $0x1a0] sm:$0xff] }
 0x4ed   : > { %v4038_v22 = vpop.f32.mrf.mxu0  ;;  %13922 = vmatmul.mubr.bf16.gmra.mxu0 %v21215_v36  ;;  %v21216_v36 = vld [vmem:[#allocation44_spill] sm:$0xff] }
 0x4ee   : > { %v4230_v13 = vadd.f32 %v4038_v22, %v16956_v16  ;;  %v4526_v10 = vpop.f32.mrf.mxu1  ;;  %13925 = vmatprep.mubr.msk.bf16.mxu0 %vm15194_vm0, %v20898_v20  ;;  %v5433_v16 = vld [vmem:[%s20632_s1 + $0x190] sm:$0xff] }
 0x4ef   : > { %v13647_v6 = vpop.f32.mrf.mxu0  ;;  %5703 = vperm.xlu1 %14898, %v5432_v40   ;;  %v5437_v40 = vld [vmem:[%s20632_s1 + $0x1b0] sm:$0xff] }
 0x4f0   : > { %v17562_v51 = vadd.f32 %v4526_v10, %v4230_v13  ;;  %v13811_v57 = vpop.f32.mrf.mxu1  ;;  %5708 = vperm.xlu0 %14897, %v5433_v16  }
 0x4f1   : > { %v4041_v61 = vpop.f32.mrf.mxu0 }
 0x4f2   : > { %v4231_v32 = vadd.f32 %v4041_v61, %v16959_v43  ;;  %v4529_v0 = vpop.f32.mrf.mxu1 }
 0x4f3   : > { %v13648_v48 = vpop.f32.mrf.mxu0  ;;  %5713 = vperm.xlu1 %14898, %v5434_v42   ;;  %v5439_v42 = vld [vmem:[%s20632_s1 + $0x1c0] sm:$0xff] }
 0x4f4   : > { %v17574_v34 = vadd.f32 %v4529_v0, %v4231_v32  ;;  %v13812_v59 = vpop.f32.mrf.mxu1  ;;  %5718 = vperm.xlu0 %14897, %v5435_v50  }
 0x4f5   : > { %v4046_v22 = vpop.f32.mrf.mxu0  ;;  %13926 = vmatmul.mubr.bf16.gmra.mxu0 %v21216_v36  ;;  %v5438_v59 = vld [vmem:[%s20632_s1 + $0x1b8] sm:$0xff] }
 0x4f6   : > { %v4232_v43 = vadd.f32 %v4046_v22, %v16968_v47  ;;  %v4534_v13 = vpop.f32.mrf.mxu1  ;;  %13929 = vmatprep.mubr.msk.bf16.mxu0 %vm15194_vm0, %v20898_v20  ;;  %v21217_v22 = vld [vmem:[#allocation47_spill] sm:$0xff] }
 0x4f7   : > { %v13651_v10 = vpop.f32.mrf.mxu0  ;;  %5723 = vperm.xlu1 %14898, %v5436_v53   ;;  %v5441_v53 = vld [vmem:[%s20632_s1 + $0x1d0] sm:$0xff] }
 0x4f8   : > { %v17586_v6 = vadd.f32 %v4534_v13, %v4232_v43  ;;  %v13815_v57 = vpop.f32.mrf.mxu1  ;;  %5728 = vperm.xlu0 %14897, %v5437_v40  }
 0x4f9   : > { %v4049_v16 = vpop.f32.mrf.mxu0  ;;  %v5440_v57 = vld [vmem:[%s20632_s1 + $0x1c8] sm:$0xff] }
 0x4fa   : > { %v4233_v47 = vadd.f32 %v4049_v16, %v16971_v25  ;;  %v4537_v61 = vpop.f32.mrf.mxu1 }
 0x4fb   : > { %v13652_v32 = vpop.f32.mrf.mxu0  ;;  %5733 = vperm.xlu1 %14898, %v5438_v59   ;;  %v5443_v59 = vld [vmem:[%s20632_s1 + $0x1e0] sm:$0xff] }
 0x4fc   : > { %v17595_v0 = vadd.f32 %v4537_v61, %v4233_v47  ;;  %v13816_v48 = vpop.f32.mrf.mxu1  ;;  %5738 = vperm.xlu0 %14897, %v5439_v42  }
 0x4fd   : > { %v4054_v50 = vpop.f32.mrf.mxu0  ;;  %13930 = vmatmul.mubr.bf16.gmra.mxu0 %v21217_v22  ;;  %v5442_v48 = vld [vmem:[%s20632_s1 + $0x1d8] sm:$0xff] }
 0x4fe   : > { %v4234_v25 = vadd.f32 %v4054_v50, %v16980_v19  ;;  %v4542_v36 = vpop.f32.mrf.mxu1  ;;  %13933 = vmatprep.mubr.msk.bf16.mxu0 %vm15194_vm0, %v20898_v20  ;;  %v21218_v50 = vld [vmem:[#allocation50_spill] sm:$0xff] }
 0x4ff   : > { %v13655_v43 = vpop.f32.mrf.mxu0  ;;  %5743 = vperm.xlu1 %14898, %v5440_v57   ;;  %v5445_v57 = vld [vmem:[%s20632_s1 + $0x1f0] sm:$0xff] }
 0x500   : > { %v17607_v13 = vadd.f32 %v4542_v36, %v4234_v25  ;;  %v13819_v10 = vpop.f32.mrf.mxu1  ;;  %5748 = vperm.xlu0 %14897, %v5441_v53  }
 0x501   : > { %v4057_v40 = vpop.f32.mrf.mxu0  ;;  %v5444_v10 = vld [vmem:[%s20632_s1 + $0x1e8] sm:$0xff] }
 0x502   : > { %v4235_v19 = vadd.f32 %v4057_v40, %v16983_v23  ;;  %v4545_v16 = vpop.f32.mrf.mxu1 }
 0x503   : > { %v13656_v47 = vpop.f32.mrf.mxu0  ;;  %5753 = vperm.xlu1 %14898, %v5442_v48   ;;  %v5447_v48 = vld [vmem:[%s20632_s1 + $0x200] sm:$0xff] }
 0x504   : > { %v17616_v61 = vadd.f32 %v4545_v16, %v4235_v19  ;;  %v13820_v32 = vpop.f32.mrf.mxu1  ;;  %5758 = vperm.xlu0 %14897, %v5443_v59   ;;  %v5446_v16 = vld [vmem:[%s20632_s1 + $0x1f8] sm:$0xff] }
 0x505   : > { %v4062_v42 = vpop.f32.mrf.mxu0  ;;  %13934 = vmatmul.mubr.bf16.gmra.mxu0 %v21218_v50  ;;  %v21221_v50 = vld [vmem:[#allocation24_spill] sm:$0xff] }
 0x506   : > { %v4236_v23 = vadd.f32 %v4062_v42, %v16992_v63  ;;  %v4550_v22 = vpop.f32.mrf.mxu1  ;;  %13937 = vmatprep.mubr.msk.bf16.mxu0 %vm15194_vm0, %v20898_v20  ;;  %v21220_v42 = vld [vmem:[#allocation53_spill] sm:$0xff] }
 0x507   : > { %v13659_v25 = vpop.f32.mrf.mxu0  ;;  %5763 = vperm.xlu1 %14898, %v5444_v10   ;;  %v5448_v10 = vld [vmem:[%s20632_s1 + $0x208] sm:$0xff] }
 0x508   : > { %v17628_v36 = vadd.f32 %v4550_v22, %v4236_v23  ;;  %v13823_v43 = vpop.f32.mrf.mxu1  ;;  %5768 = vperm.xlu0 %14897, %v5445_v57   ;;  %v5449_v57 = vld [vmem:[%s20632_s1 + $0x210] sm:$0xff] }
 0x509   : > { %v4065_v53 = vpop.f32.mrf.mxu0 }
 0x50a   : > { %v4237_v63 = vadd.f32 %v4065_v53, %v16999_v41  ;;  %v4553_v40 = vpop.f32.mrf.mxu1 }
 0x50b   : > { %v13660_v19 = vpop.f32.mrf.mxu0  ;;  %5773 = vperm.xlu1 %14898, %v5446_v16  }
 0x50c   : > { %v17640_v47 = vadd.f32 %v4553_v40, %v4237_v63  ;;  %v13824_v32 = vpop.f32.mrf.mxu1  ;;  %5778 = vperm.xlu0 %14897, %v5447_v48   ;;  %v21223_v63 = vld [vmem:[#allocation99_spill] sm:$0xff] }
 0x50d   : > { %v4070_v59 = vpop.f32.mrf.mxu0  ;;  %13938 = vmatmul.mubr.bf16.gmra.mxu0 %v21220_v42  ;;  %v5451_v42 = vld [vmem:[%s20632_s1 + $0x220] sm:$0xff] }
 0x50e   : > { %21219 = vst [vmem:[#allocation9_spill] sm:$0xff] %v17640_v47  ;;  %v4238_v41 = vadd.f32 %v4070_v59, %v21221_v50  ;;  %v4558_v23 = vpop.f32.mrf.mxu1  ;;  %13941 = vmatprep.mubr.msk.bf16.mxu0 %vm15194_vm0, %v20898_v20  ;;  %v5450_v59 = vld [vmem:[%s20632_s1 + $0x218] sm:$0xff] }
 0x50f   : > { %v13663_v22 = vpop.f32.mrf.mxu0  ;;  %5783 = vperm.xlu1 %14898, %v5448_v10  }
 0x510   : > { %v17649_v25 = vadd.f32 %v4558_v23, %v4238_v41  ;;  %v13827_v43 = vpop.f32.mrf.mxu1  ;;  %5788 = vperm.xlu0 %14897, %v5449_v57   ;;  %v21225_v41 = vld [vmem:[#allocation56_spill] sm:$0xff]  ;;  %v21226_v23 = vld [vmem:[#allocation25_spill] sm:$0xff] }
 0x511   : > { %v4073_v53 = vpop.f32.mrf.mxu0 }
 0x512   : > { %21222 = vst [vmem:[#allocation48_spill] sm:$0xff] %v17649_v25  ;;  %v4239_v40 = vadd.f32 %v4073_v53, %v21223_v63  ;;  %v4561_v19 = vpop.f32.mrf.mxu1  ;;  %v5452_v63 = vld [vmem:[%s20632_s1 + $0x228] sm:$0xff]  ;;  %v21235_v25 = vld [vmem:[#allocation62_spill] sm:$0xff] }
 0x513   : > { %v13664_v16 = vpop.f32.mrf.mxu0  ;;  %5793 = vperm.xlu1 %14898, %v5450_v59  }
 0x514   : > { %v17658_v32 = vadd.f32 %v4561_v19, %v4239_v40  ;;  %v13828_v48 = vpop.f32.mrf.mxu1  ;;  %5798 = vperm.xlu0 %14897, %v5451_v42   ;;  %v5453_v40 = vld [vmem:[%s20632_s1 + $0x230] sm:$0xff]  ;;  %v21228_v16 = vld [vmem:[#allocation101_spill] sm:$0xff] }
 0x515   : > { %v4078_v50 = vpop.f32.mrf.mxu0  ;;  %13942 = vmatmul.mubr.bf16.gmra.mxu0 %v21225_v41 }
 0x516   : > { %21224 = vst [vmem:[#allocation49_spill] sm:$0xff] %v17658_v32  ;;  %v4240_v22 = vadd.f32 %v4078_v50, %v21226_v23  ;;  %v4566_v43 = vpop.f32.mrf.mxu1  ;;  %13945 = vmatprep.mubr.msk.bf16.mxu0 %vm15194_vm0, %v20898_v20  ;;  %v15019_v23 = vld [vmem:[%s20635_s4 + $0x58] sm:$0xff]  }
 0x517   : > { %v13667_v10 = vpop.f32.mrf.mxu0  ;;  %5803 = vperm.xlu1 %14898, %v5452_v63   ;;  %v21231_v63 = vld [vmem:[#allocation26_spill] sm:$0xff]  ;;  %14061 = vmatprep.subr.bf16.mxu1 %v15019_v23 }
 0x518   : > { %v17670_v57 = vadd.f32 %v4566_v43, %v4240_v22  ;;  %v13831_v53 = vpop.f32.mrf.mxu1  ;;  %5808 = vperm.xlu0 %14897, %v5453_v40   ;;  %v5454_v22 = vld [vmem:[%s20632_s1 + $0x238] sm:$0xff]  ;;  %v5455_v43 = vld [vmem:[%s20632_s1 + $0x240] sm:$0xff]  ;;  %14062 = vmatpush3.bf16.msra.mxu1 %v15019_v23  ;;  %v21236_v23 = vld [vmem:[#allocation27_spill] sm:$0xff] }
 0x519   : > { %v4081_v19 = vpop.f32.mrf.mxu0  ;;  %v21230_v53 = vld [vmem:[#allocation59_spill] sm:$0xff] }
 0x51a   : > { %21227 = vst [vmem:[#allocation10_spill] sm:$0xff] %v17670_v57  ;;  %v4241_v48 = vadd.f32 %v4081_v19, %v21228_v16  ;;  %v4569_v59 = vpop.f32.mrf.mxu1 }
 0x51b   : > { %v13668_v50 = vpop.f32.mrf.mxu0  ;;  %5813 = vperm.xlu1 %14898, %v5454_v22  }
 0x51c   : > { %v17679_v41 = vadd.f32 %v4569_v59, %v4241_v48  ;;  %v13832_v42 = vpop.f32.mrf.mxu1  ;;  %5818 = vperm.xlu0 %14897, %v5455_v43  }
 0x51d   : > { %v4086_v10 = vpop.f32.mrf.mxu0  ;;  %13946 = vmatmul.mubr.bf16.gmra.mxu0 %v21230_v53  ;;  %v21233_v42 = vld [vmem:[#allocation103_spill] sm:$0xff] }
 0x51e   : > { %21229 = vst [vmem:[#allocation51_spill] sm:$0xff] %v17679_v41  ;;  %v4242_v40 = vadd.f32 %v4086_v10, %v21231_v63  ;;  %v4574_v19 = vpop.f32.mrf.mxu1  ;;  %13949 = vmatprep.mubr.msk.bf16.mxu0 %vm15194_vm0, %v20898_v20  ;;  %v15020_v10 = vld [vmem:[%s20635_s4 + $0x50] sm:$0xff]  }
 0x51f   : > { %v13671_v16 = vpop.f32.mrf.mxu0  ;;  %14063 = vmatprep.subr.bf16.mxu1 %v15020_v10 }
 0x520   : > { %v17694_v48 = vadd.f32 %v4574_v19, %v4242_v40  ;;  %v13835_v59 = vpop.f32.mrf.mxu1  ;;  %14064 = vmatpush3.bf16.msra.mxu1 %v15020_v10  ;;  %v15022_v10 = vld [vmem:[%s20635_s4 + $0x40] sm:$0xff]  }
 0x521   : > { %v4089_v50 = vpop.f32.mrf.mxu0  ;;  %v21238_v59 = vld [vmem:[#allocation105_spill] sm:$0xff] }
 0x522   : > { %21232 = vst [vmem:[#allocation52_spill] sm:$0xff] %v17694_v48  ;;  %v4243_v41 = vadd.f32 %v4089_v50, %v21233_v42  ;;  %v4577_v57 = vpop.f32.mrf.mxu1 }
 0x523   : > { %v13672_v32 = vpop.f32.mrf.mxu0 }
 0x524   : > { %v17697_v53 = vadd.f32 %v4577_v57, %v4243_v41  ;;  %v13836_v22 = vpop.f32.mrf.mxu1  ;;  %v15021_v41 = vld [vmem:[%s20635_s4 + $0x48] sm:$0xff]  }
 0x525   : > { %v4094_v63 = vpop.f32.mrf.mxu0  ;;  %13950 = vmatmul.mubr.bf16.gmra.mxu0 %v21235_v25  ;;  %14065 = vmatprep.subr.bf16.mxu1 %v15021_v41 }
 0x526   : > { %21234 = vst [vmem:[#allocation11_spill] sm:$0xff] %v17697_v53  ;;  %v4244_v43 = vadd.f32 %v4094_v63, %v21236_v23  ;;  %v4582_v40 = vpop.f32.mrf.mxu1  ;;  %13953 = vmatprep.mubr.msk.bf16.mxu0 %vm15194_vm0, %v20898_v20  ;;  %14066 = vmatpush3.bf16.msra.mxu1 %v15021_v41 }
 0x527   : > { %v13675_v19 = vpop.f32.mrf.mxu0  ;;  %14067 = vmatprep.subr.bf16.mxu1 %v15022_v10 }
 0x528   : > { %v17706_v32 = vadd.f32 %v4582_v40, %v4244_v43  ;;  %v13839_v57 = vpop.f32.mrf.mxu1  ;;  %v21240_v43 = vld [vmem:[#allocation65_spill] sm:$0xff]  ;;  %v21241_v40 = vld [vmem:[#allocation30_spill] sm:$0xff] }
 0x529   : > { %v4097_v16 = vpop.f32.mrf.mxu0 }
 0x52a   : > { %21237 = vst [vmem:[#allocation54_spill] sm:$0xff] %v17706_v32  ;;  %v4245_v50 = vadd.f32 %v4097_v16, %v21238_v59  ;;  %v4585_v25 = vpop.f32.mrf.mxu1  ;;  %14068 = vmatpush3.bf16.msra.mxu1 %v15022_v10 }
 0x52b   : > { %v13676_v42 = vpop.f32.mrf.mxu0 }
 0x52c   : > { %v17712_v22 = vadd.f32 %v4585_v25, %v4245_v50  ;;  %v13840_v63 = vpop.f32.mrf.mxu1  ;;  %v21242_v25 = vld [vmem:[#allocation31_spill] sm:$0xff] }
 0x52d   : > { %v4102_v23 = vpop.f32.mrf.mxu0  ;;  %13954 = vmatmul.mubr.bf16.gmra.mxu0 %v21240_v43 }
 0x52e   : > { %21239 = vst [vmem:[#allocation55_spill] sm:$0xff] %v17712_v22  ;;  %v4246_v19 = vadd.f32 %v4102_v23, %v21241_v40  ;;  %v4590_v57 = vpop.f32.mrf.mxu1  ;;  %13957 = vmatprep.mubr.msk.bf16.mxu0 %vm15194_vm0, %v20898_v20  ;;  %v21244_v23 = vld [vmem:[#allocation68_spill] sm:$0xff] }
 0x52f   : > { %v13679_v16 = vpop.f32.mrf.mxu0  ;;  %v21245_v40 = vld [vmem:[#allocation108_spill] sm:$0xff] }
 0x530   : > { %v17721_v41 = vadd.f32 %v4590_v57, %v4246_v19  ;;  %v13843_v59 = vpop.f32.mrf.mxu1 }
 0x531   : > { %v4105_v50 = vpop.f32.mrf.mxu0  ;;  %v21247_v59 = vld [vmem:[#allocation110_spill] sm:$0xff] }
 0x532   : > { %v4247_v42 = vadd.f32 %v4105_v50, %v21242_v25  ;;  %v4593_v63 = vpop.f32.mrf.mxu1 }
 0x533   : > { %v13680_v22 = vpop.f32.mrf.mxu0 }
 0x534   : > { %v17724_v32 = vadd.f32 %v4593_v63, %v4247_v42  ;;  %v13844_v43 = vpop.f32.mrf.mxu1 }
 0x535   : > { %v4110_v53 = vpop.f32.mrf.mxu0  ;;  %13958 = vmatmul.mubr.bf16.gmra.mxu0 %v21244_v23  ;;  %v21249_v23 = vld [vmem:[#allocation71_spill] sm:$0xff] }
 0x536   : > { %21243 = vst [vmem:[#allocation12_spill] sm:$0xff] %v17724_v32  ;;  %v4248_v48 = vadd.f32 %v4110_v53, %v21245_v40  ;;  %v4598_v47 = vpop.f32.mrf.mxu1  ;;  %13961 = vmatprep.mubr.msk.bf16.mxu0 %vm15194_vm0, %v20898_v20  ;;  %v21250_v53 = vld [vmem:[#allocation34_spill] sm:$0xff] }
 0x537   : > { %v13683_v10 = vpop.f32.mrf.mxu0 }
 0x538   : > { %v17730_v19 = vadd.f32 %v4598_v47, %v4248_v48  ;;  %v13847_v57 = vpop.f32.mrf.mxu1 }
 0x539   : > { %v4113_v16 = vpop.f32.mrf.mxu0 }
 0x53a   : > { %21246 = vst [vmem:[#allocation57_spill] sm:$0xff] %v17730_v19  ;;  %v4249_v50 = vadd.f32 %v4113_v16, %v21247_v59  ;;  %v4601_v22 = vpop.f32.mrf.mxu1  ;;  %v21252_v16 = vld [vmem:[#allocation4_spill] sm:$0xff] }
 0x53b   : > { %v13684_v25 = vpop.f32.mrf.mxu0 }
 0x53c   : > { %v17733_v42 = vadd.f32 %v4601_v22, %v4249_v50  ;;  %v13848_v63 = vpop.f32.mrf.mxu1 }
 0x53d   : > { %v4118_v43 = vpop.f32.mrf.mxu0  ;;  %13962 = vmatmul.mubr.bf16.gmra.mxu0 %v21249_v23  ;;  %v21254_v23 = vld [vmem:[#allocation74_spill] sm:$0xff] }
 0x53e   : > { %21248 = vst [vmem:[#allocation58_spill] sm:$0xff] %v17733_v42  ;;  %v4250_v40 = vadd.f32 %v4118_v43, %v21250_v53  ;;  %v4606_v32 = vpop.f32.mrf.mxu1  ;;  %13965 = vmatprep.mubr.msk.bf16.mxu0 %vm15194_vm0, %v20898_v20  ;;  %v21255_v43 = vld [vmem:[#allocation36_spill] sm:$0xff] }
 0x53f   : > { %v13687_v47 = vpop.f32.mrf.mxu0 }
 0x540   : > { %v17739_v48 = vadd.f32 %v4606_v32, %v4250_v40  ;;  %v13851_v10 = vpop.f32.mrf.mxu1 }
 0x541   : > { %v4121_v57 = vpop.f32.mrf.mxu0 }
 0x542   : > { %21251 = vst [vmem:[#allocation13_spill] sm:$0xff] %v17739_v48  ;;  %v4251_v59 = vadd.f32 %v4121_v57, %v21252_v16  ;;  %v4609_v25 = vpop.f32.mrf.mxu1  ;;  %v21256_v57 = vld [vmem:[#allocation2_spill] sm:$0xff] }
 0x543   : > { %v13688_v50 = vpop.f32.mrf.mxu0 }
 0x544   : > { %v17742_v22 = vadd.f32 %v4609_v25, %v4251_v59  ;;  %v13852_v63 = vpop.f32.mrf.mxu1 }
 0x545   : > { %v4126_v42 = vpop.f32.mrf.mxu0  ;;  %13966 = vmatmul.mubr.bf16.gmra.mxu0 %v21254_v23  ;;  %v21258_v23 = vld [vmem:[#allocation77_spill] sm:$0xff] }
 0x546   : > { %21253 = vst [vmem:[#allocation60_spill] sm:$0xff] %v17742_v22  ;;  %v4252_v53 = vadd.f32 %v4126_v42, %v21255_v43  ;;  %v4614_v19 = vpop.f32.mrf.mxu1  ;;  %13969 = vmatprep.mubr.msk.bf16.mxu0 %vm15194_vm0, %v20898_v20  ;;  %v21259_v42 = vld [vmem:[#allocation5_spill] sm:$0xff] }
 0x547   : > { %v13691_v32 = vpop.f32.mrf.mxu0 }
 0x548   : > { %v17748_v40 = vadd.f32 %v4614_v19, %v4252_v53  ;;  %v13855_v47 = vpop.f32.mrf.mxu1 }
 0x549   : > { %v4129_v10 = vpop.f32.mrf.mxu0 }
 0x54a   : > { %v4253_v16 = vadd.f32 %v4129_v10, %v21256_v57  ;;  %v4617_v50 = vpop.f32.mrf.mxu1  ;;  %v21260_v10 = vld [vmem:[#allocation37_spill] sm:$0xff] }
 0x54b   : > { %v13692_v59 = vpop.f32.mrf.mxu0 }
 0x54c   : > { %v17751_v25 = vadd.f32 %v4617_v50, %v4253_v16  ;;  %v13856_v63 = vpop.f32.mrf.mxu1 }
 0x54d   : > { %v4134_v22 = vpop.f32.mrf.mxu0  ;;  %13970 = vmatmul.mubr.bf16.gmra.mxu0 %v21258_v23 }
 0x54e   : > { %21257 = vst [vmem:[#allocation61_spill] sm:$0xff] %v17751_v25  ;;  %v4254_v43 = vadd.f32 %v4134_v22, %v21259_v42  ;;  %v4622_v48 = vpop.f32.mrf.mxu1  ;;  %13973 = vmatprep.mubr.msk.bf16.mxu0 %vm15194_vm0, %v20898_v20  ;;  %v15023_v22 = vld [vmem:[%s20635_s4 + $0xf8] sm:$0xff]   ;;  %v21261_v42 = vld [vmem:[#allocation80_spill] sm:$0xff]  ;;  %v21262_v25 = vld [vmem:[#allocation39_spill] sm:$0xff] }
 0x54f   : > { %v13695_v19 = vpop.f32.mrf.mxu0  ;;  %14293 = vmatprep.subr.bf16.mxu0 %v15023_v22 }
 0x550   : > { %v17757_v53 = vadd.f32 %v4622_v48, %v4254_v43  ;;  %v13859_v32 = vpop.f32.mrf.mxu1  ;;  %14294 = vmatpush3.bf16.msra.mxu0 %v15023_v22  ;;  %v15025_v22 = vld [vmem:[%s20635_s4 + $0xe8] sm:$0xff]  }
 0x551   : > { %v4137_v47 = vpop.f32.mrf.mxu0 }
 0x552   : > { %v4255_v57 = vadd.f32 %v4137_v47, %v21260_v10  ;;  %v4625_v59 = vpop.f32.mrf.mxu1  ;;  %v15024_v10 = vld [vmem:[%s20635_s4 + $0xf0] sm:$0xff]  }
 0x553   : > { %v13696_v16 = vpop.f32.mrf.mxu0  ;;  %14295 = vmatprep.subr.bf16.mxu0 %v15024_v10 }
 0x554   : > { %v17760_v50 = vadd.f32 %v4625_v59, %v4255_v57  ;;  %v13860_v63 = vpop.f32.mrf.mxu1  ;;  %v21263_v59 = vld [vmem:[#allocation6_spill] sm:$0xff]  ;;  %14296 = vmatpush3.bf16.msra.mxu0 %v15024_v10 }
 0x555   : > { %v4142_v23 = vpop.f32.mrf.mxu0  ;;  %13974 = vmatmul.mubr.bf16.gmra.mxu0 %v21261_v42  ;;  %14297 = vmatprep.subr.bf16.mxu0 %v15025_v22 }
 0x556   : > { %v4256_v19 = vadd.f32 %v4142_v23, %v21262_v25  ;;  %v4630_v48 = vpop.f32.mrf.mxu1  ;;  %13977 = vmatprep.mubr.msk.bf16.mxu0 %vm15194_vm0, %v20898_v20 }
 0x557   : > { %v13699_v43 = vpop.f32.mrf.mxu0 }
 0x558   : > { %v17769_v32 = vadd.f32 %v4630_v48, %v4256_v19  ;;  %v13863_v47 = vpop.f32.mrf.mxu1  ;;  %v21265_v48 = vld [vmem:[#allocation83_spill] sm:$0xff]  ;;  %14298 = vmatpush3.bf16.msra.mxu0 %v15025_v22  ;;  %v15027_v22 = vld [vmem:[%s20635_s4 + $0xd8] sm:$0xff]  }
 0x559   : > { %v4145_v57 = vpop.f32.mrf.mxu0 }
 0x55a   : > { %v4257_v16 = vadd.f32 %v4145_v57, %v21263_v59  ;;  %v4633_v63 = vpop.f32.mrf.mxu1 }
 0x55b   : > { %v13700_v25 = vpop.f32.mrf.mxu0 }
 0x55c   : > { %v17775_v23 = vadd.f32 %v4633_v63, %v4257_v16  ;;  %v13864_v42 = vpop.f32.mrf.mxu1  ;;  %v15026_v16 = vld [vmem:[%s20635_s4 + $0xe0] sm:$0xff]   ;;  %v21266_v25 = vld [vmem:[#allocation3_spill] sm:$0xff] }
 0x55d   : > { %v4150_v19 = vpop.f32.mrf.mxu0  ;;  %13978 = vmatmul.mubr.bf16.gmra.mxu0 %v21265_v48  ;;  %14299 = vmatprep.subr.bf16.mxu0 %v15026_v16 }
 0x55e   : > { %21264 = vst [vmem:[#allocation14_spill] sm:$0xff] %v17775_v23  ;;  %v4258_v43 = vadd.f32 %v4150_v19, %v17135_v18  ;;  %v4638_v47 = vpop.f32.mrf.mxu1  ;;  %13981 = vmatprep.mubr.msk.bf16.mxu0 %vm15194_vm0, %v20898_v20  ;;  %14300 = vmatpush3.bf16.msra.mxu0 %v15026_v16 }
 0x55f   : > { %v13703_v57 = vpop.f32.mrf.mxu0  ;;  %14301 = vmatprep.subr.bf16.mxu0 %v15027_v22 }
 0x560   : > { %v17784_v10 = vadd.f32 %v4638_v47, %v4258_v43  ;;  %v13867_v59 = vpop.f32.mrf.mxu1  ;;  %v21268_v47 = vld [vmem:[#allocation86_spill] sm:$0xff] }
 0x561   : > { %v4153_v63 = vpop.f32.mrf.mxu0 }
 0x562   : > { %v4259_v42 = vadd.f32 %v4153_v63, %v21266_v25  ;;  %v4641_v48 = vpop.f32.mrf.mxu1  ;;  %14302 = vmatpush3.bf16.msra.mxu0 %v15027_v22  ;;  %v15029_v22 = vld [vmem:[%s20635_s4 + $0xc8] sm:$0xff]  }
 0x563   : > { %v13704_v18 = vpop.f32.mrf.mxu0 }
 0x564   : > { %v17790_v19 = vadd.f32 %v4641_v48, %v4259_v42  ;;  %v13868_v23 = vpop.f32.mrf.mxu1  ;;  %v21269_v48 = vld [vmem:[#allocation40_spill] sm:$0xff] }
 0x565   : > { %v4158_v43 = vpop.f32.mrf.mxu0  ;;  %13982 = vmatmul.mubr.bf16.gmra.mxu0 %v21268_v47  ;;  %v15028_v23 = vld [vmem:[%s20635_s4 + $0xd0] sm:$0xff]  }
 0x566   : > { %21267 = vst [vmem:[#allocation63_spill] sm:$0xff] %v17790_v19  ;;  %v4260_v57 = vadd.f32 %v4158_v43, %v17147_v60  ;;  %v4646_v59 = vpop.f32.mrf.mxu1  ;;  %13985 = vmatprep.mubr.msk.bf16.mxu0 %vm15194_vm0, %v20898_v20  ;;  %14303 = vmatprep.subr.bf16.mxu0 %v15028_v23 }
 0x567   : > { %v13707_v63 = vpop.f32.mrf.mxu0  ;;  %14304 = vmatpush3.bf16.msra.mxu0 %v15028_v23 }
 0x568   : > { %v17799_v16 = vadd.f32 %v4646_v59, %v4260_v57  ;;  %v13871_v25 = vpop.f32.mrf.mxu1  ;;  %v21271_v59 = vld [vmem:[#allocation89_spill] sm:$0xff]  ;;  %14305 = vmatprep.subr.bf16.mxu0 %v15029_v22 }
 0x569   : > { %v4161_v42 = vpop.f32.mrf.mxu0 }
 0x56a   : > { %v4261_v18 = vadd.f32 %v4161_v42, %v21269_v48  ;;  %v4649_v47 = vpop.f32.mrf.mxu1 }
 0x56b   : > { %v13708_v60 = vpop.f32.mrf.mxu0  ;;  %14306 = vmatpush3.bf16.msra.mxu0 %v15029_v22 }
 0x56c   : > { %v17805_v43 = vadd.f32 %v4649_v47, %v4261_v18  ;;  %v13872_v19 = vpop.f32.mrf.mxu1 }
 0x56d   : > { %v4166_v57 = vpop.f32.mrf.mxu0  ;;  %13986 = vmatmul.mubr.bf16.gmra.mxu0 %v21271_v59  ;;  %v15030_v19 = vld [vmem:[%s20635_s4 + $0xc0] sm:$0xff]  }
 0x56e   : > { %21270 = vst [vmem:[#allocation64_spill] sm:$0xff] %v17805_v43  ;;  %v4262_v63 = vadd.f32 %v4166_v57, %v17159_v37  ;;  %v4654_v25 = vpop.f32.mrf.mxu1  ;;  %13989 = vmatprep.mubr.msk.bf16.mxu0 %vm15194_vm0, %v20898_v20  ;;  %14307 = vmatprep.subr.bf16.mxu0 %v15030_v19 }
 0x56f   : > { %v13711_v42 = vpop.f32.mrf.mxu0  ;;  %14308 = vmatpush3.bf16.msra.mxu0 %v15030_v19 }
 0x570   : > { %v17814_v23 = vadd.f32 %v4654_v25, %v4262_v63  ;;  %v13875_v48 = vpop.f32.mrf.mxu1  ;;  %v21273_v42 = vld [vmem:[#allocation90_spill] sm:$0xff] }
 0x571   : > { %v4169_v18 = vpop.f32.mrf.mxu0 }
 0x572   : > { %v4263_v47 = vadd.f32 %v4169_v18, %v17162_v52  ;;  %v4657_v60 = vpop.f32.mrf.mxu1 }
 0x573   : > { %v13712_v37 = vpop.f32.mrf.mxu0 }
 0x574   : > { %v17820_v57 = vadd.f32 %v4657_v60, %v4263_v47  ;;  %v13876_v59 = vpop.f32.mrf.mxu1 }
 0x575   : > { %v4174_v43 = vpop.f32.mrf.mxu0  ;;  %13990 = vmatmul.mubr.bf16.gmra.mxu0 %v21273_v42  ;;  %v21274_v42 = vld [vmem:[#allocation92_spill] sm:$0xff] }
 0x576   : > { %21272 = vst [vmem:[#allocation15_spill] sm:$0xff] %v17820_v57  ;;  %v4264_v22 = vadd.f32 %v4174_v43, %v17171_v12  ;;  %v4662_v63 = vpop.f32.mrf.mxu1  ;;  %13993 = vmatprep.mubr.msk.bf16.mxu0 %vm15194_vm0, %v20898_v20 }
 0x577   : > { %v13715_v25 = vpop.f32.mrf.mxu0 }
 0x578   : > { %v17826_v48 = vadd.f32 %v4662_v63, %v4264_v22  ;;  %v13879_v52 = vpop.f32.mrf.mxu1 }
 0x579   : > { %v4177_v18 = vpop.f32.mrf.mxu0 }
 0x57a   : > { %v4265_v37 = vadd.f32 %v4177_v18, %v17174_v17  ;;  %v4665_v19 = vpop.f32.mrf.mxu1 }
 0x57b   : > { %v13716_v47 = vpop.f32.mrf.mxu0 }
 0x57c   : > { %v17829_v60 = vadd.f32 %v4665_v19, %v4265_v37  ;;  %v13880_v59 = vpop.f32.mrf.mxu1 }
 0x57d   : > { %v4182_v57 = vpop.f32.mrf.mxu0  ;;  %13994 = vmatmul.mubr.bf16.gmra.mxu0 %v21274_v42  ;;  %v21277_v42 = vld [vmem:[#allocation94_spill] sm:$0xff] }
 0x57e   : > { %v4266_v12 = vadd.f32 %v4182_v57, %v17183_v26  ;;  %v4670_v43 = vpop.f32.mrf.mxu1  ;;  %13997 = vmatprep.mubr.msk.bf16.mxu0 %vm15194_vm0, %v20898_v20 }
 0x57f   : > { %v13719_v22 = vpop.f32.mrf.mxu0 }
 0x580   : > { %v17835_v63 = vadd.f32 %v4670_v43, %v4266_v12  ;;  %v13883_v25 = vpop.f32.mrf.mxu1 }
 0x581   : > { %v4185_v52 = vpop.f32.mrf.mxu0 }
 0x582   : > { %21275 = vst [vmem:[#allocation66_spill] sm:$0xff] %v17835_v63  ;;  %v4267_v17 = vadd.f32 %v4185_v52, %v17186_v31  ;;  %v4673_v18 = vpop.f32.mrf.mxu1 }
 0x583   : > { %v13720_v37 = vpop.f32.mrf.mxu0 }
 0x584   : > { %v17838_v19 = vadd.f32 %v4673_v18, %v4267_v17  ;;  %v13884_v47 = vpop.f32.mrf.mxu1  ;;  %v17849_v18 = vld [vmem:[%s20634_s3] ss:$0 sm:$0xff] }
 0x585   : > { %v4190_v59 = vpop.f32.mrf.mxu0  ;;  %13998 = vmatmul.mubr.bf16.gmra.mxu0 %v21277_v42  ;;  %v21279_v47 = vld [vmem:[#allocation96_spill] sm:$0xff] }
 0x586   : > { %21276 = vst [vmem:[#allocation67_spill] sm:$0xff] %v17838_v19  ;;  %v4268_v26 = vadd.f32 %v4190_v59, %v17195_v49  ;;  %v4678_v57 = vpop.f32.mrf.mxu1  ;;  %14001 = vmatprep.mubr.msk.bf16.mxu0 %vm15194_vm0, %v20898_v20 }
 0x587   : > { %v13723_v12 = vpop.f32.mrf.mxu0 }
 0x588   : > { %v17844_v43 = vadd.f32 %v4678_v57, %v4268_v26  ;;  %v13887_v22 = vpop.f32.mrf.mxu1  ;;  %v5459_v26 = vpop.permute.xlu0 %5458 }
 0x589   : > { %v4193_v25 = vpop.f32.mrf.mxu0 }
 0x58a   : > { %21278 = vst [vmem:[#allocation16_spill] sm:$0xff] %v17844_v43  ;;  %v4681_v31 = vpop.f32.mrf.mxu1 }
 0x58b   : > { %v13724_v52 = vpop.f32.mrf.mxu0 }
 0x58c   : > { %v13888_v37 = vpop.f32.mrf.mxu1 }
 0x58d   : > { %v4863_v17 = vpop.f32.mrf.mxu0  ;;  %14002 = vmatmul.mubr.bf16.gmra.mxu0 %v21279_v47  ;;  %v21280_v37 = vld [vmem:[#allocation98_spill] sm:$0xff] }
 0x58e   : > { %v5157_v49 = vadd.f32 %v4863_v17, %v17204_v29  ;;  %14005 = vmatprep.mubr.msk.bf16.mxu0 %vm15194_vm0, %v20898_v20  ;;  %v5464_v17 = vpop.permute.xlu0 %5463 }
 0x58f   : > { %v13907_v59 = vpop.f32.mrf.mxu0 }
 0x590   : > { %v5237_v42 = vadd.f32 %v17849_v18, %v5157_v49 }
 0x591   : > { %v4866_v57 = vpop.f32.mrf.mxu0 }
 0x592   : > { %v5158_v12 = vadd.f32 %v4866_v57, %v17207_v35  ;;  %v5310_v25 = vmax.f32 %v5237_v42, 0.0  ;;  %v5469_v35 = vpop.permute.xlu1 %5468 }
 0x593   : > { %v13908_v22 = vpop.f32.mrf.mxu0 }
 0x594   : > { %v5238_v31 = vadd.f32 %v17849_v18, %v5158_v12  ;;  %v5821_v49 = vmul.f32 %v5459_v26, %v5310_v25 }
 0x595   : > { %v4871_v52 = vpop.f32.mrf.mxu0  ;;  %14006 = vmatmul.mubr.bf16.gmra.mxu0 %v21280_v37 }
 0x596   : > { %v5311_v47 = vmax.f32 %v5238_v31, 0.0  ;;  %v5159_v29 = vadd.f32 %v4871_v52, %v17216_v28  ;;  %14009 = vmatprep.mubr.msk.bf16.mxu0 %vm15194_vm0, %v20898_v20  ;;  %v21281_v52 = vld [vmem:[#allocation100_spill] sm:$0xff]  ;;  %v5474_v25 = vpop.permute.xlu1 %5473 }
 0x597   : > { %v13911_v59 = vpop.f32.mrf.mxu0 }
 0x598   : > { %v5822_v43 = vmul.f32 %v5464_v17, %v5311_v47  ;;  %v5239_v19 = vadd.f32 %v17849_v18, %v5159_v29 }
 0x599   : > { %v4874_v57 = vpop.f32.mrf.mxu0 }
 0x59a   : > { %v17863_v42 = vpack.c.bf16 %v5822_v43, %v5821_v49  ;;  %v5160_v12 = vadd.f32 %v4874_v57, %v17219_v8  ;;  %v5312_v37 = vmax.f32 %v5239_v19, 0.0 }
 0x59b   : > { %v13912_v22 = vpop.f32.mrf.mxu0 }
 0x59c   : > { %v5240_v31 = vadd.f32 %v17849_v18, %v5160_v12  ;;  %v5967_v26 = vshll.u32 %v17863_v42, 16  ;;  %v5823_v47 = vmul.f32 %v5469_v35, %v5312_v37 }
 0x59d   : > { %v4879_v28 = vpop.f32.mrf.mxu0  ;;  %14010 = vmatmul.mubr.bf16.gmra.mxu0 %v21281_v52 }
 0x59e   : > { %v5313_v63 = vmax.f32 %v5240_v31, 0.0  ;;  %v5161_v59 = vadd.f32 %v4879_v28, %v17228_v38  ;;  %14013 = vmatprep.mubr.msk.bf16.mxu0 %vm15194_vm0, %v20898_v20  ;;  %v5969_v57 = vrot.slane %v5967_v26, 1  ;;  %v5965_v31 = vshrl.u32 %v17863_v42, 16 }
 0x59f   : > { %v13915_v43 = vpop.f32.mrf.mxu0 }
 0x5a0   : > { %v5824_v29 = vmul.f32 %v5474_v25, %v5313_v63  ;;  %v5241_v8 = vadd.f32 %v17849_v18, %v5161_v59  ;;  %v21282_v43 = vld [vmem:[#allocation102_spill] sm:$0xff]  ;;  %v5479_v63 = vpop.permute.xlu0 %5478  ;;  %v5970_v59 = vor.u32 %v5969_v57, %v5965_v31 }
 0x5a1   : > { %v4882_v19 = vpop.f32.mrf.mxu0 }
 0x5a2   : > { %v17873_v17 = vpack.c.bf16 %v5824_v29, %v5823_v47  ;;  %v5162_v49 = vadd.f32 %v4882_v19, %v17231_v62  ;;  %v5314_v22 = vmax.f32 %v5241_v8, 0.0  ;;  %v5484_v62 = vpop.permute.xlu1 %5483 }
 0x5a3   : > { %v13916_v12 = vpop.f32.mrf.mxu0 }
 0x5a4   : > { %v5242_v38 = vadd.f32 %v17849_v18, %v5162_v49  ;;  %v5972_v28 = vshll.u32 %v17873_v17, 16  ;;  %v5825_v47 = vmul.f32 %v5479_v63, %v5314_v22  ;;  %v5489_v63 = vpop.permute.xlu0 %5488 }
 0x5a5   : > { %v4887_v52 = vpop.f32.mrf.mxu0  ;;  %14014 = vmatmul.mubr.bf16.gmra.mxu0 %v21282_v43  ;;  %v21283_v43 = vld [vmem:[#allocation104_spill] sm:$0xff] }
 0x5a6   : > { %v5315_v35 = vmax.f32 %v5242_v38, 0.0  ;;  %v5163_v37 = vadd.f32 %v4887_v52, %v17240_v21  ;;  %v5974_v25 = vrot.slane %v5972_v28, 1  ;;  %14017 = vmatprep.mubr.msk.bf16.mxu0 %vm15194_vm0, %v20898_v20  ;;  %v5976_v28 = vshrl.u32 %v17873_v17, 16 }
 0x5a7   : > { %v13919_v26 = vpop.f32.mrf.mxu0 }
 0x5a8   : > { %v5826_v29 = vmul.f32 %v5484_v62, %v5315_v35  ;;  %v5243_v8 = vadd.f32 %v17849_v18, %v5163_v37  ;;  %v5975_v19 = vsel %vm654_vm1, %v5970_v59, %v5974_v25  ;;  %v5978_v37 = vor.u32 %v5976_v28, %v5974_v25 }
 0x5a9   : > { %v4890_v49 = vpop.f32.mrf.mxu0  ;;  %14069 = vmatprep.mubr.bf16.mxu1 %v5975_v19 }
 0x5aa   : > { %v17885_v12 = vpack.c.bf16 %v5826_v29, %v5825_v47  ;;  %v5164_v38 = vadd.f32 %v4890_v49, %v17246_v58  ;;  %v5316_v57 = vmax.f32 %v5243_v8, 0.0  ;;  %v5494_v58 = vpop.permute.xlu1 %5493 }
 0x5ab   : > { %v13920_v21 = vpop.f32.mrf.mxu0 }
 0x5ac   : > { %v5244_v31 = vadd.f32 %v17849_v18, %v5164_v38  ;;  %v5980_v52 = vshll.u32 %v17885_v12, 16  ;;  %v5827_v47 = vmul.f32 %v5489_v63, %v5316_v57  ;;  %v5984_v57 = vshrl.u32 %v17885_v12, 16  ;;  %v5499_v63 = vpop.permute.xlu0 %5498 }
 0x5ad   : > { %v4895_v22 = vpop.f32.mrf.mxu0  ;;  %14018 = vmatmul.mubr.bf16.gmra.mxu0 %v21283_v43  ;;  %v21284_v43 = vld [vmem:[#allocation106_spill] sm:$0xff] }
 0x5ae   : > { %v5317_v35 = vmax.f32 %v5244_v31, 0.0  ;;  %v5165_v59 = vadd.f32 %v4895_v22, %v17255_v3  ;;  %v5982_v62 = vrot.slane %v5980_v52, 1  ;;  %14021 = vmatprep.mubr.msk.bf16.mxu0 %vm15194_vm0, %v20898_v20  ;;  %v15031_v3 = vld [vmem:[%s20635_s4 + $0x38] sm:$0xff]  }
 0x5af   : > { %v13923_v26 = vpop.f32.mrf.mxu0  ;;  %14133 = vmatprep.subr.bf16.mxu1 %v15031_v3 }
 0x5b0   : > { %v5828_v29 = vmul.f32 %v5494_v58, %v5317_v35  ;;  %v5245_v8 = vadd.f32 %v17849_v18, %v5165_v59  ;;  %v5983_v19 = vsel %vm654_vm1, %v5978_v37, %v5982_v62  ;;  %v5986_v37 = vor.u32 %v5984_v57, %v5982_v62  ;;  %v5504_v58 = vpop.permute.xlu1 %5503 }
 0x5b1   : > { %v4898_v49 = vpop.f32.mrf.mxu0  ;;  %14070 = vmatmul.mubr.bf16.vlgmr.msra.gmra.mxu1 %v5983_v19 }
 0x5b2   : > { %v17897_v38 = vpack.c.bf16 %v5828_v29, %v5827_v47  ;;  %v5166_v25 = vadd.f32 %v4898_v49, %v17258_v56  ;;  %v5318_v31 = vmax.f32 %v5245_v8, 0.0  ;;  %14134 = vmatpush3.bf16.msra.mxu1 %v15031_v3 }
 0x5b3   : > { %v13924_v21 = vpop.f32.mrf.mxu0 }
 0x5b4   : > { %v5246_v28 = vadd.f32 %v17849_v18, %v5166_v25  ;;  %v5988_v52 = vshll.u32 %v17897_v38, 16  ;;  %v5829_v47 = vmul.f32 %v5499_v63, %v5318_v31 }
 0x5b5   : > { %v4903_v22 = vpop.f32.mrf.mxu0  ;;  %14022 = vmatmul.mubr.bf16.gmra.mxu0 %v21284_v43 }
 0x5b6   : > { %v5319_v35 = vmax.f32 %v5246_v28, 0.0  ;;  %v5167_v56 = vadd.f32 %v4903_v22, %v17270_v11  ;;  %v5990_v59 = vrot.slane %v5988_v52, 1  ;;  %14025 = vmatprep.mubr.msk.bf16.mxu0 %vm15194_vm0, %v20898_v20  ;;  %v5992_v28 = vshrl.u32 %v17897_v38, 16  ;;  %v21287_v52 = vld [vmem:[#allocation107_spill] sm:$0xff]  ;;  %v5509_v22 = vpop.permute.xlu0 %5508 }
 0x5b7   : > { %v13927_v26 = vpop.f32.mrf.mxu0 }
 0x5b8   : > { %v5830_v29 = vmul.f32 %v5504_v58, %v5319_v35  ;;  %v5247_v8 = vadd.f32 %v17849_v18, %v5167_v56  ;;  %v17912_v19 = vsel %vm654_vm1, %v5986_v37, %v5990_v59  ;;  %v5994_v35 = vor.u32 %v5992_v28, %v5990_v59  ;;  %v15032_v59 = vld [vmem:[%s20635_s4 + $0x30] sm:$0xff]  }
 0x5b9   : > { %21285 = vst [vmem:[#allocation69_spill] sm:$0xff] %v17912_v19  ;;  %v4906_v49 = vpop.f32.mrf.mxu0  ;;  %14073 = vmatprep.mubr.bf16.mxu1 %v17912_v19  ;;  %14135 = vmatprep.subr.bf16.mxu1 %v15032_v59 }
 0x5ba   : > { %v17915_v25 = vpack.c.bf16 %v5830_v29, %v5829_v47  ;;  %v5168_v11 = vadd.f32 %v4906_v49, %v17279_v39  ;;  %v5320_v3 = vmax.f32 %v5247_v8, 0.0  ;;  %v5514_v39 = vpop.permute.xlu1 %5513  ;;  %14136 = vmatpush3.bf16.msra.mxu1 %v15032_v59 }
 0x5bb   : > { %v13928_v62 = vpop.f32.mrf.mxu0 }
 0x5bc   : > { %21286 = vst [vmem:[#allocation70_spill] sm:$0xff] %v17915_v25  ;;  %v5248_v21 = vadd.f32 %v17849_v18, %v5168_v11  ;;  %v5996_v31 = vshll.u32 %v17915_v25, 16  ;;  %v5831_v58 = vmul.f32 %v5509_v22, %v5320_v3 }
 0x5bd   : > { %v4911_v57 = vpop.f32.mrf.mxu0  ;;  %14026 = vmatmul.mubr.bf16.gmra.mxu0 %v21287_v52  ;;  %v5519_v52 = vpop.permute.xlu0 %5518 }
 0x5be   : > { %v5321_v43 = vmax.f32 %v5248_v21, 0.0  ;;  %v5169_v63 = vadd.f32 %v4911_v57, %v17294_v27  ;;  %v5998_v56 = vrot.slane %v5996_v31, 1  ;;  %14029 = vmatprep.mubr.msk.bf16.mxu0 %vm15194_vm0, %v20898_v20  ;;  %v6000_v21 = vshrl.u32 %v17915_v25, 16  ;;  %v21290_v57 = vld [vmem:[#allocation109_spill] sm:$0xff] }
 0x5bf   : > { %v13931_v37 = vpop.f32.mrf.mxu0 }
 0x5c0   : > { %v5832_v26 = vmul.f32 %v5514_v39, %v5321_v43  ;;  %v5249_v47 = vadd.f32 %v17849_v18, %v5169_v63  ;;  %v17927_v29 = vsel %vm654_vm1, %v5994_v35, %v5998_v56  ;;  %v6002_v63 = vor.u32 %v6000_v21, %v5998_v56  ;;  %v5524_v39 = vpop.permute.xlu1 %5523 }
 0x5c1   : > { %21288 = vst [vmem:[#allocation17_spill] sm:$0xff] %v17927_v29  ;;  %v4914_v8 = vpop.f32.mrf.mxu0  ;;  %14074 = vmatmul.mubr.bf16.gmra.mxu1 %v17927_v29 }
 0x5c2   : > { %v17930_v49 = vpack.c.bf16 %v5832_v26, %v5831_v58  ;;  %v5170_v27 = vadd.f32 %v4914_v8, %v17303_v7  ;;  %v5322_v62 = vmax.f32 %v5249_v47, 0.0  ;;  %v21291_v7 = vld [vmem:[#allocation7_spill] sm:$0xff] }
 0x5c3   : > { %v13932_v11 = vpop.f32.mrf.mxu0 }
 0x5c4   : > { %21289 = vst [vmem:[#allocation72_spill] sm:$0xff] %v17930_v49  ;;  %v5250_v3 = vadd.f32 %v17849_v18, %v5170_v27  ;;  %v6004_v28 = vshll.u32 %v17930_v49, 16  ;;  %v5833_v58 = vmul.f32 %v5519_v52, %v5322_v62  ;;  %v21293_v11 = vld [vmem:[#allocation42_spill] sm:$0xff]  ;;  %v21294_v52 = vld [vmem:[#allocation93_spill] sm:$0xff] }
 0x5c5   : > { %v4919_v31 = vpop.f32.mrf.mxu0  ;;  %14030 = vmatmul.mubr.bf16.gmra.mxu0 %v21290_v57 }
 0x5c6   : > { %v5323_v22 = vmax.f32 %v5250_v3, 0.0  ;;  %v5171_v43 = vadd.f32 %v4919_v31, %v21291_v7  ;;  %v6006_v35 = vrot.slane %v6004_v28, 1  ;;  %14033 = vmatprep.mubr.msk.bf16.mxu0 %vm15194_vm0, %v20898_v20  ;;  %v6008_v31 = vshrl.u32 %v17930_v49, 16 }
 0x5c7   : > { %v13935_v37 = vpop.f32.mrf.mxu0 }
 0x5c8   : > { %v5834_v26 = vmul.f32 %v5524_v39, %v5323_v22  ;;  %v5251_v47 = vadd.f32 %v17849_v18, %v5171_v43  ;;  %v17945_v8 = vsel %vm654_vm1, %v6002_v63, %v6006_v35  ;;  %v5529_v22 = vpop.permute.xlu0 %5528  ;;  %v21295_v43 = vld [vmem:[#allocation43_spill] sm:$0xff]  ;;  %v6010_v39 = vor.u32 %v6008_v31, %v6006_v35  ;;  %v21298_v35 = vld [vmem:[#allocation8_spill] sm:$0xff] }
 0x5c9   : > { %v4922_v27 = vpop.f32.mrf.mxu0  ;;  %14077 = vmatprep.mubr.bf16.mxu1 %v17945_v8 }
 0x5ca   : > { %v17948_v59 = vpack.c.bf16 %v5834_v26, %v5833_v58  ;;  %v5172_v56 = vadd.f32 %v4922_v27, %v21293_v11  ;;  %v5324_v21 = vmax.f32 %v5251_v47, 0.0  ;;  %v5534_v58 = vpop.permute.xlu1 %5533 }
 0x5cb   : > { %v13936_v3 = vpop.f32.mrf.mxu0 }
 0x5cc   : > { %21292 = vst [vmem:[#allocation73_spill] sm:$0xff] %v17948_v59  ;;  %v5252_v28 = vadd.f32 %v17849_v18, %v5172_v56  ;;  %v6012_v62 = vshll.u32 %v17948_v59, 16  ;;  %v5835_v47 = vmul.f32 %v5529_v22, %v5324_v21  ;;  %v6016_v22 = vshrl.u32 %v17948_v59, 16 }
 0x5cd   : > { %v4927_v57 = vpop.f32.mrf.mxu0  ;;  %14034 = vmatmul.mubr.bf16.gmra.mxu0 %v21294_v52 }
 0x5ce   : > { %v5325_v7 = vmax.f32 %v5252_v28, 0.0  ;;  %v5173_v63 = vadd.f32 %v4927_v57, %v21295_v43  ;;  %v6014_v37 = vrot.slane %v6012_v62, 1  ;;  %14037 = vmatprep.mubr.msk.bf16.mxu0 %vm15194_vm0, %v20898_v20  ;;  %v15033_v62 = vld [vmem:[%s20635_s4 + $0x28] sm:$0xff]  }
 0x5cf   : > { %v13939_v26 = vpop.f32.mrf.mxu0  ;;  %14137 = vmatprep.subr.bf16.mxu1 %v15033_v62 }
 0x5d0   : > { %v5836_v27 = vmul.f32 %v5534_v58, %v5325_v7  ;;  %v5253_v11 = vadd.f32 %v17849_v18, %v5173_v63  ;;  %v17960_v56 = vsel %vm654_vm1, %v6010_v39, %v6014_v37  ;;  %v21299_v63 = vld [vmem:[#allocation23_spill] sm:$0xff]  ;;  %v15166_v39 = vld [vmem:[%s15304_s12 + $0x138] sm:$0xff]   ;;  %14138 = vmatpush3.bf16.msra.mxu1 %v15033_v62  ;;  %v5539_v26 = vpop.permute.xlu0 %5538 }
 0x5d1   : > { %21296 = vst [vmem:[#allocation75_spill] sm:$0xff] %v17960_v56  ;;  %v4930_v3 = vpop.f32.mrf.mxu0  ;;  %14078 = vmatmul.mubr.bf16.gmra.mxu1 %v17960_v56  ;;  %v4774_v58 = vrot.slane %v15166_v39, 1 }
 0x5d2   : > { %v17963_v28 = vpack.c.bf16 %v5836_v27, %v5835_v47  ;;  %v5174_v31 = vadd.f32 %v4930_v3, %v21298_v35  ;;  %v5326_v21 = vmax.f32 %v5253_v11, 0.0  ;;  %v21300_v27 = vld [vmem:[#allocation45_spill] sm:$0xff]  ;;  %v6018_v35 = vor.u32 %v6016_v22, %v6014_v37  ;;  %v5544_v11 = vpop.permute.xlu1 %5543  ;;  %v21304_v22 = vld [vmem:[#allocation95_spill] sm:$0xff] }
 0x5d3   : > { %v13940_v57 = vpop.f32.mrf.mxu0 }
 0x5d4   : > { %21297 = vst [vmem:[#allocation76_spill] sm:$0xff] %v17963_v28  ;;  %v5254_v52 = vadd.f32 %v17849_v18, %v5174_v31  ;;  %v6020_v7 = vshll.u32 %v17963_v28, 16  ;;  %v5837_v29 = vmul.f32 %v5539_v26, %v5326_v21  ;;  %v6024_v26 = vshrl.u32 %v17963_v28, 16 }
 0x5d5   : > { %v4935_v43 = vpop.f32.mrf.mxu0  ;;  %14038 = vmatmul.mubr.bf16.gmra.mxu0 %v21299_v63 }
 0x5d6   : > { %v5327_v47 = vmax.f32 %v5254_v52, 0.0  ;;  %v5175_v3 = vadd.f32 %v4935_v43, %v21300_v27  ;;  %v6022_v57 = vrot.slane %v6020_v7, 1  ;;  %14041 = vmatprep.mubr.msk.bf16.mxu0 %vm15194_vm0, %v20898_v20  ;;  %v21303_v52 = vld [vmem:[#allocation46_spill] sm:$0xff]  ;;  %v4775_v7 = vsel %vm1794_vm2, %v21304_v22, %v4774_v58 }
 0x5d7   : > { %v13943_v31 = vpop.f32.mrf.mxu0 }
 0x5d8   : > { %v5838_v19 = vmul.f32 %v5544_v11, %v5327_v47  ;;  %v5255_v56 = vadd.f32 %v17849_v18, %v5175_v3  ;;  %v17979_v63 = vsel %vm654_vm1, %v6018_v35, %v6022_v57  ;;  %v4776_v35 = vrot.slane %v17378_v46, 1  ;;  %v5549_v11 = vpop.permute.xlu0 %5548 }
 0x5d9   : > { %21301 = vst [vmem:[#allocation78_spill] sm:$0xff] %v17979_v63  ;;  %v4938_v39 = vpop.f32.mrf.mxu0  ;;  %14081 = vmatprep.mubr.bf16.mxu1 %v17979_v63  ;;  %v6026_v31 = vor.u32 %v6024_v26, %v6022_v57 }
 0x5da   : > { %v17982_v62 = vpack.c.bf16 %v5838_v19, %v5837_v29  ;;  %v5176_v37 = vadd.f32 %v4938_v39, %v21303_v52  ;;  %v5328_v27 = vmax.f32 %v5255_v56, 0.0  ;;  %v5554_v56 = vpop.permute.xlu1 %5553  ;;  %v4777_v57 = vsel %vm1794_vm2, %v4774_v58, %v4776_v35 }
 0x5db   : > { %v13944_v43 = vpop.f32.mrf.mxu0 }
 0x5dc   : > { %21302 = vst [vmem:[#allocation79_spill] sm:$0xff] %v17982_v62  ;;  %v5256_v21 = vadd.f32 %v17849_v18, %v5176_v37  ;;  %v6028_v47 = vshll.u32 %v17982_v62, 16  ;;  %v5839_v37 = vmul.f32 %v5549_v11, %v5328_v27 }
 0x5dd   : > { %v4943_v3 = vpop.f32.mrf.mxu0  ;;  %14042 = vmatmul.mubr.bf16.gmra.mxu0 %v4775_v7 }
 0x5de   : > { %v5329_v19 = vmax.f32 %v5256_v21, 0.0  ;;  %v5177_v29 = vadd.f32 %v4943_v3, %v17407_v14  ;;  %v6030_v39 = vrot.slane %v6028_v47, 1  ;;  %14045 = vmatprep.mubr.msk.bf16.mxu0 %vm15194_vm0, %v20898_v20  ;;  %v15034_v21 = vld [vmem:[%s20635_s4 + $0x20] sm:$0xff]   ;;  %v6032_v3 = vshrl.u32 %v17982_v62, 16 }
 0x5df   : > { %v13947_v52 = vpop.f32.mrf.mxu0  ;;  %14139 = vmatprep.subr.bf16.mxu1 %v15034_v21 }
 0x5e0   : > { %v5840_v22 = vmul.f32 %v5554_v56, %v5329_v19  ;;  %v5257_v43 = vadd.f32 %v17849_v18, %v5177_v29  ;;  %v17996_v63 = vsel %vm654_vm1, %v6026_v31, %v6030_v39  ;;  %14140 = vmatpush3.bf16.msra.mxu1 %v15034_v21  ;;  %v5559_v29 = vpop.permute.xlu0 %5558  ;;  %v6034_v31 = vor.u32 %v6032_v3, %v6030_v39  ;;  %v5564_v52 = vpop.permute.xlu1 %5563 }
 0x5e1   : > { %v4946_v7 = vpop.f32.mrf.mxu0  ;;  %14082 = vmatmul.mubr.bf16.gmra.mxu1 %v17996_v63 }
 0x5e2   : > { %v17999_v46 = vpack.c.bf16 %v5840_v22, %v5839_v37  ;;  %v5178_v14 = vadd.f32 %v4946_v7, %v17417_v15  ;;  %v5330_v26 = vmax.f32 %v5257_v43, 0.0 }
 0x5e3   : > { %v13948_v27 = vpop.f32.mrf.mxu0 }
 0x5e4   : > { %21305 = vst [vmem:[#allocation81_spill] sm:$0xff] %v17999_v46  ;;  %v5258_v47 = vadd.f32 %v17849_v18, %v5178_v14  ;;  %v6036_v11 = vshll.u32 %v17999_v46, 16  ;;  %v5841_v22 = vmul.f32 %v5559_v29, %v5330_v26 }
 0x5e5   : > { %v4951_v19 = vpop.f32.mrf.mxu0  ;;  %14046 = vmatmul.mubr.bf16.gmra.mxu0 %v4777_v57 }
 0x5e6   : > { %v5331_v15 = vmax.f32 %v5258_v47, 0.0  ;;  %v5179_v58 = vadd.f32 %v4951_v19, %v17432_v2  ;;  %v6038_v56 = vrot.slane %v6036_v11, 1  ;;  %14049 = vmatprep.mubr.msk.bf16.mxu0 %vm15194_vm0, %v20898_v20  ;;  %v6040_v47 = vshrl.u32 %v17999_v46, 16  ;;  %v5569_v11 = vpop.permute.xlu0 %5568 }
 0x5e7   : > { %v13951_v37 = vpop.f32.mrf.mxu0 }
 0x5e8   : > { %v5842_v43 = vmul.f32 %v5564_v52, %v5331_v15  ;;  %v5259_v7 = vadd.f32 %v17849_v18, %v5179_v58  ;;  %v18014_v14 = vsel %vm654_vm1, %v6034_v31, %v6038_v56  ;;  %v6042_v15 = vor.u32 %v6040_v47, %v6038_v56  ;;  %v5574_v31 = vpop.permute.xlu1 %5573  ;;  %v15035_v56 = vld [vmem:[%s20635_s4 + $0x18] sm:$0xff]  }
 0x5e9   : > { %v4954_v57 = vpop.f32.mrf.mxu0  ;;  %14085 = vmatprep.mubr.bf16.mxu1 %v18014_v14  ;;  %14141 = vmatprep.subr.bf16.mxu1 %v15035_v56 }
 0x5ea   : > { %v18017_v21 = vpack.c.bf16 %v5842_v43, %v5841_v22  ;;  %v5180_v2 = vadd.f32 %v4954_v57, %v17443_v33  ;;  %v5332_v27 = vmax.f32 %v5259_v7, 0.0  ;;  %14142 = vmatpush3.bf16.msra.mxu1 %v15035_v56 }
 0x5eb   : > { %v13952_v39 = vpop.f32.mrf.mxu0 }
 0x5ec   : > { %21306 = vst [vmem:[#allocation82_spill] sm:$0xff] %v18017_v21  ;;  %v5260_v20 = vadd.f32 %v17849_v18, %v5180_v2  ;;  %v6044_v26 = vshll.u32 %v18017_v21, 16  ;;  %v5843_v52 = vmul.f32 %v5569_v11, %v5332_v27  ;;  %v6048_v27 = vshrl.u32 %v18017_v21, 16 }
 0x5ed   : > { %v4959_v3 = vpop.f32.mrf.mxu0  ;;  %14050 = vmatmul.mubr.bf16.gmra.mxu0 %v4776_v35 }
 0x5ee   : > { %v5333_v19 = vmax.f32 %v5260_v20, 0.0  ;;  %v5181_v29 = vadd.f32 %v4959_v3, %v17454_v45  ;;  %14309 = vmatprep.mubr.bf16.mxu0 %v17885_v12  ;;  %v6046_v58 = vrot.slane %v6044_v26, 1  ;;  %v5579_v26 = vpop.permute.xlu0 %5578 }
 0x5ef   : > { %v13955_v33 = vpop.f32.mrf.mxu0 }
 0x5f0   : > { %v5844_v37 = vmul.f32 %v5574_v31, %v5333_v19  ;;  %v5261_v22 = vadd.f32 %v17849_v18, %v5181_v29  ;;  %v18027_v43 = vsel %vm654_vm1, %v6042_v15, %v6046_v58  ;;  %v6050_v11 = vor.u32 %v6048_v27, %v6046_v58  ;;  %v5584_v29 = vpop.permute.xlu1 %5583 }
 0x5f1   : > { %v4962_v7 = vpop.f32.mrf.mxu0  ;;  %14086 = vmatmul.mubr.bf16.gmra.mxu1 %v18027_v43 }
 0x5f2   : > { %v18030_v35 = vpack.c.bf16 %v5844_v37, %v5843_v52  ;;  %v5182_v45 = vadd.f32 %v4962_v7, %v17463_v44  ;;  %v5334_v2 = vmax.f32 %v5261_v22, 0.0  ;;  %v5589_v27 = vpop.permute.xlu0 %5588 }
 0x5f3   : > { %v13956_v57 = vpop.f32.mrf.mxu0 }
 0x5f4   : > { %21307 = vst [vmem:[#allocation84_spill] sm:$0xff] %v18030_v35  ;;  %v5262_v39 = vadd.f32 %v17849_v18, %v5182_v45  ;;  %v6052_v20 = vshll.u32 %v18030_v35, 16  ;;  %v5845_v31 = vmul.f32 %v5579_v26, %v5334_v2  ;;  %v6056_v57 = vshrl.u32 %v18030_v35, 16 }
 0x5f5   : > { %v4967_v47 = vpop.f32.mrf.mxu0  ;;  %14310 = vmatmul.mubr.bf16.vlgmr.msra.gmra.mxu0 %v17897_v38 }
 0x5f6   : > { %v5335_v3 = vmax.f32 %v5262_v39, 0.0  ;;  %v5183_v44 = vadd.f32 %v4967_v47, %v17478_v30  ;;  %14313 = vmatprep.mubr.bf16.mxu0 %v17915_v25  ;;  %v6054_v19 = vrot.slane %v6052_v20, 1 }
 0x5f7   : > { %v13959_v15 = vpop.f32.mrf.mxu0 }
 0x5f8   : > { %v5846_v33 = vmul.f32 %v5584_v29, %v5335_v3  ;;  %v5263_v52 = vadd.f32 %v17849_v18, %v5183_v44  ;;  %v18044_v37 = vsel %vm654_vm1, %v6050_v11, %v6054_v19  ;;  %v6058_v26 = vor.u32 %v6056_v57, %v6054_v19  ;;  %v15036_v19 = vld [vmem:[%s20635_s4 + $0x10] sm:$0xff]  }
 0x5f9   : > { %v4970_v22 = vpop.f32.mrf.mxu0  ;;  %14089 = vmatprep.mubr.bf16.mxu1 %v18044_v37  ;;  %14143 = vmatprep.subr.bf16.mxu1 %v15036_v19 }
 0x5fa   : > { %v18047_v7 = vpack.c.bf16 %v5846_v33, %v5845_v31  ;;  %v5184_v30 = vadd.f32 %v4970_v22, %v17487_v24  ;;  %v5336_v56 = vmax.f32 %v5263_v52, 0.0  ;;  %v5594_v24 = vpop.permute.xlu1 %5593  ;;  %14144 = vmatpush3.bf16.msra.mxu1 %v15036_v19 }
 0x5fb   : > { %v13960_v45 = vpop.f32.mrf.mxu0 }
 0x5fc   : > { %21308 = vst [vmem:[#allocation18_spill] sm:$0xff] %v18047_v7  ;;  %v5264_v58 = vadd.f32 %v17849_v18, %v5184_v30  ;;  %v6060_v2 = vshll.u32 %v18047_v7, 16  ;;  %v5847_v11 = vmul.f32 %v5589_v27, %v5336_v56  ;;  %v6064_v56 = vshrl.u32 %v18047_v7, 16 }
 0x5fd   : > { %v4975_v39 = vpop.f32.mrf.mxu0  ;;  %14314 = vmatmul.mubr.bf16.gmra.mxu0 %v17930_v49 }
 0x5fe   : > { %v5337_v20 = vmax.f32 %v5264_v58, 0.0  ;;  %v5185_v47 = vadd.f32 %v4975_v39, %v17499_v5  ;;  %14317 = vmatprep.mubr.bf16.mxu0 %v17948_v59  ;;  %v6062_v3 = vrot.slane %v6060_v2, 1  ;;  %v5599_v2 = vpop.permute.xlu0 %5598 }
 0x5ff   : > { %v13963_v44 = vpop.f32.mrf.mxu0 }
 0x600   : > { %v5848_v29 = vmul.f32 %v5594_v24, %v5337_v20  ;;  %v5265_v15 = vadd.f32 %v17849_v18, %v5185_v47  ;;  %v18058_v31 = vsel %vm654_vm1, %v6058_v26, %v6062_v3  ;;  %v6066_v27 = vor.u32 %v6064_v56, %v6062_v3  ;;  %v5604_v47 = vpop.permute.xlu1 %5603  ;;  %v15038_v3 = vld [vmem:[%s20635_s4 + $0x178] sm:$0xff]  }
 0x601   : > { %21309 = vst [vmem:[#allocation85_spill] sm:$0xff] %v18058_v31  ;;  %v4978_v33 = vpop.f32.mrf.mxu0  ;;  %14090 = vmatmul.mubr.bf16.gmra.mxu1 %v18058_v31  ;;  %14453 = vmatprep.subr.bf16.mxu0 %v15038_v3 }
 0x602   : > { %v18061_v52 = vpack.c.bf16 %v5848_v29, %v5847_v11  ;;  %v5186_v5 = vadd.f32 %v4978_v33, %v17508_v9  ;;  %v5338_v30 = vmax.f32 %v5265_v15, 0.0  ;;  %14454 = vmatpush3.bf16.msra.mxu0 %v15038_v3  ;;  %v15040_v3 = vld [vmem:[%s20635_s4 + $0x168] sm:$0xff]  }
 0x603   : > { %v13964_v22 = vpop.f32.mrf.mxu0 }
 0x604   : > { %21310 = vst [vmem:[#allocation87_spill] sm:$0xff] %v18061_v52  ;;  %v5266_v45 = vadd.f32 %v17849_v18, %v5186_v5  ;;  %v6068_v58 = vshll.u32 %v18061_v52, 16  ;;  %v5849_v24 = vmul.f32 %v5599_v2, %v5338_v30  ;;  %v6072_v30 = vshrl.u32 %v18061_v52, 16 }
 0x605   : > { %v4983_v57 = vpop.f32.mrf.mxu0  ;;  %14318 = vmatmul.mubr.bf16.gmra.mxu0 %v17963_v28 }
 0x606   : > { %v5339_v39 = vmax.f32 %v5266_v45, 0.0  ;;  %v5187_v9 = vadd.f32 %v4983_v57, %v17520_v55  ;;  %14321 = vmatprep.mubr.bf16.mxu0 %v17982_v62  ;;  %v6070_v20 = vrot.slane %v6068_v58, 1  ;;  %v5609_v58 = vpop.permute.xlu0 %5608 }
 0x607   : > { %v13967_v26 = vpop.f32.mrf.mxu0 }
 0x608   : > { %v5850_v44 = vmul.f32 %v5604_v47, %v5339_v39  ;;  %v5267_v11 = vadd.f32 %v17849_v18, %v5187_v9  ;;  %v18075_v29 = vsel %vm654_vm1, %v6066_v27, %v6070_v20  ;;  %v6074_v2 = vor.u32 %v6072_v30, %v6070_v20  ;;  %v5614_v9 = vpop.permute.xlu1 %5613  ;;  %v15039_v47 = vld [vmem:[%s20635_s4 + $0x170] sm:$0xff]  }
 0x609   : > { %21311 = vst [vmem:[#allocation29_spill] sm:$0xff] %v18075_v29  ;;  %v4986_v15 = vpop.f32.mrf.mxu0  ;;  %14093 = vmatprep.mubr.bf16.mxu1 %v18075_v29  ;;  %14455 = vmatprep.subr.bf16.mxu0 %v15039_v47 }
 0x60a   : > { %v18078_v33 = vpack.c.bf16 %v5850_v44, %v5849_v24  ;;  %v5188_v55 = vadd.f32 %v4986_v15, %v17529_v4  ;;  %v5340_v19 = vmax.f32 %v5267_v11, 0.0  ;;  %14456 = vmatpush3.bf16.msra.mxu0 %v15039_v47  ;;  %v15041_v47 = vld [vmem:[%s20635_s4 + $0x160] sm:$0xff]  }
 0x60b   : > { %v13968_v5 = vpop.f32.mrf.mxu0  ;;  %14457 = vmatprep.subr.bf16.mxu0 %v15040_v3 }
 0x60c   : > { %21312 = vst [vmem:[#allocation19_spill] sm:$0xff] %v18078_v33  ;;  %v5268_v22 = vadd.f32 %v17849_v18, %v5188_v55  ;;  %v6076_v45 = vshll.u32 %v18078_v33, 16  ;;  %v5851_v26 = vmul.f32 %v5609_v58, %v5340_v19  ;;  %v15037_v55 = vld [vmem:[%s20635_s4 + $0x8] sm:$0xff]   ;;  %v6080_v30 = vshrl.u32 %v18078_v33, 16 }
 0x60d   : > { %v4991_v56 = vpop.f32.mrf.mxu0  ;;  %14322 = vmatmul.mubr.bf16.gmra.mxu0 %v17999_v46  ;;  %14145 = vmatprep.subr.bf16.mxu1 %v15037_v55 }
 0x60e   : > { %v5341_v57 = vmax.f32 %v5268_v22, 0.0  ;;  %v5189_v4 = vadd.f32 %v4991_v56, %v17541_v54  ;;  %14325 = vmatprep.mubr.bf16.mxu0 %v18017_v21  ;;  %v6078_v39 = vrot.slane %v6076_v45, 1  ;;  %14146 = vmatpush3.bf16.msra.mxu1 %v15037_v55 }
 0x60f   : > { %v13971_v27 = vpop.f32.mrf.mxu0  ;;  %14458 = vmatpush3.bf16.msra.mxu0 %v15040_v3 }
 0x610   : > { %v5852_v24 = vmul.f32 %v5614_v9, %v5341_v57  ;;  %v5269_v44 = vadd.f32 %v17849_v18, %v5189_v4  ;;  %v18095_v11 = vsel %vm654_vm1, %v6074_v2, %v6078_v39  ;;  %v6082_v4 = vor.u32 %v6080_v30, %v6078_v39  ;;  %v5624_v9 = vpop.permute.xlu1 %5623  ;;  %14459 = vmatprep.subr.bf16.mxu0 %v15041_v47 }
 0x611   : > { %21313 = vst [vmem:[#allocation88_spill] sm:$0xff] %v18095_v11  ;;  %v4994_v15 = vpop.f32.mrf.mxu0  ;;  %14094 = vmatmul.mubr.bf16.gmra.mxu1 %v18095_v11 }
 0x612   : > { %v18098_v54 = vpack.c.bf16 %v5852_v24, %v5851_v26  ;;  %v5190_v20 = vadd.f32 %v4994_v15, %v17550_v1  ;;  %v5342_v19 = vmax.f32 %v5269_v44, 0.0  ;;  %v5619_v1 = vpop.permute.xlu0 %5618 }
 0x613   : > { %v13972_v5 = vpop.f32.mrf.mxu0  ;;  %14460 = vmatpush3.bf16.msra.mxu0 %v15041_v47 }
 0x614   : > { %21314 = vst [vmem:[#allocation20_spill] sm:$0xff] %v18098_v54  ;;  %v5270_v22 = vadd.f32 %v17849_v18, %v5190_v20  ;;  %v6084_v45 = vshll.u32 %v18098_v54, 16  ;;  %v5853_v26 = vmul.f32 %v5619_v1, %v5342_v19  ;;  %v15043_v5 = vld [vmem:[%s20635_s4 + $0x158] sm:$0xff]  }
 0x615   : > { %v4999_v56 = vpop.f32.mrf.mxu0  ;;  %14326 = vmatmul.mubr.bf16.gmra.mxu0 %v18030_v35  ;;  %14461 = vmatprep.subr.bf16.mxu0 %v15043_v5 }
 0x616   : > { %v5343_v58 = vmax.f32 %v5270_v22, 0.0  ;;  %v5191_v57 = vadd.f32 %v4999_v56, %v17562_v51  ;;  %14329 = vmatprep.mubr.bf16.mxu0 %v18047_v7  ;;  %v6086_v2 = vrot.slane %v6084_v45, 1  ;;  %v6088_v22 = vshrl.u32 %v18098_v54, 16  ;;  %v5629_v56 = vpop.permute.xlu0 %5628 }
 0x617   : > { %v13975_v27 = vpop.f32.mrf.mxu0  ;;  %14462 = vmatpush3.bf16.msra.mxu0 %v15043_v5  ;;  %v15045_v5 = vld [vmem:[%s20635_s4 + $0x148] sm:$0xff]  }
 0x618   : > { %v5854_v24 = vmul.f32 %v5624_v9, %v5343_v58  ;;  %v5271_v44 = vadd.f32 %v17849_v18, %v5191_v57  ;;  %v18118_v15 = vsel %vm654_vm1, %v6082_v4, %v6086_v2  ;;  %v6090_v58 = vor.u32 %v6088_v22, %v6086_v2  ;;  %v5634_v4 = vpop.permute.xlu1 %5633  ;;  %v15044_v27 = vld [vmem:[%s20635_s4 + $0x150] sm:$0xff]  }
 0x619   : > { %21315 = vst [vmem:[#allocation28_spill] sm:$0xff] %v18118_v15  ;;  %v5002_v51 = vpop.f32.mrf.mxu0  ;;  %14097 = vmatprep.mubr.bf16.mxu1 %v18118_v15  ;;  %14463 = vmatprep.subr.bf16.mxu0 %v15044_v27 }
 0x61a   : > { %v18121_v39 = vpack.c.bf16 %v5854_v24, %v5853_v26  ;;  %v5192_v20 = vadd.f32 %v5002_v51, %v17574_v34  ;;  %v5344_v3 = vmax.f32 %v5271_v44, 0.0 }
 0x61b   : > { %v13976_v55 = vpop.f32.mrf.mxu0  ;;  %14464 = vmatpush3.bf16.msra.mxu0 %v15044_v27  ;;  %v15046_v27 = vld [vmem:[%s20635_s4 + $0x140] sm:$0xff]  }
 0x61c   : > { %21316 = vst [vmem:[#allocation91_spill] sm:$0xff] %v18121_v39  ;;  %v5272_v19 = vadd.f32 %v17849_v18, %v5192_v20  ;;  %v6092_v30 = vshll.u32 %v18121_v39, 16  ;;  %v5855_v47 = vmul.f32 %v5629_v56, %v5344_v3  ;;  %v15042_v20 = vld [vmem:[%s20635_s4] sm:$0xff]   ;;  %v6096_v22 = vshrl.u32 %v18121_v39, 16  ;;  %14465 = vmatprep.subr.bf16.mxu0 %v15045_v5 }
 0x61d   : > { %v5007_v45 = vpop.f32.mrf.mxu0  ;;  %14330 = vmatmul.mubr.bf16.gmra.mxu0 %v18061_v52  ;;  %14147 = vmatprep.subr.bf16.mxu1 %v15042_v20 }
 0x61e   : > { %v5345_v1 = vmax.f32 %v5272_v19, 0.0  ;;  %v5193_v34 = vadd.f32 %v5007_v45, %v17586_v6  ;;  %14333 = vmatprep.mubr.bf16.mxu0 %v18078_v33  ;;  %v6094_v57 = vrot.slane %v6092_v30, 1  ;;  %14148 = vmatpush3.bf16.msra.mxu1 %v15042_v20 }
 0x61f   : > { %v13979_v9 = vpop.f32.mrf.mxu0  ;;  %14466 = vmatpush3.bf16.msra.mxu0 %v15045_v5 }
 0x620   : > { %v5856_v26 = vmul.f32 %v5634_v4, %v5345_v1  ;;  %v5273_v24 = vadd.f32 %v17849_v18, %v5193_v34  ;;  %v18138_v44 = vsel %vm654_vm1, %v6090_v58, %v6094_v57  ;;  %v6098_v34 = vor.u32 %v6096_v22, %v6094_v57  ;;  %v5644_v4 = vpop.permute.xlu1 %5643  ;;  %14467 = vmatprep.subr.bf16.mxu0 %v15046_v27 }
 0x621   : > { %21317 = vst [vmem:[#allocation21_spill] sm:$0xff] %v18138_v44  ;;  %v5010_v51 = vpop.f32.mrf.mxu0  ;;  %14098 = vmatmul.mubr.bf16.gmra.mxu1 %v18138_v44 }
 0x622   : > { %v18141_v6 = vpack.c.bf16 %v5856_v26, %v5855_v47  ;;  %v5194_v2 = vadd.f32 %v5010_v51, %v17595_v0  ;;  %v5346_v3 = vmax.f32 %v5273_v24, 0.0  ;;  %v5639_v0 = vpop.permute.xlu0 %5638 }
 0x623   : > { %v13980_v55 = vpop.f32.mrf.mxu0  ;;  %14468 = vmatpush3.bf16.msra.mxu0 %v15046_v27 }
 0x624   : > { %21318 = vst [vmem:[#allocation22_spill] sm:$0xff] %v18141_v6  ;;  %v5274_v19 = vadd.f32 %v17849_v18, %v5194_v2  ;;  %v6100_v30 = vshll.u32 %v18141_v6, 16  ;;  %v5857_v47 = vmul.f32 %v5639_v0, %v5346_v3  ;;  %v6104_v3 = vshrl.u32 %v18141_v6, 16 }
 0x625   : > { %v5015_v45 = vpop.f32.mrf.mxu0  ;;  %14334 = vmatmul.mubr.bf16.gmra.mxu0 %v18098_v54 }
 0x626   : > { %v5347_v56 = vmax.f32 %v5274_v19, 0.0  ;;  %v5195_v1 = vadd.f32 %v5015_v45, %v17607_v13  ;;  %14337 = vmatprep.mubr.bf16.mxu0 %v18121_v39  ;;  %v6102_v58 = vrot.slane %v6100_v30, 1  ;;  %v5649_v30 = vpop.permute.xlu0 %5648 }
 0x627   : > { %v13983_v9 = vpop.f32.mrf.mxu0 }
 0x628   : > { %v5858_v26 = vmul.f32 %v5644_v4, %v5347_v56  ;;  %v5275_v24 = vadd.f32 %v17849_v18, %v5195_v1  ;;  %v18161_v51 = vsel %vm654_vm1, %v6098_v34, %v6102_v58  ;;  %v6106_v56 = vor.u32 %v6104_v3, %v6102_v58  ;;  %v5654_v1 = vpop.permute.xlu1 %5653  ;;  %v18184_v58 = vld [vmem:[%s20635_s4 + $0xb8] sm:$0xff]  }
 0x629   : > { %21319 = vst [vmem:[#allocation97_spill] sm:$0xff] %v18161_v51  ;;  %v5018_v13 = vpop.f32.mrf.mxu0  ;;  %14101 = vmatprep.mubr.bf16.mxu1 %v18161_v51  ;;  %14213 = vmatprep.subr.bf16.mxu1 %v18184_v58 }
 0x62a   : > { %v18164_v57 = vpack.c.bf16 %v5858_v26, %v5857_v47  ;;  %v5196_v2 = vadd.f32 %v5018_v13, %v17616_v61  ;;  %v5348_v55 = vmax.f32 %v5275_v24, 0.0  ;;  %v21323_v13 = vld [vmem:[#allocation9_spill] sm:$0xff] }
 0x62b   : > { %v13984_v20 = vpop.f32.mrf.mxu0 }
 0x62c   : > { %21320 = vst [vmem:[#allocation32_spill] sm:$0xff] %v18164_v57  ;;  %v5276_v5 = vadd.f32 %v17849_v18, %v5196_v2  ;;  %v6108_v19 = vshll.u32 %v18164_v57, 16  ;;  %v5859_v4 = vmul.f32 %v5649_v30, %v5348_v55 }
 0x62d   : > { %v5023_v22 = vpop.f32.mrf.mxu0  ;;  %14338 = vmatmul.mubr.bf16.gmra.mxu0 %v18141_v6 }
 0x62e   : > { %v5349_v45 = vmax.f32 %v5276_v5, 0.0  ;;  %v5197_v0 = vadd.f32 %v5023_v22, %v17628_v36  ;;  %14341 = vmatprep.mubr.bf16.mxu0 %v18164_v57  ;;  %v6110_v61 = vrot.slane %v6108_v19, 1  ;;  %v6112_v5 = vshrl.u32 %v18164_v57, 16  ;;  %v5659_v22 = vpop.permute.xlu0 %5658 }
 0x62f   : > { %v13987_v34 = vpop.f32.mrf.mxu0 }
 0x630   : > { %v5860_v9 = vmul.f32 %v5654_v1, %v5349_v45  ;;  %v5277_v27 = vadd.f32 %v17849_v18, %v5197_v0  ;;  %v18175_v47 = vsel %vm654_vm1, %v6106_v56, %v6110_v61  ;;  %v18189_v18 = vld [vmem:[%s20634_s3] ss:$0 sm:$0xff]  ;;  %v21324_v45 = vld [vmem:[#allocation48_spill] sm:$0xff]  ;;  %v6114_v56 = vor.u32 %v6112_v5, %v6110_v61  ;;  %v5664_v34 = vpop.permute.xlu1 %5663 }
 0x631   : > { %21321 = vst [vmem:[#allocation33_spill] sm:$0xff] %v18175_v47  ;;  %v5026_v26 = vpop.f32.mrf.mxu0  ;;  %14102 = vmatmul.mubr.bf16.gmra.mxu1 %v18175_v47  ;;  %v21327_v47 = vld [vmem:[#allocation49_spill] sm:$0xff] }
 0x632   : > { %v18178_v24 = vpack.c.bf16 %v5860_v9, %v5859_v4  ;;  %v5198_v36 = vadd.f32 %v5026_v26, %v21323_v13  ;;  %v5350_v20 = vmax.f32 %v5277_v27, 0.0 }
 0x633   : > { %v13988_v2 = vpop.f32.mrf.mxu0 }
 0x634   : > { %21322 = vst [vmem:[#allocation35_spill] sm:$0xff] %v18178_v24  ;;  %v5278_v55 = vadd.f32 %v18189_v18, %v5198_v36  ;;  %v6116_v3 = vshll.u32 %v18178_v24, 16  ;;  %v5861_v9 = vmul.f32 %v5659_v22, %v5350_v20  ;;  %v6120_v20 = vshrl.u32 %v18178_v24, 16  ;;  %v5669_v22 = vpop.permute.xlu0 %5668 }
 0x635   : > { %v5031_v19 = vpop.f32.mrf.mxu0  ;;  %14342 = vmatmul.mubr.bf16.gmra.mxu0 %v18178_v24 }
 0x636   : > { %v5351_v30 = vmax.f32 %v5278_v55, 0.0  ;;  %v5199_v0 = vadd.f32 %v5031_v19, %v21324_v45  ;;  %v6118_v1 = vrot.slane %v6116_v3, 1  ;;  %v21328_v45 = vld [vmem:[#allocation10_spill] sm:$0xff] }
 0x637   : > { %v13991_v4 = vpop.f32.mrf.mxu0 }
 0x638   : > { %v5862_v27 = vmul.f32 %v5664_v34, %v5351_v30  ;;  %v5279_v26 = vadd.f32 %v18189_v18, %v5199_v0  ;;  %v18199_v13 = vsel %vm654_vm1, %v6114_v56, %v6118_v1  ;;  %v6122_v56 = vor.u32 %v6120_v20, %v6118_v1  ;;  %v5674_v4 = vpop.permute.xlu1 %5673 }
 0x639   : > { %21325 = vst [vmem:[#allocation38_spill] sm:$0xff] %v18199_v13  ;;  %v5034_v36 = vpop.f32.mrf.mxu0  ;;  %14105 = vmatprep.mubr.bf16.mxu1 %v18199_v13  ;;  %v21331_v13 = vld [vmem:[#allocation51_spill] sm:$0xff] }
 0x63a   : > { %v18202_v2 = vpack.c.bf16 %v5862_v27, %v5861_v9  ;;  %v5200_v55 = vadd.f32 %v5034_v36, %v21327_v47  ;;  %v5352_v19 = vmax.f32 %v5279_v26, 0.0 }
 0x63b   : > { %v13992_v51 = vpop.f32.mrf.mxu0 }
 0x63c   : > { %21326 = vst [vmem:[#allocation41_spill] sm:$0xff] %v18202_v2  ;;  %v5280_v61 = vadd.f32 %v18189_v18, %v5200_v55  ;;  %14345 = vmatprep.mubr.bf16.mxu0 %v18202_v2  ;;  %v6124_v5 = vshll.u32 %v18202_v2, 16  ;;  %v5863_v47 = vmul.f32 %v5669_v22, %v5352_v19  ;;  %v6128_v19 = vshrl.u32 %v18202_v2, 16  ;;  %v5679_v22 = vpop.permute.xlu0 %5678 }
 0x63d   : > { %v5039_v3 = vpop.f32.mrf.mxu0 }
 0x63e   : > { %v5353_v30 = vmax.f32 %v5280_v61, 0.0  ;;  %v5201_v0 = vadd.f32 %v5039_v3, %v21328_v45  ;;  %v6126_v34 = vrot.slane %v6124_v5, 1  ;;  %v21332_v45 = vld [vmem:[#allocation52_spill] sm:$0xff] }
 0x63f   : > { %v13995_v9 = vpop.f32.mrf.mxu0 }
 0x640   : > { %v5864_v51 = vmul.f32 %v5674_v4, %v5353_v30  ;;  %v5281_v27 = vadd.f32 %v18189_v18, %v5201_v0  ;;  %v18212_v26 = vsel %vm654_vm1, %v6122_v56, %v6126_v34  ;;  %v6130_v56 = vor.u32 %v6128_v19, %v6126_v34  ;;  %v5684_v9 = vpop.permute.xlu1 %5683 }
 0x641   : > { %21329 = vst [vmem:[#allocation44_spill] sm:$0xff] %v18212_v26  ;;  %v5042_v36 = vpop.f32.mrf.mxu0  ;;  %14106 = vmatmul.mubr.bf16.gmra.mxu1 %v18212_v26  ;;  %v21335_v26 = vld [vmem:[#allocation11_spill] sm:$0xff] }
 0x642   : > { %v18215_v55 = vpack.c.bf16 %v5864_v51, %v5863_v47  ;;  %v5202_v61 = vadd.f32 %v5042_v36, %v21331_v13  ;;  %v5354_v3 = vmax.f32 %v5281_v27, 0.0 }
 0x643   : > { %v13996_v44 = vpop.f32.mrf.mxu0 }
 0x644   : > { %21330 = vst [vmem:[#allocation47_spill] sm:$0xff] %v18215_v55  ;;  %v5282_v1 = vadd.f32 %v18189_v18, %v5202_v61  ;;  %14346 = vmatmul.mubr.bf16.gmra.mxu0 %v18215_v55  ;;  %v6132_v20 = vshll.u32 %v18215_v55, 16  ;;  %v5865_v13 = vmul.f32 %v5679_v22, %v5354_v3  ;;  %v6136_v3 = vshrl.u32 %v18215_v55, 16  ;;  %v5689_v22 = vpop.permute.xlu0 %5688 }
 0x645   : > { %v5047_v5 = vpop.f32.mrf.mxu0 }
 0x646   : > { %v5355_v30 = vmax.f32 %v5282_v1, 0.0  ;;  %v5203_v0 = vadd.f32 %v5047_v5, %v21332_v45  ;;  %v6134_v4 = vrot.slane %v6132_v20, 1  ;;  %v21336_v45 = vld [vmem:[#allocation54_spill] sm:$0xff] }
 0x647   : > { %v13999_v47 = vpop.f32.mrf.mxu0 }
 0x648   : > { %v5866_v44 = vmul.f32 %v5684_v9, %v5355_v30  ;;  %v5283_v51 = vadd.f32 %v18189_v18, %v5203_v0  ;;  %v18225_v27 = vsel %vm654_vm1, %v6130_v56, %v6134_v4  ;;  %v6138_v56 = vor.u32 %v6136_v3, %v6134_v4  ;;  %v5694_v47 = vpop.permute.xlu1 %5693 }
 0x649   : > { %21333 = vst [vmem:[#allocation50_spill] sm:$0xff] %v18225_v27  ;;  %v5050_v36 = vpop.f32.mrf.mxu0  ;;  %14109 = vmatprep.mubr.bf16.mxu1 %v18225_v27  ;;  %v21339_v27 = vld [vmem:[#allocation55_spill] sm:$0xff] }
 0x64a   : > { %v18228_v61 = vpack.c.bf16 %v5866_v44, %v5865_v13  ;;  %v5204_v1 = vadd.f32 %v5050_v36, %v21335_v26  ;;  %v5356_v5 = vmax.f32 %v5283_v51, 0.0 }
 0x64b   : > { %v14000_v15 = vpop.f32.mrf.mxu0 }
 0x64c   : > { %21334 = vst [vmem:[#allocation53_spill] sm:$0xff] %v18228_v61  ;;  %v5284_v34 = vadd.f32 %v18189_v18, %v5204_v1  ;;  %14349 = vmatprep.mubr.bf16.mxu0 %v18228_v61  ;;  %v6140_v19 = vshll.u32 %v18228_v61, 16  ;;  %v5867_v26 = vmul.f32 %v5689_v22, %v5356_v5  ;;  %v6144_v5 = vshrl.u32 %v18228_v61, 16  ;;  %v5699_v22 = vpop.permute.xlu0 %5698 }
 0x64d   : > { %v5055_v20 = vpop.f32.mrf.mxu0 }
 0x64e   : > { %v5357_v30 = vmax.f32 %v5284_v34, 0.0  ;;  %v5205_v0 = vadd.f32 %v5055_v20, %v21336_v45  ;;  %v6142_v9 = vrot.slane %v6140_v19, 1 }
 0x64f   : > { %v14003_v13 = vpop.f32.mrf.mxu0 }
 0x650   : > { %v5868_v15 = vmul.f32 %v5694_v47, %v5357_v30  ;;  %v5285_v44 = vadd.f32 %v18189_v18, %v5205_v0  ;;  %v18238_v51 = vsel %vm654_vm1, %v6138_v56, %v6142_v9  ;;  %v6146_v0 = vor.u32 %v6144_v5, %v6142_v9  ;;  %v5704_v47 = vpop.permute.xlu1 %5703 }
 0x651   : > { %21337 = vst [vmem:[#allocation24_spill] sm:$0xff] %v18238_v51  ;;  %v5058_v36 = vpop.f32.mrf.mxu0  ;;  %14110 = vmatmul.mubr.bf16.gmra.mxu1 %v18238_v51 }
 0x652   : > { %v18241_v1 = vpack.c.bf16 %v5868_v15, %v5867_v26  ;;  %v5206_v34 = vadd.f32 %v5058_v36, %v21339_v27  ;;  %v5358_v20 = vmax.f32 %v5285_v44, 0.0 }
 0x653   : > { %v14004_v11 = vpop.f32.mrf.mxu0 }
 0x654   : > { %21338 = vst [vmem:[#allocation99_spill] sm:$0xff] %v18241_v1  ;;  %v5286_v4 = vadd.f32 %v18189_v18, %v5206_v34  ;;  %14350 = vmatmul.mubr.bf16.gmra.mxu0 %v18241_v1  ;;  %v6148_v3 = vshll.u32 %v18241_v1, 16  ;;  %v5869_v27 = vmul.f32 %v5699_v22, %v5358_v20  ;;  %v21342_v34 = vld [vmem:[#allocation12_spill] sm:$0xff]  ;;  %v6152_v20 = vshrl.u32 %v18241_v1, 16 }
 0x655   : > { %v5063_v19 = vpop.f32.mrf.mxu0 }
 0x656   : > { %v5359_v30 = vmax.f32 %v5286_v4, 0.0  ;;  %v5207_v45 = vadd.f32 %v5063_v19, %v17721_v41  ;;  %v6150_v56 = vrot.slane %v6148_v3, 1  ;;  %v5709_v19 = vpop.permute.xlu0 %5708 }
 0x657   : > { %v14007_v13 = vpop.f32.mrf.mxu0 }
 0x658   : > { %v5870_v11 = vmul.f32 %v5704_v47, %v5359_v30  ;;  %v5287_v26 = vadd.f32 %v18189_v18, %v5207_v45  ;;  %v18251_v15 = vsel %vm654_vm1, %v6146_v0, %v6150_v56  ;;  %v21343_v30 = vld [vmem:[#allocation57_spill] sm:$0xff]  ;;  %v6154_v0 = vor.u32 %v6152_v20, %v6150_v56  ;;  %v5714_v13 = vpop.permute.xlu1 %5713 }
 0x659   : > { %21340 = vst [vmem:[#allocation56_spill] sm:$0xff] %v18251_v15  ;;  %v5066_v44 = vpop.f32.mrf.mxu0  ;;  %14113 = vmatprep.mubr.bf16.mxu1 %v18251_v15  ;;  %v21346_v15 = vld [vmem:[#allocation58_spill] sm:$0xff] }
 0x65a   : > { %v18254_v36 = vpack.c.bf16 %v5870_v11, %v5869_v27  ;;  %v5208_v4 = vadd.f32 %v5066_v44, %v21342_v34  ;;  %v5360_v41 = vmax.f32 %v5287_v26, 0.0 }
 0x65b   : > { %v14008_v51 = vpop.f32.mrf.mxu0 }
 0x65c   : > { %21341 = vst [vmem:[#allocation25_spill] sm:$0xff] %v18254_v36  ;;  %v5288_v9 = vadd.f32 %v18189_v18, %v5208_v4  ;;  %14353 = vmatprep.mubr.bf16.mxu0 %v18254_v36  ;;  %v6156_v5 = vshll.u32 %v18254_v36, 16  ;;  %v5871_v11 = vmul.f32 %v5709_v19, %v5360_v41  ;;  %v6160_v41 = vshrl.u32 %v18254_v36, 16  ;;  %v5719_v19 = vpop.permute.xlu0 %5718 }
 0x65d   : > { %v5071_v3 = vpop.f32.mrf.mxu0 }
 0x65e   : > { %v5361_v22 = vmax.f32 %v5288_v9, 0.0  ;;  %v5209_v45 = vadd.f32 %v5071_v3, %v21343_v30  ;;  %v6158_v47 = vrot.slane %v6156_v5, 1  ;;  %v21347_v30 = vld [vmem:[#allocation13_spill] sm:$0xff] }
 0x65f   : > { %v14011_v27 = vpop.f32.mrf.mxu0 }
 0x660   : > { %v5872_v51 = vmul.f32 %v5714_v13, %v5361_v22  ;;  %v5289_v26 = vadd.f32 %v18189_v18, %v5209_v45  ;;  %v18264_v44 = vsel %vm654_vm1, %v6154_v0, %v6158_v47  ;;  %v6162_v0 = vor.u32 %v6160_v41, %v6158_v47  ;;  %v5724_v27 = vpop.permute.xlu1 %5723 }
 0x661   : > { %21344 = vst [vmem:[#allocation101_spill] sm:$0xff] %v18264_v44  ;;  %v5074_v34 = vpop.f32.mrf.mxu0  ;;  %14114 = vmatmul.mubr.bf16.gmra.mxu1 %v18264_v44  ;;  %v21350_v44 = vld [vmem:[#allocation60_spill] sm:$0xff] }
 0x662   : > { %v18267_v4 = vpack.c.bf16 %v5872_v51, %v5871_v11  ;;  %v5210_v9 = vadd.f32 %v5074_v34, %v21346_v15  ;;  %v5362_v3 = vmax.f32 %v5289_v26, 0.0 }
 0x663   : > { %v14012_v29 = vpop.f32.mrf.mxu0 }
 0x664   : > { %21345 = vst [vmem:[#allocation59_spill] sm:$0xff] %v18267_v4  ;;  %v5290_v56 = vadd.f32 %v18189_v18, %v5210_v9  ;;  %14354 = vmatmul.mubr.bf16.gmra.mxu0 %v18267_v4  ;;  %v6164_v20 = vshll.u32 %v18267_v4, 16  ;;  %v5873_v15 = vmul.f32 %v5719_v19, %v5362_v3  ;;  %v6168_v3 = vshrl.u32 %v18267_v4, 16  ;;  %v5729_v19 = vpop.permute.xlu0 %5728 }
 0x665   : > { %v5079_v5 = vpop.f32.mrf.mxu0 }
 0x666   : > { %v5363_v22 = vmax.f32 %v5290_v56, 0.0  ;;  %v5211_v45 = vadd.f32 %v5079_v5, %v21347_v30  ;;  %v6166_v13 = vrot.slane %v6164_v20, 1 }
 0x667   : > { %v14015_v11 = vpop.f32.mrf.mxu0 }
 0x668   : > { %v5874_v29 = vmul.f32 %v5724_v27, %v5363_v22  ;;  %v5291_v51 = vadd.f32 %v18189_v18, %v5211_v45  ;;  %v18277_v26 = vsel %vm654_vm1, %v6162_v0, %v6166_v13  ;;  %v6170_v45 = vor.u32 %v6168_v3, %v6166_v13  ;;  %v5734_v27 = vpop.permute.xlu1 %5733 }
 0x669   : > { %21348 = vst [vmem:[#allocation26_spill] sm:$0xff] %v18277_v26  ;;  %v5082_v34 = vpop.f32.mrf.mxu0  ;;  %14117 = vmatprep.mubr.bf16.mxu1 %v18277_v26 }
 0x66a   : > { %v18280_v9 = vpack.c.bf16 %v5874_v29, %v5873_v15  ;;  %v5212_v56 = vadd.f32 %v5082_v34, %v21350_v44  ;;  %v5364_v5 = vmax.f32 %v5291_v51, 0.0 }
 0x66b   : > { %v14016_v31 = vpop.f32.mrf.mxu0 }
 0x66c   : > { %21349 = vst [vmem:[#allocation103_spill] sm:$0xff] %v18280_v9  ;;  %v5292_v47 = vadd.f32 %v18189_v18, %v5212_v56  ;;  %14357 = vmatprep.mubr.bf16.mxu0 %v18280_v9  ;;  %v6172_v41 = vshll.u32 %v18280_v9, 16  ;;  %v5875_v44 = vmul.f32 %v5729_v19, %v5364_v5  ;;  %v21353_v56 = vld [vmem:[#allocation61_spill] sm:$0xff]  ;;  %v6176_v5 = vshrl.u32 %v18280_v9, 16 }
 0x66d   : > { %v5087_v20 = vpop.f32.mrf.mxu0 }
 0x66e   : > { %v5365_v22 = vmax.f32 %v5292_v47, 0.0  ;;  %v5213_v30 = vadd.f32 %v5087_v20, %v17748_v40  ;;  %v6174_v0 = vrot.slane %v6172_v41, 1  ;;  %v5739_v20 = vpop.permute.xlu0 %5738 }
 0x66f   : > { %v14019_v11 = vpop.f32.mrf.mxu0 }
 0x670   : > { %v5876_v31 = vmul.f32 %v5734_v27, %v5365_v22  ;;  %v5293_v15 = vadd.f32 %v18189_v18, %v5213_v30  ;;  %v18290_v29 = vsel %vm654_vm1, %v6170_v45, %v6174_v0  ;;  %v6178_v30 = vor.u32 %v6176_v5, %v6174_v0  ;;  %v5744_v27 = vpop.permute.xlu1 %5743 }
 0x671   : > { %21351 = vst [vmem:[#allocation62_spill] sm:$0xff] %v18290_v29  ;;  %v5090_v51 = vpop.f32.mrf.mxu0  ;;  %14118 = vmatmul.mubr.bf16.gmra.mxu1 %v18290_v29 }
 0x672   : > { %v18293_v34 = vpack.c.bf16 %v5876_v31, %v5875_v44  ;;  %v5214_v47 = vadd.f32 %v5090_v51, %v21353_v56  ;;  %v5366_v40 = vmax.f32 %v5293_v15, 0.0 }
 0x673   : > { %v14020_v26 = vpop.f32.mrf.mxu0 }
 0x674   : > { %21352 = vst [vmem:[#allocation27_spill] sm:$0xff] %v18293_v34  ;;  %v5294_v13 = vadd.f32 %v18189_v18, %v5214_v47  ;;  %14358 = vmatmul.mubr.bf16.gmra.mxu0 %v18293_v34  ;;  %v6180_v3 = vshll.u32 %v18293_v34, 16  ;;  %v5877_v44 = vmul.f32 %v5739_v20, %v5366_v40  ;;  %v6184_v40 = vshrl.u32 %v18293_v34, 16 }
 0x675   : > { %v5095_v41 = vpop.f32.mrf.mxu0 }
 0x676   : > { %v5367_v19 = vmax.f32 %v5294_v13, 0.0  ;;  %v5215_v22 = vadd.f32 %v5095_v41, %v17757_v53  ;;  %v6182_v45 = vrot.slane %v6180_v3, 1  ;;  %v5749_v41 = vpop.permute.xlu0 %5748 }
 0x677   : > { %v14023_v11 = vpop.f32.mrf.mxu0 }
 0x678   : > { %v5878_v26 = vmul.f32 %v5744_v27, %v5367_v19  ;;  %v5295_v31 = vadd.f32 %v18189_v18, %v5215_v22  ;;  %v18303_v15 = vsel %vm654_vm1, %v6178_v30, %v6182_v45  ;;  %v6186_v22 = vor.u32 %v6184_v40, %v6182_v45  ;;  %v5754_v27 = vpop.permute.xlu1 %5753 }
 0x679   : > { %21354 = vst [vmem:[#allocation105_spill] sm:$0xff] %v18303_v15  ;;  %v5098_v51 = vpop.f32.mrf.mxu0  ;;  %14121 = vmatprep.mubr.bf16.mxu1 %v18303_v15 }
 0x67a   : > { %v18306_v56 = vpack.c.bf16 %v5878_v26, %v5877_v44  ;;  %v5216_v47 = vadd.f32 %v5098_v51, %v17760_v50  ;;  %v5368_v53 = vmax.f32 %v5295_v31, 0.0 }
 0x67b   : > { %v14024_v13 = vpop.f32.mrf.mxu0 }
 0x67c   : > { %21355 = vst [vmem:[#allocation65_spill] sm:$0xff] %v18306_v56  ;;  %v5296_v0 = vadd.f32 %v18189_v18, %v5216_v47  ;;  %14361 = vmatprep.mubr.bf16.mxu0 %v18306_v56  ;;  %v6188_v5 = vshll.u32 %v18306_v56, 16  ;;  %v5879_v50 = vmul.f32 %v5749_v41, %v5368_v53  ;;  %v21358_v13 = vld [vmem:[#allocation14_spill] sm:$0xff]  ;;  %v6192_v53 = vshrl.u32 %v18306_v56, 16 }
 0x67d   : > { %v5103_v3 = vpop.f32.mrf.mxu0 }
 0x67e   : > { %v5369_v20 = vmax.f32 %v5296_v0, 0.0  ;;  %v5217_v19 = vadd.f32 %v5103_v3, %v17769_v32  ;;  %v6190_v30 = vrot.slane %v6188_v5, 1  ;;  %v5759_v3 = vpop.permute.xlu0 %5758 }
 0x67f   : > { %v14027_v11 = vpop.f32.mrf.mxu0 }
 0x680   : > { %v5880_v44 = vmul.f32 %v5754_v27, %v5369_v20  ;;  %v5297_v26 = vadd.f32 %v18189_v18, %v5217_v19  ;;  %v18316_v31 = vsel %vm654_vm1, %v6186_v22, %v6190_v30  ;;  %v6194_v19 = vor.u32 %v6192_v53, %v6190_v30  ;;  %v5764_v27 = vpop.permute.xlu1 %5763 }
 0x681   : > { %21356 = vst [vmem:[#allocation30_spill] sm:$0xff] %v18316_v31  ;;  %v5106_v51 = vpop.f32.mrf.mxu0  ;;  %14122 = vmatmul.mubr.bf16.gmra.mxu1 %v18316_v31 }
 0x682   : > { %v18319_v47 = vpack.c.bf16 %v5880_v44, %v5879_v50  ;;  %v5218_v0 = vadd.f32 %v5106_v51, %v21358_v13  ;;  %v5370_v32 = vmax.f32 %v5297_v26, 0.0 }
 0x683   : > { %v14028_v15 = vpop.f32.mrf.mxu0 }
 0x684   : > { %21357 = vst [vmem:[#allocation31_spill] sm:$0xff] %v18319_v47  ;;  %v5298_v45 = vadd.f32 %v18189_v18, %v5218_v0  ;;  %14362 = vmatmul.mubr.bf16.gmra.mxu0 %v18319_v47  ;;  %v6196_v40 = vshll.u32 %v18319_v47, 16  ;;  %v5881_v50 = vmul.f32 %v5759_v3, %v5370_v32  ;;  %v21361_v0 = vld [vmem:[#allocation63_spill] sm:$0xff]  ;;  %v6200_v53 = vshrl.u32 %v18319_v47, 16  ;;  %v5769_v3 = vpop.permute.xlu0 %5768 }
 0x685   : > { %v5111_v5 = vpop.f32.mrf.mxu0 }
 0x686   : > { %v5371_v41 = vmax.f32 %v5298_v45, 0.0  ;;  %v5219_v20 = vadd.f32 %v5111_v5, %v17784_v10  ;;  %v6198_v22 = vrot.slane %v6196_v40, 1  ;;  %v18338_v10 = vld [vmem:[%s20635_s4 + $0x1f8] sm:$0xff]  }
 0x687   : > { %v14031_v11 = vpop.f32.mrf.mxu0  ;;  %14613 = vmatprep.subr.bf16.mxu0 %v18338_v10 }
 0x688   : > { %v5882_v15 = vmul.f32 %v5764_v27, %v5371_v41  ;;  %v5299_v44 = vadd.f32 %v18189_v18, %v5219_v20  ;;  %v18329_v26 = vsel %vm654_vm1, %v6194_v19, %v6198_v22  ;;  %v5774_v41 = vpop.permute.xlu1 %5773  ;;  %v6202_v19 = vor.u32 %v6200_v53, %v6198_v22  ;;  %v18346_v11 = vpop.f32.mrf.mxu1 }
 0x689   : > { %21359 = vst [vmem:[#allocation68_spill] sm:$0xff] %v18329_v26  ;;  %v5114_v51 = vpop.f32.mrf.mxu0  ;;  %14125 = vmatprep.mubr.bf16.mxu1 %v18329_v26  ;;  %21362 = vst [vmem:[#allocation110_spill] sm:$0xff] %v18346_v11 }
 0x68a   : > { %v18332_v13 = vpack.c.bf16 %v5882_v15, %v5881_v50  ;;  %v5220_v45 = vadd.f32 %v5114_v51, %v21361_v0  ;;  %v5372_v30 = vmax.f32 %v5299_v44, 0.0 }
 0x68b   : > { %v14032_v31 = vpop.f32.mrf.mxu0 }
 0x68c   : > { %21360 = vst [vmem:[#allocation108_spill] sm:$0xff] %v18332_v13  ;;  %v5300_v32 = vadd.f32 %v18189_v18, %v5220_v45  ;;  %14365 = vmatprep.mubr.bf16.mxu0 %v18332_v13  ;;  %v6204_v40 = vshll.u32 %v18332_v13, 16  ;;  %v5883_v15 = vmul.f32 %v5769_v3, %v5372_v30  ;;  %v6208_v30 = vshrl.u32 %v18332_v13, 16 }
 0x68d   : > { %v5119_v5 = vpop.f32.mrf.mxu0 }
 0x68e   : > { %v5373_v31 = vmax.f32 %v5300_v32, 0.0  ;;  %v5221_v20 = vadd.f32 %v5119_v5, %v17799_v16  ;;  %v6206_v27 = vrot.slane %v6204_v40, 1  ;;  %v21365_v32 = vld [vmem:[#allocation64_spill] sm:$0xff]  ;;  %v18356_v16 = vpop.f32.mrf.mxu1 }
 0x68f   : > { %v14035_v50 = vpop.f32.mrf.mxu0  ;;  %21366 = vst [vmem:[#allocation4_spill] sm:$0xff] %v18356_v16 }
 0x690   : > { %v5884_v44 = vmul.f32 %v5774_v41, %v5373_v31  ;;  %v5301_v51 = vadd.f32 %v18189_v18, %v5221_v20  ;;  %v18350_v0 = vsel %vm654_vm1, %v6202_v19, %v6206_v27  ;;  %v5779_v41 = vpop.permute.xlu0 %5778  ;;  %v5784_v31 = vpop.permute.xlu1 %5783  ;;  %v6210_v50 = vor.u32 %v6208_v30, %v6206_v27 }
 0x691   : > { %21363 = vst [vmem:[#allocation71_spill] sm:$0xff] %v18350_v0  ;;  %v5122_v45 = vpop.f32.mrf.mxu0  ;;  %14126 = vmatmul.mubr.bf16.gmra.mxu1 %v18350_v0 }
 0x692   : > { %v18353_v26 = vpack.c.bf16 %v5884_v44, %v5883_v15  ;;  %v5222_v29 = vadd.f32 %v5122_v45, %v21365_v32  ;;  %v5374_v53 = vmax.f32 %v5301_v51, 0.0  ;;  %v18363_v44 = vpop.f32.mrf.mxu1 }
 0x693   : > { %v14036_v22 = vpop.f32.mrf.mxu0  ;;  %21367 = vst [vmem:[#allocation74_spill] sm:$0xff] %v18363_v44 }
 0x694   : > { %21364 = vst [vmem:[#allocation34_spill] sm:$0xff] %v18353_v26  ;;  %v5302_v40 = vadd.f32 %v18189_v18, %v5222_v29  ;;  %14366 = vmatmul.mubr.bf16.gmra.mxu0 %v18353_v26  ;;  %v6212_v5 = vshll.u32 %v18353_v26, 16  ;;  %v5885_v51 = vmul.f32 %v5779_v41, %v5374_v53  ;;  %v6216_v53 = vshrl.u32 %v18353_v26, 16 }
 0x695   : > { %v5127_v3 = vpop.f32.mrf.mxu0 }
 0x696   : > { %v5375_v20 = vmax.f32 %v5302_v40, 0.0  ;;  %v5223_v19 = vadd.f32 %v5127_v3, %v17814_v23  ;;  %v6214_v15 = vrot.slane %v6212_v5, 1  ;;  %v21370_v40 = vld [vmem:[#allocation15_spill] sm:$0xff]  ;;  %v18373_v23 = vpop.f32.mrf.mxu1 }
 0x697   : > { %v14039_v45 = vpop.f32.mrf.mxu0  ;;  %21371 = vst [vmem:[#allocation77_spill] sm:$0xff] %v18373_v23 }
 0x698   : > { %v5886_v32 = vmul.f32 %v5784_v31, %v5375_v20  ;;  %v5303_v29 = vadd.f32 %v18189_v18, %v5223_v19  ;;  %v18367_v22 = vsel %vm654_vm1, %v6210_v50, %v6214_v15  ;;  %v18379_v41 = vpop.f32.mrf.mxu1  ;;  %v5789_v20 = vpop.permute.xlu0 %5788 }
 0x699   : > { %21368 = vst [vmem:[#allocation36_spill] sm:$0xff] %v18367_v22  ;;  %v5130_v16 = vpop.f32.mrf.mxu0  ;;  %14129 = vmatprep.mubr.bf16.mxu1 %v18367_v22  ;;  %21372 = vst [vmem:[#allocation5_spill] sm:$0xff] %v18379_v41 }
 0x69a   : > { %v18370_v11 = vpack.c.bf16 %v5886_v32, %v5885_v51  ;;  %v5224_v0 = vadd.f32 %v5130_v16, %v21370_v40  ;;  %v5376_v30 = vmax.f32 %v5303_v29, 0.0  ;;  %v6218_v16 = vor.u32 %v6216_v53, %v6214_v15  ;;  %v5794_v51 = vpop.permute.xlu1 %5793  ;;  %v18390_v41 = vpop.f32.mrf.mxu1 }
 0x69b   : > { %v14040_v27 = vpop.f32.mrf.mxu0  ;;  %21374 = vst [vmem:[#allocation80_spill] sm:$0xff] %v18390_v41 }
 0x69c   : > { %21369 = vst [vmem:[#allocation2_spill] sm:$0xff] %v18370_v11  ;;  %v5304_v5 = vadd.f32 %v18189_v18, %v5224_v0  ;;  %14369 = vmatprep.mubr.bf16.mxu0 %v18370_v11  ;;  %v6220_v3 = vshll.u32 %v18370_v11, 16  ;;  %v6985_v0 = vrot.slane %v17897_v38, 1  ;;  %v5887_v29 = vmul.f32 %v5789_v20, %v5376_v30 }
 0x69d   : > { %v5135_v31 = vpop.f32.mrf.mxu0  ;;  %v20797_v30 = vrot.slane %v17885_v12, 1 }
 0x69e   : > { %v5377_v19 = vmax.f32 %v5304_v5, 0.0  ;;  %v5225_v50 = vadd.f32 %v5135_v31, %v17826_v48  ;;  %v18382_v45 = vrot.slane %v6220_v3, 1 }
 0x69f   : > { %v14043_v32 = vpop.f32.mrf.mxu0  ;;  %v18403_v20 = vsel %vm1794_vm2, %v20797_v30, %v6985_v0 }
 0x6a0   : > { %v5888_v40 = vmul.f32 %v5794_v51, %v5377_v19  ;;  %v5305_v27 = vadd.f32 %v18189_v18, %v5225_v50  ;;  %v18388_v23 = vsel %vm654_vm1, %v6218_v16, %v18382_v45  ;;  %v18405_v19 = vpop.f32.mrf.mxu1  ;;  %v21377_v51 = vld [vmem:[#allocation66_spill] sm:$0xff] }
 0x6a1   : > { %21373 = vst [vmem:[#allocation37_spill] sm:$0xff] %v18388_v23  ;;  %v5138_v5 = vpop.f32.mrf.mxu0  ;;  %14130 = vmatmul.mubr.bf16.gmra.mxu1 %v18388_v23  ;;  %21376 = vst [vmem:[#allocation6_spill] sm:$0xff] %v18405_v19  ;;  %v6989_v19 = vrot.slane %v17930_v49, 1 }
 0x6a2   : > { %v18393_v48 = vpack.c.bf16 %v5888_v40, %v5887_v29  ;;  %v5226_v15 = vadd.f32 %v5138_v5, %v17829_v60  ;;  %14149 = vmatprep.mubr.bf16.mxu1 %v17863_v42  ;;  %v5378_v3 = vmax.f32 %v5305_v27, 0.0  ;;  %v5799_v60 = vpop.permute.xlu0 %5798  ;;  %v5804_v29 = vpop.permute.xlu1 %5803  ;;  %v6987_v27 = vrot.slane %v17915_v25, 1  ;;  %v15048_v5 = vld [vmem:[%s20635_s4 + $0xb0] sm:$0xff]  }
 0x6a3   : > { %v14044_v53 = vpop.f32.mrf.mxu0  ;;  %v18415_v41 = vpop.f32.mrf.mxu1 }
 0x6a4   : > { %21375 = vst [vmem:[#allocation39_spill] sm:$0xff] %v18393_v48  ;;  %v5306_v31 = vadd.f32 %v18189_v18, %v5226_v15  ;;  %14370 = vmatmul.mubr.bf16.gmra.mxu0 %v18393_v48  ;;  %v5889_v15 = vmul.f32 %v5799_v60, %v5378_v3  ;;  %21378 = vst [vmem:[#allocation83_spill] sm:$0xff] %v18415_v41  ;;  %v15055_v3 = vld [vmem:[%s20635_s4 + $0x1f0] sm:$0xff]  }
 0x6a5   : > { %v5143_v50 = vpop.f32.mrf.mxu0  ;;  %14469 = vmatprep.mubr.bf16.mxu0 %v18403_v20  ;;  %v18426_v60 = vpop.f32.mrf.mxu1 }
 0x6a6   : > { %v5379_v16 = vmax.f32 %v5306_v31, 0.0  ;;  %v5227_v32 = vadd.f32 %v5143_v50, %v21377_v51  ;;  %v21380_v50 = vld [vmem:[#allocation67_spill] sm:$0xff]  ;;  %21381 = vst [vmem:[#allocation86_spill] sm:$0xff] %v18426_v60 }
 0x6a7   : > { %v14047_v40 = vpop.f32.mrf.mxu0 }
 0x6a8   : > { %v5890_v53 = vmul.f32 %v5804_v29, %v5379_v16  ;;  %v5307_v30 = vadd.f32 %v18189_v18, %v5227_v32  ;;  %v18429_v32 = vsel %vm1794_vm2, %v6985_v0, %v6987_v27  ;;  %v15049_v29 = vld [vmem:[%s20635_s4 + $0xa8] sm:$0xff]   ;;  %v5809_v0 = vpop.permute.xlu0 %5808 }
 0x6a9   : > { %v5146_v44 = vpop.f32.mrf.mxu0  ;;  %14150 = vmatmul.mubr.bf16.vlgmr.msra.gmra.mxu1 %v17873_v17 }
 0x6aa   : > { %v18418_v31 = vpack.c.bf16 %v5890_v53, %v5889_v15  ;;  %v5228_v51 = vadd.f32 %v5146_v44, %v21380_v50  ;;  %14153 = vmatprep.mubr.bf16.mxu1 %v17885_v12  ;;  %14214 = vmatpush3.bf16.msra.mxu1 %v18184_v58  ;;  %v5380_v44 = vmax.f32 %v5307_v30, 0.0  ;;  %v18437_v58 = vsel %vm1794_vm2, %v6987_v27, %v6989_v19  ;;  %v5814_v53 = vpop.permute.xlu1 %5813  ;;  %v18444_v30 = vpop.f32.mrf.mxu1  ;;  %v15050_v27 = vld [vmem:[%s20635_s4 + $0xa0] sm:$0xff]  }
 0x6ab   : > { %v14048_v16 = vpop.f32.mrf.mxu0  ;;  %14215 = vmatprep.subr.bf16.mxu1 %v15048_v5  ;;  %21382 = vst [vmem:[#allocation40_spill] sm:$0xff] %v18437_v58  ;;  %21384 = vst [vmem:[#allocation89_spill] sm:$0xff] %v18444_v30 }
 0x6ac   : > { %21379 = vst [vmem:[#allocation3_spill] sm:$0xff] %v18418_v31  ;;  %v5308_v40 = vadd.f32 %v18189_v18, %v5228_v51  ;;  %14470 = vmatmul.mubr.bf16.vlgmr.msra.gmra.mxu0 %v18429_v32  ;;  %v21383_v16 = vld [vmem:[#allocation16_spill] sm:$0xff]  ;;  %v6991_v51 = vrot.slane %v17948_v59, 1  ;;  %v18461_v30 = vpop.f32.mrf.mxu1 }
 0x6ad   : > { %v5151_v15 = vpop.f32.mrf.mxu0  ;;  %14473 = vmatprep.mubr.bf16.mxu0 %v18437_v58  ;;  %14614 = vmatpush3.bf16.msra.mxu0 %v18338_v10  ;;  %v15056_v10 = vld [vmem:[%s20635_s4 + $0x1e8] sm:$0xff]  }
 0x6ae   : > { %v5381_v50 = vmax.f32 %v5308_v40, 0.0  ;;  %v18442_v60 = vadd.f32 %v5151_v15, %v21383_v16  ;;  %14216 = vmatpush3.bf16.msra.mxu1 %v15048_v5  ;;  %14615 = vmatprep.subr.bf16.mxu0 %v15055_v3  ;;  %v5891_v40 = vmul.f32 %v5809_v0, %v5380_v44  ;;  %v6993_v15 = vrot.slane %v17963_v28, 1  ;;  %v15052_v0 = vld [vmem:[%s20635_s4 + $0x90] sm:$0xff]  }
 0x6af   : > { %v14051_v18 = vpop.f32.mrf.mxu0  ;;  %14217 = vmatprep.subr.bf16.mxu1 %v15049_v29  ;;  %v18464_v44 = vsel %vm1794_vm2, %v6989_v19, %v6991_v51 }
 0x6b0   : > { %v5892_v41 = vmul.f32 %v5814_v53, %v5381_v50  ;;  %v15057_v18 = vld [vmem:[%s20635_s4 + $0x1e0] sm:$0xff]   ;;  %21386 = vst [vmem:[#allocation92_spill] sm:$0xff] %v18464_v44  ;;  %v15059_v53 = vld [vmem:[%s20635_s4 + $0x1d8] sm:$0xff]   ;;  %v6997_v50 = vrot.slane %v17999_v46, 1 }
 0x6b1   : > { %v5154_v5 = vpop.f32.mrf.mxu0  ;;  %14154 = vmatmul.mubr.bf16.gmra.mxu1 %v17897_v38  ;;  %14616 = vmatpush3.bf16.msra.mxu0 %v15055_v3  ;;  %v15051_v38 = vld [vmem:[%s20635_s4 + $0x98] sm:$0xff]  }
 0x6b2   : > { %v18455_v16 = vpack.c.bf16 %v5892_v41, %v5891_v40  ;;  %14157 = vmatprep.mubr.bf16.mxu1 %v17915_v25  ;;  %14218 = vmatpush3.bf16.msra.mxu1 %v15049_v29  ;;  %v18471_v41 = vsel %vm1794_vm2, %v6991_v51, %v6993_v15  ;;  %v6995_v29 = vrot.slane %v17982_v62, 1 }
 0x6b3   : > { %v14052_v23 = vpop.f32.mrf.mxu0  ;;  %14219 = vmatprep.subr.bf16.mxu1 %v15050_v27  ;;  %14617 = vmatprep.subr.bf16.mxu0 %v15056_v10  ;;  %21387 = vst [vmem:[#allocation94_spill] sm:$0xff] %v18471_v41 }
 0x6b4   : > { %21385 = vst [vmem:[#allocation90_spill] sm:$0xff] %v18455_v16  ;;  %14474 = vmatmul.mubr.bf16.gmra.mxu0 %v18464_v44  ;;  %v18476_v23 = vpop.f32.mrf.mxu1  ;;  %v18500_v5 = vsel %vm1794_vm2, %v6993_v15, %v6995_v29 }
 0x6b5   : > { %v18473_v3 = vpop.f32.mrf.mxu0  ;;  %14477 = vmatprep.mubr.bf16.mxu0 %v18471_v41  ;;  %14618 = vmatpush3.bf16.msra.mxu0 %v15056_v10  ;;  %v15060_v10 = vld [vmem:[%s20635_s4 + $0x1d0] sm:$0xff]   ;;  %21392 = vst [vmem:[#allocation104_spill] sm:$0xff] %v18500_v5 }
 0x6b6   : > { %21388 = vst [vmem:[#allocation96_spill] sm:$0xff] %v18473_v3  ;;  %14220 = vmatpush3.bf16.msra.mxu1 %v15050_v27  ;;  %14619 = vmatprep.subr.bf16.mxu0 %v15057_v18  ;;  %v18488_v51 = vpop.f32.mrf.mxu1  ;;  %v15058_v3 = vld [vmem:[%s20635_s4 + $0x80] sm:$0xff]  }
 0x6b7   : > { %v18478_v19 = vpop.f32.mrf.mxu0  ;;  %14221 = vmatprep.subr.bf16.mxu1 %v15051_v38 }
 0x6b8   : > { %21389 = vst [vmem:[#allocation98_spill] sm:$0xff] %v18478_v19  ;;  %v15053_v19 = vld [vmem:[%s20635_s4 + $0x88] sm:$0xff]  }
 0x6b9   : > { %14158 = vmatmul.mubr.bf16.gmra.mxu1 %v17930_v49  ;;  %v18491_v27 = vpop.f32.mrf.mxu0  ;;  %14620 = vmatpush3.bf16.msra.mxu0 %v15057_v18  ;;  %v18507_v18 = vsel %vm1794_vm2, %v6995_v29, %v6997_v50  ;;  %v15061_v29 = vld [vmem:[%s20635_s4 + $0x1c8] sm:$0xff]  }
 0x6ba   : > { %21390 = vst [vmem:[#allocation100_spill] sm:$0xff] %v18491_v27  ;;  %14161 = vmatprep.mubr.bf16.mxu1 %v17948_v59  ;;  %14222 = vmatpush3.bf16.msra.mxu1 %v15051_v38  ;;  %21393 = vst [vmem:[#allocation106_spill] sm:$0xff] %v18507_v18  ;;  %v18509_v38 = vpop.f32.mrf.mxu1 }
 0x6bb   : > { %v18497_v40 = vpop.f32.mrf.mxu0  ;;  %14223 = vmatprep.subr.bf16.mxu1 %v15052_v0  ;;  %14621 = vmatprep.subr.bf16.mxu0 %v15059_v53 }
 0x6bc   : > { %21391 = vst [vmem:[#allocation102_spill] sm:$0xff] %v18497_v40  ;;  %14478 = vmatmul.mubr.bf16.gmra.mxu0 %v18500_v5  ;;  %v6999_v40 = vrot.slane %v18017_v21, 1  ;;  %v18524_v59 = vpop.f32.mrf.mxu1 }
 0x6bd   : > { %v18511_v27 = vpop.f32.mrf.mxu0  ;;  %14481 = vmatprep.mubr.bf16.mxu0 %v18507_v18  ;;  %14622 = vmatpush3.bf16.msra.mxu0 %v15059_v53  ;;  %21396 = vst [vmem:[#allocation7_spill] sm:$0xff] %v18524_v59  ;;  %v15062_v53 = vld [vmem:[%s20635_s4 + $0x1c0] sm:$0xff]  }
 0x6be   : > { %21394 = vst [vmem:[#allocation107_spill] sm:$0xff] %v18511_v27  ;;  %14224 = vmatpush3.bf16.msra.mxu1 %v15052_v0  ;;  %14623 = vmatprep.subr.bf16.mxu0 %v15060_v10  ;;  %v7001_v27 = vrot.slane %v18030_v35, 1  ;;  %v18536_v49 = vsel %vm1794_vm2, %v6997_v50, %v6999_v40 }
 0x6bf   : > { %v18514_v15 = vpop.f32.mrf.mxu0  ;;  %14225 = vmatprep.subr.bf16.mxu1 %v15053_v19  ;;  %21399 = vst [vmem:[#allocation43_spill] sm:$0xff] %v18536_v49 }
 0x6c0   : > { %21395 = vst [vmem:[#allocation109_spill] sm:$0xff] %v18514_v15 }
 0x6c1   : > { %14162 = vmatmul.mubr.bf16.gmra.mxu1 %v17963_v28  ;;  %v18527_v0 = vpop.f32.mrf.mxu0  ;;  %14624 = vmatpush3.bf16.msra.mxu0 %v15060_v10  ;;  %v18541_v28 = vld [vmem:[%s20635_s4 + $0x138] sm:$0xff]   ;;  %v18547_v10 = vpop.f32.mrf.mxu1 }
 0x6c2   : > { %21397 = vst [vmem:[#allocation42_spill] sm:$0xff] %v18527_v0  ;;  %14165 = vmatprep.mubr.bf16.mxu1 %v17982_v62  ;;  %14226 = vmatpush3.bf16.msra.mxu1 %v15053_v19  ;;  %v18545_v19 = vsel %vm1794_vm2, %v6999_v40, %v7001_v27  ;;  %21401 = vst [vmem:[#allocation23_spill] sm:$0xff] %v18547_v10  ;;  %v7003_v62 = vrot.slane %v18047_v7, 1  ;;  %v7005_v40 = vrot.slane %v18061_v52, 1  ;;  %v21558_v10 = vld [vmem:[#allocation68_spill] sm:$0xff] }
 0x6c3   : > { %v18533_v15 = vpop.f32.mrf.mxu0  ;;  %14227 = vmatprep.subr.bf16.mxu1 %v15058_v3  ;;  %14625 = vmatprep.subr.bf16.mxu0 %v15061_v29  ;;  %21400 = vst [vmem:[#allocation8_spill] sm:$0xff] %v18545_v19  ;;  %v18552_v50 = vpop.f32.mrf.mxu1 }
 0x6c4   : > { %21398 = vst [vmem:[#allocation93_spill] sm:$0xff] %v18533_v15  ;;  %14482 = vmatmul.mubr.bf16.gmra.mxu0 %v18536_v49  ;;  %21403 = vst [vmem:[#allocation46_spill] sm:$0xff] %v18552_v50 }
 0x6c5   : > { %v18549_v0 = vpop.f32.mrf.mxu0  ;;  %14485 = vmatprep.mubr.bf16.mxu0 %v18545_v19  ;;  %14626 = vmatpush3.bf16.msra.mxu0 %v15061_v29  ;;  %v18563_v29 = vpop.f32.mrf.mxu1 }
 0x6c6   : > { %21402 = vst [vmem:[#allocation45_spill] sm:$0xff] %v18549_v0  ;;  %14228 = vmatpush3.bf16.msra.mxu1 %v15058_v3  ;;  %14627 = vmatprep.subr.bf16.mxu0 %v15062_v53  ;;  %21406 = vst [vmem:[#allocation48_spill] sm:$0xff] %v18563_v29  ;;  %v18568_v0 = vsel %vm1794_vm2, %v7001_v27, %v7003_v62 }
 0x6c7   : > { %v18554_v15 = vpop.f32.mrf.mxu0  ;;  %14373 = vmatprep.subr.bf16.mxu1 %v18541_v28  ;;  %21408 = vst [vmem:[#allocation10_spill] sm:$0xff] %v18568_v0 }
 0x6c8   : > { %21404 = vst [vmem:[#allocation95_spill] sm:$0xff] %v18554_v15  ;;  %v18572_v15 = vsel %vm1794_vm2, %v7003_v62, %v7005_v40 }
 0x6c9   : > { %14166 = vmatmul.mubr.bf16.gmra.mxu1 %v17999_v46  ;;  %v18560_v25 = vpop.f32.mrf.mxu0  ;;  %14628 = vmatpush3.bf16.msra.mxu0 %v15062_v53  ;;  %21409 = vst [vmem:[#allocation51_spill] sm:$0xff] %v18572_v15 }
 0x6ca   : > { %21405 = vst [vmem:[#allocation9_spill] sm:$0xff] %v18560_v25  ;;  %14169 = vmatprep.mubr.bf16.mxu1 %v18017_v21  ;;  %v18577_v25 = vpop.f32.mrf.mxu1  ;;  %v7007_v21 = vrot.slane %v18078_v33, 1 }
 0x6cb   : > { %v18565_v3 = vpop.f32.mrf.mxu0  ;;  %21411 = vst [vmem:[#allocation11_spill] sm:$0xff] %v18577_v25 }
 0x6cc   : > { %21407 = vst [vmem:[#allocation49_spill] sm:$0xff] %v18565_v3  ;;  %14486 = vmatmul.mubr.bf16.gmra.mxu0 %v18568_v0  ;;  %v7009_v3 = vrot.slane %v18098_v54, 1  ;;  %v18587_v62 = vpop.f32.mrf.mxu1 }
 0x6cd   : > { %v18574_v50 = vpop.f32.mrf.mxu0  ;;  %14489 = vmatprep.mubr.bf16.mxu0 %v18572_v15  ;;  %21414 = vst [vmem:[#allocation12_spill] sm:$0xff] %v18587_v62 }
 0x6ce   : > { %21410 = vst [vmem:[#allocation52_spill] sm:$0xff] %v18574_v50  ;;  %v18592_v50 = vsel %vm1794_vm2, %v7005_v40, %v7007_v21  ;;  %v18598_v25 = vpop.f32.mrf.mxu1 }
 0x6cf   : > { %v18579_v53 = vpop.f32.mrf.mxu0  ;;  %21416 = vst [vmem:[#allocation58_spill] sm:$0xff] %v18592_v50  ;;  %21418 = vst [vmem:[#allocation60_spill] sm:$0xff] %v18598_v25 }
 0x6d0   : > { %21412 = vst [vmem:[#allocation54_spill] sm:$0xff] %v18579_v53  ;;  %v18596_v53 = vsel %vm1794_vm2, %v7007_v21, %v7009_v3 }
 0x6d1   : > { %14170 = vmatmul.mubr.bf16.gmra.mxu1 %v18030_v35  ;;  %v18584_v27 = vpop.f32.mrf.mxu0  ;;  %21417 = vst [vmem:[#allocation13_spill] sm:$0xff] %v18596_v53  ;;  %v18607_v35 = vpop.f32.mrf.mxu1 }
 0x6d2   : > { %21413 = vst [vmem:[#allocation55_spill] sm:$0xff] %v18584_v27  ;;  %14173 = vmatprep.mubr.bf16.mxu1 %v18047_v7  ;;  %v7011_v7 = vrot.slane %v18121_v39, 1  ;;  %21421 = vst [vmem:[#allocation63_spill] sm:$0xff] %v18607_v35 }
 0x6d3   : > { %v18589_v46 = vpop.f32.mrf.mxu0  ;;  %v18622_v25 = vpop.f32.mrf.mxu1 }
 0x6d4   : > { %21415 = vst [vmem:[#allocation57_spill] sm:$0xff] %v18589_v46  ;;  %14490 = vmatmul.mubr.bf16.gmra.mxu0 %v18592_v50  ;;  %v7013_v46 = vrot.slane %v18141_v6, 1  ;;  %21426 = vst [vmem:[#allocation16_spill] sm:$0xff] %v18622_v25 }
 0x6d5   : > { %v18600_v29 = vpop.f32.mrf.mxu0  ;;  %14493 = vmatprep.mubr.bf16.mxu0 %v18596_v53 }
 0x6d6   : > { %21419 = vst [vmem:[#allocation61_spill] sm:$0xff] %v18600_v29  ;;  %v18616_v29 = vsel %vm1794_vm2, %v7009_v3, %v7011_v7 }
 0x6d7   : > { %v18603_v27 = vpop.f32.mrf.mxu0  ;;  %21424 = vst [vmem:[#allocation66_spill] sm:$0xff] %v18616_v29 }
 0x6d8   : > { %21420 = vst [vmem:[#allocation14_spill] sm:$0xff] %v18603_v27  ;;  %v18620_v27 = vsel %vm1794_vm2, %v7011_v7, %v7013_v46 }
 0x6d9   : > { %14174 = vmatmul.mubr.bf16.gmra.mxu1 %v18061_v52  ;;  %v18610_v40 = vpop.f32.mrf.mxu0  ;;  %21425 = vst [vmem:[#allocation67_spill] sm:$0xff] %v18620_v27 }
 0x6da   : > { %21422 = vst [vmem:[#allocation64_spill] sm:$0xff] %v18610_v40  ;;  %14177 = vmatprep.mubr.bf16.mxu1 %v18078_v33  ;;  %v7015_v40 = vrot.slane %v18164_v57, 1  ;;  %v18631_v33 = vpop.f32.mrf.mxu1 }
 0x6db   : > { %v18613_v21 = vpop.f32.mrf.mxu0  ;;  %21429 = vst [vmem:[#allocation113_spill] sm:$0xff] %v18631_v33 }
 0x6dc   : > { %21423 = vst [vmem:[#allocation15_spill] sm:$0xff] %v18613_v21  ;;  %14494 = vmatmul.mubr.bf16.gmra.mxu0 %v18616_v29  ;;  %v7017_v21 = vrot.slane %v18178_v24, 1  ;;  %v18637_v7 = vpop.f32.mrf.mxu1 }
 0x6dd   : > { %v18624_v62 = vpop.f32.mrf.mxu0  ;;  %14497 = vmatprep.mubr.bf16.mxu0 %v18620_v27  ;;  %21431 = vst [vmem:[#allocation115_spill] sm:$0xff] %v18637_v7 }
 0x6de   : > { %21427 = vst [vmem:[#allocation111_spill] sm:$0xff] %v18624_v62  ;;  %v18642_v62 = vsel %vm1794_vm2, %v7013_v46, %v7015_v40 }
 0x6df   : > { %v18627_v52 = vpop.f32.mrf.mxu0  ;;  %21433 = vst [vmem:[#allocation117_spill] sm:$0xff] %v18642_v62 }
 0x6e0   : > { %21428 = vst [vmem:[#allocation112_spill] sm:$0xff] %v18627_v52  ;;  %v18646_v52 = vsel %vm1794_vm2, %v7015_v40, %v7017_v21 }
 0x6e1   : > { %14178 = vmatmul.mubr.bf16.gmra.mxu1 %v18098_v54  ;;  %v18634_v3 = vpop.f32.mrf.mxu0  ;;  %21434 = vst [vmem:[#allocation118_spill] sm:$0xff] %v18646_v52  ;;  %v18651_v54 = vpop.f32.mrf.mxu1 }
 0x6e2   : > { %21430 = vst [vmem:[#allocation114_spill] sm:$0xff] %v18634_v3  ;;  %14181 = vmatprep.mubr.bf16.mxu1 %v18121_v39  ;;  %21436 = vst [vmem:[#allocation120_spill] sm:$0xff] %v18651_v54  ;;  %v7019_v39 = vrot.slane %v18202_v2, 1 }
 0x6e3   : > { %v18639_v25 = vpop.f32.mrf.mxu0  ;;  %v18661_v40 = vpop.f32.mrf.mxu1 }
 0x6e4   : > { %21432 = vst [vmem:[#allocation116_spill] sm:$0xff] %v18639_v25  ;;  %14498 = vmatmul.mubr.bf16.gmra.mxu0 %v18642_v62  ;;  %v7021_v25 = vrot.slane %v18215_v55, 1  ;;  %21439 = vst [vmem:[#allocation123_spill] sm:$0xff] %v18661_v40 }
 0x6e5   : > { %v18648_v35 = vpop.f32.mrf.mxu0  ;;  %14501 = vmatprep.mubr.bf16.mxu0 %v18646_v52  ;;  %v18673_v7 = vpop.f32.mrf.mxu1 }
 0x6e6   : > { %21435 = vst [vmem:[#allocation119_spill] sm:$0xff] %v18648_v35  ;;  %v18664_v35 = vsel %vm1794_vm2, %v7017_v21, %v7019_v39  ;;  %v18668_v54 = vsel %vm1794_vm2, %v7019_v39, %v7021_v25  ;;  %21443 = vst [vmem:[#allocation127_spill] sm:$0xff] %v18673_v7 }
 0x6e7   : > { %v18653_v3 = vpop.f32.mrf.mxu0  ;;  %21440 = vst [vmem:[#allocation124_spill] sm:$0xff] %v18664_v35  ;;  %21441 = vst [vmem:[#allocation125_spill] sm:$0xff] %v18668_v54 }
 0x6e8   : > { %21437 = vst [vmem:[#allocation121_spill] sm:$0xff] %v18653_v3 }
 0x6e9   : > { %14182 = vmatmul.mubr.bf16.gmra.mxu1 %v18141_v6  ;;  %v18658_v46 = vpop.f32.mrf.mxu0  ;;  %v18677_v6 = vpop.f32.mrf.mxu1 }
 0x6ea   : > { %21438 = vst [vmem:[#allocation122_spill] sm:$0xff] %v18658_v46  ;;  %14185 = vmatprep.mubr.bf16.mxu1 %v18164_v57  ;;  %v7023_v46 = vrot.slane %v18228_v61, 1  ;;  %v7025_v57 = vrot.slane %v18241_v1, 1  ;;  %21444 = vst [vmem:[#allocation128_spill] sm:$0xff] %v18677_v6 }
 0x6eb   : > { %v18671_v3 = vpop.f32.mrf.mxu0  ;;  %v18690_v7 = vpop.f32.mrf.mxu1 }
 0x6ec   : > { %14502 = vmatmul.mubr.bf16.gmra.mxu0 %v18664_v35  ;;  %21442 = vst [vmem:[#allocation126_spill] sm:$0xff] %v18671_v3  ;;  %v18684_v39 = vsel %vm1794_vm2, %v7021_v25, %v7023_v46  ;;  %v18688_v3 = vsel %vm1794_vm2, %v7023_v46, %v7025_v57  ;;  %21448 = vst [vmem:[#allocation132_spill] sm:$0xff] %v18690_v7 }
 0x6ed   : > { %14505 = vmatprep.mubr.bf16.mxu0 %v18668_v54  ;;  %v18680_v21 = vpop.f32.mrf.mxu0  ;;  %21446 = vst [vmem:[#allocation130_spill] sm:$0xff] %v18684_v39  ;;  %21447 = vst [vmem:[#allocation131_spill] sm:$0xff] %v18688_v3  ;;  %v18697_v6 = vpop.f32.mrf.mxu1 }
 0x6ee   : > { %21445 = vst [vmem:[#allocation129_spill] sm:$0xff] %v18680_v21  ;;  %v7029_v21 = vrot.slane %v18267_v4, 1  ;;  %21450 = vst [vmem:[#allocation134_spill] sm:$0xff] %v18697_v6 }
 0x6ef   : > { %v18693_v40 = vpop.f32.mrf.mxu0 }
 0x6f0   : > { %21449 = vst [vmem:[#allocation133_spill] sm:$0xff] %v18693_v40  ;;  %v18710_v40 = vpop.f32.mrf.mxu1 }
 0x6f1   : > { %14186 = vmatmul.mubr.bf16.gmra.mxu1 %v18178_v24  ;;  %v7027_v24 = vrot.slane %v18254_v36, 1  ;;  %v18700_v25 = vpop.f32.mrf.mxu0  ;;  %21454 = vst [vmem:[#allocation138_spill] sm:$0xff] %v18710_v40 }
 0x6f2   : > { %14189 = vmatprep.mubr.bf16.mxu1 %v18202_v2  ;;  %21451 = vst [vmem:[#allocation135_spill] sm:$0xff] %v18700_v25  ;;  %v18715_v6 = vpop.f32.mrf.mxu1  ;;  %v7031_v25 = vrot.slane %v18280_v9, 1 }
 0x6f3   : > { %v18704_v46 = vsel %vm1794_vm2, %v7025_v57, %v7027_v24  ;;  %v18708_v2 = vsel %vm1794_vm2, %v7027_v24, %v7029_v21  ;;  %v18713_v7 = vpop.f32.mrf.mxu0  ;;  %21456 = vst [vmem:[#allocation140_spill] sm:$0xff] %v18715_v6 }
 0x6f4   : > { %14506 = vmatmul.mubr.bf16.gmra.mxu0 %v18684_v39  ;;  %21452 = vst [vmem:[#allocation136_spill] sm:$0xff] %v18704_v46  ;;  %21453 = vst [vmem:[#allocation137_spill] sm:$0xff] %v18708_v2  ;;  %v18723_v24 = vpop.f32.mrf.mxu1 }
 0x6f5   : > { %14509 = vmatprep.mubr.bf16.mxu0 %v18688_v3  ;;  %21455 = vst [vmem:[#allocation139_spill] sm:$0xff] %v18713_v7  ;;  %v18720_v57 = vpop.f32.mrf.mxu0  ;;  %21458 = vst [vmem:[#allocation142_spill] sm:$0xff] %v18723_v24 }
 0x6f6   : > { %21457 = vst [vmem:[#allocation141_spill] sm:$0xff] %v18720_v57  ;;  %v18735_v40 = vpop.f32.mrf.mxu1  ;;  %v7035_v57 = vrot.slane %v18306_v56, 1 }
 0x6f7   : > { %v18733_v6 = vpop.f32.mrf.mxu0  ;;  %21462 = vst [vmem:[#allocation146_spill] sm:$0xff] %v18735_v40 }
 0x6f8   : > { %21461 = vst [vmem:[#allocation145_spill] sm:$0xff] %v18733_v6 }
 0x6f9   : > { %14190 = vmatmul.mubr.bf16.gmra.mxu1 %v18215_v55  ;;  %v18726_v55 = vsel %vm1794_vm2, %v7029_v21, %v7031_v25  ;;  %v18743_v21 = vpop.f32.mrf.mxu1 }
 0x6fa   : > { %14193 = vmatprep.mubr.bf16.mxu1 %v18228_v61  ;;  %v7033_v61 = vrot.slane %v18293_v34, 1  ;;  %21459 = vst [vmem:[#allocation143_spill] sm:$0xff] %v18726_v55  ;;  %21464 = vst [vmem:[#allocation148_spill] sm:$0xff] %v18743_v21 }
 0x6fc   : > { %14510 = vmatmul.mubr.bf16.gmra.mxu0 %v18704_v46  ;;  %v18730_v7 = vsel %vm1794_vm2, %v7031_v25, %v7033_v61  ;;  %v18746_v25 = vsel %vm1794_vm2, %v7033_v61, %v7035_v57 }
 0x6fd   : > { %14513 = vmatprep.mubr.bf16.mxu0 %v18708_v2  ;;  %21460 = vst [vmem:[#allocation144_spill] sm:$0xff] %v18730_v7  ;;  %21465 = vst [vmem:[#allocation149_spill] sm:$0xff] %v18746_v25 }
 0x701   : > { %14194 = vmatmul.mubr.bf16.gmra.mxu1 %v18241_v1  ;;  %v18740_v1 = vpop.f32.mrf.mxu0  ;;  %v18752_v40 = vpop.f32.mrf.mxu1 }
 0x702   : > { %14197 = vmatprep.mubr.bf16.mxu1 %v18254_v36  ;;  %v7037_v36 = vrot.slane %v18319_v47, 1  ;;  %21463 = vst [vmem:[#allocation147_spill] sm:$0xff] %v18740_v1  ;;  %21467 = vst [vmem:[#allocation151_spill] sm:$0xff] %v18752_v40  ;;  %v7039_v1 = vrot.slane %v18332_v13, 1 }
 0x703   : > { %v18755_v24 = vpop.f32.mrf.mxu0  ;;  %v18761_v21 = vpop.f32.mrf.mxu1 }
 0x704   : > { %14514 = vmatmul.mubr.bf16.gmra.mxu0 %v18726_v55  ;;  %v18750_v6 = vsel %vm1794_vm2, %v7035_v57, %v7037_v36  ;;  %21468 = vst [vmem:[#allocation152_spill] sm:$0xff] %v18755_v24  ;;  %21470 = vst [vmem:[#allocation154_spill] sm:$0xff] %v18761_v21  ;;  %v18766_v61 = vsel %vm1794_vm2, %v7037_v36, %v7039_v1 }
 0x705   : > { %14517 = vmatprep.mubr.bf16.mxu0 %v18730_v7  ;;  %21466 = vst [vmem:[#allocation150_spill] sm:$0xff] %v18750_v6  ;;  %21471 = vst [vmem:[#allocation155_spill] sm:$0xff] %v18766_v61  ;;  %v18774_v40 = vpop.f32.mrf.mxu1 }
 0x706   : > { %21474 = vst [vmem:[#allocation158_spill] sm:$0xff] %v18774_v40 }
 0x709   : > { %14198 = vmatmul.mubr.bf16.gmra.mxu1 %v18267_v4  ;;  %v18758_v4 = vpop.f32.mrf.mxu0 }
 0x70a   : > { %14201 = vmatprep.mubr.bf16.mxu1 %v18280_v9  ;;  %21469 = vst [vmem:[#allocation153_spill] sm:$0xff] %v18758_v4  ;;  %v7041_v9 = vrot.slane %v18353_v26, 1  ;;  %v7043_v4 = vrot.slane %v18370_v11, 1 }
 0x70b   : > { %v18768_v57 = vpop.f32.mrf.mxu0 }
 0x70c   : > { %14518 = vmatmul.mubr.bf16.gmra.mxu0 %v18746_v25  ;;  %21472 = vst [vmem:[#allocation156_spill] sm:$0xff] %v18768_v57  ;;  %v18772_v24 = vsel %vm1794_vm2, %v7039_v1, %v7041_v9  ;;  %v18788_v1 = vsel %vm1794_vm2, %v7041_v9, %v7043_v4  ;;  %v20828_v9 = vrot.slane %v18418_v31, 1 }
 0x70d   : > { %14521 = vmatprep.mubr.bf16.mxu0 %v18750_v6  ;;  %21473 = vst [vmem:[#allocation157_spill] sm:$0xff] %v18772_v24  ;;  %v18778_v21 = vpop.f32.mrf.mxu0  ;;  %21478 = vst [vmem:[#allocation162_spill] sm:$0xff] %v18788_v1 }
 0x70e   : > { %21475 = vst [vmem:[#allocation159_spill] sm:$0xff] %v18778_v21  ;;  %v6981_v21 = vrot.slane %v17873_v17, 1 }
 0x70f   : > { %v18790_v57 = vpop.f32.mrf.mxu0 }
 0x710   : > { %21479 = vst [vmem:[#allocation163_spill] sm:$0xff] %v18790_v57 }
 0x711   : > { %14202 = vmatmul.mubr.bf16.gmra.mxu1 %v18293_v34  ;;  %v18781_v34 = vpop.f32.mrf.mxu1 }
 0x712   : > { %14205 = vmatprep.mubr.bf16.mxu1 %v18306_v56  ;;  %v8351_v56 = vrot.slane %v18393_v48, 1  ;;  %21476 = vst [vmem:[#allocation160_spill] sm:$0xff] %v18781_v34 }
 0x713   : > { %v18785_v36 = vpop.f32.mrf.mxu1 }
 0x714   : > { %14522 = vmatmul.mubr.bf16.gmra.mxu0 %v18766_v61  ;;  %21477 = vst [vmem:[#allocation161_spill] sm:$0xff] %v18785_v36  ;;  %v18794_v40 = vsel %vm1794_vm2, %v7043_v4, %v8351_v56  ;;  %v18798_v34 = vpop.f32.mrf.mxu0  ;;  %v18813_v17 = vsel %vm1794_vm2, %v8351_v56, %v20828_v9  ;;  %v15065_v9 = vld [vmem:[%s20635_s4 + $0x128] sm:$0xff]  }
 0x715   : > { %14525 = vmatprep.mubr.bf16.mxu0 %v18772_v24  ;;  %21480 = vst [vmem:[#allocation164_spill] sm:$0xff] %v18794_v40  ;;  %21481 = vst [vmem:[#allocation165_spill] sm:$0xff] %v18798_v34 }
 0x716   : > { %v18806_v36 = vpop.f32.mrf.mxu0  ;;  %21485 = vst [vmem:[#allocation169_spill] sm:$0xff] %v18813_v17 }
 0x717   : > { %21483 = vst [vmem:[#allocation167_spill] sm:$0xff] %v18806_v36 }
 0x719   : > { %14206 = vmatmul.mubr.bf16.gmra.mxu1 %v18319_v47  ;;  %v18800_v47 = vpop.f32.mrf.mxu1 }
 0x71a   : > { %14209 = vmatprep.mubr.bf16.mxu1 %v18332_v13  ;;  %21482 = vst [vmem:[#allocation166_spill] sm:$0xff] %v18800_v47  ;;  %v6980_v13 = vrot.slane %v17863_v42, 1  ;;  %v18817_v42 = vpop.f32.mrf.mxu0 }
 0x71b   : > { %v18808_v4 = vpop.f32.mrf.mxu1  ;;  %21486 = vst [vmem:[#allocation170_spill] sm:$0xff] %v18817_v42  ;;  %v21492_v42 = vld [vmem:[#allocation75_spill] sm:$0xff] }
 0x71c   : > { %14526 = vmatmul.mubr.bf16.gmra.mxu0 %v18788_v1  ;;  %v6982_v57 = vsel %vm1794_vm2, %v6980_v13, %v6981_v21  ;;  %21484 = vst [vmem:[#allocation168_spill] sm:$0xff] %v18808_v4  ;;  %v15064_v13 = vld [vmem:[%s20635_s4 + $0x130] sm:$0xff]   ;;  %v18829_v56 = vpop.f32.mrf.mxu0 }
 0x71d   : > { %14529 = vmatprep.mubr.bf16.mxu0 %v18794_v40  ;;  %v18819_v40 = vpop.f32.mrf.mxu1  ;;  %21490 = vst [vmem:[#allocation173_spill] sm:$0xff] %v18829_v56 }
 0x71e   : > { %21487 = vst [vmem:[#allocation171_spill] sm:$0xff] %v18819_v40  ;;  %v21553_v40 = vld [vmem:[#allocation105_spill] sm:$0xff] }
 0x721   : > { %14210 = vmatmul.mubr.bf16.gmra.mxu1 %v18353_v26  ;;  %v18827_v34 = vpop.f32.mrf.mxu1  ;;  %v21509_v26 = vld [vmem:[#allocation29_spill] sm:$0xff] }
 0x722   : > { %14229 = vmatprep.mubr.bf16.mxu1 %v6982_v57  ;;  %v21488_v57 = vrot.slane %v17885_v12, 1  ;;  %21489 = vst [vmem:[#allocation172_spill] sm:$0xff] %v18827_v34 }
 0x723   : > { %v18839_v12 = vpop.f32.mrf.mxu1 }
 0x724   : > { %14530 = vmatmul.mubr.bf16.gmra.mxu0 %v18813_v17  ;;  %v6984_v36 = vsel %vm1794_vm2, %v6981_v21, %v21488_v57  ;;  %v18836_v17 = vpop.f32.mrf.mxu0  ;;  %21493 = vst [vmem:[#allocation75_spill] sm:$0xff] %v18839_v12  ;;  %v21494_v21 = vld [vmem:[#allocation78_spill] sm:$0xff]  ;;  %v15067_v57 = vld [vmem:[%s20635_s4 + $0x118] sm:$0xff]  }
 0x725   : > { %14629 = vmatprep.mubr.bf16.mxu0 %v17945_v8  ;;  %21491 = vst [vmem:[#allocation174_spill] sm:$0xff] %v18836_v17 }
 0x729   : > { %14230 = vmatmul.mubr.bf16.vlgmr.msra.gmra.mxu1 %v6984_v36  ;;  %v18847_v36 = vpop.f32.mrf.mxu1 }
 0x72a   : > { %14233 = vmatprep.mubr.bf16.mxu1 %v18403_v20  ;;  %14374 = vmatpush3.bf16.msra.mxu1 %v18541_v28  ;;  %v15066_v20 = vld [vmem:[%s20635_s4 + $0x120] sm:$0xff]   ;;  %v18845_v28 = vpop.f32.mrf.mxu0  ;;  %21496 = vst [vmem:[#allocation175_spill] sm:$0xff] %v18847_v36 }
 0x72b   : > { %14375 = vmatprep.subr.bf16.mxu1 %v15064_v13  ;;  %21495 = vst [vmem:[#allocation78_spill] sm:$0xff] %v18845_v28  ;;  %v18857_v17 = vpop.f32.mrf.mxu1  ;;  %v21549_v36 = vld [vmem:[#allocation26_spill] sm:$0xff] }
 0x72c   : > { %14630 = vmatmul.mubr.bf16.vlgmr.msra.gmra.mxu0 %v21492_v42  ;;  %21498 = vst [vmem:[#allocation177_spill] sm:$0xff] %v18857_v17 }
 0x72d   : > { %14633 = vmatprep.mubr.bf16.mxu0 %v21494_v21 }
 0x72e   : > { %14376 = vmatpush3.bf16.msra.mxu1 %v15064_v13  ;;  %v18854_v13 = vpop.f32.mrf.mxu0 }
 0x72f   : > { %14377 = vmatprep.subr.bf16.mxu1 %v15065_v9  ;;  %21497 = vst [vmem:[#allocation176_spill] sm:$0xff] %v18854_v13 }
 0x731   : > { %14234 = vmatmul.mubr.bf16.gmra.mxu1 %v18429_v32  ;;  %v18860_v28 = vpop.f32.mrf.mxu1  ;;  %v15068_v32 = vld [vmem:[%s20635_s4 + $0x110] sm:$0xff]  }
 0x732   : > { %14237 = vmatprep.mubr.bf16.mxu1 %v18437_v58  ;;  %14378 = vmatpush3.bf16.msra.mxu1 %v15065_v9  ;;  %21499 = vst [vmem:[#allocation178_spill] sm:$0xff] %v18860_v28  ;;  %v18865_v9 = vpop.f32.mrf.mxu0 }
 0x733   : > { %14379 = vmatprep.subr.bf16.mxu1 %v15066_v20  ;;  %21500 = vst [vmem:[#allocation179_spill] sm:$0xff] %v18865_v9  ;;  %v18871_v13 = vpop.f32.mrf.mxu1 }
 0x734   : > { %14634 = vmatmul.mubr.bf16.gmra.mxu0 %v17996_v63  ;;  %v18868_v56 = vpop.f32.mrf.mxu0  ;;  %21502 = vst [vmem:[#allocation181_spill] sm:$0xff] %v18871_v13 }
 0x735   : > { %14637 = vmatprep.mubr.bf16.mxu0 %v18014_v14  ;;  %21501 = vst [vmem:[#allocation180_spill] sm:$0xff] %v18868_v56  ;;  %v18880_v9 = vpop.f32.mrf.mxu1 }
 0x736   : > { %14380 = vmatpush3.bf16.msra.mxu1 %v15066_v20  ;;  %v15069_v20 = vld [vmem:[%s20635_s4 + $0x108] sm:$0xff]   ;;  %v18878_v58 = vpop.f32.mrf.mxu0  ;;  %21504 = vst [vmem:[#allocation183_spill] sm:$0xff] %v18880_v9  ;;  %v21516_v9 = vld [vmem:[#allocation28_spill] sm:$0xff] }
 0x737   : > { %14381 = vmatprep.subr.bf16.mxu1 %v15067_v57  ;;  %21503 = vst [vmem:[#allocation182_spill] sm:$0xff] %v18878_v58  ;;  %v21507_v58 = vld [vmem:[#allocation85_spill] sm:$0xff] }
 0x738   : > { %v18886_v56 = vpop.f32.mrf.mxu0 }
 0x739   : > { %14238 = vmatmul.mubr.bf16.gmra.mxu1 %v18464_v44  ;;  %21505 = vst [vmem:[#allocation184_spill] sm:$0xff] %v18886_v56 }
 0x73a   : > { %14241 = vmatprep.mubr.bf16.mxu1 %v18471_v41  ;;  %14382 = vmatpush3.bf16.msra.mxu1 %v15067_v57  ;;  %v15070_v57 = vld [vmem:[%s20635_s4 + $0x100] sm:$0xff]   ;;  %v18889_v41 = vpop.f32.mrf.mxu1 }
 0x73b   : > { %14383 = vmatprep.subr.bf16.mxu1 %v15068_v32  ;;  %21506 = vst [vmem:[#allocation185_spill] sm:$0xff] %v18889_v41  ;;  %v21514_v41 = vld [vmem:[#allocation88_spill] sm:$0xff] }
 0x73c   : > { %14638 = vmatmul.mubr.bf16.gmra.mxu0 %v18027_v43 }
 0x73d   : > { %14641 = vmatprep.mubr.bf16.mxu0 %v18044_v37 }
 0x73e   : > { %14384 = vmatpush3.bf16.msra.mxu1 %v15068_v32  ;;  %v18894_v32 = vld [vmem:[%s20635_s4 + $0x1b8] sm:$0xff]  }
 0x73f   : > { %14385 = vmatprep.subr.bf16.mxu1 %v15069_v20 }
 0x741   : > { %14242 = vmatmul.mubr.bf16.gmra.mxu1 %v18500_v5  ;;  %v18897_v44 = vpop.f32.mrf.mxu1  ;;  %v18900_v5 = vpop.f32.mrf.mxu0 }
 0x742   : > { %14245 = vmatprep.mubr.bf16.mxu1 %v18507_v18  ;;  %14386 = vmatpush3.bf16.msra.mxu1 %v15069_v20  ;;  %21508 = vst [vmem:[#allocation85_spill] sm:$0xff] %v18897_v44  ;;  %21510 = vst [vmem:[#allocation29_spill] sm:$0xff] %v18900_v5 }
 0x743   : > { %14387 = vmatprep.subr.bf16.mxu1 %v15070_v57  ;;  %v18905_v56 = vpop.f32.mrf.mxu1 }
 0x744   : > { %14642 = vmatmul.mubr.bf16.gmra.mxu0 %v21507_v58  ;;  %v18903_v20 = vpop.f32.mrf.mxu0  ;;  %21512 = vst [vmem:[#allocation187_spill] sm:$0xff] %v18905_v56 }
 0x745   : > { %14645 = vmatprep.mubr.bf16.mxu0 %v21509_v26  ;;  %21511 = vst [vmem:[#allocation186_spill] sm:$0xff] %v18903_v20  ;;  %v18912_v44 = vpop.f32.mrf.mxu1 }
 0x746   : > { %14388 = vmatpush3.bf16.msra.mxu1 %v15070_v57  ;;  %v18909_v18 = vpop.f32.mrf.mxu0  ;;  %21515 = vst [vmem:[#allocation88_spill] sm:$0xff] %v18912_v44 }
 0x747   : > { %14533 = vmatprep.subr.bf16.mxu1 %v18894_v32  ;;  %21513 = vst [vmem:[#allocation188_spill] sm:$0xff] %v18909_v18  ;;  %v18917_v57 = vpop.f32.mrf.mxu1  ;;  %v21522_v18 = vld [vmem:[#allocation97_spill] sm:$0xff] }
 0x748   : > { %v18915_v5 = vpop.f32.mrf.mxu0  ;;  %21518 = vst [vmem:[#allocation189_spill] sm:$0xff] %v18917_v57 }
 0x749   : > { %14246 = vmatmul.mubr.bf16.gmra.mxu1 %v18536_v49  ;;  %21517 = vst [vmem:[#allocation28_spill] sm:$0xff] %v18915_v5 }
 0x74a   : > { %14249 = vmatprep.mubr.bf16.mxu1 %v18545_v19  ;;  %v18923_v49 = vpop.f32.mrf.mxu0  ;;  %v21521_v19 = vld [vmem:[#allocation21_spill] sm:$0xff] }
 0x74b   : > { %21520 = vst [vmem:[#allocation191_spill] sm:$0xff] %v18923_v49 }
 0x74c   : > { %14646 = vmatmul.mubr.bf16.gmra.mxu0 %v21514_v41 }
 0x74d   : > { %14649 = vmatprep.mubr.bf16.mxu0 %v21516_v9 }
 0x751   : > { %14250 = vmatmul.mubr.bf16.gmra.mxu1 %v18568_v0  ;;  %v18921_v20 = vpop.f32.mrf.mxu1 }
 0x752   : > { %14253 = vmatprep.mubr.bf16.mxu1 %v18572_v15  ;;  %21519 = vst [vmem:[#allocation190_spill] sm:$0xff] %v18921_v20  ;;  %v21527_v15 = vld [vmem:[#allocation33_spill] sm:$0xff]  ;;  %v21528_v20 = vld [vmem:[#allocation38_spill] sm:$0xff] }
 0x753   : > { %v18929_v44 = vpop.f32.mrf.mxu1 }
 0x754   : > { %14650 = vmatmul.mubr.bf16.gmra.mxu0 %v21521_v19  ;;  %v18927_v56 = vpop.f32.mrf.mxu0  ;;  %21524 = vst [vmem:[#allocation97_spill] sm:$0xff] %v18929_v44  ;;  %v21537_v44 = vld [vmem:[#allocation50_spill] sm:$0xff] }
 0x755   : > { %14653 = vmatprep.mubr.bf16.mxu0 %v21522_v18  ;;  %21523 = vst [vmem:[#allocation21_spill] sm:$0xff] %v18927_v56  ;;  %v18935_v0 = vpop.f32.mrf.mxu1 }
 0x756   : > { %v18932_v5 = vpop.f32.mrf.mxu0  ;;  %21526 = vst [vmem:[#allocation193_spill] sm:$0xff] %v18935_v0 }
 0x757   : > { %21525 = vst [vmem:[#allocation192_spill] sm:$0xff] %v18932_v5  ;;  %v18941_v57 = vpop.f32.mrf.mxu1 }
 0x758   : > { %v18939_v49 = vpop.f32.mrf.mxu0  ;;  %21530 = vst [vmem:[#allocation38_spill] sm:$0xff] %v18941_v57 }
 0x759   : > { %14254 = vmatmul.mubr.bf16.gmra.mxu1 %v18592_v50  ;;  %21529 = vst [vmem:[#allocation33_spill] sm:$0xff] %v18939_v49  ;;  %v21535_v50 = vld [vmem:[#allocation44_spill] sm:$0xff] }
 0x75a   : > { %14257 = vmatprep.mubr.bf16.mxu1 %v18596_v53  ;;  %v18946_v56 = vpop.f32.mrf.mxu0 }
 0x75b   : > { %21532 = vst [vmem:[#allocation195_spill] sm:$0xff] %v18946_v56 }
 0x75c   : > { %14654 = vmatmul.mubr.bf16.gmra.mxu0 %v21527_v15 }
 0x75d   : > { %14657 = vmatprep.mubr.bf16.mxu0 %v21528_v20 }
 0x761   : > { %v18943_v13 = vpop.f32.mrf.mxu1  ;;  %14258 = vmatmul.mubr.bf16.gmra.mxu1 %v18616_v29 }
 0x762   : > { %21531 = vst [vmem:[#allocation194_spill] sm:$0xff] %v18943_v13  ;;  %14261 = vmatprep.mubr.bf16.mxu1 %v18620_v27 }
 0x763   : > { %v18949_v5 = vpop.f32.mrf.mxu1 }
 0x764   : > { %21533 = vst [vmem:[#allocation196_spill] sm:$0xff] %v18949_v5  ;;  %v18951_v53 = vpop.f32.mrf.mxu0  ;;  %14658 = vmatmul.mubr.bf16.gmra.mxu0 %v21535_v50 }
 0x765   : > { %21534 = vst [vmem:[#allocation197_spill] sm:$0xff] %v18951_v53  ;;  %v18954_v0 = vpop.f32.mrf.mxu1  ;;  %14661 = vmatprep.mubr.bf16.mxu0 %v21537_v44 }
 0x766   : > { %21536 = vst [vmem:[#allocation44_spill] sm:$0xff] %v18954_v0  ;;  %v18957_v49 = vpop.f32.mrf.mxu0  ;;  %v21543_v0 = vld [vmem:[#allocation24_spill] sm:$0xff] }
 0x767   : > { %21538 = vst [vmem:[#allocation50_spill] sm:$0xff] %v18957_v49  ;;  %v18959_v57 = vpop.f32.mrf.mxu1  ;;  %v21544_v49 = vld [vmem:[#allocation56_spill] sm:$0xff] }
 0x768   : > { %21539 = vst [vmem:[#allocation198_spill] sm:$0xff] %v18959_v57  ;;  %v18961_v13 = vpop.f32.mrf.mxu0 }
 0x769   : > { %21540 = vst [vmem:[#allocation199_spill] sm:$0xff] %v18961_v13  ;;  %v18963_v29 = vpop.f32.mrf.mxu1  ;;  %14262 = vmatmul.mubr.bf16.gmra.mxu1 %v18642_v62 }
 0x76a   : > { %14265 = vmatprep.mubr.bf16.mxu1 %v18646_v52  ;;  %v18967_v56 = vpop.f32.mrf.mxu0  ;;  %v21548_v52 = vld [vmem:[#allocation101_spill] sm:$0xff] }
 0x76b   : > { %21541 = vst [vmem:[#allocation200_spill] sm:$0xff] %v18967_v56  ;;  %v18969_v53 = vpop.f32.mrf.mxu1 }
 0x76c   : > { %v18971_v27 = vpop.f32.mrf.mxu0  ;;  %14662 = vmatmul.mubr.bf16.gmra.mxu0 %v21543_v0 }
 0x76d   : > { %21542 = vst [vmem:[#allocation201_spill] sm:$0xff] %v18971_v27  ;;  %v18974_v5 = vpop.f32.mrf.mxu1  ;;  %14665 = vmatprep.mubr.bf16.mxu0 %v21544_v49 }
 0x76e   : > { %v18977_v57 = vpop.f32.mrf.mxu0 }
 0x76f   : > { %21545 = vst [vmem:[#allocation24_spill] sm:$0xff] %v18977_v57  ;;  %v18979_v13 = vpop.f32.mrf.mxu1 }
 0x770   : > { %v18981_v28 = vpop.f32.mrf.mxu0 }
 0x771   : > { %21546 = vst [vmem:[#allocation56_spill] sm:$0xff] %v18981_v28  ;;  %v18983_v62 = vpop.f32.mrf.mxu1  ;;  %14266 = vmatmul.mubr.bf16.gmra.mxu1 %v18664_v35 }
 0x772   : > { %14269 = vmatprep.mubr.bf16.mxu1 %v18668_v54  ;;  %v18989_v27 = vpop.f32.mrf.mxu0 }
 0x773   : > { %v18987_v56 = vpop.f32.mrf.mxu1  ;;  %21547 = vst [vmem:[#allocation202_spill] sm:$0xff] %v18989_v27  ;;  %v21552_v27 = vld [vmem:[#allocation62_spill] sm:$0xff] }
 0x774   : > { %14666 = vmatmul.mubr.bf16.gmra.mxu0 %v21548_v52  ;;  %v18997_v12 = vpop.f32.mrf.mxu0 }
 0x775   : > { %v18992_v17 = vpop.f32.mrf.mxu1  ;;  %14669 = vmatprep.mubr.bf16.mxu0 %v21549_v36  ;;  %21550 = vst [vmem:[#allocation101_spill] sm:$0xff] %v18997_v12 }
 0x776   : > { %v19005_v35 = vpop.f32.mrf.mxu0 }
 0x777   : > { %v18995_v57 = vpop.f32.mrf.mxu1  ;;  %21551 = vst [vmem:[#allocation26_spill] sm:$0xff] %v19005_v35  ;;  %v21556_v35 = vld [vmem:[#allocation30_spill] sm:$0xff] }
 0x778   : > { %v19013_v47 = vpop.f32.mrf.mxu0 }
 0x779   : > { %v18999_v28 = vpop.f32.mrf.mxu1  ;;  %14270 = vmatmul.mubr.bf16.gmra.mxu1 %v18684_v39  ;;  %21554 = vst [vmem:[#allocation62_spill] sm:$0xff] %v19013_v47 }
 0x77a   : > { %14273 = vmatprep.mubr.bf16.mxu1 %v18688_v3  ;;  %v19021_v39 = vpop.f32.mrf.mxu0 }
 0x77b   : > { %v19003_v54 = vpop.f32.mrf.mxu1  ;;  %21555 = vst [vmem:[#allocation203_spill] sm:$0xff] %v19021_v39  ;;  %v15168_v39 = vld [vmem:[%s20634_s3] ss:$0 sm:$0xff] }
 0x77c   : > { %14670 = vmatmul.mubr.bf16.gmra.mxu0 %v21552_v27 }
 0x77d   : > { %v19008_v34 = vpop.f32.mrf.mxu1  ;;  %14673 = vmatprep.mubr.bf16.mxu0 %v21553_v40  ;;  %v19029_v40 = vpop.f32.mrf.mxu0 }
 0x77e   : > { %21560 = vst [vmem:[#allocation206_spill] sm:$0xff] %v19029_v40  ;;  %v7917_v40 = vshll.u32 %v18393_v48, 16 }
 0x77f   : > { %v19011_v4 = vpop.f32.mrf.mxu1 }
 0x781   : > { %v19015_v12 = vpop.f32.mrf.mxu1  ;;  %14274 = vmatmul.mubr.bf16.gmra.mxu1 %v18704_v46 }
 0x782   : > { %14277 = vmatprep.mubr.bf16.mxu1 %v18708_v2  ;;  %v5309_v2 = vadd.f32 %v15168_v39, %v18442_v60  ;;  %v7919_v60 = vrot.slane %v7917_v40, 1 }
 0x783   : > { %v19019_v3 = vpop.f32.mrf.mxu1 }
 0x784   : > { %14674 = vmatmul.mubr.bf16.gmra.mxu0 %v21556_v35  ;;  %v19041_v35 = vpop.f32.mrf.mxu0 }
 0x785   : > { %v19024_v33 = vpop.f32.mrf.mxu1  ;;  %14677 = vmatprep.mubr.bf16.mxu0 %v21558_v10  ;;  %21562 = vst [vmem:[#allocation208_spill] sm:$0xff] %v19041_v35  ;;  %v21563_v10 = vld [vmem:[#allocation71_spill] sm:$0xff]  ;;  %v5819_v35 = vpop.permute.xlu0 %5818 }
 0x786   : > { %21557 = vst [vmem:[#allocation204_spill] sm:$0xff] %v19024_v33  ;;  %v7913_v33 = vshrl.u32 %v18370_v11, 16  ;;  %v9197_v11 = vshll.u32 %v18455_v16, 16 }
 0x787   : > { %v19027_v59 = vpop.f32.mrf.mxu1 }
 0x788   : > { %21559 = vst [vmem:[#allocation205_spill] sm:$0xff] %v19027_v59 }
 0x789   : > { %v19031_v47 = vpop.f32.mrf.mxu1  ;;  %14278 = vmatmul.mubr.bf16.gmra.mxu1 %v18726_v55  ;;  %v5382_v55 = vmax.f32 %v5309_v2, 0.0 }
 0x78a   : > { %21561 = vst [vmem:[#allocation207_spill] sm:$0xff] %v19031_v47  ;;  %14281 = vmatprep.mubr.bf16.mxu1 %v18730_v7  ;;  %v19050_v47 = vpop.f32.mrf.mxu0 }
 0x78b   : > { %v19039_v46 = vpop.f32.mrf.mxu1  ;;  %21566 = vst [vmem:[#allocation211_spill] sm:$0xff] %v19050_v47  ;;  %v21569_v47 = vld [vmem:[#allocation37_spill] sm:$0xff] }
 0x78c   : > { %14678 = vmatmul.mubr.bf16.gmra.mxu0 %v21563_v10  ;;  %v7915_v10 = vor.u32 %v7913_v33, %v18382_v45 }
 0x78d   : > { %v19045_v59 = vpop.f32.mrf.mxu1  ;;  %14681 = vmatprep.mubr.bf16.mxu0 %v18367_v22  ;;  %v5893_v22 = vmul.f32 %v5819_v35, %v5382_v55  ;;  %v7921_v35 = vshrl.u32 %v18393_v48, 16 }
 0x78e   : > { %21564 = vst [vmem:[#allocation209_spill] sm:$0xff] %v19045_v59  ;;  %v7925_v59 = vshll.u32 %v18418_v31, 16  ;;  %v19065_v40 = vsel %vm654_vm1, %v7915_v10, %v7919_v60 }
 0x78f   : > { %v19048_v7 = vpop.f32.mrf.mxu1  ;;  %21570 = vst [vmem:[#allocation214_spill] sm:$0xff] %v19065_v40  ;;  %v19071_v33 = vpack.c.bf16 %v5893_v22, %v5893_v22 }
 0x790   : > { %21565 = vst [vmem:[#allocation210_spill] sm:$0xff] %v19048_v7  ;;  %v19061_v7 = vpop.f32.mrf.mxu0 }
 0x791   : > { %v19053_v39 = vpop.f32.mrf.mxu1  ;;  %14282 = vmatmul.mubr.bf16.gmra.mxu1 %v18746_v25  ;;  %21568 = vst [vmem:[#allocation213_spill] sm:$0xff] %v19061_v7  ;;  %21571 = vst [vmem:[#allocation215_spill] sm:$0xff] %v19071_v33  ;;  %v9193_v7 = vshrl.u32 %v18418_v31, 16 }
 0x792   : > { %14285 = vmatprep.mubr.bf16.mxu1 %v18750_v6  ;;  %v7927_v6 = vrot.slane %v7925_v59, 1  ;;  %v19076_v55 = vpop.f32.mrf.mxu0  ;;  %v9205_v59 = vshll.u32 %v19071_v33, 16 }
 0x793   : > { %v19059_v2 = vpop.f32.mrf.mxu1  ;;  %21573 = vst [vmem:[#allocation217_spill] sm:$0xff] %v19076_v55 }
 0x794   : > { %21567 = vst [vmem:[#allocation212_spill] sm:$0xff] %v19059_v2  ;;  %14682 = vmatmul.mubr.bf16.gmra.mxu0 %v21569_v47  ;;  %v9199_v47 = vrot.slane %v9197_v11, 1  ;;  %v7923_v2 = vor.u32 %v7921_v35, %v7919_v60  ;;  %v19089_v48 = vpop.f32.mrf.mxu0  ;;  %v9207_v35 = vrot.slane %v9205_v59, 1  ;;  %v15072_v59 = vld [vmem:[%s20635_s4 + $0x1b0] sm:$0xff]  }
 0x795   : > { %v19068_v25 = vpop.f32.mrf.mxu1  ;;  %14685 = vmatprep.mubr.bf16.mxu0 %v19065_v40  ;;  %v9195_v40 = vor.u32 %v9193_v7, %v7927_v6  ;;  %21574 = vst [vmem:[#allocation218_spill] sm:$0xff] %v19089_v48  ;;  %v9201_v7 = vshrl.u32 %v18455_v16, 16 }
 0x796   : > { %v19098_v33 = vpop.f32.mrf.mxu0 }
 0x797   : > { %v19073_v45 = vpop.f32.mrf.mxu1  ;;  %v9200_v11 = vsel %vm654_vm1, %v9195_v40, %v9199_v47  ;;  %21575 = vst [vmem:[#allocation219_spill] sm:$0xff] %v19098_v33 }
 0x798   : > { %21572 = vst [vmem:[#allocation216_spill] sm:$0xff] %v19073_v45  ;;  %v19087_v45 = vsel %vm654_vm1, %v7923_v2, %v7927_v6  ;;  %v9203_v6 = vor.u32 %v9201_v7, %v9199_v47  ;;  %v21576_v2 = vld [vmem:[#allocation69_spill] sm:$0xff]  ;;  %v19107_v48 = vpop.f32.mrf.mxu0 }
 0x799   : > { %v19079_v10 = vpop.f32.mrf.mxu1  ;;  %14286 = vmatmul.mubr.bf16.gmra.mxu1 %v18766_v61  ;;  %21577 = vst [vmem:[#allocation69_spill] sm:$0xff] %v19107_v48  ;;  %v21578_v47 = vld [vmem:[#allocation17_spill] sm:$0xff] }
 0x79a   : > { %14289 = vmatprep.mubr.bf16.mxu1 %v18772_v24  ;;  %v9208_v40 = vsel %vm654_vm1, %v9203_v6, %v9207_v35  ;;  %v15073_v35 = vld [vmem:[%s20635_s4 + $0x1a8] sm:$0xff]  }
 0x79b   : > { %v19084_v22 = vpop.f32.mrf.mxu1 }
 0x79c   : > { %14686 = vmatmul.mubr.bf16.gmra.mxu0 %v19087_v45 }
 0x79d   : > { %v19093_v55 = vpop.f32.mrf.mxu1  ;;  %14689 = vmatprep.mubr.bf16.mxu0 %v9200_v11 }
 0x79f   : > { %v19095_v60 = vpop.f32.mrf.mxu1 }
 0x7a1   : > { %v19100_v24 = vpop.f32.mrf.mxu1  ;;  %14290 = vmatmul.mubr.bf16.gmra.mxu1 %v18788_v1 }
 0x7a2   : > { %14389 = vmatprep.mubr.bf16.mxu1 %v21576_v2 }
 0x7a3   : > { %v19104_v61 = vpop.f32.mrf.mxu1 }
 0x7a4   : > { %14690 = vmatmul.mubr.bf16.gmra.mxu0 %v9208_v40  ;;  %v15074_v40 = vld [vmem:[%s20635_s4 + $0x1a0] sm:$0xff]  }
 0x7a5   : > { %v19109_v11 = vpop.f32.mrf.mxu1 }
 0x7a7   : > { %v19111_v16 = vpop.f32.mrf.mxu1 }
 0x7a9   : > { %v19116_v33 = vpop.f32.mrf.mxu1  ;;  %14390 = vmatmul.mubr.bf16.vlgmr.msra.gmra.mxu1 %v21578_v47 }
 0x7aa   : > { %14393 = vmatprep.mubr.bf16.mxu1 %v17945_v8  ;;  %14534 = vmatpush3.bf16.msra.mxu1 %v18894_v32 }
 0x7ab   : > { %v19121_v7 = vpop.f32.mrf.mxu1  ;;  %14535 = vmatprep.subr.bf16.mxu1 %v15072_v59 }
 0x7ad   : > { %v19126_v6 = vpop.f32.mrf.mxu1 }
 0x7ae   : > { %14536 = vmatpush3.bf16.msra.mxu1 %v15072_v59  ;;  %v15075_v59 = vld [vmem:[%s20635_s4 + $0x198] sm:$0xff]  }
 0x7af   : > { %v19128_v2 = vpop.f32.mrf.mxu1  ;;  %14537 = vmatprep.subr.bf16.mxu1 %v15073_v35 }
 0x7b1   : > { %v19133_v8 = vpop.f32.mrf.mxu1  ;;  %14394 = vmatmul.mubr.bf16.gmra.mxu1 %v21492_v42  ;;  %v15076_v42 = vld [vmem:[%s20635_s4 + $0x190] sm:$0xff]  }
 0x7b2   : > { %14397 = vmatprep.mubr.bf16.mxu1 %v21494_v21  ;;  %14538 = vmatpush3.bf16.msra.mxu1 %v15073_v35  ;;  %v15077_v35 = vld [vmem:[%s20635_s4 + $0x188] sm:$0xff]  }
 0x7b3   : > { %v19137_v32 = vpop.f32.mrf.mxu1  ;;  %14539 = vmatprep.subr.bf16.mxu1 %v15074_v40 }
 0x7b5   : > { %v19142_v47 = vpop.f32.mrf.mxu1 }
 0x7b6   : > { %14540 = vmatpush3.bf16.msra.mxu1 %v15074_v40 }
 0x7b7   : > { %v19144_v1 = vpop.f32.mrf.mxu1  ;;  %14541 = vmatprep.subr.bf16.mxu1 %v15075_v59 }
 0x7b9   : > { %v19149_v48 = vpop.f32.mrf.mxu1  ;;  %14398 = vmatmul.mubr.bf16.gmra.mxu1 %v17996_v63  ;;  %v15078_v63 = vld [vmem:[%s20635_s4 + $0x180] sm:$0xff]  }
 0x7ba   : > { %21579 = vst [vmem:[#allocation17_spill] sm:$0xff] %v19149_v48  ;;  %14401 = vmatprep.mubr.bf16.mxu1 %v18014_v14  ;;  %14542 = vmatpush3.bf16.msra.mxu1 %v15075_v59  ;;  %v19174_v59 = vld [vmem:[%s20635_s4 + $0x238] sm:$0xff]  }
 0x7bb   : > { %v19153_v21 = vpop.f32.mrf.mxu1  ;;  %14543 = vmatprep.subr.bf16.mxu1 %v15076_v42 }
 0x7bd   : > { %v19158_v40 = vpop.f32.mrf.mxu1 }
 0x7be   : > { %14544 = vmatpush3.bf16.msra.mxu1 %v15076_v42 }
 0x7bf   : > { %v19160_v31 = vpop.f32.mrf.mxu1  ;;  %14545 = vmatprep.subr.bf16.mxu1 %v15077_v35 }
 0x7c0   : > { %21580 = vst [vmem:[#allocation220_spill] sm:$0xff] %v19160_v31 }
 0x7c1   : > { %v19165_v48 = vpop.f32.mrf.mxu1  ;;  %14402 = vmatmul.mubr.bf16.gmra.mxu1 %v18027_v43 }
 0x7c2   : > { %21581 = vst [vmem:[#allocation221_spill] sm:$0xff] %v19165_v48  ;;  %14405 = vmatprep.mubr.bf16.mxu1 %v18044_v37  ;;  %14546 = vmatpush3.bf16.msra.mxu1 %v15077_v35 }
 0x7c3   : > { %v19169_v14 = vpop.f32.mrf.mxu1  ;;  %14547 = vmatprep.subr.bf16.mxu1 %v15078_v63 }
 0x7c4   : > { %21582 = vst [vmem:[#allocation222_spill] sm:$0xff] %v19169_v14 }
 0x7c5   : > { %v19176_v42 = vpop.f32.mrf.mxu1 }
 0x7c6   : > { %14548 = vmatpush3.bf16.msra.mxu1 %v15078_v63 }
 0x7c7   : > { %v19178_v31 = vpop.f32.mrf.mxu1  ;;  %14693 = vmatprep.subr.bf16.mxu1 %v19174_v59 }
 0x7c8   : > { %21583 = vst [vmem:[#allocation223_spill] sm:$0xff] %v19178_v31 }
 0x7c9   : > { %v19181_v48 = vpop.f32.mrf.mxu1  ;;  %14406 = vmatmul.mubr.bf16.gmra.mxu1 %v21507_v58 }
 0x7ca   : > { %21584 = vst [vmem:[#allocation224_spill] sm:$0xff] %v19181_v48  ;;  %14409 = vmatprep.mubr.bf16.mxu1 %v21509_v26 }
 0x7cb   : > { %v19185_v43 = vpop.f32.mrf.mxu1 }
 0x7cd   : > { %v19187_v37 = vpop.f32.mrf.mxu1 }
 0x7cf   : > { %v19189_v35 = vpop.f32.mrf.mxu1 }
 0x7d0   : > { %21585 = vst [vmem:[#allocation225_spill] sm:$0xff] %v19189_v35 }
 0x7d1   : > { %v19191_v14 = vpop.f32.mrf.mxu1  ;;  %14410 = vmatmul.mubr.bf16.gmra.mxu1 %v21514_v41 }
 0x7d2   : > { %21586 = vst [vmem:[#allocation226_spill] sm:$0xff] %v19191_v14  ;;  %14413 = vmatprep.mubr.bf16.mxu1 %v21516_v9 }
 0x7d3   : > { %v19195_v63 = vpop.f32.mrf.mxu1 }
 0x7d4   : > { %21587 = vst [vmem:[#allocation227_spill] sm:$0xff] %v19195_v63  ;;  %v21602_v63 = vld [vmem:[#allocation5_spill] sm:$0xff] }
 0x7d5   : > { %v19197_v31 = vpop.f32.mrf.mxu1 }
 0x7d6   : > { %21588 = vst [vmem:[#allocation228_spill] sm:$0xff] %v19197_v31  ;;  %v21601_v31 = vld [vmem:[#allocation77_spill] sm:$0xff] }
 0x7d7   : > { %v19199_v48 = vpop.f32.mrf.mxu1 }
 0x7d8   : > { %21589 = vst [vmem:[#allocation229_spill] sm:$0xff] %v19199_v48 }
 0x7d9   : > { %v19201_v58 = vpop.f32.mrf.mxu1  ;;  %14414 = vmatmul.mubr.bf16.gmra.mxu1 %v21521_v19  ;;  %v21598_v19 = vld [vmem:[#allocation110_spill] sm:$0xff] }
 0x7da   : > { %21590 = vst [vmem:[#allocation230_spill] sm:$0xff] %v19201_v58  ;;  %14417 = vmatprep.mubr.bf16.mxu1 %v21522_v18  ;;  %v6684_v18 = vadd.f32 %v18963_v29, %v21598_v19  ;;  %v6679_v29 = vadd.f32 %v18979_v13, %v21601_v31  ;;  %v21604_v31 = vld [vmem:[#allocation6_spill] sm:$0xff] }
 0x7db   : > { %v19205_v26 = vpop.f32.mrf.mxu1  ;;  %v6703_v13 = vadd.f32 %v18992_v17, %v21604_v31 }
 0x7dc   : > { %21591 = vst [vmem:[#allocation231_spill] sm:$0xff] %v19205_v26 }
 0x7dd   : > { %v19207_v35 = vpop.f32.mrf.mxu1 }
 0x7de   : > { %21592 = vst [vmem:[#allocation232_spill] sm:$0xff] %v19207_v35  ;;  %v21599_v35 = vld [vmem:[#allocation4_spill] sm:$0xff] }
 0x7df   : > { %v19209_v14 = vpop.f32.mrf.mxu1 }
 0x7e0   : > { %21593 = vst [vmem:[#allocation233_spill] sm:$0xff] %v19209_v14  ;;  %v6676_v14 = vadd.f32 %v18969_v53, %v21599_v35  ;;  %v6700_v53 = vadd.f32 %v18983_v62, %v21602_v63  ;;  %v21605_v62 = vld [vmem:[#allocation83_spill] sm:$0xff] }
 0x7e1   : > { %v19211_v41 = vpop.f32.mrf.mxu1  ;;  %14418 = vmatmul.mubr.bf16.gmra.mxu1 %v21527_v15  ;;  %v6695_v63 = vadd.f32 %v18995_v57, %v21605_v62  ;;  %v6719_v57 = vadd.f32 %v19008_v34, %v18461_v30  ;;  %v6724_v34 = vadd.f32 %v19019_v3, %v18509_v38 }
 0x7e2   : > { %21594 = vst [vmem:[#allocation234_spill] sm:$0xff] %v19211_v41  ;;  %14421 = vmatprep.mubr.bf16.mxu1 %v21528_v20  ;;  %v21600_v20 = vld [vmem:[#allocation74_spill] sm:$0xff] }
 0x7e3   : > { %v19215_v9 = vpop.f32.mrf.mxu1 }
 0x7e4   : > { %21595 = vst [vmem:[#allocation235_spill] sm:$0xff] %v19215_v9  ;;  %v6687_v9 = vadd.f32 %v18974_v5, %v21600_v20  ;;  %v21606_v20 = vld [vmem:[#allocation86_spill] sm:$0xff] }
 0x7e5   : > { %v19217_v48 = vpop.f32.mrf.mxu1 }
 0x7e6   : > { %21596 = vst [vmem:[#allocation236_spill] sm:$0xff] %v19217_v48 }
 0x7e7   : > { %v19219_v58 = vpop.f32.mrf.mxu1 }
 0x7e8   : > { %21597 = vst [vmem:[#allocation237_spill] sm:$0xff] %v19219_v58 }
 0x7e9   : > { %v14231_v26 = vpop.f32.mrf.mxu1  ;;  %14422 = vmatmul.mubr.bf16.gmra.mxu1 %v21535_v50 }
 0x7ea   : > { %v19226_v41 = vadd.f32 %v14231_v26, %v6684_v18  ;;  %14425 = vmatprep.mubr.bf16.mxu1 %v21537_v44  ;;  %v21603_v44 = vld [vmem:[#allocation80_spill] sm:$0xff] }
 0x7eb   : > { %v7159_v15 = vpop.f32.mrf.mxu1  ;;  %v6692_v5 = vadd.f32 %v18987_v56, %v21603_v44  ;;  %v6716_v56 = vadd.f32 %v18999_v28, %v21606_v20  ;;  %v6711_v28 = vadd.f32 %v19011_v4, %v18476_v23  ;;  %v21609_v23 = vld [vmem:[#allocation7_spill] sm:$0xff]  ;;  %v21610_v4 = vld [vmem:[#allocation204_spill] sm:$0xff] }
 0x7ec   : > { %v19231_v48 = vadd.f32 %v7159_v15, %v6676_v14  ;;  %v6735_v62 = vadd.f32 %v21610_v4, %v21609_v23  ;;  %v21620_v4 = vld [vmem:[#allocation12_spill] sm:$0xff] }
 0x7ed   : > { %v14232_v58 = vpop.f32.mrf.mxu1 }
 0x7ee   : > { %v19235_v19 = vadd.f32 %v14232_v58, %v6687_v9 }
 0x7ef   : > { %v7162_v50 = vpop.f32.mrf.mxu1 }
 0x7f0   : > { %v19239_v35 = vadd.f32 %v7162_v50, %v6679_v29 }
 0x7f1   : > { %v14235_v26 = vpop.f32.mrf.mxu1  ;;  %14426 = vmatmul.mubr.bf16.gmra.mxu1 %v21543_v0 }
 0x7f2   : > { %v19244_v14 = vadd.f32 %v14235_v26, %v6700_v53  ;;  %14429 = vmatprep.mubr.bf16.mxu1 %v21544_v49  ;;  %v21607_v49 = vld [vmem:[#allocation89_spill] sm:$0xff] }
 0x7f3   : > { %v7175_v18 = vpop.f32.mrf.mxu1  ;;  %v6708_v17 = vadd.f32 %v19003_v54, %v21607_v49  ;;  %v6732_v54 = vadd.f32 %v19015_v12, %v18488_v51  ;;  %v21611_v51 = vld [vmem:[#allocation23_spill] sm:$0xff]  ;;  %v21612_v12 = vld [vmem:[#allocation205_spill] sm:$0xff] }
 0x7f4   : > { %v19249_v58 = vadd.f32 %v7175_v18, %v6692_v5  ;;  %v6727_v20 = vadd.f32 %v21612_v12, %v21611_v51  ;;  %v21614_v49 = vld [vmem:[#allocation207_spill] sm:$0xff] }
 0x7f5   : > { %v14236_v9 = vpop.f32.mrf.mxu1 }
 0x7f6   : > { %v19253_v15 = vadd.f32 %v14236_v9, %v6703_v13 }
 0x7f7   : > { %v7178_v0 = vpop.f32.mrf.mxu1 }
 0x7f8   : > { %v19257_v29 = vadd.f32 %v7178_v0, %v6695_v63 }
 0x7f9   : > { %v14239_v50 = vpop.f32.mrf.mxu1  ;;  %14430 = vmatmul.mubr.bf16.gmra.mxu1 %v21548_v52 }
 0x7fa   : > { %v19262_v53 = vadd.f32 %v14239_v50, %v6716_v56  ;;  %14433 = vmatprep.mubr.bf16.mxu1 %v21549_v36  ;;  %v21608_v36 = vld [vmem:[#allocation105_spill] sm:$0xff]  ;;  %v21613_v50 = vld [vmem:[#allocation46_spill] sm:$0xff] }
 0x7fb   : > { %v7191_v26 = vpop.f32.mrf.mxu1  ;;  %v6748_v38 = vadd.f32 %v21614_v49, %v21613_v50  ;;  %v21623_v49 = vld [vmem:[#allocation71_spill] sm:$0xff] }
 0x7fc   : > { %v19267_v44 = vadd.f32 %v7191_v26, %v6708_v17  ;;  %v21615_v26 = vld [vmem:[#allocation30_spill] sm:$0xff] }
 0x7fd   : > { %v14240_v5 = vpop.f32.mrf.mxu1 }
 0x7fe   : > { %v19271_v18 = vadd.f32 %v14240_v5, %v6719_v57  ;;  %v21616_v57 = vld [vmem:[#allocation48_spill] sm:$0xff] }
 0x7ff   : > { %v7194_v52 = vpop.f32.mrf.mxu1  ;;  %v6740_v5 = vadd.f32 %v19039_v46, %v21616_v57 }
 0x800   : > { %v19275_v31 = vadd.f32 %v7194_v52, %v6711_v28  ;;  %v21617_v52 = vld [vmem:[#allocation68_spill] sm:$0xff] }
 0x801   : > { %v14243_v13 = vpop.f32.mrf.mxu1  ;;  %14434 = vmatmul.mubr.bf16.gmra.mxu1 %v21552_v27 }
 0x802   : > { %v19280_v30 = vadd.f32 %v14243_v13, %v6732_v54  ;;  %14437 = vmatprep.mubr.bf16.mxu1 %v21608_v36  ;;  %v21618_v13 = vld [vmem:[#allocation11_spill] sm:$0xff] }
 0x803   : > { %v7207_v9 = vpop.f32.mrf.mxu1 }
 0x804   : > { %v19285_v63 = vadd.f32 %v7207_v9, %v6724_v34  ;;  %v21619_v34 = vld [vmem:[#allocation209_spill] sm:$0xff] }
 0x805   : > { %v14244_v0 = vpop.f32.mrf.mxu1  ;;  %v6751_v36 = vadd.f32 %v21619_v34, %v21618_v13 }
 0x806   : > { %v19289_v56 = vadd.f32 %v14244_v0, %v6735_v62  ;;  %v21621_v62 = vld [vmem:[#allocation210_spill] sm:$0xff] }
 0x807   : > { %v7210_v27 = vpop.f32.mrf.mxu1  ;;  %v6743_v0 = vadd.f32 %v21621_v62, %v21620_v4 }
 0x808   : > { %v19293_v3 = vadd.f32 %v7210_v27, %v6727_v20  ;;  %v21622_v20 = vld [vmem:[#allocation60_spill] sm:$0xff] }
 0x809   : > { %v14247_v17 = vpop.f32.mrf.mxu1  ;;  %14438 = vmatmul.mubr.bf16.gmra.mxu1 %v21615_v26  ;;  %v6764_v46 = vadd.f32 %v19053_v39, %v21622_v20  ;;  %v21628_v39 = vld [vmem:[#allocation113_spill] sm:$0xff] }
 0x80a   : > { %v19298_v28 = vadd.f32 %v14247_v17, %v6748_v38  ;;  %14441 = vmatprep.mubr.bf16.mxu1 %v21617_v52  ;;  %v21624_v38 = vld [vmem:[#allocation63_spill] sm:$0xff]  ;;  %v21625_v17 = vld [vmem:[#allocation212_spill] sm:$0xff] }
 0x80b   : > { %v7223_v54 = vpop.f32.mrf.mxu1  ;;  %v6756_v26 = vadd.f32 %v21625_v17, %v21624_v38  ;;  %v21632_v38 = vld [vmem:[#allocation120_spill] sm:$0xff] }
 0x80c   : > { %v19303_v9 = vadd.f32 %v7223_v54, %v6740_v5  ;;  %v21626_v5 = vld [vmem:[#allocation36_spill] sm:$0xff] }
 0x80d   : > { %v14248_v23 = vpop.f32.mrf.mxu1  ;;  %v21627_v54 = vld [vmem:[#allocation16_spill] sm:$0xff] }
 0x80e   : > { %v19307_v51 = vadd.f32 %v14248_v23, %v6751_v36  ;;  %v6767_v13 = vadd.f32 %v19068_v25, %v21627_v54  ;;  %v21629_v23 = vld [vmem:[#allocation216_spill] sm:$0xff]  ;;  %v6772_v25 = vadd.f32 %v19084_v22, %v21632_v38  ;;  %v21638_v38 = vld [vmem:[#allocation70_spill] sm:$0xff] }
 0x80f   : > { %v7226_v12 = vpop.f32.mrf.mxu1  ;;  %v6759_v4 = vadd.f32 %v21629_v23, %v21628_v39 }
 0x810   : > { %v19311_v27 = vadd.f32 %v7226_v12, %v6743_v0  ;;  %v21630_v12 = vld [vmem:[#allocation115_spill] sm:$0xff] }
 0x811   : > { %v14251_v50 = vpop.f32.mrf.mxu1  ;;  %14442 = vmatmul.mubr.bf16.gmra.mxu1 %v21623_v49  ;;  %v6780_v20 = vadd.f32 %v19079_v10, %v21630_v12  ;;  %v21631_v49 = vld [vmem:[#allocation37_spill] sm:$0xff]  ;;  %v21635_v10 = vld [vmem:[#allocation127_spill] sm:$0xff] }
 0x812   : > { %v19316_v57 = vadd.f32 %v14251_v50, %v6764_v46  ;;  %14445 = vmatprep.mubr.bf16.mxu1 %v21626_v5  ;;  %v6775_v39 = vadd.f32 %v19095_v60, %v21635_v10  ;;  %v21639_v60 = vld [vmem:[#allocation134_spill] sm:$0xff]  ;;  %v21641_v10 = vld [vmem:[#allocation140_spill] sm:$0xff] }
 0x813   : > { %v7239_v52 = vpop.f32.mrf.mxu1 }
 0x814   : > { %v19321_v34 = vadd.f32 %v7239_v52, %v6756_v26  ;;  %v21633_v26 = vld [vmem:[#allocation214_spill] sm:$0xff]  ;;  %v21634_v52 = vld [vmem:[#allocation123_spill] sm:$0xff] }
 0x815   : > { %v14252_v36 = vpop.f32.mrf.mxu1  ;;  %v6783_v54 = vadd.f32 %v19093_v55, %v21634_v52 }
 0x816   : > { %v19325_v62 = vadd.f32 %v14252_v36, %v6767_v13 }
 0x817   : > { %v7242_v0 = vpop.f32.mrf.mxu1 }
 0x818   : > { %v19329_v46 = vadd.f32 %v7242_v0, %v6759_v4  ;;  %v21636_v0 = vld [vmem:[#allocation128_spill] sm:$0xff] }
 0x819   : > { %v14255_v50 = vpop.f32.mrf.mxu1  ;;  %14446 = vmatmul.mubr.bf16.gmra.mxu1 %v21631_v49  ;;  %v6796_v22 = vadd.f32 %v19100_v24, %v21636_v0  ;;  %v21640_v24 = vld [vmem:[#allocation138_spill] sm:$0xff]  ;;  %v19370_v0 = vpop.f32.mrf.mxu0 }
 0x81a   : > { %v19334_v17 = vadd.f32 %v14255_v50, %v6780_v20  ;;  %14449 = vmatprep.mubr.bf16.mxu1 %v21633_v26  ;;  %v21637_v50 = vld [vmem:[#allocation132_spill] sm:$0xff]  ;;  %v6799_v26 = vadd.f32 %v19109_v11, %v21639_v60  ;;  %21642 = vst [vmem:[#allocation110_spill] sm:$0xff] %v19370_v0  ;;  %v21676_v0 = vld [vmem:[#allocation175_spill] sm:$0xff] }
 0x81b   : > { %v7255_v5 = vpop.f32.mrf.mxu1  ;;  %v6788_v55 = vadd.f32 %v19104_v61, %v21637_v50  ;;  %v15080_v61 = vld [vmem:[%s20635_s4 + $0x230] sm:$0xff]  }
 0x81c   : > { %v19339_v13 = vadd.f32 %v7255_v5, %v6772_v25 }
 0x81d   : > { %v14256_v36 = vpop.f32.mrf.mxu1 }
 0x81e   : > { %v19343_v23 = vadd.f32 %v14256_v36, %v6783_v54  ;;  %v6791_v54 = vadd.f32 %v19111_v16, %v21640_v24  ;;  %v21648_v24 = vld [vmem:[#allocation148_spill] sm:$0xff] }
 0x81f   : > { %v7258_v4 = vpop.f32.mrf.mxu1 }
 0x820   : > { %v19347_v12 = vadd.f32 %v7258_v4, %v6775_v39  ;;  %v6812_v39 = vadd.f32 %v19116_v33, %v21641_v10  ;;  %v15081_v33 = vld [vmem:[%s20635_s4 + $0x228] sm:$0xff]   ;;  %v15082_v10 = vld [vmem:[%s20635_s4 + $0x220] sm:$0xff]  }
 0x821   : > { %v14259_v20 = vpop.f32.mrf.mxu1  ;;  %14450 = vmatmul.mubr.bf16.gmra.mxu1 %v19087_v45 }
 0x822   : > { %v19352_v49 = vadd.f32 %v14259_v20, %v6796_v22  ;;  %14549 = vmatprep.mubr.bf16.mxu1 %v21638_v38  ;;  %v21643_v22 = vld [vmem:[#allocation72_spill] sm:$0xff]  ;;  %v21644_v20 = vld [vmem:[#allocation142_spill] sm:$0xff] }
 0x823   : > { %v7271_v25 = vpop.f32.mrf.mxu1  ;;  %v6804_v16 = vadd.f32 %v19121_v7, %v21644_v20 }
 0x824   : > { %v19357_v5 = vadd.f32 %v7271_v25, %v6788_v55  ;;  %v21645_v55 = vld [vmem:[#allocation73_spill] sm:$0xff]  ;;  %v21646_v25 = vld [vmem:[#allocation146_spill] sm:$0xff] }
 0x825   : > { %v14260_v52 = vpop.f32.mrf.mxu1  ;;  %v6815_v60 = vadd.f32 %v19126_v6, %v21646_v25 }
 0x826   : > { %v19361_v36 = vadd.f32 %v14260_v52, %v6799_v26  ;;  %v19386_v52 = vpop.f32.mrf.mxu0 }
 0x827   : > { %v7274_v45 = vpop.f32.mrf.mxu1  ;;  %21647 = vst [vmem:[#allocation4_spill] sm:$0xff] %v19386_v52 }
 0x828   : > { %v19368_v4 = vadd.f32 %v7274_v45, %v6791_v54  ;;  %v6807_v54 = vadd.f32 %v19128_v2, %v21648_v24  ;;  %v21652_v2 = vld [vmem:[#allocation154_spill] sm:$0xff] }
 0x829   : > { %v14263_v11 = vpop.f32.mrf.mxu1  ;;  %14550 = vmatmul.mubr.bf16.vlgmr.msra.gmra.mxu1 %v21643_v22  ;;  %v19399_v22 = vpop.f32.mrf.mxu0 }
 0x82a   : > { %v19375_v50 = vadd.f32 %v14263_v11, %v6812_v39  ;;  %14553 = vmatprep.mubr.bf16.mxu1 %v21645_v55  ;;  %14694 = vmatpush3.bf16.msra.mxu1 %v19174_v59  ;;  %v21649_v39 = vld [vmem:[#allocation151_spill] sm:$0xff]  ;;  %21650 = vst [vmem:[#allocation74_spill] sm:$0xff] %v19399_v22  ;;  %v6820_v55 = vadd.f32 %v19137_v32, %v21652_v2  ;;  %v21656_v32 = vld [vmem:[#allocation160_spill] sm:$0xff]  ;;  %v21658_v2 = vld [vmem:[#allocation17_spill] sm:$0xff] }
 0x82b   : > { %v7287_v38 = vpop.f32.mrf.mxu1  ;;  %14695 = vmatprep.subr.bf16.mxu1 %v15080_v61  ;;  %v6828_v6 = vadd.f32 %v19133_v8, %v21649_v39  ;;  %v15083_v8 = vld [vmem:[%s20635_s4 + $0x218] sm:$0xff]   ;;  %v6823_v39 = vadd.f32 %v19144_v1, %v21656_v32  ;;  %v21661_v1 = vld [vmem:[#allocation166_spill] sm:$0xff] }
 0x82c   : > { %v19384_v26 = vadd.f32 %v7287_v38, %v6804_v16  ;;  %v21651_v16 = vld [vmem:[#allocation76_spill] sm:$0xff]  ;;  %v21653_v38 = vld [vmem:[#allocation79_spill] sm:$0xff]  ;;  %v21669_v22 = vld [vmem:[#allocation221_spill] sm:$0xff] }
 0x82d   : > { %v14264_v7 = vpop.f32.mrf.mxu1 }
 0x82e   : > { %v19390_v45 = vadd.f32 %v14264_v7, %v6815_v60  ;;  %14696 = vmatpush3.bf16.msra.mxu1 %v15080_v61  ;;  %v21654_v60 = vld [vmem:[#allocation158_spill] sm:$0xff] }
 0x82f   : > { %v7290_v59 = vpop.f32.mrf.mxu1  ;;  %14697 = vmatprep.subr.bf16.mxu1 %v15081_v33  ;;  %v6831_v7 = vadd.f32 %v19142_v47, %v21654_v60  ;;  %v21660_v60 = vld [vmem:[#allocation81_spill] sm:$0xff] }
 0x830   : > { %v19397_v11 = vadd.f32 %v7290_v59, %v6807_v54  ;;  %v19414_v54 = vpop.f32.mrf.mxu0 }
 0x831   : > { %v14267_v20 = vpop.f32.mrf.mxu1  ;;  %14554 = vmatmul.mubr.bf16.gmra.mxu1 %v21651_v16  ;;  %21655 = vst [vmem:[#allocation77_spill] sm:$0xff] %v19414_v54  ;;  %v21657_v16 = vld [vmem:[#allocation161_spill] sm:$0xff] }
 0x832   : > { %v19404_v61 = vadd.f32 %v14267_v20, %v6828_v6  ;;  %14557 = vmatprep.mubr.bf16.mxu1 %v21653_v38  ;;  %14698 = vmatpush3.bf16.msra.mxu1 %v15081_v33  ;;  %v15084_v20 = vld [vmem:[%s20635_s4 + $0x210] sm:$0xff]   ;;  %v6844_v47 = vadd.f32 %v21658_v2, %v21657_v16  ;;  %v19427_v38 = vpop.f32.mrf.mxu0 }
 0x833   : > { %v7303_v25 = vpop.f32.mrf.mxu1  ;;  %14699 = vmatprep.subr.bf16.mxu1 %v15082_v10  ;;  %21659 = vst [vmem:[#allocation5_spill] sm:$0xff] %v19427_v38  ;;  %v21668_v38 = vld [vmem:[#allocation172_spill] sm:$0xff] }
 0x834   : > { %v19412_v24 = vadd.f32 %v7303_v25, %v6820_v55 }
 0x835   : > { %v14268_v59 = vpop.f32.mrf.mxu1 }
 0x836   : > { %v19418_v6 = vadd.f32 %v14268_v59, %v6831_v7  ;;  %14700 = vmatpush3.bf16.msra.mxu1 %v15082_v10  ;;  %v6836_v7 = vadd.f32 %v19153_v21, %v21661_v1  ;;  %v21662_v59 = vld [vmem:[#allocation82_spill] sm:$0xff]  ;;  %v21665_v21 = vld [vmem:[#allocation171_spill] sm:$0xff] }
 0x837   : > { %v7306_v33 = vpop.f32.mrf.mxu1  ;;  %14701 = vmatprep.subr.bf16.mxu1 %v15083_v8 }
 0x838   : > { %v19425_v55 = vadd.f32 %v7306_v33, %v6823_v39  ;;  %v15085_v39 = vld [vmem:[%s20635_s4 + $0x208] sm:$0xff]   ;;  %v21663_v33 = vld [vmem:[#allocation168_spill] sm:$0xff] }
 0x839   : > { %v14271_v25 = vpop.f32.mrf.mxu1  ;;  %14558 = vmatmul.mubr.bf16.gmra.mxu1 %v21660_v60  ;;  %v6847_v16 = vadd.f32 %v19158_v40, %v21663_v33  ;;  %v19442_v60 = vpop.f32.mrf.mxu0  ;;  %v6860_v40 = vadd.f32 %v21669_v22, %v21668_v38  ;;  %v6863_v22 = vadd.f32 %v19176_v42, %v21676_v0  ;;  %v21684_v0 = vld [vmem:[#allocation87_spill] sm:$0xff] }
 0x83a   : > { %v19432_v10 = vadd.f32 %v14271_v25, %v6844_v47  ;;  %14561 = vmatprep.mubr.bf16.mxu1 %v21662_v59  ;;  %14702 = vmatpush3.bf16.msra.mxu1 %v15083_v8  ;;  %21664 = vst [vmem:[#allocation80_spill] sm:$0xff] %v19442_v60  ;;  %v21666_v47 = vld [vmem:[#allocation220_spill] sm:$0xff]  ;;  %v15086_v59 = vld [vmem:[%s20635_s4 + $0x200] sm:$0xff]  }
 0x83b   : > { %v7319_v32 = vpop.f32.mrf.mxu1  ;;  %14703 = vmatprep.subr.bf16.mxu1 %v15084_v20  ;;  %v6839_v25 = vadd.f32 %v21666_v47, %v21665_v21  ;;  %v21672_v60 = vld [vmem:[#allocation84_spill] sm:$0xff]  ;;  %v21673_v21 = vld [vmem:[#allocation75_spill] sm:$0xff]  ;;  %v21675_v47 = vld [vmem:[#allocation18_spill] sm:$0xff] }
 0x83c   : > { %v19440_v2 = vadd.f32 %v7319_v32, %v6836_v7  ;;  %v19455_v32 = vpop.f32.mrf.mxu0 }
 0x83d   : > { %v14272_v54 = vpop.f32.mrf.mxu1  ;;  %21671 = vst [vmem:[#allocation86_spill] sm:$0xff] %v19455_v32  ;;  %v21678_v32 = vld [vmem:[#allocation177_spill] sm:$0xff] }
 0x83e   : > { %v19446_v1 = vadd.f32 %v14272_v54, %v6847_v16  ;;  %14704 = vmatpush3.bf16.msra.mxu1 %v15084_v20  ;;  %v21674_v54 = vld [vmem:[#allocation222_spill] sm:$0xff] }
 0x83f   : > { %v7322_v8 = vpop.f32.mrf.mxu1  ;;  %14705 = vmatprep.subr.bf16.mxu1 %v15085_v39  ;;  %v6852_v16 = vadd.f32 %v21674_v54, %v21673_v21  ;;  %v21681_v21 = vld [vmem:[#allocation224_spill] sm:$0xff] }
 0x840   : > { %21667 = vst [vmem:[#allocation6_spill] sm:$0xff] %v19446_v1  ;;  %v19453_v7 = vadd.f32 %v7322_v8, %v6839_v25  ;;  %v19467_v25 = vpop.f32.mrf.mxu0 }
 0x841   : > { %v14275_v33 = vpop.f32.mrf.mxu1  ;;  %14562 = vmatmul.mubr.bf16.gmra.mxu1 %v21672_v60  ;;  %21677 = vst [vmem:[#allocation89_spill] sm:$0xff] %v19467_v25  ;;  %v21679_v60 = vld [vmem:[#allocation223_spill] sm:$0xff] }
 0x842   : > { %21670 = vst [vmem:[#allocation83_spill] sm:$0xff] %v19453_v7  ;;  %v19460_v20 = vadd.f32 %v14275_v33, %v6860_v40  ;;  %14565 = vmatprep.mubr.bf16.mxu1 %v21675_v47  ;;  %14706 = vmatpush3.bf16.msra.mxu1 %v15085_v39  ;;  %v6855_v7 = vadd.f32 %v21679_v60, %v21678_v32  ;;  %v21680_v33 = vld [vmem:[#allocation178_spill] sm:$0xff]  ;;  %v19477_v47 = vpop.f32.mrf.mxu0  ;;  %v21687_v32 = vld [vmem:[#allocation19_spill] sm:$0xff] }
 0x843   : > { %v7335_v52 = vpop.f32.mrf.mxu1  ;;  %14707 = vmatprep.subr.bf16.mxu1 %v15086_v59  ;;  %v6876_v39 = vadd.f32 %v21681_v21, %v21680_v33  ;;  %21683 = vst [vmem:[#allocation7_spill] sm:$0xff] %v19477_v47  ;;  %v21691_v33 = vld [vmem:[#allocation185_spill] sm:$0xff] }
 0x844   : > { %v19465_v38 = vadd.f32 %v7335_v52, %v6852_v16  ;;  %v21685_v52 = vld [vmem:[#allocation181_spill] sm:$0xff] }
 0x845   : > { %v14276_v8 = vpop.f32.mrf.mxu1  ;;  %v6868_v16 = vadd.f32 %v19185_v43, %v21685_v52  ;;  %v21692_v21 = vld [vmem:[#allocation225_spill] sm:$0xff] }
 0x846   : > { %v19471_v1 = vadd.f32 %v14276_v8, %v6863_v22  ;;  %14708 = vmatpush3.bf16.msra.mxu1 %v15086_v59  ;;  %v21688_v59 = vld [vmem:[#allocation183_spill] sm:$0xff]  ;;  %v6871_v47 = vadd.f32 %v21692_v21, %v21691_v33  ;;  %v21694_v43 = vld [vmem:[#allocation85_spill] sm:$0xff]  ;;  %v21704_v33 = vld [vmem:[#allocation228_spill] sm:$0xff] }
 0x847   : > { %v7338_v40 = vpop.f32.mrf.mxu1  ;;  %v6879_v8 = vadd.f32 %v19187_v37, %v21688_v59  ;;  %v21698_v37 = vld [vmem:[#allocation20_spill] sm:$0xff] }
 0x848   : > { %v19475_v54 = vadd.f32 %v7338_v40, %v6855_v7  ;;  %v19489_v7 = vpop.f32.mrf.mxu0 }
 0x849   : > { %v14279_v42 = vpop.f32.mrf.mxu1  ;;  %14566 = vmatmul.mubr.bf16.gmra.mxu1 %v21684_v0  ;;  %21690 = vst [vmem:[#allocation205_spill] sm:$0xff] %v19489_v7 }
 0x84a   : > { %21682 = vst [vmem:[#allocation105_spill] sm:$0xff] %v19475_v54  ;;  %v19482_v25 = vadd.f32 %v14279_v42, %v6876_v39  ;;  %14569 = vmatprep.mubr.bf16.mxu1 %v21687_v32  ;;  %v21695_v39 = vld [vmem:[#allocation226_spill] sm:$0xff]  ;;  %v19499_v32 = vpop.f32.mrf.mxu0 }
 0x84b   : > { %v7351_v22 = vpop.f32.mrf.mxu1  ;;  %v6892_v42 = vadd.f32 %v21695_v39, %v21694_v43  ;;  %21697 = vst [vmem:[#allocation30_spill] sm:$0xff] %v19499_v32  ;;  %v21707_v43 = vld [vmem:[#allocation189_spill] sm:$0xff] }
 0x84c   : > { %21686 = vst [vmem:[#allocation204_spill] sm:$0xff] %v19482_v25  ;;  %v19487_v60 = vadd.f32 %v7351_v22, %v6868_v16  ;;  %v21699_v16 = vld [vmem:[#allocation187_spill] sm:$0xff]  ;;  %v21708_v39 = vld [vmem:[#allocation229_spill] sm:$0xff] }
 0x84d   : > { %v14280_v40 = vpop.f32.mrf.mxu1  ;;  %v21700_v22 = vld [vmem:[#allocation227_spill] sm:$0xff]  ;;  %v6887_v32 = vadd.f32 %v21708_v39, %v21707_v43  ;;  %v21720_v43 = vld [vmem:[#allocation232_spill] sm:$0xff] }
 0x84e   : > { %21689 = vst [vmem:[#allocation23_spill] sm:$0xff] %v19487_v60  ;;  %v19493_v0 = vadd.f32 %v14280_v40, %v6879_v8  ;;  %v6884_v59 = vadd.f32 %v21700_v22, %v21699_v16  ;;  %v21702_v60 = vld [vmem:[#allocation91_spill] sm:$0xff]  ;;  %v21703_v40 = vld [vmem:[#allocation88_spill] sm:$0xff]  ;;  %v21710_v16 = vld [vmem:[#allocation190_spill] sm:$0xff] }
 0x84f   : > { %v7354_v54 = vpop.f32.mrf.mxu1  ;;  %v6895_v21 = vadd.f32 %v21704_v33, %v21703_v40  ;;  %v21714_v40 = vld [vmem:[#allocation22_spill] sm:$0xff] }
 0x850   : > { %21693 = vst [vmem:[#allocation46_spill] sm:$0xff] %v19493_v0  ;;  %v19497_v52 = vadd.f32 %v7354_v54, %v6871_v47  ;;  %v19511_v54 = vpop.f32.mrf.mxu0 }
 0x851   : > { %v14283_v25 = vpop.f32.mrf.mxu1  ;;  %14570 = vmatmul.mubr.bf16.gmra.mxu1 %v21698_v37  ;;  %21706 = vst [vmem:[#allocation11_spill] sm:$0xff] %v19511_v54 }
 0x852   : > { %21696 = vst [vmem:[#allocation207_spill] sm:$0xff] %v19497_v52  ;;  %v19504_v7 = vadd.f32 %v14283_v25, %v6892_v42  ;;  %14573 = vmatprep.mubr.bf16.mxu1 %v21702_v60  ;;  %v21711_v25 = vld [vmem:[#allocation230_spill] sm:$0xff]  ;;  %v19521_v60 = vpop.f32.mrf.mxu0 }
 0x853   : > { %v7367_v8 = vpop.f32.mrf.mxu1  ;;  %v6908_v42 = vadd.f32 %v21711_v25, %v21710_v16  ;;  %21713 = vst [vmem:[#allocation210_spill] sm:$0xff] %v19521_v60  ;;  %v21723_v16 = vld [vmem:[#allocation38_spill] sm:$0xff]  ;;  %v21724_v25 = vld [vmem:[#allocation233_spill] sm:$0xff] }
 0x854   : > { %21701 = vst [vmem:[#allocation48_spill] sm:$0xff] %v19504_v7  ;;  %v19509_v0 = vadd.f32 %v7367_v8, %v6884_v59  ;;  %v21715_v59 = vld [vmem:[#allocation97_spill] sm:$0xff]  ;;  %v21716_v8 = vld [vmem:[#allocation231_spill] sm:$0xff]  ;;  %v6903_v60 = vadd.f32 %v21724_v25, %v21723_v16  ;;  %v21735_v16 = vld [vmem:[#allocation236_spill] sm:$0xff] }
 0x855   : > { %v14284_v47 = vpop.f32.mrf.mxu1  ;;  %v6900_v33 = vadd.f32 %v21716_v8, %v21715_v59  ;;  %v21726_v59 = vld [vmem:[#allocation194_spill] sm:$0xff] }
 0x856   : > { %21705 = vst [vmem:[#allocation68_spill] sm:$0xff] %v19509_v0  ;;  %v19515_v37 = vadd.f32 %v14284_v47, %v6895_v21  ;;  %v21718_v0 = vld [vmem:[#allocation32_spill] sm:$0xff]  ;;  %v21719_v47 = vld [vmem:[#allocation193_spill] sm:$0xff] }
 0x857   : > { %v7370_v52 = vpop.f32.mrf.mxu1  ;;  %v6911_v39 = vadd.f32 %v21720_v43, %v21719_v47  ;;  %v21730_v47 = vld [vmem:[#allocation35_spill] sm:$0xff] }
 0x858   : > { %21709 = vst [vmem:[#allocation209_spill] sm:$0xff] %v19515_v37  ;;  %v19519_v22 = vadd.f32 %v7370_v52, %v6887_v32  ;;  %v19533_v52 = vpop.f32.mrf.mxu0 }
 0x859   : > { %v14287_v7 = vpop.f32.mrf.mxu1  ;;  %14574 = vmatmul.mubr.bf16.gmra.mxu1 %v21714_v40  ;;  %21722 = vst [vmem:[#allocation63_spill] sm:$0xff] %v19533_v52 }
 0x85a   : > { %21712 = vst [vmem:[#allocation12_spill] sm:$0xff] %v19519_v22  ;;  %v19526_v54 = vadd.f32 %v14287_v7, %v6908_v42  ;;  %14577 = vmatprep.mubr.bf16.mxu1 %v21718_v0  ;;  %v21727_v7 = vld [vmem:[#allocation234_spill] sm:$0xff]  ;;  %v19543_v0 = vpop.f32.mrf.mxu0 }
 0x85b   : > { %v7383_v21 = vpop.f32.mrf.mxu1  ;;  %v6924_v42 = vadd.f32 %v21727_v7, %v21726_v59  ;;  %21729 = vst [vmem:[#allocation16_spill] sm:$0xff] %v19543_v0  ;;  %v21737_v59 = vld [vmem:[#allocation198_spill] sm:$0xff]  ;;  %v21738_v7 = vld [vmem:[#allocation237_spill] sm:$0xff] }
 0x85c   : > { %21717 = vst [vmem:[#allocation60_spill] sm:$0xff] %v19526_v54  ;;  %v19531_v37 = vadd.f32 %v7383_v21, %v6900_v33  ;;  %v21731_v33 = vld [vmem:[#allocation196_spill] sm:$0xff]  ;;  %v21732_v21 = vld [vmem:[#allocation235_spill] sm:$0xff]  ;;  %v6919_v0 = vadd.f32 %v21738_v7, %v21737_v59 }
 0x85d   : > { %v14288_v32 = vpop.f32.mrf.mxu1  ;;  %v6916_v43 = vadd.f32 %v21732_v21, %v21731_v33 }
 0x85e   : > { %21721 = vst [vmem:[#allocation71_spill] sm:$0xff] %v19531_v37  ;;  %v19537_v40 = vadd.f32 %v14288_v32, %v6911_v39  ;;  %v21733_v37 = vld [vmem:[#allocation41_spill] sm:$0xff]  ;;  %v21734_v32 = vld [vmem:[#allocation44_spill] sm:$0xff] }
 0x85f   : > { %v7386_v22 = vpop.f32.mrf.mxu1  ;;  %v6927_v25 = vadd.f32 %v21735_v16, %v21734_v32  ;;  %v21741_v32 = vld [vmem:[#allocation47_spill] sm:$0xff]  ;;  %v21743_v16 = vld [vmem:[#allocation98_spill] sm:$0xff] }
 0x860   : > { %21725 = vst [vmem:[#allocation212_spill] sm:$0xff] %v19537_v40  ;;  %v19541_v8 = vadd.f32 %v7386_v22, %v6903_v60  ;;  %v19555_v22 = vpop.f32.mrf.mxu0  ;;  %v7832_v59 = vadd.f32 %v21743_v16, %v19231_v48 }
 0x861   : > { %v14291_v54 = vpop.f32.mrf.mxu1  ;;  %14578 = vmatmul.mubr.bf16.gmra.mxu1 %v21730_v47  ;;  %21736 = vst [vmem:[#allocation113_spill] sm:$0xff] %v19555_v22 }
 0x862   : > { %21728 = vst [vmem:[#allocation36_spill] sm:$0xff] %v19541_v8  ;;  %v19548_v52 = vadd.f32 %v14291_v54, %v6924_v42  ;;  %14581 = vmatprep.mubr.bf16.mxu1 %v21733_v37  ;;  %v21739_v54 = vld [vmem:[#allocation96_spill] sm:$0xff]  ;;  %v19565_v42 = vpop.f32.mrf.mxu0 }
 0x863   : > { %v7399_v39 = vpop.f32.mrf.mxu1  ;;  %v7834_v37 = vadd.f32 %v21739_v54, %v19226_v41  ;;  %21740 = vst [vmem:[#allocation216_spill] sm:$0xff] %v19565_v42 }
 0x864   : > { %v19553_v40 = vadd.f32 %v7399_v39, %v6916_v43  ;;  %v21742_v39 = vld [vmem:[#allocation53_spill] sm:$0xff]  ;;  %v19577_v7 = vpop.f32.mrf.mxu0 }
 0x865   : > { %v14292_v60 = vpop.f32.mrf.mxu1  ;;  %21745 = vst [vmem:[#allocation115_spill] sm:$0xff] %v19577_v7 }
 0x866   : > { %v19559_v47 = vadd.f32 %v14292_v60, %v6927_v25  ;;  %v19587_v16 = vpop.f32.mrf.mxu0 }
 0x867   : > { %v7402_v8 = vpop.f32.mrf.mxu1  ;;  %21748 = vst [vmem:[#allocation37_spill] sm:$0xff] %v19587_v16 }
 0x868   : > { %v19561_v33 = vadd.f32 %v7402_v8, %v6919_v0  ;;  %v21744_v8 = vld [vmem:[#allocation100_spill] sm:$0xff] }
 0x869   : > { %v14391_v21 = vpop.f32.mrf.mxu1  ;;  %14582 = vmatmul.mubr.bf16.gmra.mxu1 %v21741_v32  ;;  %v7835_v0 = vadd.f32 %v21744_v8, %v19235_v19  ;;  %v21746_v32 = vld [vmem:[#allocation102_spill] sm:$0xff]  ;;  %v21750_v8 = vld [vmem:[#allocation25_spill] sm:$0xff] }
 0x86a   : > { %v19568_v43 = vadd.f32 %v14391_v21, %v7834_v37  ;;  %14585 = vmatprep.mubr.bf16.mxu1 %v21742_v39  ;;  %v7833_v37 = vadd.f32 %v21746_v32, %v19239_v35  ;;  %v21747_v39 = vld [vmem:[#allocation107_spill] sm:$0xff]  ;;  %v21752_v32 = vld [vmem:[#allocation42_spill] sm:$0xff] }
 0x86b   : > { %v8013_v25 = vpop.f32.mrf.mxu1  ;;  %v7838_v48 = vadd.f32 %v21747_v39, %v19244_v14 }
 0x86c   : > { %v19573_v60 = vadd.f32 %v8013_v25, %v7832_v59  ;;  %v21749_v25 = vld [vmem:[#allocation99_spill] sm:$0xff] }
 0x86d   : > { %v14392_v41 = vpop.f32.mrf.mxu1 }
 0x86e   : > { %v19579_v54 = vadd.f32 %v14392_v41, %v7835_v0  ;;  %v21751_v0 = vld [vmem:[#allocation109_spill] sm:$0xff] }
 0x86f   : > { %v8016_v21 = vpop.f32.mrf.mxu1  ;;  %v7836_v41 = vadd.f32 %v21751_v0, %v19249_v58 }
 0x870   : > { %v19583_v42 = vadd.f32 %v8016_v21, %v7833_v37  ;;  %v7839_v37 = vadd.f32 %v21752_v32, %v19253_v15  ;;  %v19599_v21 = vpop.f32.mrf.mxu0  ;;  %v21758_v32 = vld [vmem:[#allocation103_spill] sm:$0xff] }
 0x871   : > { %v14395_v59 = vpop.f32.mrf.mxu1  ;;  %14586 = vmatmul.mubr.bf16.gmra.mxu1 %v21749_v25  ;;  %21753 = vst [vmem:[#allocation120_spill] sm:$0xff] %v19599_v21  ;;  %v21754_v25 = vld [vmem:[#allocation93_spill] sm:$0xff] }
 0x872   : > { %v19590_v19 = vadd.f32 %v14395_v59, %v7838_v48  ;;  %14589 = vmatprep.mubr.bf16.mxu1 %v21750_v8  ;;  %v7837_v48 = vadd.f32 %v21754_v25, %v19257_v29  ;;  %v21755_v8 = vld [vmem:[#allocation45_spill] sm:$0xff]  ;;  %v19609_v0 = vpop.f32.mrf.mxu0 }
 0x873   : > { %v8029_v7 = vpop.f32.mrf.mxu1  ;;  %v7842_v58 = vadd.f32 %v21755_v8, %v19262_v53  ;;  %21756 = vst [vmem:[#allocation214_spill] sm:$0xff] %v19609_v0  ;;  %v21760_v25 = vld [vmem:[#allocation9_spill] sm:$0xff] }
 0x874   : > { %v19595_v35 = vadd.f32 %v8029_v7, %v7836_v41  ;;  %v21757_v41 = vld [vmem:[#allocation59_spill] sm:$0xff] }
 0x875   : > { %v14396_v14 = vpop.f32.mrf.mxu1 }
 0x876   : > { %v19601_v39 = vadd.f32 %v14396_v14, %v7839_v37  ;;  %v21759_v37 = vld [vmem:[#allocation95_spill] sm:$0xff] }
 0x877   : > { %v8032_v59 = vpop.f32.mrf.mxu1  ;;  %v7840_v14 = vadd.f32 %v21759_v37, %v19267_v44 }
 0x878   : > { %v19605_v16 = vadd.f32 %v8032_v59, %v7837_v48  ;;  %v7843_v48 = vadd.f32 %v21760_v25, %v19271_v18  ;;  %v19621_v59 = vpop.f32.mrf.mxu0  ;;  %v21766_v25 = vld [vmem:[#allocation65_spill] sm:$0xff] }
 0x879   : > { %v14399_v7 = vpop.f32.mrf.mxu1  ;;  %14590 = vmatmul.mubr.bf16.gmra.mxu1 %v21757_v41  ;;  %21761 = vst [vmem:[#allocation123_spill] sm:$0xff] %v19621_v59  ;;  %v21762_v41 = vld [vmem:[#allocation49_spill] sm:$0xff] }
 0x87a   : > { %v19612_v15 = vadd.f32 %v14399_v7, %v7842_v58  ;;  %14593 = vmatprep.mubr.bf16.mxu1 %v21758_v32  ;;  %v7841_v58 = vadd.f32 %v21762_v41, %v19275_v31  ;;  %v21763_v32 = vld [vmem:[#allocation52_spill] sm:$0xff]  ;;  %v19631_v37 = vpop.f32.mrf.mxu0  ;;  %v21768_v41 = vld [vmem:[#allocation55_spill] sm:$0xff] }
 0x87b   : > { %v8045_v21 = vpop.f32.mrf.mxu1  ;;  %v7846_v44 = vadd.f32 %v21763_v32, %v19280_v30  ;;  %21764 = vst [vmem:[#allocation127_spill] sm:$0xff] %v19631_v37 }
 0x87c   : > { %v19617_v29 = vadd.f32 %v8045_v21, %v7840_v14  ;;  %v21765_v14 = vld [vmem:[#allocation27_spill] sm:$0xff] }
 0x87d   : > { %v14400_v53 = vpop.f32.mrf.mxu1 }
 0x87e   : > { %v19623_v8 = vadd.f32 %v14400_v53, %v7843_v48  ;;  %v21767_v48 = vld [vmem:[#allocation54_spill] sm:$0xff] }
 0x87f   : > { %v8048_v7 = vpop.f32.mrf.mxu1  ;;  %v7844_v53 = vadd.f32 %v21767_v48, %v19285_v63 }
 0x880   : > { %v19627_v0 = vadd.f32 %v8048_v7, %v7841_v58  ;;  %v7847_v58 = vadd.f32 %v21768_v41, %v19289_v56  ;;  %v19643_v7 = vpop.f32.mrf.mxu0  ;;  %v21774_v41 = vld [vmem:[#allocation108_spill] sm:$0xff] }
 0x881   : > { %v14403_v21 = vpop.f32.mrf.mxu1  ;;  %14594 = vmatmul.mubr.bf16.gmra.mxu1 %v21765_v14  ;;  %21769 = vst [vmem:[#allocation128_spill] sm:$0xff] %v19643_v7  ;;  %v21770_v14 = vld [vmem:[#allocation57_spill] sm:$0xff]  ;;  %v21783_v7 = vld [vmem:[#allocation2_spill] sm:$0xff] }
 0x882   : > { %v19634_v18 = vadd.f32 %v14403_v21, %v7846_v44  ;;  %14597 = vmatprep.mubr.bf16.mxu1 %v21766_v25  ;;  %v7845_v44 = vadd.f32 %v21770_v14, %v19293_v3  ;;  %v21771_v25 = vld [vmem:[#allocation61_spill] sm:$0xff]  ;;  %v19653_v48 = vpop.f32.mrf.mxu0 }
 0x883   : > { %v8061_v59 = vpop.f32.mrf.mxu1  ;;  %v7850_v63 = vadd.f32 %v21771_v25, %v19298_v28  ;;  %21772 = vst [vmem:[#allocation132_spill] sm:$0xff] %v19653_v48  ;;  %v19664_v3 = vld [vmem:[%s20637_s6 + $0x38] sm:$0xff]   ;;  %v21776_v28 = vld [vmem:[#allocation64_spill] sm:$0xff]  ;;  %v21782_v48 = vld [vmem:[#allocation34_spill] sm:$0xff] }
 0x884   : > { %v19639_v31 = vadd.f32 %v8061_v59, %v7844_v53  ;;  %v21773_v53 = vld [vmem:[#allocation31_spill] sm:$0xff]  ;;  %14773 = vmatprep.subr.bf16.mxu0 %v19664_v3  ;;  %14853 = vmatprep.subr.bf16.mxu1 %v19664_v3  ;;  %v19672_v25 = vpop.f32.mrf.mxu0 }
 0x885   : > { %v14404_v30 = vpop.f32.mrf.mxu1  ;;  %21777 = vst [vmem:[#allocation70_spill] sm:$0xff] %v19672_v25  ;;  %14774 = vmatpush3.bf16.msra.mxu0 %v19664_v3 }
 0x886   : > { %v19645_v32 = vadd.f32 %v14404_v30, %v7847_v58  ;;  %v21775_v58 = vld [vmem:[#allocation14_spill] sm:$0xff] }
 0x887   : > { %v8064_v21 = vpop.f32.mrf.mxu1  ;;  %v7848_v30 = vadd.f32 %v21775_v58, %v19303_v9 }
 0x888   : > { %v19649_v37 = vadd.f32 %v8064_v21, %v7845_v44  ;;  %v7851_v21 = vadd.f32 %v21776_v28, %v19307_v51 }
 0x889   : > { %v14407_v59 = vpop.f32.mrf.mxu1  ;;  %14598 = vmatmul.mubr.bf16.gmra.mxu1 %v21773_v53 }
 0x88a   : > { %v19656_v56 = vadd.f32 %v14407_v59, %v7850_v63  ;;  %14601 = vmatprep.mubr.bf16.mxu1 %v21774_v41  ;;  %v21778_v59 = vld [vmem:[#allocation15_spill] sm:$0xff] }
 0x88b   : > { %v8077_v14 = vpop.f32.mrf.mxu1  ;;  %v7849_v53 = vadd.f32 %v21778_v59, %v19311_v27  ;;  %v21785_v59 = vld [vmem:[#allocation114_spill] sm:$0xff] }
 0x88c   : > { %v19666_v44 = vadd.f32 %v8077_v14, %v7848_v30  ;;  %v21780_v30 = vld [vmem:[#allocation111_spill] sm:$0xff]  ;;  %v19683_v14 = vpop.f32.mrf.mxu0 }
 0x88d   : > { %v14408_v63 = vpop.f32.mrf.mxu1  ;;  %v7854_v51 = vadd.f32 %v21780_v30, %v19316_v57  ;;  %21781 = vst [vmem:[#allocation138_spill] sm:$0xff] %v19683_v14 }
 0x88e   : > { %v19675_v9 = vadd.f32 %v14408_v63, %v7851_v21  ;;  %v21784_v21 = vld [vmem:[#allocation112_spill] sm:$0xff] }
 0x88f   : > { %v8080_v41 = vpop.f32.mrf.mxu1  ;;  %v7852_v63 = vadd.f32 %v21784_v21, %v19321_v34 }
 0x890   : > { %v19679_v58 = vadd.f32 %v8080_v41, %v7849_v53  ;;  %v7855_v53 = vadd.f32 %v21785_v59, %v19325_v62  ;;  %v19695_v41 = vpop.f32.mrf.mxu0  ;;  %v21792_v59 = vld [vmem:[#allocation3_spill] sm:$0xff] }
 0x891   : > { %v14411_v28 = vpop.f32.mrf.mxu1  ;;  %14602 = vmatmul.mubr.bf16.gmra.mxu1 %v21782_v48  ;;  %21786 = vst [vmem:[#allocation140_spill] sm:$0xff] %v19695_v41  ;;  %v21787_v48 = vld [vmem:[#allocation116_spill] sm:$0xff] }
 0x892   : > { %21779 = vst [vmem:[#allocation134_spill] sm:$0xff] %v19679_v58  ;;  %v19686_v25 = vadd.f32 %v14411_v28, %v7854_v51  ;;  %14605 = vmatprep.mubr.bf16.mxu1 %v21783_v7  ;;  %v7853_v51 = vadd.f32 %v21787_v48, %v19329_v46  ;;  %v21789_v7 = vld [vmem:[#allocation119_spill] sm:$0xff]  ;;  %v19705_v21 = vpop.f32.mrf.mxu0  ;;  %v15088_v46 = vld [vmem:[%s20637_s6 + $0x30] sm:$0xff]  }
 0x893   : > { %v8093_v22 = vpop.f32.mrf.mxu1  ;;  %v7858_v34 = vadd.f32 %v21789_v7, %v19334_v17  ;;  %21790 = vst [vmem:[#allocation142_spill] sm:$0xff] %v19705_v21  ;;  %v21794_v17 = vld [vmem:[#allocation122_spill] sm:$0xff]  ;;  %14775 = vmatprep.subr.bf16.mxu0 %v15088_v46  ;;  %v21797_v21 = vld [vmem:[#allocation129_spill] sm:$0xff] }
 0x894   : > { %v19691_v27 = vadd.f32 %v8093_v22, %v7852_v63  ;;  %v21791_v63 = vld [vmem:[#allocation39_spill] sm:$0xff]  ;;  %v19720_v7 = vpop.f32.mrf.mxu0  ;;  %14776 = vmatpush3.bf16.msra.mxu0 %v15088_v46 }
 0x895   : > { %v14412_v57 = vpop.f32.mrf.mxu1  ;;  %21795 = vst [vmem:[#allocation73_spill] sm:$0xff] %v19720_v7  ;;  %v21801_v7 = vld [vmem:[#allocation40_spill] sm:$0xff] }
 0x896   : > { %v19697_v30 = vadd.f32 %v14412_v57, %v7855_v53  ;;  %v21793_v53 = vld [vmem:[#allocation121_spill] sm:$0xff] }
 0x897   : > { %v8096_v28 = vpop.f32.mrf.mxu1  ;;  %v7856_v57 = vadd.f32 %v21793_v53, %v19339_v13 }
 0x898   : > { %v19701_v58 = vadd.f32 %v8096_v28, %v7853_v51  ;;  %v7859_v28 = vadd.f32 %v21794_v17, %v19343_v23  ;;  %v21799_v23 = vld [vmem:[#allocation90_spill] sm:$0xff] }
 0x899   : > { %v14415_v22 = vpop.f32.mrf.mxu1  ;;  %14606 = vmatmul.mubr.bf16.gmra.mxu1 %v21791_v63  ;;  %v21796_v63 = vld [vmem:[#allocation126_spill] sm:$0xff] }
 0x89a   : > { %21788 = vst [vmem:[#allocation72_spill] sm:$0xff] %v19701_v58  ;;  %v19708_v62 = vadd.f32 %v14415_v22, %v7858_v34  ;;  %14609 = vmatprep.mubr.bf16.mxu1 %v21792_v59  ;;  %v7857_v13 = vadd.f32 %v21796_v63, %v19347_v12  ;;  %v21803_v63 = vld [vmem:[#allocation135_spill] sm:$0xff] }
 0x89b   : > { %v8109_v48 = vpop.f32.mrf.mxu1 }
 0x89c   : > { %v19716_v51 = vadd.f32 %v8109_v48, %v7856_v57  ;;  %v7862_v57 = vadd.f32 %v21797_v21, %v19352_v49  ;;  %v19730_v48 = vpop.f32.mrf.mxu0 }
 0x89d   : > { %v14416_v34 = vpop.f32.mrf.mxu1  ;;  %21798 = vst [vmem:[#allocation146_spill] sm:$0xff] %v19730_v48  ;;  %v21805_v48 = vld [vmem:[#allocation139_spill] sm:$0xff] }
 0x89e   : > { %v19722_v22 = vadd.f32 %v14416_v34, %v7859_v28  ;;  %v21802_v28 = vld [vmem:[#allocation133_spill] sm:$0xff] }
 0x89f   : > { %v8112_v53 = vpop.f32.mrf.mxu1  ;;  %v7860_v34 = vadd.f32 %v21802_v28, %v19357_v5 }
 0x8a0   : > { %v19726_v58 = vadd.f32 %v8112_v53, %v7857_v13  ;;  %v7863_v13 = vadd.f32 %v21803_v63, %v19361_v36  ;;  %v19742_v53 = vpop.f32.mrf.mxu0  ;;  %v21809_v63 = vld [vmem:[#allocation94_spill] sm:$0xff] }
 0x8a1   : > { %v14419_v41 = vpop.f32.mrf.mxu1  ;;  %14610 = vmatmul.mubr.bf16.gmra.mxu1 %v21799_v23  ;;  %21804 = vst [vmem:[#allocation151_spill] sm:$0xff] %v19742_v53  ;;  %v21837_v53 = vld [vmem:[#allocation51_spill] sm:$0xff] }
 0x8a2   : > { %v19733_v17 = vadd.f32 %v14419_v41, %v7862_v57  ;;  %14709 = vmatprep.mubr.bf16.mxu1 %v21801_v7  ;;  %v7861_v41 = vadd.f32 %v21805_v48, %v19368_v4  ;;  %v21806_v7 = vld [vmem:[#allocation141_spill] sm:$0xff]  ;;  %v19752_v28 = vpop.f32.mrf.mxu0  ;;  %v15089_v4 = vld [vmem:[%s20637_s6 + $0x28] sm:$0xff]  }
 0x8a3   : > { %v8125_v14 = vpop.f32.mrf.mxu1  ;;  %v7866_v5 = vadd.f32 %v21806_v7, %v19375_v50  ;;  %21807 = vst [vmem:[#allocation76_spill] sm:$0xff] %v19752_v28  ;;  %14777 = vmatprep.subr.bf16.mxu0 %v15089_v4 }
 0x8a4   : > { %21800 = vst [vmem:[#allocation148_spill] sm:$0xff] %v19733_v17  ;;  %v19738_v12 = vadd.f32 %v8125_v14, %v7860_v34  ;;  %v21808_v34 = vld [vmem:[#allocation92_spill] sm:$0xff]  ;;  %v19768_v7 = vpop.f32.mrf.mxu0  ;;  %14778 = vmatpush3.bf16.msra.mxu0 %v15089_v4 }
 0x8a5   : > { %v14420_v49 = vpop.f32.mrf.mxu1  ;;  %21812 = vst [vmem:[#allocation154_spill] sm:$0xff] %v19768_v7 }
 0x8a6   : > { %v19744_v21 = vadd.f32 %v14420_v49, %v7863_v13  ;;  %v21810_v13 = vld [vmem:[#allocation145_spill] sm:$0xff] }
 0x8a7   : > { %v8128_v57 = vpop.f32.mrf.mxu1  ;;  %v7864_v49 = vadd.f32 %v21810_v13, %v19384_v26  ;;  %v21813_v26 = vld [vmem:[#allocation152_spill] sm:$0xff]  ;;  %v21814_v13 = vld [vmem:[#allocation153_spill] sm:$0xff] }
 0x8a8   : > { %v19748_v17 = vadd.f32 %v8128_v57, %v7861_v41  ;;  %v21811_v41 = vld [vmem:[#allocation147_spill] sm:$0xff] }
 0x8a9   : > { %v14423_v14 = vpop.f32.mrf.mxu1  ;;  %14710 = vmatmul.mubr.bf16.vlgmr.msra.gmra.mxu1 %v21808_v34  ;;  %v7867_v57 = vadd.f32 %v21811_v41, %v19390_v45  ;;  %v7865_v34 = vadd.f32 %v21813_v26, %v19397_v11  ;;  %v21816_v41 = vld [vmem:[#allocation104_spill] sm:$0xff] }
 0x8aa   : > { %v19755_v36 = vadd.f32 %v14423_v14, %v7866_v5  ;;  %14713 = vmatprep.mubr.bf16.mxu1 %v21809_v63  ;;  %14861 = vmatpush3.bf16.msra.mxu1 %v19664_v3 }
 0x8ab   : > { %v8141_v48 = vpop.f32.mrf.mxu1  ;;  %14854 = vmatprep.subr.bf16.mxu1 %v15088_v46 }
 0x8ac   : > { %v19764_v50 = vadd.f32 %v8141_v48, %v7864_v49  ;;  %v7870_v49 = vadd.f32 %v21814_v13, %v19404_v61  ;;  %v19778_v48 = vpop.f32.mrf.mxu0 }
 0x8ad   : > { %v14424_v5 = vpop.f32.mrf.mxu1  ;;  %21815 = vst [vmem:[#allocation79_spill] sm:$0xff] %v19778_v48 }
 0x8ae   : > { %v19770_v14 = vadd.f32 %v14424_v5, %v7867_v57  ;;  %14862 = vmatpush3.bf16.msra.mxu1 %v15088_v46  ;;  %v21817_v57 = vld [vmem:[#allocation106_spill] sm:$0xff]  ;;  %v21818_v5 = vld [vmem:[#allocation156_spill] sm:$0xff]  ;;  %v19790_v61 = vpop.f32.mrf.mxu0 }
 0x8af   : > { %v8144_v63 = vpop.f32.mrf.mxu1  ;;  %14855 = vmatprep.subr.bf16.mxu1 %v15089_v4  ;;  %v7868_v11 = vadd.f32 %v21818_v5, %v19412_v24  ;;  %21820 = vst [vmem:[#allocation158_spill] sm:$0xff] %v19790_v61  ;;  %v21822_v24 = vld [vmem:[#allocation165_spill] sm:$0xff] }
 0x8b0   : > { %v19774_v3 = vadd.f32 %v8144_v63, %v7865_v34  ;;  %v21819_v34 = vld [vmem:[#allocation159_spill] sm:$0xff]  ;;  %v19800_v5 = vpop.f32.mrf.mxu0 }
 0x8b1   : > { %v14427_v45 = vpop.f32.mrf.mxu1  ;;  %14714 = vmatmul.mubr.bf16.gmra.mxu1 %v21816_v41  ;;  %v7871_v63 = vadd.f32 %v21819_v34, %v19418_v6  ;;  %21823 = vst [vmem:[#allocation160_spill] sm:$0xff] %v19800_v5  ;;  %v21825_v34 = vld [vmem:[#allocation8_spill] sm:$0xff] }
 0x8b2   : > { %v19781_v7 = vadd.f32 %v14427_v45, %v7870_v49  ;;  %14717 = vmatprep.mubr.bf16.mxu1 %v21817_v57  ;;  %14863 = vmatpush3.bf16.msra.mxu1 %v15089_v4  ;;  %v21821_v49 = vld [vmem:[#allocation163_spill] sm:$0xff]  ;;  %v7874_v4 = vadd.f32 %v21822_v24, %v19432_v10  ;;  %v21827_v10 = vld [vmem:[#allocation6_spill] sm:$0xff] }
 0x8b3   : > { %v8157_v46 = vpop.f32.mrf.mxu1  ;;  %v7869_v45 = vadd.f32 %v21821_v49, %v19425_v55  ;;  %v15090_v55 = vld [vmem:[%s20637_s6 + $0x20] sm:$0xff]  }
 0x8b4   : > { %v19786_v26 = vadd.f32 %v8157_v46, %v7868_v11  ;;  %v21824_v46 = vld [vmem:[#allocation43_spill] sm:$0xff]  ;;  %14779 = vmatprep.subr.bf16.mxu0 %v15090_v55  ;;  %14856 = vmatprep.subr.bf16.mxu1 %v15090_v55 }
 0x8b5   : > { %v14428_v13 = vpop.f32.mrf.mxu1  ;;  %14780 = vmatpush3.bf16.msra.mxu0 %v15090_v55 }
 0x8b6   : > { %v19792_v48 = vadd.f32 %v14428_v13, %v7871_v63  ;;  %v21826_v63 = vld [vmem:[#allocation167_spill] sm:$0xff]  ;;  %14864 = vmatpush3.bf16.msra.mxu1 %v15090_v55  ;;  %v21838_v55 = vld [vmem:[#allocation78_spill] sm:$0xff] }
 0x8b7   : > { %v8160_v41 = vpop.f32.mrf.mxu1  ;;  %v7872_v13 = vadd.f32 %v21826_v63, %v19440_v2  ;;  %v21830_v2 = vld [vmem:[#allocation83_spill] sm:$0xff] }
 0x8b8   : > { %v19796_v57 = vadd.f32 %v8160_v41, %v7869_v45  ;;  %v21828_v41 = vld [vmem:[#allocation170_spill] sm:$0xff] }
 0x8b9   : > { %v14431_v11 = vpop.f32.mrf.mxu1  ;;  %14718 = vmatmul.mubr.bf16.gmra.mxu1 %v21824_v46  ;;  %v7875_v24 = vadd.f32 %v21828_v41, %v21827_v10  ;;  %v19815_v46 = vpop.f32.mrf.mxu0  ;;  %v21835_v41 = vld [vmem:[#allocation10_spill] sm:$0xff] }
 0x8ba   : > { %v19803_v6 = vadd.f32 %v14431_v11, %v7874_v4  ;;  %14721 = vmatprep.mubr.bf16.mxu1 %v21825_v34  ;;  %21829 = vst [vmem:[#allocation161_spill] sm:$0xff] %v19815_v46  ;;  %v21831_v34 = vld [vmem:[#allocation173_spill] sm:$0xff] }
 0x8bb   : > { %v8173_v49 = vpop.f32.mrf.mxu1  ;;  %v7873_v63 = vadd.f32 %v21831_v34, %v21830_v2  ;;  %v19825_v28 = vpop.f32.mrf.mxu0 }
 0x8bc   : > { %v19811_v45 = vadd.f32 %v8173_v49, %v7872_v13  ;;  %v21833_v13 = vld [vmem:[#allocation174_spill] sm:$0xff]  ;;  %21834 = vst [vmem:[#allocation81_spill] sm:$0xff] %v19825_v28  ;;  %v21843_v28 = vld [vmem:[#allocation105_spill] sm:$0xff] }
 0x8bd   : > { %v14432_v4 = vpop.f32.mrf.mxu1  ;;  %v7878_v49 = vadd.f32 %v21833_v13, %v19460_v20 }
 0x8be   : > { %v19817_v11 = vadd.f32 %v14432_v4, %v7875_v24  ;;  %v7876_v24 = vadd.f32 %v21838_v55, %v19465_v38 }
 0x8bf   : > { %v8176_v5 = vpop.f32.mrf.mxu1 }
 0x8c0   : > { %v19821_v61 = vadd.f32 %v8176_v5, %v7873_v63  ;;  %v21840_v5 = vld [vmem:[#allocation176_spill] sm:$0xff]  ;;  %v19837_v63 = vpop.f32.mrf.mxu0 }
 0x8c1   : > { %v14435_v10 = vpop.f32.mrf.mxu1  ;;  %14722 = vmatmul.mubr.bf16.gmra.mxu1 %v21835_v41  ;;  %v7879_v34 = vadd.f32 %v21840_v5, %v19471_v1  ;;  %21841 = vst [vmem:[#allocation168_spill] sm:$0xff] %v19837_v63  ;;  %v21844_v41 = vld [vmem:[#allocation179_spill] sm:$0xff]  ;;  %v21851_v5 = vld [vmem:[#allocation13_spill] sm:$0xff] }
 0x8c2   : > { %21832 = vst [vmem:[#allocation17_spill] sm:$0xff] %v19821_v61  ;;  %v19828_v46 = vadd.f32 %v14435_v10, %v7878_v49  ;;  %14725 = vmatprep.mubr.bf16.mxu1 %v21837_v53  ;;  %v7877_v49 = vadd.f32 %v21844_v41, %v21843_v28  ;;  %v21846_v53 = vld [vmem:[#allocation204_spill] sm:$0xff]  ;;  %v19847_v55 = vpop.f32.mrf.mxu0  ;;  %v15091_v28 = vld [vmem:[%s20637_s6 + $0x18] sm:$0xff]  }
 0x8c3   : > { %v8189_v4 = vpop.f32.mrf.mxu1  ;;  %v21847_v61 = vld [vmem:[#allocation180_spill] sm:$0xff]  ;;  %21848 = vst [vmem:[#allocation172_spill] sm:$0xff] %v19847_v55  ;;  %14781 = vmatprep.subr.bf16.mxu0 %v15091_v28  ;;  %14857 = vmatprep.subr.bf16.mxu1 %v15091_v28 }
 0x8c4   : > { %21836 = vst [vmem:[#allocation166_spill] sm:$0xff] %v19828_v46  ;;  %v19833_v2 = vadd.f32 %v8189_v4, %v7876_v24  ;;  %v7882_v38 = vadd.f32 %v21847_v61, %v21846_v53  ;;  %v21849_v4 = vld [vmem:[#allocation58_spill] sm:$0xff]  ;;  %14782 = vmatpush3.bf16.msra.mxu0 %v15091_v28  ;;  %14865 = vmatpush3.bf16.msra.mxu1 %v15091_v28  ;;  %v21868_v28 = vld [vmem:[#allocation68_spill] sm:$0xff] }
 0x8c5   : > { %v14436_v20 = vpop.f32.mrf.mxu1  ;;  %v21855_v61 = vld [vmem:[#allocation46_spill] sm:$0xff] }
 0x8c6   : > { %21839 = vst [vmem:[#allocation82_spill] sm:$0xff] %v19833_v2  ;;  %v19839_v13 = vadd.f32 %v14436_v20, %v7879_v34  ;;  %v21852_v34 = vld [vmem:[#allocation23_spill] sm:$0xff]  ;;  %v21853_v20 = vld [vmem:[#allocation182_spill] sm:$0xff]  ;;  %v21877_v2 = vld [vmem:[#allocation21_spill] sm:$0xff] }
 0x8c7   : > { %v8192_v10 = vpop.f32.mrf.mxu1  ;;  %v7880_v63 = vadd.f32 %v21853_v20, %v21852_v34  ;;  %v21860_v34 = vld [vmem:[#allocation29_spill] sm:$0xff] }
 0x8c8   : > { %21842 = vst [vmem:[#allocation171_spill] sm:$0xff] %v19839_v13  ;;  %v19843_v46 = vadd.f32 %v8192_v10, %v7877_v49  ;;  %v21856_v10 = vld [vmem:[#allocation184_spill] sm:$0xff]  ;;  %v21867_v13 = vld [vmem:[#allocation67_spill] sm:$0xff] }
 0x8c9   : > { %v14439_v24 = vpop.f32.mrf.mxu1  ;;  %14726 = vmatmul.mubr.bf16.gmra.mxu1 %v21849_v4  ;;  %v7883_v53 = vadd.f32 %v21856_v10, %v21855_v61  ;;  %v19862_v4 = vpop.f32.mrf.mxu0  ;;  %v21865_v10 = vld [vmem:[#allocation66_spill] sm:$0xff] }
 0x8ca   : > { %21845 = vst [vmem:[#allocation220_spill] sm:$0xff] %v19843_v46  ;;  %v19850_v1 = vadd.f32 %v14439_v24, %v7882_v38  ;;  %14729 = vmatprep.mubr.bf16.mxu1 %v21851_v5  ;;  %21857 = vst [vmem:[#allocation75_spill] sm:$0xff] %v19862_v4  ;;  %v21859_v5 = vld [vmem:[#allocation207_spill] sm:$0xff] }
 0x8cb   : > { %v8205_v41 = vpop.f32.mrf.mxu1  ;;  %v7881_v20 = vadd.f32 %v21860_v34, %v21859_v5  ;;  %v19872_v46 = vpop.f32.mrf.mxu0  ;;  %v21871_v34 = vld [vmem:[#allocation28_spill] sm:$0xff] }
 0x8cc   : > { %21850 = vst [vmem:[#allocation221_spill] sm:$0xff] %v19850_v1  ;;  %v19858_v49 = vadd.f32 %v8205_v41, %v7880_v63  ;;  %v21862_v63 = vld [vmem:[#allocation48_spill] sm:$0xff]  ;;  %v21863_v41 = vld [vmem:[#allocation186_spill] sm:$0xff]  ;;  %21864 = vst [vmem:[#allocation175_spill] sm:$0xff] %v19872_v46 }
 0x8cd   : > { %v14440_v38 = vpop.f32.mrf.mxu1  ;;  %v21873_v46 = vld [vmem:[#allocation12_spill] sm:$0xff] }
 0x8ce   : > { %21854 = vst [vmem:[#allocation84_spill] sm:$0xff] %v19858_v49  ;;  %v19864_v24 = vadd.f32 %v14440_v38, %v7883_v53  ;;  %v7886_v49 = vadd.f32 %v21863_v41, %v21862_v63  ;;  %v21869_v53 = vld [vmem:[#allocation188_spill] sm:$0xff] }
 0x8cf   : > { %v8208_v55 = vpop.f32.mrf.mxu1  ;;  %v7884_v38 = vadd.f32 %v21869_v53, %v21868_v28 }
 0x8d0   : > { %21858 = vst [vmem:[#allocation222_spill] sm:$0xff] %v19864_v24  ;;  %v19868_v1 = vadd.f32 %v8208_v55, %v7881_v20  ;;  %v21870_v55 = vld [vmem:[#allocation209_spill] sm:$0xff] }
 0x8d1   : > { %v14443_v61 = vpop.f32.mrf.mxu1  ;;  %14730 = vmatmul.mubr.bf16.gmra.mxu1 %v21865_v10  ;;  %v7887_v20 = vadd.f32 %v21871_v34, %v21870_v55  ;;  %v21874_v10 = vld [vmem:[#allocation191_spill] sm:$0xff]  ;;  %v21881_v34 = vld [vmem:[#allocation118_spill] sm:$0xff] }
 0x8d2   : > { %21861 = vst [vmem:[#allocation18_spill] sm:$0xff] %v19868_v1  ;;  %v19875_v4 = vadd.f32 %v14443_v61, %v7886_v49  ;;  %14733 = vmatprep.mubr.bf16.mxu1 %v21867_v13  ;;  %v19884_v1 = vpop.f32.mrf.mxu0  ;;  %v7885_v49 = vadd.f32 %v21874_v10, %v21873_v46  ;;  %v21876_v13 = vld [vmem:[#allocation60_spill] sm:$0xff] }
 0x8d3   : > { %v8221_v24 = vpop.f32.mrf.mxu1  ;;  %21872 = vst [vmem:[#allocation223_spill] sm:$0xff] %v19884_v1  ;;  %v7890_v28 = vadd.f32 %v21877_v2, %v21876_v13  ;;  %v15092_v46 = vld [vmem:[%s20637_s6 + $0x10] sm:$0xff]  }
 0x8d4   : > { %21866 = vst [vmem:[#allocation177_spill] sm:$0xff] %v19875_v4  ;;  %v19880_v5 = vadd.f32 %v8221_v24, %v7884_v38  ;;  %v19894_v53 = vpop.f32.mrf.mxu0  ;;  %v21879_v38 = vld [vmem:[#allocation117_spill] sm:$0xff]  ;;  %v21885_v2 = vld [vmem:[#allocation212_spill] sm:$0xff]  ;;  %14783 = vmatprep.subr.bf16.mxu0 %v15092_v46  ;;  %14858 = vmatprep.subr.bf16.mxu1 %v15092_v46 }
 0x8d5   : > { %v14444_v63 = vpop.f32.mrf.mxu1  ;;  %21878 = vst [vmem:[#allocation224_spill] sm:$0xff] %v19894_v53  ;;  %14784 = vmatpush3.bf16.msra.mxu0 %v15092_v46  ;;  %14866 = vmatpush3.bf16.msra.mxu1 %v15092_v46  ;;  %v21894_v46 = vld [vmem:[#allocation50_spill] sm:$0xff] }
 0x8d6   : > { %v19886_v41 = vadd.f32 %v14444_v63, %v7887_v20  ;;  %v21882_v20 = vld [vmem:[#allocation71_spill] sm:$0xff]  ;;  %v21883_v63 = vld [vmem:[#allocation192_spill] sm:$0xff] }
 0x8d7   : > { %v8224_v61 = vpop.f32.mrf.mxu1  ;;  %v7888_v1 = vadd.f32 %v21883_v63, %v21882_v20  ;;  %v21889_v20 = vld [vmem:[#allocation195_spill] sm:$0xff] }
 0x8d8   : > { %v19890_v4 = vadd.f32 %v8224_v61, %v7885_v49  ;;  %v21886_v61 = vld [vmem:[#allocation33_spill] sm:$0xff] }
 0x8d9   : > { %v14447_v24 = vpop.f32.mrf.mxu1  ;;  %14734 = vmatmul.mubr.bf16.gmra.mxu1 %v21879_v38  ;;  %v7891_v13 = vadd.f32 %v21886_v61, %v21885_v2  ;;  %v19909_v38 = vpop.f32.mrf.mxu0  ;;  %v21892_v61 = vld [vmem:[#allocation124_spill] sm:$0xff] }
 0x8da   : > { %21875 = vst [vmem:[#allocation178_spill] sm:$0xff] %v19890_v4  ;;  %v19897_v55 = vadd.f32 %v14447_v24, %v7890_v28  ;;  %14737 = vmatprep.mubr.bf16.mxu1 %v21881_v34  ;;  %21887 = vst [vmem:[#allocation19_spill] sm:$0xff] %v19909_v38  ;;  %v21888_v34 = vld [vmem:[#allocation36_spill] sm:$0xff]  ;;  %v21893_v4 = vld [vmem:[#allocation125_spill] sm:$0xff] }
 0x8db   : > { %v8237_v10 = vpop.f32.mrf.mxu1  ;;  %v7889_v63 = vadd.f32 %v21889_v20, %v21888_v34 }
 0x8dc   : > { %21880 = vst [vmem:[#allocation87_spill] sm:$0xff] %v19897_v55  ;;  %v19905_v49 = vadd.f32 %v8237_v10, %v7888_v1  ;;  %v21890_v1 = vld [vmem:[#allocation197_spill] sm:$0xff] }
 0x8dd   : > { %v14448_v28 = vpop.f32.mrf.mxu1  ;;  %v7894_v10 = vadd.f32 %v21890_v1, %v19548_v52 }
 0x8de   : > { %21884 = vst [vmem:[#allocation181_spill] sm:$0xff] %v19905_v49  ;;  %v19911_v24 = vadd.f32 %v14448_v28, %v7891_v13  ;;  %v19919_v49 = vpop.f32.mrf.mxu0  ;;  %v7892_v13 = vadd.f32 %v21894_v46, %v19553_v40 }
 0x8df   : > { %v8240_v53 = vpop.f32.mrf.mxu1  ;;  %21891 = vst [vmem:[#allocation183_spill] sm:$0xff] %v19919_v49 }
 0x8e0   : > { %v19915_v55 = vadd.f32 %v8240_v53, %v7889_v63  ;;  %v21895_v53 = vld [vmem:[#allocation199_spill] sm:$0xff]  ;;  %v19931_v63 = vpop.f32.mrf.mxu0 }
 0x8e1   : > { %v14451_v2 = vpop.f32.mrf.mxu1  ;;  %14738 = vmatmul.mubr.bf16.gmra.mxu1 %v21892_v61  ;;  %v7895_v20 = vadd.f32 %v21895_v53, %v19559_v47  ;;  %21896 = vst [vmem:[#allocation185_spill] sm:$0xff] %v19931_v63  ;;  %v21897_v61 = vld [vmem:[#allocation200_spill] sm:$0xff]  ;;  %v21900_v53 = vld [vmem:[#allocation131_spill] sm:$0xff] }
 0x8e2   : > { %v19922_v38 = vadd.f32 %v14451_v2, %v7894_v10  ;;  %14741 = vmatprep.mubr.bf16.mxu1 %v21893_v4  ;;  %v7893_v10 = vadd.f32 %v21897_v61, %v19561_v33  ;;  %v21898_v4 = vld [vmem:[#allocation201_spill] sm:$0xff]  ;;  %v19941_v46 = vpop.f32.mrf.mxu0  ;;  %v21902_v61 = vld [vmem:[#allocation56_spill] sm:$0xff] }
 0x8e3   : > { %v8253_v28 = vpop.f32.mrf.mxu1  ;;  %v8696_v40 = vadd.f32 %v21898_v4, %v19568_v43 }
 0x8e4   : > { %v19927_v34 = vadd.f32 %v8253_v28, %v7892_v13  ;;  %v21899_v28 = vld [vmem:[#allocation130_spill] sm:$0xff] }
 0x8e5   : > { %v14452_v52 = vpop.f32.mrf.mxu1 }
 0x8e6   : > { %v19933_v1 = vadd.f32 %v14452_v52, %v7895_v20  ;;  %v21901_v20 = vld [vmem:[#allocation24_spill] sm:$0xff] }
 0x8e7   : > { %v8256_v2 = vpop.f32.mrf.mxu1  ;;  %v8694_v52 = vadd.f32 %v21901_v20, %v19573_v60 }
 0x8e8   : > { %v19937_v49 = vadd.f32 %v8256_v2, %v7893_v10  ;;  %v8697_v10 = vadd.f32 %v21902_v61, %v19579_v54  ;;  %v19953_v2 = vpop.f32.mrf.mxu0  ;;  %v21906_v61 = vld [vmem:[#allocation136_spill] sm:$0xff] }
 0x8e9   : > { %v14551_v13 = vpop.f32.mrf.mxu1  ;;  %14742 = vmatmul.mubr.bf16.gmra.mxu1 %v21899_v28  ;;  %v21903_v28 = vld [vmem:[#allocation202_spill] sm:$0xff] }
 0x8ea   : > { %v19944_v47 = vadd.f32 %v14551_v13, %v8696_v40  ;;  %14745 = vmatprep.mubr.bf16.mxu1 %v21900_v53  ;;  %v8695_v40 = vadd.f32 %v21903_v28, %v19583_v42  ;;  %v15093_v13 = vld [vmem:[%s20637_s6 + $0x8] sm:$0xff]   ;;  %v19966_v54 = vpop.f32.mrf.mxu0  ;;  %v21908_v42 = vld [vmem:[#allocation137_spill] sm:$0xff] }
 0x8eb   : > { %v8857_v63 = vpop.f32.mrf.mxu1  ;;  %14785 = vmatprep.subr.bf16.mxu0 %v15093_v13  ;;  %14859 = vmatprep.subr.bf16.mxu1 %v15093_v13 }
 0x8ec   : > { %v19949_v33 = vadd.f32 %v8857_v63, %v8694_v52  ;;  %v21905_v63 = vld [vmem:[#allocation101_spill] sm:$0xff]  ;;  %14786 = vmatpush3.bf16.msra.mxu0 %v15093_v13  ;;  %14867 = vmatpush3.bf16.msra.mxu1 %v15093_v13 }
 0x8ed   : > { %v14552_v43 = vpop.f32.mrf.mxu1  ;;  %v8700_v20 = vadd.f32 %v21905_v63, %v19590_v19  ;;  %v21911_v19 = vld [vmem:[#allocation62_spill] sm:$0xff] }
 0x8ee   : > { %v19955_v4 = vadd.f32 %v14552_v43, %v8697_v10  ;;  %v21909_v43 = vld [vmem:[#allocation26_spill] sm:$0xff]  ;;  %v8701_v63 = vadd.f32 %v21911_v19, %v19601_v39  ;;  %v21915_v19 = vld [vmem:[#allocation143_spill] sm:$0xff] }
 0x8ef   : > { %v8860_v53 = vpop.f32.mrf.mxu1  ;;  %v8698_v28 = vadd.f32 %v21909_v43, %v19595_v35  ;;  %v21914_v39 = vld [vmem:[#allocation206_spill] sm:$0xff] }
 0x8f0   : > { %v19962_v60 = vadd.f32 %v8860_v53, %v8695_v40  ;;  %v8704_v43 = vadd.f32 %v21914_v39, %v19612_v15 }
 0x8f1   : > { %v14555_v52 = vpop.f32.mrf.mxu1  ;;  %14746 = vmatmul.mubr.bf16.gmra.mxu1 %v21906_v61  ;;  %v19981_v61 = vpop.f32.mrf.mxu0 }
 0x8f2   : > { %21904 = vst [vmem:[#allocation225_spill] sm:$0xff] %v19962_v60  ;;  %v19969_v10 = vadd.f32 %v14555_v52, %v8700_v20  ;;  %14749 = vmatprep.mubr.bf16.mxu1 %v21908_v42  ;;  %v15094_v60 = vld [vmem:[%s20637_s6] sm:$0xff]   ;;  %v21913_v42 = vld [vmem:[#allocation203_spill] sm:$0xff] }
 0x8f3   : > { %v8873_v40 = vpop.f32.mrf.mxu1  ;;  %14787 = vmatprep.subr.bf16.mxu0 %v15094_v60  ;;  %14860 = vmatprep.subr.bf16.mxu1 %v15094_v60 }
 0x8f4   : > { %21907 = vst [vmem:[#allocation85_spill] sm:$0xff] %v19969_v10  ;;  %v19974_v53 = vadd.f32 %v8873_v40, %v8698_v28  ;;  %v8699_v10 = vadd.f32 %v21913_v42, %v19605_v16  ;;  %14788 = vmatpush3.bf16.msra.mxu0 %v15094_v60  ;;  %14868 = vmatpush3.bf16.msra.mxu1 %v15094_v60  ;;  %v19991_v28 = vpop.f32.mrf.mxu0  ;;  %v21918_v16 = vld [vmem:[#allocation208_spill] sm:$0xff]  ;;  %v21919_v60 = vld [vmem:[#allocation211_spill] sm:$0xff] }
 0x8f5   : > { %v14556_v20 = vpop.f32.mrf.mxu1  ;;  %v8702_v42 = vadd.f32 %v21918_v16, %v19617_v29 }
 0x8f6   : > { %21910 = vst [vmem:[#allocation226_spill] sm:$0xff] %v19974_v53  ;;  %v19983_v52 = vadd.f32 %v14556_v20, %v8701_v63  ;;  %v21917_v20 = vld [vmem:[#allocation144_spill] sm:$0xff] }
 0x8f7   : > { %v8876_v35 = vpop.f32.mrf.mxu1 }
 0x8f8   : > { %21912 = vst [vmem:[#allocation20_spill] sm:$0xff] %v19983_v52  ;;  %v19987_v13 = vadd.f32 %v8876_v35, %v8699_v10  ;;  %v8705_v10 = vadd.f32 %v21919_v60, %v19623_v8  ;;  %v20003_v35 = vpop.f32.mrf.mxu0  ;;  %v21925_v60 = vld [vmem:[#allocation150_spill] sm:$0xff] }
 0x8f9   : > { %v14559_v40 = vpop.f32.mrf.mxu1  ;;  %14750 = vmatmul.mubr.bf16.gmra.mxu1 %v21915_v19  ;;  %v21921_v19 = vld [vmem:[#allocation213_spill] sm:$0xff] }
 0x8fa   : > { %v19994_v63 = vadd.f32 %v14559_v40, %v8704_v43  ;;  %14753 = vmatprep.mubr.bf16.mxu1 %v21917_v20  ;;  %v8703_v43 = vadd.f32 %v21921_v19, %v19627_v0  ;;  %v21922_v20 = vld [vmem:[#allocation217_spill] sm:$0xff]  ;;  %v20013_v16 = vpop.f32.mrf.mxu0  ;;  %v21927_v19 = vld [vmem:[#allocation219_spill] sm:$0xff] }
 0x8fb   : > { %v8889_v52 = vpop.f32.mrf.mxu1  ;;  %v8708_v29 = vadd.f32 %v21922_v20, %v19634_v18 }
 0x8fc   : > { %21916 = vst [vmem:[#allocation187_spill] sm:$0xff] %v19994_v63  ;;  %v19999_v53 = vadd.f32 %v8889_v52, %v8702_v42  ;;  %v21923_v42 = vld [vmem:[#allocation149_spill] sm:$0xff] }
 0x8fd   : > { %v14560_v15 = vpop.f32.mrf.mxu1 }
 0x8fe   : > { %v20005_v39 = vadd.f32 %v14560_v15, %v8705_v10  ;;  %v21926_v10 = vld [vmem:[#allocation218_spill] sm:$0xff] }
 0x8ff   : > { %v8892_v40 = vpop.f32.mrf.mxu1  ;;  %v8706_v15 = vadd.f32 %v21926_v10, %v19639_v31 }
 0x900   : > { %21920 = vst [vmem:[#allocation227_spill] sm:$0xff] %v20005_v39  ;;  %v20009_v63 = vadd.f32 %v8892_v40, %v8703_v43  ;;  %v8709_v43 = vadd.f32 %v21927_v19, %v19645_v32  ;;  %v20025_v40 = vpop.f32.mrf.mxu0  ;;  %v21933_v19 = vld [vmem:[#allocation157_spill] sm:$0xff] }
 0x901   : > { %v14563_v52 = vpop.f32.mrf.mxu1  ;;  %14754 = vmatmul.mubr.bf16.gmra.mxu1 %v21923_v42  ;;  %v21929_v42 = vld [vmem:[#allocation69_spill] sm:$0xff] }
 0x902   : > { %v20016_v8 = vadd.f32 %v14563_v52, %v8708_v29  ;;  %14757 = vmatprep.mubr.bf16.mxu1 %v21925_v60  ;;  %v8707_v29 = vadd.f32 %v21929_v42, %v19649_v37  ;;  %v21931_v60 = vld [vmem:[#allocation110_spill] sm:$0xff]  ;;  %v20035_v10 = vpop.f32.mrf.mxu0 }
 0x903   : > { %v8905_v39 = vpop.f32.mrf.mxu1  ;;  %v8712_v31 = vadd.f32 %v21931_v60, %v19656_v56  ;;  %v21936_v42 = vld [vmem:[#allocation74_spill] sm:$0xff] }
 0x904   : > { %21924 = vst [vmem:[#allocation91_spill] sm:$0xff] %v20016_v8  ;;  %v20021_v0 = vadd.f32 %v8905_v39, %v8706_v15  ;;  %v21932_v15 = vld [vmem:[#allocation155_spill] sm:$0xff] }
 0x905   : > { %v14564_v18 = vpop.f32.mrf.mxu1 }
 0x906   : > { %v20027_v20 = vadd.f32 %v14564_v18, %v8709_v43  ;;  %v21934_v43 = vld [vmem:[#allocation4_spill] sm:$0xff] }
 0x907   : > { %v8908_v52 = vpop.f32.mrf.mxu1  ;;  %v8710_v18 = vadd.f32 %v21934_v43, %v19666_v44  ;;  %v21940_v44 = vld [vmem:[#allocation162_spill] sm:$0xff]  ;;  %v21941_v43 = vld [vmem:[#allocation164_spill] sm:$0xff] }
 0x908   : > { %21928 = vst [vmem:[#allocation88_spill] sm:$0xff] %v20027_v20  ;;  %v20031_v8 = vadd.f32 %v8908_v52, %v8707_v29  ;;  %v8713_v29 = vadd.f32 %v21936_v42, %v19675_v9  ;;  %v20047_v52 = vpop.f32.mrf.mxu0  ;;  %v21942_v9 = vld [vmem:[#allocation80_spill] sm:$0xff] }
 0x909   : > { %v14567_v39 = vpop.f32.mrf.mxu1  ;;  %14758 = vmatmul.mubr.bf16.gmra.mxu1 %v21932_v15 }
 0x90a   : > { %21930 = vst [vmem:[#allocation228_spill] sm:$0xff] %v20031_v8  ;;  %v20038_v32 = vadd.f32 %v14567_v39, %v8712_v31  ;;  %14761 = vmatprep.mubr.bf16.mxu1 %v21933_v19  ;;  %v21939_v31 = vld [vmem:[#allocation5_spill] sm:$0xff]  ;;  %v20055_v15 = vpop.f32.mrf.mxu0 }
 0x90b   : > { %v8921_v20 = vpop.f32.mrf.mxu1  ;;  %v8716_v39 = vadd.f32 %v21939_v31, %v19686_v25  ;;  %v9631_v31 = vrot.slane %v21799_v23, 1  ;;  %v21951_v23 = vld [vmem:[#allocation205_spill] sm:$0xff] }
 0x90c   : > { %v20043_v37 = vadd.f32 %v8921_v20, %v8710_v18  ;;  %v8714_v18 = vadd.f32 %v21942_v9, %v19691_v27  ;;  %v21948_v9 = vld [vmem:[#allocation169_spill] sm:$0xff] }
 0x90d   : > { %v14568_v56 = vpop.f32.mrf.mxu1 }
 0x90e   : > { %21935 = vst [vmem:[#allocation189_spill] sm:$0xff] %v20043_v37  ;;  %v20049_v60 = vadd.f32 %v14568_v56, %v8713_v29  ;;  %v21944_v56 = vld [vmem:[#allocation86_spill] sm:$0xff]  ;;  %v20067_v37 = vpop.f32.mrf.mxu0 }
 0x90f   : > { %v20051_v8 = vpop.f32.mrf.mxu1 }
 0x910   : > { %21937 = vst [vmem:[#allocation229_spill] sm:$0xff] %v20049_v60  ;;  %21938 = vst [vmem:[#allocation190_spill] sm:$0xff] %v20051_v8  ;;  %v8717_v60 = vadd.f32 %v21944_v56, %v19697_v30 }
 0x911   : > { %v14571_v19 = vpop.f32.mrf.mxu1  ;;  %14762 = vmatmul.mubr.bf16.gmra.mxu1 %v21940_v44 }
 0x912   : > { %v20058_v20 = vadd.f32 %v14571_v19, %v8716_v39  ;;  %14765 = vmatprep.mubr.bf16.mxu1 %v21941_v43  ;;  %v21947_v19 = vld [vmem:[#allocation7_spill] sm:$0xff]  ;;  %v20076_v43 = vpop.f32.mrf.mxu0 }
 0x913   : > { %v8937_v42 = vpop.f32.mrf.mxu1  ;;  %v8720_v44 = vadd.f32 %v21947_v19, %v19708_v62  ;;  %v21953_v62 = vld [vmem:[#allocation30_spill] sm:$0xff] }
 0x914   : > { %v20063_v29 = vadd.f32 %v8937_v42, %v8714_v18  ;;  %v21949_v18 = vrot.slane %v21792_v59, 1  ;;  %v8721_v19 = vadd.f32 %v21953_v62, %v19722_v22  ;;  %v21958_v62 = vld [vmem:[#allocation63_spill] sm:$0xff] }
 0x915   : > { %v14572_v25 = vpop.f32.mrf.mxu1 }
 0x916   : > { %21943 = vst [vmem:[#allocation230_spill] sm:$0xff] %v20063_v29  ;;  %v20070_v8 = vadd.f32 %v14572_v25, %v8717_v60  ;;  %v9632_v30 = vsel %vm1794_vm2, %v21949_v18, %v9631_v31  ;;  %v8718_v60 = vadd.f32 %v21951_v23, %v19716_v51  ;;  %v21952_v25 = vld [vmem:[#allocation215_spill] sm:$0xff]  ;;  %v21956_v51 = vld [vmem:[#allocation148_spill] sm:$0xff]  ;;  %v21957_v23 = vld [vmem:[#allocation210_spill] sm:$0xff] }
 0x917   : > { %v20072_v39 = vpop.f32.mrf.mxu1 }
 0x918   : > { %21945 = vst [vmem:[#allocation22_spill] sm:$0xff] %v20070_v8  ;;  %21946 = vst [vmem:[#allocation97_spill] sm:$0xff] %v20072_v39  ;;  %v9633_v8 = vrot.slane %v21952_v25, 1  ;;  %v20091_v39 = vpop.f32.mrf.mxu0 }
 0x919   : > { %v14575_v27 = vpop.f32.mrf.mxu1  ;;  %14766 = vmatmul.mubr.bf16.gmra.mxu1 %v21948_v9 }
 0x91a   : > { %v20082_v42 = vadd.f32 %v14575_v27, %v8720_v44  ;;  %14769 = vmatprep.mubr.bf16.mxu1 %v9632_v30  ;;  %v21955_v44 = vld [vmem:[#allocation11_spill] sm:$0xff] }
 0x91b   : > { %v8953_v56 = vpop.f32.mrf.mxu1  ;;  %v8719_v27 = vadd.f32 %v21955_v44, %v19726_v58  ;;  %v21960_v58 = vld [vmem:[#allocation16_spill] sm:$0xff] }
 0x91c   : > { %21950 = vst [vmem:[#allocation231_spill] sm:$0xff] %v20082_v42  ;;  %v20087_v29 = vadd.f32 %v8953_v56, %v8718_v60  ;;  %v8724_v42 = vadd.f32 %v21957_v23, %v21956_v51  ;;  %v9634_v60 = vsel %vm1794_vm2, %v9631_v31, %v9633_v8  ;;  %v20102_v56 = vpop.f32.mrf.mxu0  ;;  %v8725_v44 = vadd.f32 %v21960_v58, %v19744_v21  ;;  %v21962_v8 = vld [vmem:[#allocation113_spill] sm:$0xff]  ;;  %v21966_v21 = vld [vmem:[#allocation115_spill] sm:$0xff] }
 0x91d   : > { %v14576_v9 = vpop.f32.mrf.mxu1  ;;  %v8723_v31 = vadd.f32 %v21962_v8, %v19748_v17 }
 0x91e   : > { %v20093_v59 = vadd.f32 %v14576_v9, %v8721_v19  ;;  %v8722_v19 = vadd.f32 %v21958_v62, %v19738_v12 }
 0x91f   : > { %v8956_v18 = vpop.f32.mrf.mxu1 }
 0x920   : > { %21954 = vst [vmem:[#allocation32_spill] sm:$0xff] %v20093_v59  ;;  %v20097_v30 = vadd.f32 %v8956_v18, %v8719_v27  ;;  %v20112_v27 = vpop.f32.mrf.mxu0 }
 0x921   : > { %v14579_v25 = vpop.f32.mrf.mxu1  ;;  %14770 = vmatmul.mubr.bf16.gmra.mxu1 %v9634_v60  ;;  %v21964_v60 = vld [vmem:[#allocation216_spill] sm:$0xff] }
 0x922   : > { %v20104_v22 = vadd.f32 %v14579_v25, %v8724_v42  ;;  %v8728_v12 = vadd.f32 %v21964_v60, %v19755_v36  ;;  %v20122_v25 = vpop.f32.mrf.mxu0  ;;  %v21970_v36 = vld [vmem:[#allocation120_spill] sm:$0xff] }
 0x923   : > { %v8969_v9 = vpop.f32.mrf.mxu1  ;;  %v8727_v60 = vadd.f32 %v21970_v36, %v19774_v3 }
 0x924   : > { %v20108_v59 = vadd.f32 %v8969_v9, %v8722_v19  ;;  %v8726_v9 = vadd.f32 %v21966_v21, %v19764_v50  ;;  %v20132_v8 = vpop.f32.mrf.mxu0 }
 0x925   : > { %v14580_v18 = vpop.f32.mrf.mxu1 }
 0x926   : > { %21959 = vst [vmem:[#allocation193_spill] sm:$0xff] %v20108_v59  ;;  %v20114_v51 = vadd.f32 %v14580_v18, %v8725_v44  ;;  %v21968_v18 = vld [vmem:[#allocation37_spill] sm:$0xff]  ;;  %v20142_v21 = vpop.f32.mrf.mxu0 }
 0x927   : > { %v8972_v23 = vpop.f32.mrf.mxu1  ;;  %v8729_v17 = vadd.f32 %v21968_v18, %v19770_v14  ;;  %v21974_v14 = vld [vmem:[#allocation123_spill] sm:$0xff] }
 0x928   : > { %21961 = vst [vmem:[#allocation232_spill] sm:$0xff] %v20114_v51  ;;  %v20118_v42 = vadd.f32 %v8972_v23, %v8723_v31  ;;  %v8730_v18 = vadd.f32 %v21974_v14, %v19786_v26  ;;  %v20152_v36 = vpop.f32.mrf.mxu0 }
 0x929   : > { %v14583_v62 = vpop.f32.mrf.mxu1 }
 0x92a   : > { %21963 = vst [vmem:[#allocation38_spill] sm:$0xff] %v20118_v42  ;;  %v20124_v19 = vadd.f32 %v14583_v62, %v8728_v12  ;;  %v21972_v62 = vld [vmem:[#allocation214_spill] sm:$0xff]  ;;  %v20162_v14 = vpop.f32.mrf.mxu0 }
 0x92b   : > { %v8985_v58 = vpop.f32.mrf.mxu1  ;;  %v8732_v50 = vadd.f32 %v21972_v62, %v19781_v7  ;;  %v21978_v7 = vld [vmem:[#allocation128_spill] sm:$0xff] }
 0x92c   : > { %21965 = vst [vmem:[#allocation233_spill] sm:$0xff] %v20124_v19  ;;  %v20128_v44 = vadd.f32 %v8985_v58, %v8726_v9  ;;  %v8731_v62 = vadd.f32 %v21978_v7, %v19796_v57  ;;  %v20172_v7 = vpop.f32.mrf.mxu0 }
 0x92d   : > { %v14584_v31 = vpop.f32.mrf.mxu1 }
 0x92e   : > { %21967 = vst [vmem:[#allocation194_spill] sm:$0xff] %v20128_v44  ;;  %v20134_v23 = vadd.f32 %v14584_v31, %v8729_v17  ;;  %v21976_v31 = vld [vmem:[#allocation127_spill] sm:$0xff] }
 0x92f   : > { %v8988_v42 = vpop.f32.mrf.mxu1  ;;  %v8733_v3 = vadd.f32 %v21976_v31, %v19792_v48  ;;  %v21982_v48 = vld [vmem:[#allocation70_spill] sm:$0xff] }
 0x930   : > { %21969 = vst [vmem:[#allocation234_spill] sm:$0xff] %v20134_v23  ;;  %v20138_v12 = vadd.f32 %v8988_v42, %v8727_v60  ;;  %v8734_v31 = vadd.f32 %v21982_v48, %v19811_v45  ;;  %v20182_v48 = vpop.f32.mrf.mxu0 }
 0x931   : > { %v14587_v9 = vpop.f32.mrf.mxu1 }
 0x932   : > { %21971 = vst [vmem:[#allocation35_spill] sm:$0xff] %v20138_v12  ;;  %v20144_v58 = vadd.f32 %v14587_v9, %v8732_v50  ;;  %v21980_v9 = vld [vmem:[#allocation132_spill] sm:$0xff] }
 0x933   : > { %v9001_v44 = vpop.f32.mrf.mxu1  ;;  %v8736_v26 = vadd.f32 %v21980_v9, %v19803_v6  ;;  %v21986_v6 = vld [vmem:[#allocation17_spill] sm:$0xff]  ;;  %v21987_v9 = vld [vmem:[#allocation140_spill] sm:$0xff] }
 0x934   : > { %21973 = vst [vmem:[#allocation196_spill] sm:$0xff] %v20144_v58  ;;  %v20148_v17 = vadd.f32 %v9001_v44, %v8730_v18 }
 0x935   : > { %v14588_v42 = vpop.f32.mrf.mxu1 }
 0x936   : > { %21975 = vst [vmem:[#allocation235_spill] sm:$0xff] %v20148_v17  ;;  %v20154_v60 = vadd.f32 %v14588_v42, %v8733_v3  ;;  %v21984_v42 = vld [vmem:[#allocation138_spill] sm:$0xff] }
 0x937   : > { %v9004_v12 = vpop.f32.mrf.mxu1  ;;  %v8737_v57 = vadd.f32 %v21984_v42, %v19817_v11  ;;  %v21992_v11 = vld [vmem:[#allocation82_spill] sm:$0xff]  ;;  %v21993_v42 = vld [vmem:[#allocation73_spill] sm:$0xff] }
 0x938   : > { %21977 = vst [vmem:[#allocation41_spill] sm:$0xff] %v20154_v60  ;;  %v20158_v50 = vadd.f32 %v9004_v12, %v8731_v62 }
 0x939   : > { %v14591_v44 = vpop.f32.mrf.mxu1 }
 0x93a   : > { %21979 = vst [vmem:[#allocation44_spill] sm:$0xff] %v20158_v50  ;;  %v20164_v18 = vadd.f32 %v14591_v44, %v8736_v26  ;;  %v8735_v50 = vadd.f32 %v21987_v9, %v21986_v6  ;;  %v21989_v44 = vld [vmem:[#allocation166_spill] sm:$0xff]  ;;  %v20192_v9 = vpop.f32.mrf.mxu0 }
 0x93b   : > { %v9017_v17 = vpop.f32.mrf.mxu1 }
 0x93c   : > { %21981 = vst [vmem:[#allocation236_spill] sm:$0xff] %v20164_v18  ;;  %v20168_v3 = vadd.f32 %v9017_v17, %v8734_v31  ;;  %v21990_v18 = vld [vmem:[#allocation142_spill] sm:$0xff] }
 0x93d   : > { %v14592_v12 = vpop.f32.mrf.mxu1  ;;  %v8740_v45 = vadd.f32 %v21990_v18, %v21989_v44  ;;  %v21998_v18 = vld [vmem:[#allocation220_spill] sm:$0xff]  ;;  %v21999_v44 = vld [vmem:[#allocation151_spill] sm:$0xff] }
 0x93e   : > { %21983 = vst [vmem:[#allocation198_spill] sm:$0xff] %v20168_v3  ;;  %v20174_v62 = vadd.f32 %v14592_v12, %v8737_v57  ;;  %v8738_v3 = vadd.f32 %v21993_v42, %v21992_v11  ;;  %v21995_v12 = vld [vmem:[#allocation171_spill] sm:$0xff]  ;;  %v20202_v42 = vpop.f32.mrf.mxu0 }
 0x93f   : > { %v9020_v60 = vpop.f32.mrf.mxu1 }
 0x940   : > { %21985 = vst [vmem:[#allocation237_spill] sm:$0xff] %v20174_v62  ;;  %v20178_v26 = vadd.f32 %v9020_v60, %v8735_v50  ;;  %v21996_v62 = vld [vmem:[#allocation146_spill] sm:$0xff] }
 0x941   : > { %v14595_v17 = vpop.f32.mrf.mxu1  ;;  %v8741_v6 = vadd.f32 %v21996_v62, %v21995_v12  ;;  %v22004_v62 = vld [vmem:[#allocation84_spill] sm:$0xff]  ;;  %v22005_v12 = vld [vmem:[#allocation154_spill] sm:$0xff] }
 0x942   : > { %21988 = vst [vmem:[#allocation96_spill] sm:$0xff] %v20178_v26  ;;  %v20184_v31 = vadd.f32 %v14595_v17, %v8740_v45  ;;  %v8739_v26 = vadd.f32 %v21999_v44, %v21998_v18  ;;  %v22001_v17 = vld [vmem:[#allocation221_spill] sm:$0xff]  ;;  %v20212_v44 = vpop.f32.mrf.mxu0 }
 0x943   : > { %v9033_v58 = vpop.f32.mrf.mxu1 }
 0x944   : > { %21991 = vst [vmem:[#allocation47_spill] sm:$0xff] %v20184_v31  ;;  %v20188_v57 = vadd.f32 %v9033_v58, %v8738_v3  ;;  %v22002_v31 = vld [vmem:[#allocation76_spill] sm:$0xff] }
 0x945   : > { %v14596_v60 = vpop.f32.mrf.mxu1  ;;  %v8744_v11 = vadd.f32 %v22002_v31, %v22001_v17  ;;  %v22010_v31 = vld [vmem:[#allocation18_spill] sm:$0xff] }
 0x946   : > { %21994 = vst [vmem:[#allocation53_spill] sm:$0xff] %v20188_v57  ;;  %v20194_v50 = vadd.f32 %v14596_v60, %v8741_v6  ;;  %v8742_v57 = vadd.f32 %v22005_v12, %v22004_v62  ;;  %v22007_v60 = vld [vmem:[#allocation222_spill] sm:$0xff]  ;;  %v20222_v12 = vpop.f32.mrf.mxu0 }
 0x947   : > { %v9036_v23 = vpop.f32.mrf.mxu1  ;;  %v22011_v17 = vld [vmem:[#allocation158_spill] sm:$0xff] }
 0x948   : > { %21997 = vst [vmem:[#allocation98_spill] sm:$0xff] %v20194_v50  ;;  %v20198_v45 = vadd.f32 %v9036_v23, %v8739_v26  ;;  %v22008_v50 = vld [vmem:[#allocation79_spill] sm:$0xff] }
 0x949   : > { %v14599_v58 = vpop.f32.mrf.mxu1  ;;  %v8745_v18 = vadd.f32 %v22008_v50, %v22007_v60  ;;  %v22016_v50 = vld [vmem:[#allocation161_spill] sm:$0xff] }
 0x94a   : > { %22000 = vst [vmem:[#allocation100_spill] sm:$0xff] %v20198_v45  ;;  %v20204_v3 = vadd.f32 %v14599_v58, %v8744_v11  ;;  %v8743_v45 = vadd.f32 %v22011_v17, %v22010_v31  ;;  %v22013_v58 = vld [vmem:[#allocation177_spill] sm:$0xff]  ;;  %v8746_v60 = vadd.f32 %v22016_v50, %v19880_v5  ;;  %v20232_v17 = vpop.f32.mrf.mxu0 }
 0x94b   : > { %v9049_v19 = vpop.f32.mrf.mxu1 }
 0x94c   : > { %22003 = vst [vmem:[#allocation102_spill] sm:$0xff] %v20204_v3  ;;  %v20208_v6 = vadd.f32 %v9049_v19, %v8742_v57  ;;  %v22014_v3 = vld [vmem:[#allocation160_spill] sm:$0xff]  ;;  %v20242_v50 = vpop.f32.mrf.mxu0 }
 0x94d   : > { %v14600_v23 = vpop.f32.mrf.mxu1  ;;  %v8748_v62 = vadd.f32 %v22014_v3, %v22013_v58  ;;  %v22019_v3 = vld [vmem:[#allocation178_spill] sm:$0xff]  ;;  %v22020_v58 = vld [vmem:[#allocation168_spill] sm:$0xff] }
 0x94e   : > { %22006 = vst [vmem:[#allocation107_spill] sm:$0xff] %v20208_v6  ;;  %v20214_v26 = vadd.f32 %v14600_v23, %v8745_v18  ;;  %v22018_v23 = vld [vmem:[#allocation81_spill] sm:$0xff] }
 0x94f   : > { %v9052_v51 = vpop.f32.mrf.mxu1  ;;  %v8749_v31 = vadd.f32 %v22018_v23, %v19886_v41  ;;  %v22025_v41 = vld [vmem:[#allocation181_spill] sm:$0xff]  ;;  %v22026_v23 = vld [vmem:[#allocation75_spill] sm:$0xff] }
 0x950   : > { %22009 = vst [vmem:[#allocation99_spill] sm:$0xff] %v20214_v26  ;;  %v20218_v11 = vadd.f32 %v9052_v51, %v8743_v45 }
 0x951   : > { %v14603_v19 = vpop.f32.mrf.mxu1 }
 0x952   : > { %22012 = vst [vmem:[#allocation25_spill] sm:$0xff] %v20218_v11  ;;  %v20224_v57 = vadd.f32 %v14603_v19, %v8748_v62  ;;  %v8747_v11 = vadd.f32 %v22020_v58, %v22019_v3  ;;  %v22022_v19 = vld [vmem:[#allocation87_spill] sm:$0xff]  ;;  %v20252_v58 = vpop.f32.mrf.mxu0 }
 0x953   : > { %v9065_v6 = vpop.f32.mrf.mxu1 }
 0x954   : > { %22015 = vst [vmem:[#allocation109_spill] sm:$0xff] %v20224_v57  ;;  %v20228_v18 = vadd.f32 %v9065_v6, %v8746_v60  ;;  %v22023_v57 = vld [vmem:[#allocation172_spill] sm:$0xff] }
 0x955   : > { %v14604_v51 = vpop.f32.mrf.mxu1  ;;  %v8752_v5 = vadd.f32 %v22023_v57, %v22022_v19  ;;  %v22030_v57 = vld [vmem:[#allocation223_spill] sm:$0xff] }
 0x956   : > { %22017 = vst [vmem:[#allocation42_spill] sm:$0xff] %v20228_v18  ;;  %v20234_v45 = vadd.f32 %v14604_v51, %v8749_v31  ;;  %v8750_v18 = vadd.f32 %v22026_v23, %v22025_v41  ;;  %v22028_v51 = vld [vmem:[#allocation175_spill] sm:$0xff]  ;;  %v8751_v19 = vadd.f32 %v22030_v57, %v19915_v55  ;;  %v20262_v23 = vpop.f32.mrf.mxu0 }
 0x957   : > { %v9068_v26 = vpop.f32.mrf.mxu1  ;;  %v8753_v3 = vadd.f32 %v22028_v51, %v19911_v24  ;;  %v22034_v24 = vld [vmem:[#allocation19_spill] sm:$0xff] }
 0x958   : > { %v20238_v62 = vadd.f32 %v9068_v26, %v8747_v11  ;;  %v8754_v51 = vadd.f32 %v22034_v24, %v19927_v34  ;;  %v20272_v57 = vpop.f32.mrf.mxu0  ;;  %v9550_v34 = vadd.f32 %v19941_v46, %v19944_v47 }
 0x959   : > { %v14607_v6 = vpop.f32.mrf.mxu1 }
 0x95a   : > { %22021 = vst [vmem:[#allocation93_spill] sm:$0xff] %v20238_v62  ;;  %v20244_v60 = vadd.f32 %v14607_v6, %v8752_v5  ;;  %v22032_v6 = vld [vmem:[#allocation224_spill] sm:$0xff] }
 0x95b   : > { %v9081_v59 = vpop.f32.mrf.mxu1  ;;  %v8756_v41 = vadd.f32 %v22032_v6, %v19922_v38  ;;  %v22038_v38 = vld [vmem:[#allocation185_spill] sm:$0xff] }
 0x95c   : > { %22024 = vst [vmem:[#allocation45_spill] sm:$0xff] %v20244_v60  ;;  %v20248_v31 = vadd.f32 %v9081_v59, %v8750_v18  ;;  %v8755_v6 = vadd.f32 %v22038_v38, %v19937_v49  ;;  %v22040_v38 = vld [vmem:[#allocation225_spill] sm:$0xff] }
 0x95d   : > { %v14608_v26 = vpop.f32.mrf.mxu1 }
 0x95e   : > { %22027 = vst [vmem:[#allocation59_spill] sm:$0xff] %v20248_v31  ;;  %v20254_v11 = vadd.f32 %v14608_v26, %v8753_v3  ;;  %v22036_v26 = vld [vmem:[#allocation183_spill] sm:$0xff] }
 0x95f   : > { %v9084_v62 = vpop.f32.mrf.mxu1  ;;  %v8757_v55 = vadd.f32 %v22036_v26, %v19933_v1  ;;  %v9548_v1 = vadd.f32 %v19953_v2, %v19949_v33 }
 0x960   : > { %22029 = vst [vmem:[#allocation103_spill] sm:$0xff] %v20254_v11  ;;  %v20258_v5 = vadd.f32 %v9084_v62, %v8751_v19 }
 0x961   : > { %v14611_v59 = vpop.f32.mrf.mxu1 }
 0x962   : > { %22031 = vst [vmem:[#allocation95_spill] sm:$0xff] %v20258_v5  ;;  %v20264_v18 = vadd.f32 %v14611_v59, %v8756_v41  ;;  %v20282_v59 = vpop.f32.mrf.mxu0 }
 0x963   : > { %v9097_v31 = vpop.f32.mrf.mxu1 }
 0x964   : > { %22033 = vst [vmem:[#allocation9_spill] sm:$0xff] %v20264_v18  ;;  %v20268_v3 = vadd.f32 %v9097_v31, %v8754_v51  ;;  %v20289_v51 = vld [vmem:[%s20636_s5] ss:$0 sm:$0xff] }
 0x965   : > { %v14612_v62 = vpop.f32.mrf.mxu1 }
 0x966   : > { %22035 = vst [vmem:[#allocation49_spill] sm:$0xff] %v20268_v3  ;;  %v20274_v19 = vadd.f32 %v14612_v62, %v8757_v55  ;;  %v20293_v55 = vpop.f32.mrf.mxu0  ;;  %v22043_v3 = vld [vmem:[#allocation20_spill] sm:$0xff] }
 0x967   : > { %v9100_v5 = vpop.f32.mrf.mxu1 }
 0x968   : > { %22037 = vst [vmem:[#allocation52_spill] sm:$0xff] %v20274_v19  ;;  %v20278_v41 = vadd.f32 %v9100_v5, %v8755_v6  ;;  %v9551_v5 = vadd.f32 %v19966_v54, %v19955_v4  ;;  %v9549_v6 = vadd.f32 %v19981_v61, %v22040_v38  ;;  %v22042_v54 = vld [vmem:[#allocation226_spill] sm:$0xff] }
 0x969   : > { %v14711_v31 = vpop.f32.mrf.mxu1  ;;  %v9552_v19 = vadd.f32 %v20003_v35, %v22042_v54  ;;  %v9553_v35 = vadd.f32 %v20025_v40, %v19987_v13  ;;  %v9556_v54 = vadd.f32 %v20047_v52, %v19999_v53  ;;  %v9557_v53 = vadd.f32 %v20067_v37, %v20009_v63 }
 0x96a   : > { %22039 = vst [vmem:[#allocation27_spill] sm:$0xff] %v20278_v41  ;;  %v9976_v24 = vadd.f32 %v14711_v31, %v9550_v34  ;;  %v22041_v41 = vld [vmem:[#allocation85_spill] sm:$0xff] }
 0x96b   : > { %v9719_v26 = vpop.f32.mrf.mxu1 }
 0x96c   : > { %v9974_v49 = vadd.f32 %v9719_v26, %v9548_v1  ;;  %v10047_v47 = vadd.f32 %v20289_v51, %v9976_v24  ;;  %v9554_v1 = vadd.f32 %v19991_v28, %v22041_v41  ;;  %v20302_v26 = vpop.f32.mrf.mxu0 }
 0x96d   : > { %v14712_v46 = vpop.f32.mrf.mxu1 }
 0x96e   : > { %v9977_v62 = vadd.f32 %v14712_v46, %v9551_v5  ;;  %v10045_v2 = vadd.f32 %v20289_v51, %v9974_v49  ;;  %v10111_v24 = vmax.f32 %v10047_v47, 0.0  ;;  %v9555_v49 = vadd.f32 %v20013_v16, %v22043_v3  ;;  %v20309_v28 = vpop.f32.mrf.mxu0  ;;  %v22044_v3 = vld [vmem:[#allocation187_spill] sm:$0xff] }
 0x96f   : > { %v9722_v33 = vpop.f32.mrf.mxu1 }
 0x970   : > { %v10048_v34 = vadd.f32 %v20289_v51, %v9977_v62  ;;  %v9975_v31 = vadd.f32 %v9722_v33, %v9549_v6  ;;  %v10109_v62 = vmax.f32 %v10045_v2, 0.0  ;;  %v20318_v2 = vpop.f32.mrf.mxu0 }
 0x971   : > { %v14715_v4 = vpop.f32.mrf.mxu1 }
 0x972   : > { %v10112_v5 = vmax.f32 %v10048_v34, 0.0  ;;  %v10046_v46 = vadd.f32 %v20289_v51, %v9975_v31  ;;  %v9980_v61 = vadd.f32 %v14715_v4, %v9554_v1 }
 0x973   : > { %v9735_v38 = vpop.f32.mrf.mxu1 }
 0x974   : > { %v10174_v6 = vpack.c.bf16 %v10112_v5, %v10111_v24  ;;  %v10110_v33 = vmax.f32 %v10046_v46, 0.0  ;;  %v9978_v18 = vadd.f32 %v9735_v38, %v9552_v19  ;;  %v10051_v11 = vadd.f32 %v20289_v51, %v9980_v61  ;;  %v22045_v46 = vld [vmem:[#allocation227_spill] sm:$0xff] }
 0x975   : > { %v14716_v41 = vpop.f32.mrf.mxu1  ;;  %v9558_v19 = vadd.f32 %v20035_v10, %v22044_v3  ;;  %v9560_v3 = vadd.f32 %v20091_v39, %v20021_v0  ;;  %v22048_v0 = vld [vmem:[#allocation228_spill] sm:$0xff] }
 0x976   : > { %v9981_v60 = vadd.f32 %v14716_v41, %v9555_v49  ;;  %v10173_v47 = vpack.c.bf16 %v10110_v33, %v10109_v62  ;;  %v10049_v31 = vadd.f32 %v20289_v51, %v9978_v18  ;;  %v10115_v24 = vmax.f32 %v10051_v11, 0.0  ;;  %v20325_v62 = vpop.f32.mrf.mxu0 }
 0x977   : > { %v9738_v34 = vpop.f32.mrf.mxu1  ;;  %v9561_v39 = vadd.f32 %v20112_v27, %v22048_v0  ;;  %v22052_v27 = vld [vmem:[#allocation189_spill] sm:$0xff] }
 0x978   : > { %v10052_v1 = vadd.f32 %v20289_v51, %v9981_v60  ;;  %v9979_v16 = vadd.f32 %v9738_v34, %v9553_v35  ;;  %14789 = vmatprep.mubr.bf16.mxu0 %v10173_v47  ;;  %v9559_v60 = vadd.f32 %v20055_v15, %v22045_v46  ;;  %v10113_v61 = vmax.f32 %v10049_v31, 0.0  ;;  %v22046_v34 = vld [vmem:[#allocation91_spill] sm:$0xff] }
 0x979   : > { %v14719_v4 = vpop.f32.mrf.mxu1  ;;  %14790 = vmatmul.mubr.bf16.vlgmr.msra.gmra.mxu0 %v10174_v6  ;;  %v9562_v31 = vadd.f32 %v20076_v43, %v22046_v34 }
 0x97a   : > { %v10116_v13 = vmax.f32 %v10052_v1, 0.0  ;;  %v10050_v40 = vadd.f32 %v20289_v51, %v9979_v16  ;;  %v9984_v5 = vadd.f32 %v14719_v4, %v9558_v19  ;;  %v20334_v1 = vpop.f32.mrf.mxu0 }
 0x97b   : > { %v9751_v18 = vpop.f32.mrf.mxu1 }
 0x97c   : > { %v10176_v38 = vpack.c.bf16 %v10116_v13, %v10115_v24  ;;  %v10114_v49 = vmax.f32 %v10050_v40, 0.0  ;;  %v9982_v10 = vadd.f32 %v9751_v18, %v9556_v54  ;;  %v10055_v6 = vadd.f32 %v20289_v51, %v9984_v5  ;;  %v22047_v24 = vld [vmem:[#allocation88_spill] sm:$0xff]  ;;  %v20341_v46 = vpop.f32.mrf.mxu0 }
 0x97d   : > { %v14720_v33 = vpop.f32.mrf.mxu1  ;;  %v9563_v13 = vadd.f32 %v20102_v56, %v22047_v24 }
 0x97e   : > { %v9985_v41 = vadd.f32 %v14720_v33, %v9559_v60  ;;  %v10175_v52 = vpack.c.bf16 %v10114_v49, %v10113_v61  ;;  %v10053_v35 = vadd.f32 %v20289_v51, %v9982_v10  ;;  %v10119_v19 = vmax.f32 %v10055_v6, 0.0  ;;  %v22049_v10 = vld [vmem:[#allocation134_spill] sm:$0xff]  ;;  %v22050_v33 = vld [vmem:[#allocation77_spill] sm:$0xff] }
 0x97f   : > { %v9754_v11 = vpop.f32.mrf.mxu1  ;;  %v8711_v6 = vadd.f32 %v22050_v33, %v22049_v10  ;;  %v9570_v33 = vadd.f32 %v20162_v14, %v20058_v20 }
 0x980   : > { %v10056_v47 = vadd.f32 %v20289_v51, %v9985_v41  ;;  %v9983_v15 = vadd.f32 %v9754_v11, %v9557_v53  ;;  %14793 = vmatprep.mubr.bf16.mxu0 %v10175_v52  ;;  %v10117_v40 = vmax.f32 %v10053_v35, 0.0  ;;  %v9566_v11 = vadd.f32 %v20122_v25, %v20038_v32  ;;  %v20352_v35 = vpop.f32.mrf.mxu0 }
 0x981   : > { %v14723_v16 = vpop.f32.mrf.mxu1  ;;  %14794 = vmatmul.mubr.bf16.gmra.mxu0 %v10176_v38 }
 0x982   : > { %v10120_v63 = vmax.f32 %v10056_v47, 0.0  ;;  %v10054_v37 = vadd.f32 %v20289_v51, %v9983_v15  ;;  %v9988_v4 = vadd.f32 %v14723_v16, %v9562_v31  ;;  %v22051_v47 = vld [vmem:[#allocation190_spill] sm:$0xff]  ;;  %v9564_v31 = vadd.f32 %v20132_v8, %v22052_v27 }
 0x983   : > { %v9767_v54 = vpop.f32.mrf.mxu1  ;;  %v9129_v15 = vadd.f32 %v22051_v47, %v8711_v6 }
 0x984   : > { %v10178_v5 = vpack.c.bf16 %v10120_v63, %v10119_v19  ;;  %v10118_v18 = vmax.f32 %v10054_v37, 0.0  ;;  %v9986_v43 = vadd.f32 %v9767_v54, %v9560_v3  ;;  %v10059_v61 = vadd.f32 %v20289_v51, %v9988_v4  ;;  %v22053_v4 = vld [vmem:[#allocation229_spill] sm:$0xff] }
 0x985   : > { %v14724_v60 = vpop.f32.mrf.mxu1  ;;  %v9567_v54 = vadd.f32 %v20142_v21, %v22053_v4  ;;  %v9565_v8 = vadd.f32 %v20152_v36, %v9129_v15  ;;  %v22057_v36 = vld [vmem:[#allocation230_spill] sm:$0xff] }
 0x986   : > { %v9989_v38 = vadd.f32 %v14724_v60, %v9563_v13  ;;  %v10177_v49 = vpack.c.bf16 %v10118_v18, %v10117_v40  ;;  %v10057_v56 = vadd.f32 %v20289_v51, %v9986_v43  ;;  %v10123_v16 = vmax.f32 %v10059_v61, 0.0  ;;  %v20360_v40 = vpop.f32.mrf.mxu0  ;;  %v22054_v61 = vld [vmem:[#allocation72_spill] sm:$0xff] }
 0x987   : > { %v9770_v41 = vpop.f32.mrf.mxu1 }
 0x988   : > { %v10060_v53 = vadd.f32 %v20289_v51, %v9989_v38  ;;  %v9987_v52 = vadd.f32 %v9770_v41, %v9561_v39  ;;  %14797 = vmatprep.mubr.bf16.mxu0 %v10177_v49  ;;  %v10121_v24 = vmax.f32 %v10057_v56, 0.0  ;;  %v22055_v38 = vld [vmem:[#allocation89_spill] sm:$0xff]  ;;  %v20370_v6 = vpop.f32.mrf.mxu0 }
 0x989   : > { %v14727_v34 = vpop.f32.mrf.mxu1  ;;  %14798 = vmatmul.mubr.bf16.gmra.mxu0 %v10178_v5  ;;  %v8715_v0 = vadd.f32 %v22055_v38, %v22054_v61  ;;  %v22056_v41 = vld [vmem:[#allocation97_spill] sm:$0xff] }
 0x98a   : > { %v10124_v3 = vmax.f32 %v10060_v53, 0.0  ;;  %v10058_v19 = vadd.f32 %v20289_v51, %v9987_v52  ;;  %v9992_v63 = vadd.f32 %v14727_v34, %v9566_v11  ;;  %v9568_v52 = vadd.f32 %v20172_v7, %v22057_v36 }
 0x98b   : > { %v9783_v37 = vpop.f32.mrf.mxu1  ;;  %v9133_v56 = vadd.f32 %v22056_v41, %v8715_v0 }
 0x98c   : > { %v10180_v32 = vpack.c.bf16 %v10124_v3, %v10123_v16  ;;  %v10122_v25 = vmax.f32 %v10058_v19, 0.0  ;;  %v9990_v13 = vadd.f32 %v9783_v37, %v9564_v31  ;;  %v10063_v5 = vadd.f32 %v20289_v51, %v9992_v63  ;;  %v22058_v31 = vld [vmem:[#allocation22_spill] sm:$0xff]  ;;  %v20378_v63 = vpop.f32.mrf.mxu0 }
 0x98d   : > { %v14728_v18 = vpop.f32.mrf.mxu1  ;;  %v9571_v16 = vadd.f32 %v20182_v48, %v22058_v31  ;;  %v9569_v7 = vadd.f32 %v20192_v9, %v9133_v56  ;;  %v22059_v48 = vld [vmem:[#allocation231_spill] sm:$0xff] }
 0x98e   : > { %v9993_v43 = vadd.f32 %v14728_v18, %v9567_v54  ;;  %v10179_v60 = vpack.c.bf16 %v10122_v25, %v10121_v24  ;;  %v10061_v49 = vadd.f32 %v20289_v51, %v9990_v13  ;;  %v10127_v11 = vmax.f32 %v10063_v5, 0.0 }
 0x98f   : > { %v9786_v39 = vpop.f32.mrf.mxu1  ;;  %v9574_v5 = vadd.f32 %v20202_v42, %v22059_v48 }
 0x990   : > { %v10064_v21 = vadd.f32 %v20289_v51, %v9993_v43  ;;  %v9991_v10 = vadd.f32 %v9786_v39, %v9565_v8  ;;  %14801 = vmatprep.mubr.bf16.mxu0 %v10179_v60  ;;  %v10125_v3 = vmax.f32 %v10061_v49, 0.0  ;;  %v20386_v43 = vpop.f32.mrf.mxu0  ;;  %v9572_v60 = vadd.f32 %v20212_v44, %v20087_v29  ;;  %v22060_v49 = vld [vmem:[#allocation32_spill] sm:$0xff] }
 0x991   : > { %v14731_v53 = vpop.f32.mrf.mxu1  ;;  %14802 = vmatmul.mubr.bf16.gmra.mxu0 %v10180_v32  ;;  %v9573_v29 = vadd.f32 %v20232_v17, %v20097_v30 }
 0x992   : > { %v10128_v47 = vmax.f32 %v10064_v21, 0.0  ;;  %v10062_v15 = vadd.f32 %v20289_v51, %v9991_v10  ;;  %v9996_v34 = vadd.f32 %v14731_v53, %v9570_v33  ;;  %v9575_v21 = vadd.f32 %v20222_v12, %v22060_v49  ;;  %v20393_v56 = vpop.f32.mrf.mxu0 }
 0x993   : > { %v9799_v27 = vpop.f32.mrf.mxu1 }
 0x994   : > { %v10182_v20 = vpack.c.bf16 %v10128_v47, %v10127_v11  ;;  %v10126_v14 = vmax.f32 %v10062_v15, 0.0  ;;  %v9994_v19 = vadd.f32 %v9799_v27, %v9568_v52  ;;  %v10067_v4 = vadd.f32 %v20289_v51, %v9996_v34  ;;  %v20402_v27 = vpop.f32.mrf.mxu0 }
 0x995   : > { %v14732_v37 = vpop.f32.mrf.mxu1  ;;  %v9578_v34 = vadd.f32 %v20242_v50, %v20104_v22 }
 0x996   : > { %v9997_v54 = vadd.f32 %v14732_v37, %v9571_v16  ;;  %v10181_v24 = vpack.c.bf16 %v10126_v14, %v10125_v3  ;;  %v10065_v25 = vadd.f32 %v20289_v51, %v9994_v19  ;;  %v10131_v61 = vmax.f32 %v10067_v4, 0.0  ;;  %v22061_v16 = vld [vmem:[#allocation193_spill] sm:$0xff]  ;;  %v22062_v37 = vld [vmem:[#allocation232_spill] sm:$0xff]  ;;  %v20409_v50 = vpop.f32.mrf.mxu0 }
 0x997   : > { %v9802_v32 = vpop.f32.mrf.mxu1  ;;  %v9576_v3 = vadd.f32 %v20252_v58, %v22061_v16  ;;  %v9579_v4 = vadd.f32 %v20262_v23, %v22062_v37  ;;  %v22063_v58 = vld [vmem:[#allocation38_spill] sm:$0xff] }
 0x998   : > { %v10068_v13 = vadd.f32 %v20289_v51, %v9997_v54  ;;  %v9995_v18 = vadd.f32 %v9802_v32, %v9569_v7  ;;  %14805 = vmatprep.mubr.bf16.mxu0 %v10181_v24  ;;  %v10129_v10 = vmax.f32 %v10065_v25, 0.0 }
 0x999   : > { %v14735_v8 = vpop.f32.mrf.mxu1  ;;  %14806 = vmatmul.mubr.bf16.gmra.mxu0 %v10182_v20 }
 0x99a   : > { %v10132_v9 = vmax.f32 %v10068_v13, 0.0  ;;  %v10066_v38 = vadd.f32 %v20289_v51, %v9995_v18  ;;  %v10000_v0 = vadd.f32 %v14735_v8, %v9574_v5  ;;  %v9577_v18 = vadd.f32 %v20272_v57, %v22063_v58 }
 0x99b   : > { %v9815_v39 = vpop.f32.mrf.mxu1 }
 0x99c   : > { %v10184_v33 = vpack.c.bf16 %v10132_v9, %v10131_v61  ;;  %v10130_v41 = vmax.f32 %v10066_v38, 0.0  ;;  %v9998_v42 = vadd.f32 %v9815_v39, %v9572_v60  ;;  %v10071_v36 = vadd.f32 %v20289_v51, %v10000_v0  ;;  %v22064_v61 = vld [vmem:[#allocation233_spill] sm:$0xff]  ;;  %v20418_v38 = vpop.f32.mrf.mxu0  ;;  %v22065_v39 = vld [vmem:[#allocation194_spill] sm:$0xff] }
 0x99d   : > { %v14736_v53 = vpop.f32.mrf.mxu1  ;;  %v9582_v9 = vadd.f32 %v20282_v59, %v22064_v61  ;;  %v9580_v49 = vadd.f32 %v20293_v55, %v22065_v39  ;;  %v22067_v55 = vld [vmem:[#allocation35_spill] sm:$0xff]  ;;  %v22072_v39 = vld [vmem:[#allocation236_spill] sm:$0xff] }
 0x99e   : > { %v10001_v52 = vadd.f32 %v14736_v53, %v9575_v21  ;;  %v10183_v44 = vpack.c.bf16 %v10130_v41, %v10129_v10  ;;  %v10069_v47 = vadd.f32 %v20289_v51, %v9998_v42  ;;  %v10135_v20 = vmax.f32 %v10071_v36, 0.0  ;;  %v22066_v42 = vld [vmem:[#allocation234_spill] sm:$0xff] }
 0x99f   : > { %v9818_v11 = vpop.f32.mrf.mxu1  ;;  %v9583_v53 = vadd.f32 %v20302_v26, %v22066_v42 }
 0x9a0   : > { %v10072_v15 = vadd.f32 %v20289_v51, %v10001_v52  ;;  %v9999_v12 = vadd.f32 %v9818_v11, %v9573_v29  ;;  %14809 = vmatprep.mubr.bf16.mxu0 %v10183_v44  ;;  %v10133_v54 = vmax.f32 %v10069_v47, 0.0  ;;  %v20425_v44 = vpop.f32.mrf.mxu0 }
 0x9a1   : > { %v14739_v31 = vpop.f32.mrf.mxu1  ;;  %14810 = vmatmul.mubr.bf16.gmra.mxu0 %v10184_v33 }
 0x9a2   : > { %v10136_v30 = vmax.f32 %v10072_v15, 0.0  ;;  %v10070_v17 = vadd.f32 %v20289_v51, %v9999_v12  ;;  %v10004_v14 = vadd.f32 %v14739_v31, %v9578_v34  ;;  %v9581_v12 = vadd.f32 %v20309_v28, %v22067_v55 }
 0x9a3   : > { %v9831_v19 = vpop.f32.mrf.mxu1 }
 0x9a4   : > { %v10186_v7 = vpack.c.bf16 %v10136_v30, %v10135_v20  ;;  %v10134_v24 = vmax.f32 %v10070_v17, 0.0  ;;  %v10002_v22 = vadd.f32 %v9831_v19, %v9576_v3  ;;  %v10075_v25 = vadd.f32 %v20289_v51, %v10004_v14  ;;  %v22068_v20 = vld [vmem:[#allocation196_spill] sm:$0xff]  ;;  %v20434_v17 = vpop.f32.mrf.mxu0  ;;  %v22069_v19 = vld [vmem:[#allocation235_spill] sm:$0xff] }
 0x9a5   : > { %v14740_v32 = vpop.f32.mrf.mxu1  ;;  %v9586_v30 = vadd.f32 %v20318_v2, %v22068_v20  ;;  %v9584_v37 = vadd.f32 %v20325_v62, %v22069_v19  ;;  %v22071_v62 = vld [vmem:[#allocation44_spill] sm:$0xff] }
 0x9a6   : > { %v10005_v13 = vadd.f32 %v14740_v32, %v9579_v4  ;;  %v10185_v48 = vpack.c.bf16 %v10134_v24, %v10133_v54  ;;  %v10073_v8 = vadd.f32 %v20289_v51, %v10002_v22  ;;  %v10139_v21 = vmax.f32 %v10075_v25, 0.0  ;;  %v22070_v22 = vld [vmem:[#allocation41_spill] sm:$0xff] }
 0x9a7   : > { %v9834_v5 = vpop.f32.mrf.mxu1  ;;  %v9587_v32 = vadd.f32 %v20334_v1, %v22070_v22 }
 0x9a8   : > { %v10076_v60 = vadd.f32 %v20289_v51, %v10005_v13  ;;  %v10003_v23 = vadd.f32 %v9834_v5, %v9577_v18  ;;  %14813 = vmatprep.mubr.bf16.mxu0 %v10185_v48  ;;  %v10137_v36 = vmax.f32 %v10073_v8, 0.0  ;;  %v20441_v18 = vpop.f32.mrf.mxu0 }
 0x9a9   : > { %v14743_v0 = vpop.f32.mrf.mxu1  ;;  %14814 = vmatmul.mubr.bf16.gmra.mxu0 %v10186_v7 }
 0x9aa   : > { %v10140_v57 = vmax.f32 %v10076_v60, 0.0  ;;  %v10074_v10 = vadd.f32 %v20289_v51, %v10003_v23  ;;  %v10008_v33 = vadd.f32 %v14743_v0, %v9582_v9  ;;  %v9585_v60 = vadd.f32 %v20341_v46, %v22071_v62 }
 0x9ab   : > { %v9847_v41 = vpop.f32.mrf.mxu1 }
 0x9ac   : > { %v10188_v52 = vpack.c.bf16 %v10140_v57, %v10139_v21  ;;  %v10138_v29 = vmax.f32 %v10074_v10, 0.0  ;;  %v10006_v59 = vadd.f32 %v9847_v41, %v9580_v49  ;;  %v10079_v47 = vadd.f32 %v20289_v51, %v10008_v33  ;;  %v20450_v21 = vpop.f32.mrf.mxu0  ;;  %v22073_v10 = vld [vmem:[#allocation198_spill] sm:$0xff] }
 0x9ad   : > { %v14744_v11 = vpop.f32.mrf.mxu1  ;;  %v9590_v49 = vadd.f32 %v20352_v35, %v22072_v39  ;;  %v9588_v33 = vadd.f32 %v20360_v40, %v22073_v10  ;;  %v22075_v40 = vld [vmem:[#allocation96_spill] sm:$0xff]  ;;  %v22081_v10 = vld [vmem:[#allocation107_spill] sm:$0xff] }
 0x9ae   : > { %v10009_v15 = vadd.f32 %v14744_v11, %v9583_v53  ;;  %v10187_v34 = vpack.c.bf16 %v10138_v29, %v10137_v36  ;;  %v10077_v16 = vadd.f32 %v20289_v51, %v10006_v59  ;;  %v10143_v4 = vmax.f32 %v10079_v47, 0.0 }
 0x9af   : > { %v9850_v31 = vpop.f32.mrf.mxu1 }
 0x9b0   : > { %v10080_v3 = vadd.f32 %v20289_v51, %v10009_v15  ;;  %v10007_v26 = vadd.f32 %v9850_v31, %v9581_v12  ;;  %14817 = vmatprep.mubr.bf16.mxu0 %v10187_v34  ;;  %v10141_v25 = vmax.f32 %v10077_v16, 0.0  ;;  %v20457_v15 = vpop.f32.mrf.mxu0  ;;  %v9589_v31 = vadd.f32 %v20378_v63, %v22075_v40 }
 0x9b1   : > { %v14747_v14 = vpop.f32.mrf.mxu1  ;;  %14818 = vmatmul.mubr.bf16.gmra.mxu0 %v10188_v52  ;;  %v22074_v52 = vld [vmem:[#allocation237_spill] sm:$0xff] }
 0x9b2   : > { %v10144_v28 = vmax.f32 %v10080_v3, 0.0  ;;  %v10078_v54 = vadd.f32 %v20289_v51, %v10007_v26  ;;  %v10012_v7 = vadd.f32 %v14747_v14, %v9586_v30  ;;  %v9591_v29 = vadd.f32 %v20370_v6, %v22074_v52  ;;  %v22076_v30 = vld [vmem:[#allocation47_spill] sm:$0xff]  ;;  %v14684_v19 = vpop.f32.mrf.mxu0 }
 0x9b3   : > { %v9863_v24 = vpop.f32.mrf.mxu1  ;;  %v9594_v14 = vadd.f32 %v20386_v43, %v22076_v30 }
 0x9b4   : > { %v10190_v13 = vpack.c.bf16 %v10144_v28, %v10143_v4  ;;  %v10142_v58 = vmax.f32 %v10078_v54, 0.0  ;;  %v10010_v2 = vadd.f32 %v9863_v24, %v9584_v37  ;;  %v10083_v5 = vadd.f32 %v20289_v51, %v10012_v7  ;;  %v22077_v4 = vld [vmem:[#allocation53_spill] sm:$0xff]  ;;  %v9504_v43 = vpop.f32.mrf.mxu0 }
 0x9b5   : > { %v14748_v48 = vpop.f32.mrf.mxu1  ;;  %v9592_v28 = vadd.f32 %v20393_v56, %v22077_v4 }
 0x9b6   : > { %v10013_v8 = vadd.f32 %v14748_v48, %v9587_v32  ;;  %v10189_v23 = vpack.c.bf16 %v10142_v58, %v10141_v25  ;;  %v10081_v9 = vadd.f32 %v20289_v51, %v10010_v2  ;;  %v10147_v41 = vmax.f32 %v10083_v5, 0.0  ;;  %v22078_v32 = vld [vmem:[#allocation98_spill] sm:$0xff] }
 0x9b7   : > { %v9866_v61 = vpop.f32.mrf.mxu1  ;;  %v9595_v25 = vadd.f32 %v20402_v27, %v22078_v32  ;;  %v22080_v27 = vld [vmem:[#allocation102_spill] sm:$0xff] }
 0x9b8   : > { %v10084_v0 = vadd.f32 %v20289_v51, %v10013_v8  ;;  %v10011_v1 = vadd.f32 %v9866_v61, %v9585_v60  ;;  %14821 = vmatprep.mubr.bf16.mxu0 %v10189_v23  ;;  %v10145_v59 = vmax.f32 %v10081_v9, 0.0  ;;  %v22079_v60 = vld [vmem:[#allocation100_spill] sm:$0xff]  ;;  %v9598_v39 = vadd.f32 %v20418_v38, %v22080_v27 }
 0x9b9   : > { %v14751_v57 = vpop.f32.mrf.mxu1  ;;  %14822 = vmatmul.mubr.bf16.gmra.mxu0 %v10190_v13  ;;  %v9593_v56 = vadd.f32 %v20409_v50, %v22079_v60 }
 0x9ba   : > { %v10148_v46 = vmax.f32 %v10084_v0, 0.0  ;;  %v10082_v42 = vadd.f32 %v20289_v51, %v10011_v1  ;;  %v10016_v53 = vadd.f32 %v14751_v57, %v9590_v49  ;;  %v14687_v49 = vpop.f32.mrf.mxu0 }
 0x9bb   : > { %v9879_v36 = vpop.f32.mrf.mxu1 }
 0x9bc   : > { %v10192_v11 = vpack.c.bf16 %v10148_v46, %v10147_v41  ;;  %v10146_v47 = vmax.f32 %v10082_v42, 0.0  ;;  %v10014_v35 = vadd.f32 %v9879_v36, %v9588_v33  ;;  %v10087_v12 = vadd.f32 %v20289_v51, %v10016_v53  ;;  %v22082_v36 = vld [vmem:[#allocation99_spill] sm:$0xff]  ;;  %v9517_v38 = vpop.f32.mrf.mxu0 }
 0x9bd   : > { %v14752_v55 = vpop.f32.mrf.mxu1  ;;  %v9596_v33 = vadd.f32 %v20425_v44, %v22081_v10  ;;  %v9599_v52 = vadd.f32 %v20434_v17, %v22082_v36  ;;  %v22084_v17 = vld [vmem:[#allocation109_spill] sm:$0xff]  ;;  %v22089_v10 = vld [vmem:[#allocation103_spill] sm:$0xff] }
 0x9be   : > { %v10017_v34 = vadd.f32 %v14752_v55, %v9591_v29  ;;  %v10191_v16 = vpack.c.bf16 %v10146_v47, %v10145_v59  ;;  %v10085_v26 = vadd.f32 %v20289_v51, %v10014_v35  ;;  %v10151_v54 = vmax.f32 %v10087_v12, 0.0 }
 0x9bf   : > { %v9882_v3 = vpop.f32.mrf.mxu1 }
 0x9c0   : > { %v10088_v20 = vadd.f32 %v20289_v51, %v10017_v34  ;;  %v10015_v6 = vadd.f32 %v9882_v3, %v9589_v31  ;;  %14825 = vmatprep.mubr.bf16.mxu0 %v10191_v16  ;;  %v10149_v13 = vmax.f32 %v10085_v26, 0.0  ;;  %v22083_v34 = vld [vmem:[#allocation25_spill] sm:$0xff] }
 0x9c1   : > { %v14755_v37 = vpop.f32.mrf.mxu1  ;;  %14826 = vmatmul.mubr.bf16.gmra.mxu0 %v10192_v11  ;;  %v9597_v44 = vadd.f32 %v20441_v18, %v22083_v34 }
 0x9c2   : > { %v10152_v7 = vmax.f32 %v10088_v20, 0.0  ;;  %v10086_v63 = vadd.f32 %v20289_v51, %v10015_v6  ;;  %v10020_v24 = vadd.f32 %v14755_v37, %v9594_v14  ;;  %v9602_v20 = vadd.f32 %v20450_v21, %v22084_v17  ;;  %v14688_v6 = vpop.f32.mrf.mxu0  ;;  %v22085_v14 = vld [vmem:[#allocation42_spill] sm:$0xff] }
 0x9c3   : > { %v9895_v22 = vpop.f32.mrf.mxu1  ;;  %v9600_v37 = vadd.f32 %v20457_v15, %v22085_v14 }
 0x9c4   : > { %v10194_v58 = vpack.c.bf16 %v10152_v7, %v10151_v54  ;;  %v10150_v2 = vmax.f32 %v10086_v63, 0.0  ;;  %v10018_v48 = vadd.f32 %v9895_v22, %v9592_v28  ;;  %v10091_v8 = vadd.f32 %v20289_v51, %v10020_v24 }
 0x9c5   : > { %v14756_v5 = vpop.f32.mrf.mxu1  ;;  %v9603_v63 = vadd.f32 %v14684_v19, %v20234_v45  ;;  %v22087_v45 = vld [vmem:[#allocation45_spill] sm:$0xff] }
 0x9c6   : > { %v10021_v62 = vadd.f32 %v14756_v5, %v9595_v25  ;;  %v10193_v23 = vpack.c.bf16 %v10150_v2, %v10149_v13  ;;  %v10089_v9 = vadd.f32 %v20289_v51, %v10018_v48  ;;  %v10155_v41 = vmax.f32 %v10091_v8, 0.0  ;;  %v9520_v13 = vpop.f32.mrf.mxu0  ;;  %v22086_v48 = vld [vmem:[#allocation93_spill] sm:$0xff] }
 0x9c7   : > { %v9898_v61 = vpop.f32.mrf.mxu1  ;;  %v9601_v5 = vadd.f32 %v9504_v43, %v22086_v48  ;;  %v9606_v19 = vadd.f32 %v14687_v49, %v22087_v45 }
 0x9c8   : > { %v10092_v0 = vadd.f32 %v20289_v51, %v10021_v62  ;;  %v10019_v1 = vadd.f32 %v9898_v61, %v9593_v56  ;;  %14829 = vmatprep.mubr.bf16.mxu0 %v10193_v23  ;;  %v10153_v29 = vmax.f32 %v10089_v9, 0.0  ;;  %v14691_v23 = vpop.f32.mrf.mxu0  ;;  %v22088_v9 = vld [vmem:[#allocation59_spill] sm:$0xff] }
 0x9c9   : > { %v14759_v57 = vpop.f32.mrf.mxu1  ;;  %14830 = vmatmul.mubr.bf16.gmra.mxu0 %v10194_v58 }
 0x9ca   : > { %v10156_v46 = vmax.f32 %v10092_v0, 0.0  ;;  %v10090_v50 = vadd.f32 %v20289_v51, %v10019_v1  ;;  %v10024_v42 = vadd.f32 %v14759_v57, %v9598_v39  ;;  %v9604_v0 = vadd.f32 %v9517_v38, %v22088_v9 }
 0x9cb   : > { %v9911_v53 = vpop.f32.mrf.mxu1 }
 0x9cc   : > { %v10196_v59 = vpack.c.bf16 %v10156_v46, %v10155_v41  ;;  %v10154_v11 = vmax.f32 %v10090_v50, 0.0  ;;  %v10022_v47 = vadd.f32 %v9911_v53, %v9596_v33  ;;  %v10095_v55 = vadd.f32 %v20289_v51, %v10024_v42  ;;  %v9533_v53 = vpop.f32.mrf.mxu0 }
 0x9cd   : > { %v14760_v35 = vpop.f32.mrf.mxu1  ;;  %v9607_v33 = vadd.f32 %v14688_v6, %v22089_v10 }
 0x9ce   : > { %v10025_v12 = vadd.f32 %v14760_v35, %v9599_v52  ;;  %v10195_v40 = vpack.c.bf16 %v10154_v11, %v10153_v29  ;;  %v10093_v16 = vadd.f32 %v20289_v51, %v10022_v47  ;;  %v10159_v4 = vmax.f32 %v10095_v55, 0.0  ;;  %v22090_v29 = vld [vmem:[#allocation95_spill] sm:$0xff] }
 0x9cf   : > { %v9914_v31 = vpop.f32.mrf.mxu1 }
 0x9d0   : > { %v10096_v3 = vadd.f32 %v20289_v51, %v10025_v12  ;;  %v10023_v26 = vadd.f32 %v9914_v31, %v9597_v44  ;;  %14833 = vmatprep.mubr.bf16.mxu0 %v10195_v40  ;;  %v10157_v24 = vmax.f32 %v10093_v16, 0.0  ;;  %v22091_v12 = vld [vmem:[#allocation9_spill] sm:$0xff]  ;;  %v14692_v44 = vpop.f32.mrf.mxu0 }
 0x9d1   : > { %v14763_v30 = vpop.f32.mrf.mxu1  ;;  %14834 = vmatmul.mubr.bf16.gmra.mxu0 %v10196_v59  ;;  %v9605_v59 = vadd.f32 %v9520_v13, %v22090_v29  ;;  %v9610_v34 = vadd.f32 %v14691_v23, %v22091_v12  ;;  %v22092_v31 = vld [vmem:[#allocation49_spill] sm:$0xff] }
 0x9d2   : > { %v10160_v28 = vmax.f32 %v10096_v3, 0.0  ;;  %v10094_v18 = vadd.f32 %v20289_v51, %v10023_v26  ;;  %v10028_v54 = vadd.f32 %v14763_v30, %v9602_v20  ;;  %v9608_v16 = vadd.f32 %v9533_v53, %v22092_v31  ;;  %v22093_v30 = vld [vmem:[#allocation52_spill] sm:$0xff] }
 0x9d3   : > { %v9927_v7 = vpop.f32.mrf.mxu1  ;;  %v9611_v14 = vadd.f32 %v14692_v44, %v22093_v30 }
 0x9d4   : > { %v10198_v22 = vpack.c.bf16 %v10160_v28, %v10159_v4  ;;  %v10158_v32 = vmax.f32 %v10094_v18, 0.0  ;;  %v10026_v25 = vadd.f32 %v9927_v7, %v9600_v37  ;;  %v10099_v58 = vadd.f32 %v20289_v51, %v10028_v54  ;;  %v9536_v54 = vpop.f32.mrf.mxu0 }
 0x9d5   : > { %v14764_v21 = vpop.f32.mrf.mxu1 }
 0x9d6   : > { %v10029_v2 = vadd.f32 %v14764_v21, %v9603_v63  ;;  %v10197_v15 = vpack.c.bf16 %v10158_v32, %v10157_v24  ;;  %v10097_v62 = vadd.f32 %v20289_v51, %v10026_v25  ;;  %v10163_v1 = vmax.f32 %v10099_v58, 0.0 }
 0x9d7   : > { %v9930_v8 = vpop.f32.mrf.mxu1 }
 0x9d8   : > { %v10100_v60 = vadd.f32 %v20289_v51, %v10029_v2  ;;  %v10027_v56 = vadd.f32 %v9930_v8, %v9601_v5  ;;  %14837 = vmatprep.mubr.bf16.mxu0 %v10197_v15  ;;  %v10161_v41 = vmax.f32 %v10097_v62, 0.0 }
 0x9d9   : > { %v14767_v61 = vpop.f32.mrf.mxu1  ;;  %14838 = vmatmul.mubr.bf16.gmra.mxu0 %v10198_v22  ;;  %v22094_v22 = vld [vmem:[#allocation27_spill] sm:$0xff] }
 0x9da   : > { %v10164_v27 = vmax.f32 %v10100_v60, 0.0  ;;  %v10098_v39 = vadd.f32 %v20289_v51, %v10027_v56  ;;  %v10032_v43 = vadd.f32 %v14767_v61, %v9606_v19  ;;  %v9609_v32 = vadd.f32 %v9536_v54, %v22094_v22  ;;  %v20518_v19 = vld [vmem:[%s20638_s7] ss:$0 sm:$0xff] }
 0x9db   : > { %v9943_v57 = vpop.f32.mrf.mxu1 }
 0x9dc   : > { %v10200_v46 = vpack.c.bf16 %v10164_v27, %v10163_v1  ;;  %v10162_v50 = vmax.f32 %v10098_v39, 0.0  ;;  %v10030_v42 = vadd.f32 %v9943_v57, %v9604_v0  ;;  %v10103_v49 = vadd.f32 %v20289_v51, %v10032_v43 }
 0x9dd   : > { %v14768_v36 = vpop.f32.mrf.mxu1 }
 0x9de   : > { %v10033_v52 = vadd.f32 %v14768_v36, %v9607_v33  ;;  %v10199_v11 = vpack.c.bf16 %v10162_v50, %v10161_v41  ;;  %v10101_v38 = vadd.f32 %v20289_v51, %v10030_v42  ;;  %v10167_v3 = vmax.f32 %v10103_v49, 0.0 }
 0x9df   : > { %v9946_v47 = vpop.f32.mrf.mxu1 }
 0x9e0   : > { %v10104_v35 = vadd.f32 %v20289_v51, %v10033_v52  ;;  %v10031_v55 = vadd.f32 %v9946_v47, %v9605_v59  ;;  %14841 = vmatprep.mubr.bf16.mxu0 %v10199_v11  ;;  %v10165_v37 = vmax.f32 %v10101_v38, 0.0 }
 0x9e1   : > { %v14771_v40 = vpop.f32.mrf.mxu1  ;;  %14842 = vmatmul.mubr.bf16.gmra.mxu0 %v10200_v46 }
 0x9e2   : > { %v10168_v26 = vmax.f32 %v10104_v35, 0.0  ;;  %v10102_v17 = vadd.f32 %v20289_v51, %v10031_v55  ;;  %v10036_v20 = vadd.f32 %v14771_v40, %v9610_v34 }
 0x9e3   : > { %v9959_v6 = vpop.f32.mrf.mxu1 }
 0x9e4   : > { %v10202_v4 = vpack.c.bf16 %v10168_v26, %v10167_v3  ;;  %v10166_v28 = vmax.f32 %v10102_v17, 0.0  ;;  %v10034_v18 = vadd.f32 %v9959_v6, %v9608_v16  ;;  %v10107_v63 = vadd.f32 %v20289_v51, %v10036_v20 }
 0x9e5   : > { %v14772_v7 = vpop.f32.mrf.mxu1 }
 0x9e6   : > { %v10037_v24 = vadd.f32 %v14772_v7, %v9611_v14  ;;  %v10201_v25 = vpack.c.bf16 %v10166_v28, %v10165_v37  ;;  %v10105_v21 = vadd.f32 %v20289_v51, %v10034_v18  ;;  %v10171_v48 = vmax.f32 %v10107_v63, 0.0 }
 0x9e7   : > { %v9962_v13 = vpop.f32.mrf.mxu1 }
 0x9e8   : > { %v10108_v58 = vadd.f32 %v20289_v51, %v10037_v24  ;;  %v10035_v2 = vadd.f32 %v9962_v13, %v9609_v32  ;;  %14845 = vmatprep.mubr.bf16.mxu1 %v10201_v25  ;;  %v10169_v8 = vmax.f32 %v10105_v21, 0.0 }
 0x9e9   : > { %14846 = vmatmul.mubr.bf16.vlgmr.msra.gmra.mxu1 %v10202_v4 }
 0x9ea   : > { %v10172_v5 = vmax.f32 %v10108_v58, 0.0  ;;  %v10106_v15 = vadd.f32 %v20289_v51, %v10035_v2 }
 0x9ec   : > { %v10204_v62 = vpack.c.bf16 %v10172_v5, %v10171_v48  ;;  %v10170_v60 = vmax.f32 %v10106_v15, 0.0 }
 0x9ee   : > { %v10203_v56 = vpack.c.bf16 %v10170_v60, %v10169_v8 }
 0x9f0   : > { %14849 = vmatprep.mubr.bf16.mxu1 %v10203_v56 }
 0x9f1   : > { %14850 = vmatmul.mubr.bf16.gmra.mxu1 %v10204_v62 }
 0xa39   : > { %v14791_v45 = vpop.f32.mrf.mxu0 }
 0xa3a   : > { %v10319_v9 = vadd.f32 %v14791_v45, %v20518_v19 }
 0xa3b   : > { %v10310_v23 = vpop.f32.mrf.mxu0 }
 0xa3c   : > { %v10311_v1 = vadd.f32 %v20518_v19, %v10310_v23 }
 0xa3d   : > { %v14792_v61 = vpop.f32.mrf.mxu0 }
 0xa3e   : > { %v10322_v0 = vadd.f32 %v14792_v61, %v20518_v19 }
 0xa3f   : > { %v10313_v51 = vpop.f32.mrf.mxu0 }
 0xa40   : > { %v11589_v27 = vpack.c.bf16 %v10322_v0, %v10319_v9  ;;  %v10314_v39 = vadd.f32 %v20518_v19, %v10313_v51 }
 0xa41   : > { %v14795_v43 = vpop.f32.mrf.mxu0 }
 0xa42   : > { %11741 = vst [vmem:[%s20526_s25 + $0x8] sm:$0xff] %v11589_v27   ;;  %v11584_v57 = vpack.c.bf16 %v10314_v39, %v10311_v1  ;;  %v10335_v41 = vadd.f32 %v14795_v43, %v20518_v19 }
 0xa43   : > { %v10326_v10 = vpop.f32.mrf.mxu0 }
 0xa44   : > { %11585 = vst [vmem:[%s20526_s25] sm:$0xff] %v11584_v57   ;;  %v10327_v42 = vadd.f32 %v20518_v19, %v10326_v10 }
 0xa45   : > { %v14796_v33 = vpop.f32.mrf.mxu0 }
 0xa46   : > { %v10338_v46 = vadd.f32 %v14796_v33, %v20518_v19 }
 0xa47   : > { %v10329_v50 = vpop.f32.mrf.mxu0 }
 0xa48   : > { %v11599_v53 = vpack.c.bf16 %v10338_v46, %v10335_v41  ;;  %v10330_v36 = vadd.f32 %v20518_v19, %v10329_v50 }
 0xa49   : > { %v14799_v49 = vpop.f32.mrf.mxu0 }
 0xa4a   : > { %11743 = vst [vmem:[%s20526_s25 + $0x18] sm:$0xff] %v11599_v53   ;;  %v11594_v52 = vpack.c.bf16 %v10330_v36, %v10327_v42  ;;  %v10351_v11 = vadd.f32 %v14799_v49, %v20518_v19 }
 0xa4b   : > { %v10342_v29 = vpop.f32.mrf.mxu0 }
 0xa4c   : > { %11742 = vst [vmem:[%s20526_s25 + $0x10] sm:$0xff] %v11594_v52   ;;  %v10343_v35 = vadd.f32 %v20518_v19, %v10342_v29 }
 0xa4d   : > { %v14800_v59 = vpop.f32.mrf.mxu0 }
 0xa4e   : > { %v10354_v47 = vadd.f32 %v14800_v59, %v20518_v19 }
 0xa4f   : > { %v10345_v38 = vpop.f32.mrf.mxu0 }
 0xa50   : > { %v11609_v55 = vpack.c.bf16 %v10354_v47, %v10351_v11  ;;  %v10346_v12 = vadd.f32 %v20518_v19, %v10345_v38 }
 0xa51   : > { %v14803_v34 = vpop.f32.mrf.mxu0 }
 0xa52   : > { %11745 = vst [vmem:[%s20526_s25 + $0x28] sm:$0xff] %v11609_v55   ;;  %v11604_v44 = vpack.c.bf16 %v10346_v12, %v10343_v35  ;;  %v10367_v16 = vadd.f32 %v14803_v34, %v20518_v19 }
 0xa53   : > { %v10358_v40 = vpop.f32.mrf.mxu0 }
 0xa54   : > { %11744 = vst [vmem:[%s20526_s25 + $0x20] sm:$0xff] %v11604_v44   ;;  %v10359_v17 = vadd.f32 %v20518_v19, %v10358_v40 }
 0xa55   : > { %v14804_v31 = vpop.f32.mrf.mxu0 }
 0xa56   : > { %v10370_v3 = vadd.f32 %v14804_v31, %v20518_v19 }
 0xa57   : > { %v10361_v26 = vpop.f32.mrf.mxu0 }
 0xa58   : > { %v11619_v20 = vpack.c.bf16 %v10370_v3, %v10367_v16  ;;  %v10362_v6 = vadd.f32 %v20518_v19, %v10361_v26 }
 0xa59   : > { %v14807_v30 = vpop.f32.mrf.mxu0 }
 0xa5a   : > { %11747 = vst [vmem:[%s20526_s25 + $0x38] sm:$0xff] %v11619_v20   ;;  %v11614_v14 = vpack.c.bf16 %v10362_v6, %v10359_v17  ;;  %v10383_v28 = vadd.f32 %v14807_v30, %v20518_v19 }
 0xa5b   : > { %v10374_v37 = vpop.f32.mrf.mxu0 }
 0xa5c   : > { %11746 = vst [vmem:[%s20526_s25 + $0x30] sm:$0xff] %v11614_v14   ;;  %v10375_v7 = vadd.f32 %v20518_v19, %v10374_v37 }
 0xa5d   : > { %v14808_v4 = vpop.f32.mrf.mxu0 }
 0xa5e   : > { %v10386_v18 = vadd.f32 %v14808_v4, %v20518_v19 }
 0xa5f   : > { %v10377_v54 = vpop.f32.mrf.mxu0 }
 0xa60   : > { %v11629_v63 = vpack.c.bf16 %v10386_v18, %v10383_v28  ;;  %v10378_v24 = vadd.f32 %v20518_v19, %v10377_v54 }
 0xa61   : > { %v14811_v22 = vpop.f32.mrf.mxu0 }
 0xa62   : > { %11749 = vst [vmem:[%s20526_s25 + $0x48] sm:$0xff] %v11629_v63   ;;  %v11624_v32 = vpack.c.bf16 %v10378_v24, %v10375_v7  ;;  %v10399_v21 = vadd.f32 %v14811_v22, %v20518_v19 }
 0xa63   : > { %v10390_v25 = vpop.f32.mrf.mxu0 }
 0xa64   : > { %11748 = vst [vmem:[%s20526_s25 + $0x40] sm:$0xff] %v11624_v32   ;;  %v10391_v48 = vadd.f32 %v20518_v19, %v10390_v25 }
 0xa65   : > { %v14812_v13 = vpop.f32.mrf.mxu0 }
 0xa66   : > { %v10402_v58 = vadd.f32 %v14812_v13, %v20518_v19 }
 0xa67   : > { %v10393_v2 = vpop.f32.mrf.mxu0 }
 0xa68   : > { %v11639_v5 = vpack.c.bf16 %v10402_v58, %v10399_v21  ;;  %v10394_v15 = vadd.f32 %v20518_v19, %v10393_v2 }
 0xa69   : > { %v14815_v8 = vpop.f32.mrf.mxu0 }
 0xa6a   : > { %11751 = vst [vmem:[%s20526_s25 + $0x58] sm:$0xff] %v11639_v5   ;;  %v11634_v62 = vpack.c.bf16 %v10394_v15, %v10391_v48  ;;  %v10415_v45 = vadd.f32 %v14815_v8, %v20518_v19 }
 0xa6b   : > { %v10406_v60 = vpop.f32.mrf.mxu0 }
 0xa6c   : > { %11750 = vst [vmem:[%s20526_s25 + $0x50] sm:$0xff] %v11634_v62   ;;  %v10407_v9 = vadd.f32 %v20518_v19, %v10406_v60 }
 0xa6d   : > { %v14816_v56 = vpop.f32.mrf.mxu0 }
 0xa6e   : > { %v10418_v23 = vadd.f32 %v14816_v56, %v20518_v19 }
 0xa6f   : > { %v10409_v61 = vpop.f32.mrf.mxu0 }
 0xa70   : > { %v11649_v0 = vpack.c.bf16 %v10418_v23, %v10415_v45  ;;  %v10410_v51 = vadd.f32 %v20518_v19, %v10409_v61 }
 0xa71   : > { %v14819_v1 = vpop.f32.mrf.mxu0 }
 0xa72   : > { %11753 = vst [vmem:[%s20526_s25 + $0x68] sm:$0xff] %v11649_v0   ;;  %v11644_v27 = vpack.c.bf16 %v10410_v51, %v10407_v9  ;;  %v10431_v57 = vadd.f32 %v14819_v1, %v20518_v19 }
 0xa73   : > { %v10422_v39 = vpop.f32.mrf.mxu0 }
 0xa74   : > { %11752 = vst [vmem:[%s20526_s25 + $0x60] sm:$0xff] %v11644_v27   ;;  %v10423_v41 = vadd.f32 %v20518_v19, %v10422_v39 }
 0xa75   : > { %v14820_v43 = vpop.f32.mrf.mxu0 }
 0xa76   : > { %v10434_v10 = vadd.f32 %v14820_v43, %v20518_v19 }
 0xa77   : > { %v10425_v33 = vpop.f32.mrf.mxu0 }
 0xa78   : > { %v11659_v46 = vpack.c.bf16 %v10434_v10, %v10431_v57  ;;  %v10426_v50 = vadd.f32 %v20518_v19, %v10425_v33 }
 0xa79   : > { %v14823_v42 = vpop.f32.mrf.mxu0 }
 0xa7a   : > { %11755 = vst [vmem:[%s20526_s25 + $0x78] sm:$0xff] %v11659_v46   ;;  %v11654_v53 = vpack.c.bf16 %v10426_v50, %v10423_v41  ;;  %v10447_v52 = vadd.f32 %v14823_v42, %v20518_v19 }
 0xa7b   : > { %v10438_v36 = vpop.f32.mrf.mxu0 }
 0xa7c   : > { %11754 = vst [vmem:[%s20526_s25 + $0x70] sm:$0xff] %v11654_v53   ;;  %v10439_v11 = vadd.f32 %v20518_v19, %v10438_v36 }
 0xa7d   : > { %v14824_v49 = vpop.f32.mrf.mxu0 }
 0xa7e   : > { %v10450_v29 = vadd.f32 %v14824_v49, %v20518_v19 }
 0xa7f   : > { %v10441_v59 = vpop.f32.mrf.mxu0 }
 0xa80   : > { %v11669_v47 = vpack.c.bf16 %v10450_v29, %v10447_v52  ;;  %v10442_v38 = vadd.f32 %v20518_v19, %v10441_v59 }
 0xa81   : > { %v14827_v35 = vpop.f32.mrf.mxu0 }
 0xa82   : > { %11757 = vst [vmem:[%s20526_s25 + $0x88] sm:$0xff] %v11669_v47   ;;  %v11664_v55 = vpack.c.bf16 %v10442_v38, %v10439_v11  ;;  %v10463_v44 = vadd.f32 %v14827_v35, %v20518_v19 }
 0xa83   : > { %v10454_v12 = vpop.f32.mrf.mxu0 }
 0xa84   : > { %11756 = vst [vmem:[%s20526_s25 + $0x80] sm:$0xff] %v11664_v55   ;;  %v10455_v16 = vadd.f32 %v20518_v19, %v10454_v12 }
 0xa85   : > { %v14828_v34 = vpop.f32.mrf.mxu0 }
 0xa86   : > { %v10466_v40 = vadd.f32 %v14828_v34, %v20518_v19 }
 0xa87   : > { %v10457_v31 = vpop.f32.mrf.mxu0 }
 0xa88   : > { %v11679_v3 = vpack.c.bf16 %v10466_v40, %v10463_v44  ;;  %v10458_v26 = vadd.f32 %v20518_v19, %v10457_v31 }
 0xa89   : > { %v14831_v17 = vpop.f32.mrf.mxu0 }
 0xa8a   : > { %11759 = vst [vmem:[%s20526_s25 + $0x98] sm:$0xff] %v11679_v3   ;;  %v11674_v20 = vpack.c.bf16 %v10458_v26, %v10455_v16  ;;  %v10479_v14 = vadd.f32 %v14831_v17, %v20518_v19 }
 0xa8b   : > { %v10470_v6 = vpop.f32.mrf.mxu0 }
 0xa8c   : > { %11758 = vst [vmem:[%s20526_s25 + $0x90] sm:$0xff] %v11674_v20   ;;  %v10471_v28 = vadd.f32 %v20518_v19, %v10470_v6 }
 0xa8d   : > { %v14832_v30 = vpop.f32.mrf.mxu0 }
 0xa8e   : > { %v10482_v37 = vadd.f32 %v14832_v30, %v20518_v19 }
 0xa8f   : > { %v10473_v4 = vpop.f32.mrf.mxu0 }
 0xa90   : > { %v11689_v18 = vpack.c.bf16 %v10482_v37, %v10479_v14  ;;  %v10474_v54 = vadd.f32 %v20518_v19, %v10473_v4 }
 0xa91   : > { %v14835_v7 = vpop.f32.mrf.mxu0 }
 0xa92   : > { %11761 = vst [vmem:[%s20526_s25 + $0xa8] sm:$0xff] %v11689_v18   ;;  %v11684_v63 = vpack.c.bf16 %v10474_v54, %v10471_v28  ;;  %v10495_v32 = vadd.f32 %v14835_v7, %v20518_v19 }
 0xa93   : > { %v10486_v24 = vpop.f32.mrf.mxu0 }
 0xa94   : > { %11760 = vst [vmem:[%s20526_s25 + $0xa0] sm:$0xff] %v11684_v63   ;;  %v10487_v21 = vadd.f32 %v20518_v19, %v10486_v24 }
 0xa95   : > { %v14836_v22 = vpop.f32.mrf.mxu0 }
 0xa96   : > { %v10498_v25 = vadd.f32 %v14836_v22, %v20518_v19 }
 0xa97   : > { %v10489_v13 = vpop.f32.mrf.mxu0 }
 0xa98   : > { %v11699_v58 = vpack.c.bf16 %v10498_v25, %v10495_v32  ;;  %v10490_v2 = vadd.f32 %v20518_v19, %v10489_v13 }
 0xa99   : > { %v14839_v48 = vpop.f32.mrf.mxu0 }
 0xa9a   : > { %11763 = vst [vmem:[%s20526_s25 + $0xb8] sm:$0xff] %v11699_v58   ;;  %v11694_v5 = vpack.c.bf16 %v10490_v2, %v10487_v21  ;;  %v10511_v62 = vadd.f32 %v14839_v48, %v20518_v19 }
 0xa9b   : > { %v10502_v15 = vpop.f32.mrf.mxu0 }
 0xa9c   : > { %11762 = vst [vmem:[%s20526_s25 + $0xb0] sm:$0xff] %v11694_v5   ;;  %v10503_v45 = vadd.f32 %v20518_v19, %v10502_v15 }
 0xa9d   : > { %v14840_v8 = vpop.f32.mrf.mxu0 }
 0xa9e   : > { %v10514_v60 = vadd.f32 %v14840_v8, %v20518_v19 }
 0xa9f   : > { %v10505_v56 = vpop.f32.mrf.mxu0 }
 0xaa0   : > { %v11709_v23 = vpack.c.bf16 %v10514_v60, %v10511_v62  ;;  %v10506_v61 = vadd.f32 %v20518_v19, %v10505_v56 }
 0xaa1   : > { %v14843_v9 = vpop.f32.mrf.mxu0 }
 0xaa2   : > { %11765 = vst [vmem:[%s20526_s25 + $0xc8] sm:$0xff] %v11709_v23   ;;  %v11704_v0 = vpack.c.bf16 %v10506_v61, %v10503_v45  ;;  %v10527_v27 = vadd.f32 %v14843_v9, %v20518_v19 }
 0xaa3   : > { %v10518_v51 = vpop.f32.mrf.mxu0 }
 0xaa4   : > { %11764 = vst [vmem:[%s20526_s25 + $0xc0] sm:$0xff] %v11704_v0   ;;  %v10519_v57 = vadd.f32 %v20518_v19, %v10518_v51 }
 0xaa5   : > { %v14844_v1 = vpop.f32.mrf.mxu0 }
 0xaa6   : > { %v10530_v39 = vadd.f32 %v14844_v1, %v20518_v19 }
 0xaa7   : > { %v10521_v43 = vpop.f32.mrf.mxu0 }
 0xaa8   : > { %v11719_v10 = vpack.c.bf16 %v10530_v39, %v10527_v27  ;;  %v10522_v33 = vadd.f32 %v20518_v19, %v10521_v43 }
 0xaa9   : > { %v14847_v41 = vpop.f32.mrf.mxu1 }
 0xaaa   : > { %11767 = vst [vmem:[%s20526_s25 + $0xd8] sm:$0xff] %v11719_v10   ;;  %v11714_v46 = vpack.c.bf16 %v10522_v33, %v10519_v57  ;;  %v10543_v53 = vadd.f32 %v14847_v41, %v20518_v19 }
 0xaab   : > { %v10534_v50 = vpop.f32.mrf.mxu1 }
 0xaac   : > { %11766 = vst [vmem:[%s20526_s25 + $0xd0] sm:$0xff] %v11714_v46   ;;  %v10535_v52 = vadd.f32 %v20518_v19, %v10534_v50 }
 0xaad   : > { %v14848_v42 = vpop.f32.mrf.mxu1 }
 0xaae   : > { %v10546_v36 = vadd.f32 %v14848_v42, %v20518_v19 }
 0xaaf   : > { %v10537_v49 = vpop.f32.mrf.mxu1 }
 0xab0   : > { %v11729_v29 = vpack.c.bf16 %v10546_v36, %v10543_v53  ;;  %v10538_v59 = vadd.f32 %v20518_v19, %v10537_v49 }
 0xab1   : > { %v14851_v11 = vpop.f32.mrf.mxu1 }
 0xab2   : > { %11769 = vst [vmem:[%s20526_s25 + $0xe8] sm:$0xff] %v11729_v29   ;;  %v11724_v47 = vpack.c.bf16 %v10538_v59, %v10535_v52  ;;  %v10559_v55 = vadd.f32 %v14851_v11, %v20518_v19 }
 0xab3   : > { %v10550_v38 = vpop.f32.mrf.mxu1 }
 0xab4   : > { %11768 = vst [vmem:[%s20526_s25 + $0xe0] sm:$0xff] %v11724_v47   ;;  %v10551_v44 = vadd.f32 %v20518_v19, %v10550_v38 }
 0xab5   : > { %v14852_v35 = vpop.f32.mrf.mxu1 }
 0xab6   : > { %v10562_v12 = vadd.f32 %v14852_v35, %v20518_v19 }
 0xab7   : > { %v10553_v34 = vpop.f32.mrf.mxu1 }
 0xab8   : > { %v11739_v40 = vpack.c.bf16 %v10562_v12, %v10559_v55  ;;  %v10554_v31 = vadd.f32 %v20518_v19, %v10553_v34 }
 0xaba   : > { %11771 = vst [vmem:[%s20526_s25 + $0xf8] sm:$0xff] %v11739_v40   ;;  %v11734_v16 = vpack.c.bf16 %v10554_v31, %v10551_v44 }
 0xabc   : > { %11770 = vst [vmem:[%s20526_s25 + $0xf0] sm:$0xff] %v11734_v16  }
 0xabd PF: > { %s18_s29 = sadd.s32 1, %s15191_s29   ;;  %s22095_s27 = smov %s15187_s28 }
 0xabe   : > { %p15_p5 = scmp.ge.s32.totalorder %s18_s29, 4   ;;  %s22096_s28 = smov %s22098_s30 }
 0xac0   :  { %17 = sbr.rel (!%p15_p5) target bundleno = 2 (0x2), region = 102 }

</bundles_post_ra>
